<compile_context>
chip_gen: v7x
topology: tpu7x:2x2x1
jax: 0.10.0
libtpu: 0.0.40
codegen_flags: <defaults>
</compile_context>

<pallas_src>
import numpy as np
import jax
import jax.numpy as jnp
from jax import lax
from jax.experimental import pallas as pl
from jax.experimental.pallas import tpu as pltpu

KSIZE, STRIDE, PAD = 4, 2, 1
NEG_SLOPE = 0.2
CHANS = [3, 64, 128, 256, 512, 1]
K1PAD = 64           # layer-1 im2col K (=48) padded only to 64 (was 128)
SUBPACK = 16         # bf16 sublane pack: per-tap / per-image row blocks align to it


# ------------------------------ Pallas kernel --------------------------------
def _disc_fused_kernel(p1_ref, g2_ref, g3_ref, g4_ref, g5_ref,
                       w1_ref, w2_ref, w3_ref, w4_ref, w5r_ref, s5_ref,
                       bias_ref, out_ref):
    f32, bf16 = jnp.float32, jnp.bfloat16
    bias = bias_ref[...]                                       # (8, 512) f32
    m1 = g2_ref.shape[1]
    bsz = p1_ref.shape[1] // m1                                # images per grid step

    def leaky(v):                                              # f32 elementwise (VPU)
        return jnp.where(v >= 0, v, NEG_SLOPE * v)

    def conv_layer(h_imgs, g_ref, w_ref, layer_idx):
        # h_imgs : list of per-image activations, each (rows_in, cin) bf16.
        # g_ref  : (16*blk, rows_in) one-hot gather, tap-major, 16-aligned blocks;
        #          zero rows/cols encode the p=1 padding and alignment padding.
        # w_ref  : (16*cin, cout) tap-major stacked conv weights (bf16).
        cin = h_imgs[0].shape[1]
        blk = g_ref.shape[0] // 16
        cout = w_ref.shape[1]
        g = g_ref[...]
        # In-kernel im2col: one exact-copy MXU matmul per image (M = 16*blk).
        patches = [jnp.dot(g, h_b, preferred_element_type=f32).astype(bf16)
                   for h_b in h_imgs]
        acc = jnp.zeros((bsz * blk, cout), f32)
        for t in range(16):                                    # unrolled 4x4 taps
            # Tap blocks are 16-row aligned so these slices/concats are cheap;
            # every weight matmul sees M = bsz*blk rows (batch-blocked).
            p_t = jnp.concatenate(
                [p_b[t * blk:(t + 1) * blk, :] for p_b in patches], axis=0)
            acc = acc + jnp.dot(p_t, w_ref[t * cin:(t + 1) * cin, :],
                                preferred_element_type=f32)
        h_out = leaky(acc + bias[layer_idx:layer_idx + 1, :cout]).astype(bf16)
        return [h_out[b * blk:(b + 1) * blk, :] for b in range(bsz)]

    # ---- Layer 1: host-side im2col patches -> one big matmul (M = bsz*m1).
    c1 = w1_ref.shape[1]
    h1 = jnp.dot(p1_ref[0], w1_ref[...], preferred_element_type=f32)
    h1 = leaky(h1 + bias[0:1, :c1]).astype(bf16)               # (bsz*m1, 64)
    h_imgs = [h1[b * m1:(b + 1) * m1, :] for b in range(bsz)]

    # ---- Layers 2-4: in-kernel gather + 16 tap-major MXU accumulates.
    h_imgs = conv_layer(h_imgs, g2_ref, w2_ref, 1)
    h_imgs = conv_layer(h_imgs, g3_ref, w3_ref, 2)
    h_imgs = conv_layer(h_imgs, g4_ref, w4_ref, 3)

    # ---- Layer 5 (Cout=1): pixel-major gather, ONE elementwise multiply,
    # one grouped row-sum (tiny 0/1 matmul) and one lane reduction.
    p5 = jnp.concatenate(
        [jnp.dot(g5_ref[...], h_b, preferred_element_type=f32) for h_b in h_imgs],
        axis=0)                                                # (bsz*m5*16, 512) f32
    prod = p5 * w5r_ref[...]                                   # one VPU multiply
    grouped = jnp.dot(s5_ref[...], prod,
                      preferred_element_type=f32)              # (bsz*m5, 512)
    logit = jnp.sum(grouped, axis=1, keepdims=True) + bias[4:5, 0:1]
    prob = 1.0 / (1.0 + jnp.exp(-logit))                       # exact sigmoid, f32
    out_ref[0] = jnp.broadcast_to(prob, (prob.shape[0], out_ref.shape[2]))


# -------------------------- host-side constant prep --------------------------
def _round_up(v, m):
    return ((v + m - 1) // m) * m


def _gather_tapmajor(h_in, w_in, cols, blk):
    """One-hot gather, rows (tap, out_pixel); tap blocks padded to `blk` rows.
    Zero rows encode both p=1 zero padding and alignment padding; only the
    first h_in*w_in columns are ever set (cols may be larger)."""
    h_out, w_out = h_in // 2, w_in // 2
    g = np.zeros((16 * blk, cols), np.float32)
    for kh in range(KSIZE):
        for kw in range(KSIZE):
            t = kh * KSIZE + kw
            for oi in range(h_out):
                for oj in range(w_out):
                    ii = STRIDE * oi - PAD + kh
                    jj = STRIDE * oj - PAD + kw
                    if 0 <= ii < h_in and 0 <= jj < w_in:
                        g[t * blk + oi * w_out + oj, ii * w_in + jj] = 1.0
    return g


def _gather_pixmajor(h_in, w_in, cols):
    """Layer-5 gather, rows (out_pixel, tap): 16 consecutive rows per pixel."""
    h_out, w_out = h_in // 2, w_in // 2
    g = np.zeros((h_out * w_out * 16, cols), np.float32)
    for oi in range(h_out):
        for oj in range(w_out):
            m = oi * w_out + oj
            for kh in range(KSIZE):
                for kw in range(KSIZE):
                    t = kh * KSIZE + kw
                    ii = STRIDE * oi - PAD + kh
                    jj = STRIDE * oj - PAD + kw
                    if 0 <= ii < h_in and 0 <= jj < w_in:
                        g[m * 16 + t, ii * w_in + jj] = 1.0
    return g


def _im2col_l1(x_nhwc):
    """4x4/s2/p1 patches of the raw input, K ordered (kh, kw, cin)."""
    n, h, w, c = x_nhwc.shape
    xp = jnp.pad(x_nhwc, ((0, 0), (PAD, PAD), (PAD, PAD), (0, 0)))
    ho, wo = h // 2, w // 2
    taps = []
    for kh in range(KSIZE):
        for kw in range(KSIZE):
            taps.append(xp[:, kh:kh + STRIDE * ho:STRIDE,
                           kw:kw + STRIDE * wo:STRIDE, :])
    return jnp.stack(taps, axis=3).reshape(n, ho * wo, KSIZE * KSIZE * c)


def pack_params(params):
    """PyTorch-layout f32 params -> matmul-ready matrices (done once)."""
    (w1, b1), (w2, b2), (w3, b3), (w4, b4), (w5, b5) = params
    bf = jnp.bfloat16

    # Layer 1: (48, 64) in (kh, kw, cin) order; K padded 48 -> K1PAD only.
    w1m = jnp.transpose(w1, (2, 3, 1, 0)).reshape(KSIZE * KSIZE * 3, 64)
    w1m = jnp.pad(w1m, ((0, K1PAD - w1m.shape[0]), (0, 0)))

    def stack_taps(wt):
        blocks = []
        for kh in range(KSIZE):
            for kw in range(KSIZE):
                blocks.append(wt[:, :, kh, kw].T)              # (cin, cout)
        return jnp.concatenate(blocks, axis=0)                 # (16*cin, cout)

    w2m, w3m, w4m = stack_taps(w2), stack_taps(w3), stack_taps(w4)
    w5m = jnp.transpose(w5[0], (1, 2, 0)).reshape(KSIZE * KSIZE, 512)  # (16, 512)

    bias = jnp.zeros((8, 512), jnp.float32)
    bias = bias.at[0, :64].set(b1)
    bias = bias.at[1, :128].set(b2)
    bias = bias.at[2, :256].set(b3)
    bias = bias.at[3, :512].set(b4)
    bias = bias.at[4, 0].set(b5[0])

    return dict(w1=w1m.astype(bf), w2=w2m.astype(bf), w3=w3m.astype(bf),
                w4=w4m.astype(bf), w5=w5m.astype(jnp.float32), bias=bias)


# --------------------------------- forward -----------------------------------
def _pick_batch_block(n, max_b=8):
    """Largest B<=max_b dividing n while keeping >=2 grid steps (v7x has 2 TCs)."""
    best = 1
    for b in range(1, min(max_b, n) + 1):
        if n % b == 0 and n // b >= 2:
            best = b
    return best


def _const_spec(shape):
    """Whole-array, grid-invariant operand; single-buffered (fetched once)."""
    assert len(shape) == 2
    return pl.BlockSpec(tuple(shape), lambda i: (0, 0),
                        pipeline_mode=pl.Buffered(1))


def _nbytes(a):
    return int(np.prod(a.shape)) * np.dtype(a.dtype).itemsize


@jax.jit
def discriminator_forward(x_nchw, packed):
    n, c, h, w = x_nchw.shape
    assert c == 3 and h % 32 == 0 and w % 32 == 0
    bsz = _pick_batch_block(n)
    nb = n // bsz
    m1 = (h // 2) * (w // 2)
    m2, m3, m4 = (h // 4) * (w // 4), (h // 8) * (w // 8), (h // 16) * (w // 16)
    m5 = (h // 32) * (w // 32)
    blk2 = _round_up(m2, SUBPACK)
    blk3 = _round_up(m3, SUBPACK)
    blk4 = _round_up(m4, SUBPACK)

    # Host-side im2col only for the raw input (layer 1); K padded 48 -> 64.
    x_nhwc = jnp.transpose(x_nchw, (0, 2, 3, 1))
    patches = _im2col_l1(x_nhwc)
    patches = jnp.pad(patches, ((0, 0), (0, 0), (0, K1PAD - patches.shape[-1])))
    patches = patches.astype(jnp.bfloat16).reshape(nb, bsz * m1, K1PAD)

    # One-hot gather matrices (in-kernel im2col for layers 2-5).
    g2 = jnp.asarray(_gather_tapmajor(h // 2, w // 2, m1, blk2), jnp.bfloat16)
    g3 = jnp.asarray(_gather_tapmajor(h // 4, w // 4, blk2, blk3), jnp.bfloat16)
    g4 = jnp.asarray(_gather_tapmajor(h // 8, w // 8, blk3, blk4), jnp.bfloat16)
    g5 = jnp.asarray(_gather_pixmajor(h // 16, w // 16, blk4), jnp.bfloat16)

    w1m, w2m, w3m, w4m = packed["w1"], packed["w2"], packed["w3"], packed["w4"]
    bias = packed["bias"]
    # Layer-5 epilogue constants: per-row tap weights + 0/1 group-sum matrix.
    w5r = jnp.tile(packed["w5"], (bsz * m5, 1))                 # (bsz*m5*16, 512) f32
    s5 = jnp.asarray(np.kron(np.eye(bsz * m5, dtype=np.float32),
                             np.ones((1, 16), np.float32)))     # (bsz*m5, bsz*m5*16)

    consts = (g2, g3, g4, g5, w1m, w2m, w3m, w4m, w5r, s5, bias)
    const_bytes = sum(_nbytes(a) for a in consts)
    # VMEM budget from actual sizes: constants (x2 safety margin) + pipeline /
    # intermediate headroom; stays well below v7x's 64 MiB/TC, above v5e default.
    vmem_limit = int(min(56 << 20, max(32 << 20, 2 * const_bytes + (16 << 20))))

    flops_img = 2 * m1 * K1PAD * 64
    flops_img += 2 * (16 * blk2) * m1 * 64 + 2 * 16 * blk2 * 64 * 128
    flops_img += 2 * (16 * blk3) * blk2 * 128 + 2 * 16 * blk3 * 128 * 256
    flops_img += 2 * (16 * blk4) * blk3 * 256 + 2 * 16 * blk4 * 256 * 512
    flops_img += 2 * (16 * m5) * blk4 * 512 + 4 * m5 * 16 * 512
    cost = pl.CostEstimate(
        flops=int(n * flops_img),
        transcendentals=int(n * m5),
        bytes_accessed=int(_nbytes(patches) + const_bytes + n * m5 * 128 * 4))

    out = pl.pallas_call(
        _disc_fused_kernel,
        out_shape=jax.ShapeDtypeStruct((nb, bsz * m5, 128), jnp.float32),
        grid_spec=pltpu.PrefetchScalarGridSpec(
            num_scalar_prefetch=0,
            grid=(nb,),
            in_specs=[
                pl.BlockSpec((1, bsz * m1, K1PAD), lambda i: (i, 0, 0)),
                _const_spec(g2.shape), _const_spec(g3.shape),
                _const_spec(g4.shape), _const_spec(g5.shape),
                _const_spec(w1m.shape), _const_spec(w2m.shape),
                _const_spec(w3m.shape), _const_spec(w4m.shape),
                _const_spec(w5r.shape), _const_spec(s5.shape),
                _const_spec(bias.shape),
            ],
            out_specs=pl.BlockSpec((1, bsz * m5, 128), lambda i: (i, 0, 0)),
        ),
        compiler_params=pltpu.CompilerParams(
            dimension_semantics=("parallel",),
            vmem_limit_bytes=vmem_limit,
        ),
        cost_estimate=cost,
    )(patches, g2, g3, g4, g5, w1m, w2m, w3m, w4m, w5r, s5, bias)

    return out[:, :, 0].reshape(n, 1, h // 32, w // 32)


# ------------------------------ init & reference -----------------------------
def init_params(key):
    params = []
    for li in range(5):
        key, kw_, kb_ = jax.random.split(key, 3)
        cin, cout = CHANS[li], CHANS[li + 1]
        wt = jax.random.normal(kw_, (cout, cin, KSIZE, KSIZE), jnp.float32) * 0.05
        b = jax.random.normal(kb_, (cout,), jnp.float32) * 0.05
        params.append((wt, b))
    return params


def discriminator_ref(x_nchw, params):
    """f32 conv reference; weights/input rounded to bf16 once (same effective
    model the kernel uses), math in f32."""
    x = x_nchw.astype(jnp.bfloat16).astype(jnp.float32)
    acts = ["leaky"] * 4 + ["sigmoid"]
    for (wt, b), act in zip(params, acts):
        wq = wt.astype(jnp.bfloat16).astype(jnp.float32)
        x = lax.conv_general_dilated(
            x, wq, window_strides=(STRIDE, STRIDE),
            padding=((PAD, PAD), (PAD, PAD)),
            dimension_numbers=("NCHW", "OIHW", "NCHW"))
        x = x + b.reshape(1, -1, 1, 1)
        if act == "leaky":
            x = jnp.where(x >= 0, x, NEG_SLOPE * x)
        else:
            x = jax.nn.sigmoid(x)
    return x


if __name__ == "__main__":
    key = jax.random.PRNGKey(0)
    key, kx = jax.random.split(key)
    # 5 stride-2 convs: 32 -> 16 -> 8 -> 4 -> 2 -> 1
    x = jax.random.normal(kx, (2, 3, 32, 32), jnp.float32)
    params = init_params(key)
    packed = pack_params(params)

    out = jax.block_until_ready(discriminator_forward(x, packed))
    ref = jax.block_until_ready(discriminator_ref(x, params))

    assert out.shape == (2, 1, 1, 1), out.shape
    # bf16 weights/activations in the kernel vs f32-math reference.
    assert jnp.allclose(out, ref, rtol=3e-2, atol=3e-2), (out, ref)
    print("KERNEL_OK")
</pallas_src>

<mosaic_0001>
module attributes {stable_mosaic.version = 11 : i64} {
  func.func @_disc_fused_kernel(%arg0: i32, %arg1: memref<1x256x64xbf16, #tpu.memory_space<vmem>>, %arg2: memref<1024x256xbf16, #tpu.memory_space<vmem>>, %arg3: memref<256x64xbf16, #tpu.memory_space<vmem>>, %arg4: memref<256x16xbf16, #tpu.memory_space<vmem>>, %arg5: memref<16x16xbf16, #tpu.memory_space<vmem>>, %arg6: memref<64x64xbf16, #tpu.memory_space<vmem>>, %arg7: memref<1024x128xbf16, #tpu.memory_space<vmem>>, %arg8: memref<2048x256xbf16, #tpu.memory_space<vmem>>, %arg9: memref<4096x512xbf16, #tpu.memory_space<vmem>>, %arg10: memref<16x512xf32, #tpu.memory_space<vmem>>, %arg11: memref<1x16xf32, #tpu.memory_space<vmem>>, %arg12: memref<8x512xf32, #tpu.memory_space<vmem>>, %arg13: memref<1x1x128xf32, #tpu.memory_space<vmem>>) attributes {dimension_semantics = [#tpu.dimension_semantics<parallel>], iteration_bounds = array<i64: 2>, scalar_prefetch = 0 : i64, scratch_operands = 0 : i64, tpu.core_type = #tpu.core_type<tc>, window_params = [{transform_indices = @transform_0, window_bounds = array<i64: 1, 256, 64>}, {pipeline_mode = #tpu.pipeline_mode<synchronous>, transform_indices = @transform_1, window_bounds = array<i64: 1024, 256>}, {pipeline_mode = #tpu.pipeline_mode<synchronous>, transform_indices = @transform_2, window_bounds = array<i64: 256, 64>}, {pipeline_mode = #tpu.pipeline_mode<synchronous>, transform_indices = @transform_3, window_bounds = array<i64: 256, 16>}, {pipeline_mode = #tpu.pipeline_mode<synchronous>, transform_indices = @transform_4, window_bounds = array<i64: 16, 16>}, {pipeline_mode = #tpu.pipeline_mode<synchronous>, transform_indices = @transform_5, window_bounds = array<i64: 64, 64>}, {pipeline_mode = #tpu.pipeline_mode<synchronous>, transform_indices = @transform_6, window_bounds = array<i64: 1024, 128>}, {pipeline_mode = #tpu.pipeline_mode<synchronous>, transform_indices = @transform_7, window_bounds = array<i64: 2048, 256>}, {pipeline_mode = #tpu.pipeline_mode<synchronous>, transform_indices = @transform_8, window_bounds = array<i64: 4096, 512>}, {pipeline_mode = #tpu.pipeline_mode<synchronous>, transform_indices = @transform_9, window_bounds = array<i64: 16, 512>}, {pipeline_mode = #tpu.pipeline_mode<synchronous>, transform_indices = @transform_10, window_bounds = array<i64: 1, 16>}, {pipeline_mode = #tpu.pipeline_mode<synchronous>, transform_indices = @transform_11, window_bounds = array<i64: 8, 512>}, {transform_indices = @transform_12, window_bounds = array<i64: 1, 1, 128>}]} {
    %c0 = arith.constant 0 : index
    %c0_0 = arith.constant 0 : index
    %0 = vector.load %arg12[%c0, %c0_0] : memref<8x512xf32, #tpu.memory_space<vmem>>, vector<8x512xf32>
    %c0_1 = arith.constant 0 : index
    %c0_2 = arith.constant 0 : index
    %c0_3 = arith.constant 0 : index
    %1 = vector.load %arg1[%c0_1, %c0_2, %c0_3] : memref<1x256x64xbf16, #tpu.memory_space<vmem>>, vector<1x256x64xbf16>
    %2 = vector.shape_cast %1 : vector<1x256x64xbf16> to vector<256x64xbf16>
    %c0_4 = arith.constant 0 : index
    %c0_5 = arith.constant 0 : index
    %3 = vector.load %arg6[%c0_4, %c0_5] : memref<64x64xbf16, #tpu.memory_space<vmem>>, vector<64x64xbf16>
    %cst = arith.constant dense<0.000000e+00> : vector<256x64xf32>
    %4 = tpu.matmul %2, %3, %cst {dimension_numbers = #tpu.dot_dimension_numbers<[1], [0], [0], [1], [0, 0, 1, 1], [], []>} : vector<256x64xbf16>, vector<64x64xbf16>, vector<256x64xf32> -> vector<256x64xf32>
    %5 = vector.extract_strided_slice %0 {offsets = [0, 0], sizes = [1, 64], strides = [1, 1]} : vector<8x512xf32> to vector<1x64xf32>
    %6 = vector.broadcast %5 : vector<1x64xf32> to vector<256x64xf32>
    %7 = arith.addf %4, %6 : vector<256x64xf32>
    %cst_6 = arith.constant 0.000000e+00 : f32
    %8 = vector.broadcast %cst_6 : f32 to vector<256x64xf32>
    %9 = arith.cmpf oge, %7, %8 : vector<256x64xf32>
    %cst_7 = arith.constant 2.000000e-01 : f32
    %10 = vector.broadcast %cst_7 : f32 to vector<256x64xf32>
    %11 = arith.mulf %10, %7 : vector<256x64xf32>
    %12 = arith.select %9, %7, %11 : vector<256x64xi1>, vector<256x64xf32>
    %13 = arith.truncf %12 : vector<256x64xf32> to vector<256x64xbf16>
    %c0_8 = arith.constant 0 : index
    %c0_9 = arith.constant 0 : index
    %14 = vector.load %arg2[%c0_8, %c0_9] : memref<1024x256xbf16, #tpu.memory_space<vmem>>, vector<1024x256xbf16>
    %cst_10 = arith.constant dense<0.000000e+00> : vector<1024x64xf32>
    %15 = tpu.matmul %14, %13, %cst_10 {dimension_numbers = #tpu.dot_dimension_numbers<[1], [0], [0], [1], [0, 0, 1, 1], [], []>} : vector<1024x256xbf16>, vector<256x64xbf16>, vector<1024x64xf32> -> vector<1024x64xf32>
    %16 = arith.truncf %15 : vector<1024x64xf32> to vector<1024x64xbf16>
    %cst_11 = arith.constant 0.000000e+00 : f32
    %17 = vector.broadcast %cst_11 : f32 to vector<64x128xf32>
    %18 = vector.extract_strided_slice %16 {offsets = [0, 0], sizes = [64, 64], strides = [1, 1]} : vector<1024x64xbf16> to vector<64x64xbf16>
    %c0_12 = arith.constant 0 : index
    %c0_13 = arith.constant 0 : index
    %19 = vector.load %arg7[%c0_12, %c0_13] : memref<1024x128xbf16, #tpu.memory_space<vmem>>, vector<64x128xbf16>
    %cst_14 = arith.constant dense<0.000000e+00> : vector<64x128xf32>
    %20 = tpu.matmul %18, %19, %cst_14 {dimension_numbers = #tpu.dot_dimension_numbers<[1], [0], [0], [1], [0, 0, 1, 1], [], []>} : vector<64x64xbf16>, vector<64x128xbf16>, vector<64x128xf32> -> vector<64x128xf32>
    %21 = arith.addf %17, %20 : vector<64x128xf32>
    %22 = vector.extract_strided_slice %16 {offsets = [64, 0], sizes = [64, 64], strides = [1, 1]} : vector<1024x64xbf16> to vector<64x64xbf16>
    %c64 = arith.constant 64 : index
    %c0_15 = arith.constant 0 : index
    %23 = vector.load %arg7[%c64, %c0_15] : memref<1024x128xbf16, #tpu.memory_space<vmem>>, vector<64x128xbf16>
    %cst_16 = arith.constant dense<0.000000e+00> : vector<64x128xf32>
    %24 = tpu.matmul %22, %23, %cst_16 {dimension_numbers = #tpu.dot_dimension_numbers<[1], [0], [0], [1], [0, 0, 1, 1], [], []>} : vector<64x64xbf16>, vector<64x128xbf16>, vector<64x128xf32> -> vector<64x128xf32>
    %25 = arith.addf %21, %24 : vector<64x128xf32>
    %26 = vector.extract_strided_slice %16 {offsets = [128, 0], sizes = [64, 64], strides = [1, 1]} : vector<1024x64xbf16> to vector<64x64xbf16>
    %c128 = arith.constant 128 : index
    %c0_17 = arith.constant 0 : index
    %27 = vector.load %arg7[%c128, %c0_17] : memref<1024x128xbf16, #tpu.memory_space<vmem>>, vector<64x128xbf16>
    %cst_18 = arith.constant dense<0.000000e+00> : vector<64x128xf32>
    %28 = tpu.matmul %26, %27, %cst_18 {dimension_numbers = #tpu.dot_dimension_numbers<[1], [0], [0], [1], [0, 0, 1, 1], [], []>} : vector<64x64xbf16>, vector<64x128xbf16>, vector<64x128xf32> -> vector<64x128xf32>
    %29 = arith.addf %25, %28 : vector<64x128xf32>
    %30 = vector.extract_strided_slice %16 {offsets = [192, 0], sizes = [64, 64], strides = [1, 1]} : vector<1024x64xbf16> to vector<64x64xbf16>
    %c192 = arith.constant 192 : index
    %c0_19 = arith.constant 0 : index
    %31 = vector.load %arg7[%c192, %c0_19] : memref<1024x128xbf16, #tpu.memory_space<vmem>>, vector<64x128xbf16>
    %cst_20 = arith.constant dense<0.000000e+00> : vector<64x128xf32>
    %32 = tpu.matmul %30, %31, %cst_20 {dimension_numbers = #tpu.dot_dimension_numbers<[1], [0], [0], [1], [0, 0, 1, 1], [], []>} : vector<64x64xbf16>, vector<64x128xbf16>, vector<64x128xf32> -> vector<64x128xf32>
    %33 = arith.addf %29, %32 : vector<64x128xf32>
    %34 = vector.extract_strided_slice %16 {offsets = [256, 0], sizes = [64, 64], strides = [1, 1]} : vector<1024x64xbf16> to vector<64x64xbf16>
    %c256 = arith.constant 256 : index
    %c0_21 = arith.constant 0 : index
    %35 = vector.load %arg7[%c256, %c0_21] : memref<1024x128xbf16, #tpu.memory_space<vmem>>, vector<64x128xbf16>
    %cst_22 = arith.constant dense<0.000000e+00> : vector<64x128xf32>
    %36 = tpu.matmul %34, %35, %cst_22 {dimension_numbers = #tpu.dot_dimension_numbers<[1], [0], [0], [1], [0, 0, 1, 1], [], []>} : vector<64x64xbf16>, vector<64x128xbf16>, vector<64x128xf32> -> vector<64x128xf32>
    %37 = arith.addf %33, %36 : vector<64x128xf32>
    %38 = vector.extract_strided_slice %16 {offsets = [320, 0], sizes = [64, 64], strides = [1, 1]} : vector<1024x64xbf16> to vector<64x64xbf16>
    %c320 = arith.constant 320 : index
    %c0_23 = arith.constant 0 : index
    %39 = vector.load %arg7[%c320, %c0_23] : memref<1024x128xbf16, #tpu.memory_space<vmem>>, vector<64x128xbf16>
    %cst_24 = arith.constant dense<0.000000e+00> : vector<64x128xf32>
    %40 = tpu.matmul %38, %39, %cst_24 {dimension_numbers = #tpu.dot_dimension_numbers<[1], [0], [0], [1], [0, 0, 1, 1], [], []>} : vector<64x64xbf16>, vector<64x128xbf16>, vector<64x128xf32> -> vector<64x128xf32>
    %41 = arith.addf %37, %40 : vector<64x128xf32>
    %42 = vector.extract_strided_slice %16 {offsets = [384, 0], sizes = [64, 64], strides = [1, 1]} : vector<1024x64xbf16> to vector<64x64xbf16>
    %c384 = arith.constant 384 : index
    %c0_25 = arith.constant 0 : index
    %43 = vector.load %arg7[%c384, %c0_25] : memref<1024x128xbf16, #tpu.memory_space<vmem>>, vector<64x128xbf16>
    %cst_26 = arith.constant dense<0.000000e+00> : vector<64x128xf32>
    %44 = tpu.matmul %42, %43, %cst_26 {dimension_numbers = #tpu.dot_dimension_numbers<[1], [0], [0], [1], [0, 0, 1, 1], [], []>} : vector<64x64xbf16>, vector<64x128xbf16>, vector<64x128xf32> -> vector<64x128xf32>
    %45 = arith.addf %41, %44 : vector<64x128xf32>
    %46 = vector.extract_strided_slice %16 {offsets = [448, 0], sizes = [64, 64], strides = [1, 1]} : vector<1024x64xbf16> to vector<64x64xbf16>
    %c448 = arith.constant 448 : index
    %c0_27 = arith.constant 0 : index
    %47 = vector.load %arg7[%c448, %c0_27] : memref<1024x128xbf16, #tpu.memory_space<vmem>>, vector<64x128xbf16>
    %cst_28 = arith.constant dense<0.000000e+00> : vector<64x128xf32>
    %48 = tpu.matmul %46, %47, %cst_28 {dimension_numbers = #tpu.dot_dimension_numbers<[1], [0], [0], [1], [0, 0, 1, 1], [], []>} : vector<64x64xbf16>, vector<64x128xbf16>, vector<64x128xf32> -> vector<64x128xf32>
    %49 = arith.addf %45, %48 : vector<64x128xf32>
    %50 = vector.extract_strided_slice %16 {offsets = [512, 0], sizes = [64, 64], strides = [1, 1]} : vector<1024x64xbf16> to vector<64x64xbf16>
    %c512 = arith.constant 512 : index
    %c0_29 = arith.constant 0 : index
    %51 = vector.load %arg7[%c512, %c0_29] : memref<1024x128xbf16, #tpu.memory_space<vmem>>, vector<64x128xbf16>
    %cst_30 = arith.constant dense<0.000000e+00> : vector<64x128xf32>
    %52 = tpu.matmul %50, %51, %cst_30 {dimension_numbers = #tpu.dot_dimension_numbers<[1], [0], [0], [1], [0, 0, 1, 1], [], []>} : vector<64x64xbf16>, vector<64x128xbf16>, vector<64x128xf32> -> vector<64x128xf32>
    %53 = arith.addf %49, %52 : vector<64x128xf32>
    %54 = vector.extract_strided_slice %16 {offsets = [576, 0], sizes = [64, 64], strides = [1, 1]} : vector<1024x64xbf16> to vector<64x64xbf16>
    %c576 = arith.constant 576 : index
    %c0_31 = arith.constant 0 : index
    %55 = vector.load %arg7[%c576, %c0_31] : memref<1024x128xbf16, #tpu.memory_space<vmem>>, vector<64x128xbf16>
    %cst_32 = arith.constant dense<0.000000e+00> : vector<64x128xf32>
    %56 = tpu.matmul %54, %55, %cst_32 {dimension_numbers = #tpu.dot_dimension_numbers<[1], [0], [0], [1], [0, 0, 1, 1], [], []>} : vector<64x64xbf16>, vector<64x128xbf16>, vector<64x128xf32> -> vector<64x128xf32>
    %57 = arith.addf %53, %56 : vector<64x128xf32>
    %58 = vector.extract_strided_slice %16 {offsets = [640, 0], sizes = [64, 64], strides = [1, 1]} : vector<1024x64xbf16> to vector<64x64xbf16>
    %c640 = arith.constant 640 : index
    %c0_33 = arith.constant 0 : index
    %59 = vector.load %arg7[%c640, %c0_33] : memref<1024x128xbf16, #tpu.memory_space<vmem>>, vector<64x128xbf16>
    %cst_34 = arith.constant dense<0.000000e+00> : vector<64x128xf32>
    %60 = tpu.matmul %58, %59, %cst_34 {dimension_numbers = #tpu.dot_dimension_numbers<[1], [0], [0], [1], [0, 0, 1, 1], [], []>} : vector<64x64xbf16>, vector<64x128xbf16>, vector<64x128xf32> -> vector<64x128xf32>
    %61 = arith.addf %57, %60 : vector<64x128xf32>
    %62 = vector.extract_strided_slice %16 {offsets = [704, 0], sizes = [64, 64], strides = [1, 1]} : vector<1024x64xbf16> to vector<64x64xbf16>
    %c704 = arith.constant 704 : index
    %c0_35 = arith.constant 0 : index
    %63 = vector.load %arg7[%c704, %c0_35] : memref<1024x128xbf16, #tpu.memory_space<vmem>>, vector<64x128xbf16>
    %cst_36 = arith.constant dense<0.000000e+00> : vector<64x128xf32>
    %64 = tpu.matmul %62, %63, %cst_36 {dimension_numbers = #tpu.dot_dimension_numbers<[1], [0], [0], [1], [0, 0, 1, 1], [], []>} : vector<64x64xbf16>, vector<64x128xbf16>, vector<64x128xf32> -> vector<64x128xf32>
    %65 = arith.addf %61, %64 : vector<64x128xf32>
    %66 = vector.extract_strided_slice %16 {offsets = [768, 0], sizes = [64, 64], strides = [1, 1]} : vector<1024x64xbf16> to vector<64x64xbf16>
    %c768 = arith.constant 768 : index
    %c0_37 = arith.constant 0 : index
    %67 = vector.load %arg7[%c768, %c0_37] : memref<1024x128xbf16, #tpu.memory_space<vmem>>, vector<64x128xbf16>
    %cst_38 = arith.constant dense<0.000000e+00> : vector<64x128xf32>
    %68 = tpu.matmul %66, %67, %cst_38 {dimension_numbers = #tpu.dot_dimension_numbers<[1], [0], [0], [1], [0, 0, 1, 1], [], []>} : vector<64x64xbf16>, vector<64x128xbf16>, vector<64x128xf32> -> vector<64x128xf32>
    %69 = arith.addf %65, %68 : vector<64x128xf32>
    %70 = vector.extract_strided_slice %16 {offsets = [832, 0], sizes = [64, 64], strides = [1, 1]} : vector<1024x64xbf16> to vector<64x64xbf16>
    %c832 = arith.constant 832 : index
    %c0_39 = arith.constant 0 : index
    %71 = vector.load %arg7[%c832, %c0_39] : memref<1024x128xbf16, #tpu.memory_space<vmem>>, vector<64x128xbf16>
    %cst_40 = arith.constant dense<0.000000e+00> : vector<64x128xf32>
    %72 = tpu.matmul %70, %71, %cst_40 {dimension_numbers = #tpu.dot_dimension_numbers<[1], [0], [0], [1], [0, 0, 1, 1], [], []>} : vector<64x64xbf16>, vector<64x128xbf16>, vector<64x128xf32> -> vector<64x128xf32>
    %73 = arith.addf %69, %72 : vector<64x128xf32>
    %74 = vector.extract_strided_slice %16 {offsets = [896, 0], sizes = [64, 64], strides = [1, 1]} : vector<1024x64xbf16> to vector<64x64xbf16>
    %c896 = arith.constant 896 : index
    %c0_41 = arith.constant 0 : index
    %75 = vector.load %arg7[%c896, %c0_41] : memref<1024x128xbf16, #tpu.memory_space<vmem>>, vector<64x128xbf16>
    %cst_42 = arith.constant dense<0.000000e+00> : vector<64x128xf32>
    %76 = tpu.matmul %74, %75, %cst_42 {dimension_numbers = #tpu.dot_dimension_numbers<[1], [0], [0], [1], [0, 0, 1, 1], [], []>} : vector<64x64xbf16>, vector<64x128xbf16>, vector<64x128xf32> -> vector<64x128xf32>
    %77 = arith.addf %73, %76 : vector<64x128xf32>
    %78 = vector.extract_strided_slice %16 {offsets = [960, 0], sizes = [64, 64], strides = [1, 1]} : vector<1024x64xbf16> to vector<64x64xbf16>
    %c960 = arith.constant 960 : index
    %c0_43 = arith.constant 0 : index
    %79 = vector.load %arg7[%c960, %c0_43] : memref<1024x128xbf16, #tpu.memory_space<vmem>>, vector<64x128xbf16>
    %cst_44 = arith.constant dense<0.000000e+00> : vector<64x128xf32>
    %80 = tpu.matmul %78, %79, %cst_44 {dimension_numbers = #tpu.dot_dimension_numbers<[1], [0], [0], [1], [0, 0, 1, 1], [], []>} : vector<64x64xbf16>, vector<64x128xbf16>, vector<64x128xf32> -> vector<64x128xf32>
    %81 = arith.addf %77, %80 : vector<64x128xf32>
    %82 = vector.extract_strided_slice %0 {offsets = [1, 0], sizes = [1, 128], strides = [1, 1]} : vector<8x512xf32> to vector<1x128xf32>
    %83 = vector.broadcast %82 : vector<1x128xf32> to vector<64x128xf32>
    %84 = arith.addf %81, %83 : vector<64x128xf32>
    %cst_45 = arith.constant 0.000000e+00 : f32
    %85 = vector.broadcast %cst_45 : f32 to vector<64x128xf32>
    %86 = arith.cmpf oge, %84, %85 : vector<64x128xf32>
    %cst_46 = arith.constant 2.000000e-01 : f32
    %87 = vector.broadcast %cst_46 : f32 to vector<64x128xf32>
    %88 = arith.mulf %87, %84 : vector<64x128xf32>
    %89 = arith.select %86, %84, %88 : vector<64x128xi1>, vector<64x128xf32>
    %90 = arith.truncf %89 : vector<64x128xf32> to vector<64x128xbf16>
    %c0_47 = arith.constant 0 : index
    %c0_48 = arith.constant 0 : index
    %91 = vector.load %arg3[%c0_47, %c0_48] : memref<256x64xbf16, #tpu.memory_space<vmem>>, vector<256x64xbf16>
    %cst_49 = arith.constant dense<0.000000e+00> : vector<256x128xf32>
    %92 = tpu.matmul %91, %90, %cst_49 {dimension_numbers = #tpu.dot_dimension_numbers<[1], [0], [0], [1], [0, 0, 1, 1], [], []>} : vector<256x64xbf16>, vector<64x128xbf16>, vector<256x128xf32> -> vector<256x128xf32>
    %93 = arith.truncf %92 : vector<256x128xf32> to vector<256x128xbf16>
    %cst_50 = arith.constant 0.000000e+00 : f32
    %94 = vector.broadcast %cst_50 : f32 to vector<16x256xf32>
    %95 = vector.extract_strided_slice %93 {offsets = [0, 0], sizes = [16, 128], strides = [1, 1]} : vector<256x128xbf16> to vector<16x128xbf16>
    %c0_51 = arith.constant 0 : index
    %c0_52 = arith.constant 0 : index
    %96 = vector.load %arg8[%c0_51, %c0_52] : memref<2048x256xbf16, #tpu.memory_space<vmem>>, vector<128x256xbf16>
    %cst_53 = arith.constant dense<0.000000e+00> : vector<16x256xf32>
    %97 = tpu.matmul %95, %96, %cst_53 {dimension_numbers = #tpu.dot_dimension_numbers<[1], [0], [0], [1], [0, 0, 1, 1], [], []>} : vector<16x128xbf16>, vector<128x256xbf16>, vector<16x256xf32> -> vector<16x256xf32>
    %98 = arith.addf %94, %97 : vector<16x256xf32>
    %99 = vector.extract_strided_slice %93 {offsets = [16, 0], sizes = [16, 128], strides = [1, 1]} : vector<256x128xbf16> to vector<16x128xbf16>
    %c128_54 = arith.constant 128 : index
    %c0_55 = arith.constant 0 : index
    %100 = vector.load %arg8[%c128_54, %c0_55] : memref<2048x256xbf16, #tpu.memory_space<vmem>>, vector<128x256xbf16>
    %cst_56 = arith.constant dense<0.000000e+00> : vector<16x256xf32>
    %101 = tpu.matmul %99, %100, %cst_56 {dimension_numbers = #tpu.dot_dimension_numbers<[1], [0], [0], [1], [0, 0, 1, 1], [], []>} : vector<16x128xbf16>, vector<128x256xbf16>, vector<16x256xf32> -> vector<16x256xf32>
    %102 = arith.addf %98, %101 : vector<16x256xf32>
    %103 = vector.extract_strided_slice %93 {offsets = [32, 0], sizes = [16, 128], strides = [1, 1]} : vector<256x128xbf16> to vector<16x128xbf16>
    %c256_57 = arith.constant 256 : index
    %c0_58 = arith.constant 0 : index
    %104 = vector.load %arg8[%c256_57, %c0_58] : memref<2048x256xbf16, #tpu.memory_space<vmem>>, vector<128x256xbf16>
    %cst_59 = arith.constant dense<0.000000e+00> : vector<16x256xf32>
    %105 = tpu.matmul %103, %104, %cst_59 {dimension_numbers = #tpu.dot_dimension_numbers<[1], [0], [0], [1], [0, 0, 1, 1], [], []>} : vector<16x128xbf16>, vector<128x256xbf16>, vector<16x256xf32> -> vector<16x256xf32>
    %106 = arith.addf %102, %105 : vector<16x256xf32>
    %107 = vector.extract_strided_slice %93 {offsets = [48, 0], sizes = [16, 128], strides = [1, 1]} : vector<256x128xbf16> to vector<16x128xbf16>
    %c384_60 = arith.constant 384 : index
    %c0_61 = arith.constant 0 : index
    %108 = vector.load %arg8[%c384_60, %c0_61] : memref<2048x256xbf16, #tpu.memory_space<vmem>>, vector<128x256xbf16>
    %cst_62 = arith.constant dense<0.000000e+00> : vector<16x256xf32>
    %109 = tpu.matmul %107, %108, %cst_62 {dimension_numbers = #tpu.dot_dimension_numbers<[1], [0], [0], [1], [0, 0, 1, 1], [], []>} : vector<16x128xbf16>, vector<128x256xbf16>, vector<16x256xf32> -> vector<16x256xf32>
    %110 = arith.addf %106, %109 : vector<16x256xf32>
    %111 = vector.extract_strided_slice %93 {offsets = [64, 0], sizes = [16, 128], strides = [1, 1]} : vector<256x128xbf16> to vector<16x128xbf16>
    %c512_63 = arith.constant 512 : index
    %c0_64 = arith.constant 0 : index
    %112 = vector.load %arg8[%c512_63, %c0_64] : memref<2048x256xbf16, #tpu.memory_space<vmem>>, vector<128x256xbf16>
    %cst_65 = arith.constant dense<0.000000e+00> : vector<16x256xf32>
    %113 = tpu.matmul %111, %112, %cst_65 {dimension_numbers = #tpu.dot_dimension_numbers<[1], [0], [0], [1], [0, 0, 1, 1], [], []>} : vector<16x128xbf16>, vector<128x256xbf16>, vector<16x256xf32> -> vector<16x256xf32>
    %114 = arith.addf %110, %113 : vector<16x256xf32>
    %115 = vector.extract_strided_slice %93 {offsets = [80, 0], sizes = [16, 128], strides = [1, 1]} : vector<256x128xbf16> to vector<16x128xbf16>
    %c640_66 = arith.constant 640 : index
    %c0_67 = arith.constant 0 : index
    %116 = vector.load %arg8[%c640_66, %c0_67] : memref<2048x256xbf16, #tpu.memory_space<vmem>>, vector<128x256xbf16>
    %cst_68 = arith.constant dense<0.000000e+00> : vector<16x256xf32>
    %117 = tpu.matmul %115, %116, %cst_68 {dimension_numbers = #tpu.dot_dimension_numbers<[1], [0], [0], [1], [0, 0, 1, 1], [], []>} : vector<16x128xbf16>, vector<128x256xbf16>, vector<16x256xf32> -> vector<16x256xf32>
    %118 = arith.addf %114, %117 : vector<16x256xf32>
    %119 = vector.extract_strided_slice %93 {offsets = [96, 0], sizes = [16, 128], strides = [1, 1]} : vector<256x128xbf16> to vector<16x128xbf16>
    %c768_69 = arith.constant 768 : index
    %c0_70 = arith.constant 0 : index
    %120 = vector.load %arg8[%c768_69, %c0_70] : memref<2048x256xbf16, #tpu.memory_space<vmem>>, vector<128x256xbf16>
    %cst_71 = arith.constant dense<0.000000e+00> : vector<16x256xf32>
    %121 = tpu.matmul %119, %120, %cst_71 {dimension_numbers = #tpu.dot_dimension_numbers<[1], [0], [0], [1], [0, 0, 1, 1], [], []>} : vector<16x128xbf16>, vector<128x256xbf16>, vector<16x256xf32> -> vector<16x256xf32>
    %122 = arith.addf %118, %121 : vector<16x256xf32>
    %123 = vector.extract_strided_slice %93 {offsets = [112, 0], sizes = [16, 128], strides = [1, 1]} : vector<256x128xbf16> to vector<16x128xbf16>
    %c896_72 = arith.constant 896 : index
    %c0_73 = arith.constant 0 : index
    %124 = vector.load %arg8[%c896_72, %c0_73] : memref<2048x256xbf16, #tpu.memory_space<vmem>>, vector<128x256xbf16>
    %cst_74 = arith.constant dense<0.000000e+00> : vector<16x256xf32>
    %125 = tpu.matmul %123, %124, %cst_74 {dimension_numbers = #tpu.dot_dimension_numbers<[1], [0], [0], [1], [0, 0, 1, 1], [], []>} : vector<16x128xbf16>, vector<128x256xbf16>, vector<16x256xf32> -> vector<16x256xf32>
    %126 = arith.addf %122, %125 : vector<16x256xf32>
    %127 = vector.extract_strided_slice %93 {offsets = [128, 0], sizes = [16, 128], strides = [1, 1]} : vector<256x128xbf16> to vector<16x128xbf16>
    %c1024 = arith.constant 1024 : index
    %c0_75 = arith.constant 0 : index
    %128 = vector.load %arg8[%c1024, %c0_75] : memref<2048x256xbf16, #tpu.memory_space<vmem>>, vector<128x256xbf16>
    %cst_76 = arith.constant dense<0.000000e+00> : vector<16x256xf32>
    %129 = tpu.matmul %127, %128, %cst_76 {dimension_numbers = #tpu.dot_dimension_numbers<[1], [0], [0], [1], [0, 0, 1, 1], [], []>} : vector<16x128xbf16>, vector<128x256xbf16>, vector<16x256xf32> -> vector<16x256xf32>
    %130 = arith.addf %126, %129 : vector<16x256xf32>
    %131 = vector.extract_strided_slice %93 {offsets = [144, 0], sizes = [16, 128], strides = [1, 1]} : vector<256x128xbf16> to vector<16x128xbf16>
    %c1152 = arith.constant 1152 : index
    %c0_77 = arith.constant 0 : index
    %132 = vector.load %arg8[%c1152, %c0_77] : memref<2048x256xbf16, #tpu.memory_space<vmem>>, vector<128x256xbf16>
    %cst_78 = arith.constant dense<0.000000e+00> : vector<16x256xf32>
    %133 = tpu.matmul %131, %132, %cst_78 {dimension_numbers = #tpu.dot_dimension_numbers<[1], [0], [0], [1], [0, 0, 1, 1], [], []>} : vector<16x128xbf16>, vector<128x256xbf16>, vector<16x256xf32> -> vector<16x256xf32>
    %134 = arith.addf %130, %133 : vector<16x256xf32>
    %135 = vector.extract_strided_slice %93 {offsets = [160, 0], sizes = [16, 128], strides = [1, 1]} : vector<256x128xbf16> to vector<16x128xbf16>
    %c1280 = arith.constant 1280 : index
    %c0_79 = arith.constant 0 : index
    %136 = vector.load %arg8[%c1280, %c0_79] : memref<2048x256xbf16, #tpu.memory_space<vmem>>, vector<128x256xbf16>
    %cst_80 = arith.constant dense<0.000000e+00> : vector<16x256xf32>
    %137 = tpu.matmul %135, %136, %cst_80 {dimension_numbers = #tpu.dot_dimension_numbers<[1], [0], [0], [1], [0, 0, 1, 1], [], []>} : vector<16x128xbf16>, vector<128x256xbf16>, vector<16x256xf32> -> vector<16x256xf32>
    %138 = arith.addf %134, %137 : vector<16x256xf32>
    %139 = vector.extract_strided_slice %93 {offsets = [176, 0], sizes = [16, 128], strides = [1, 1]} : vector<256x128xbf16> to vector<16x128xbf16>
    %c1408 = arith.constant 1408 : index
    %c0_81 = arith.constant 0 : index
    %140 = vector.load %arg8[%c1408, %c0_81] : memref<2048x256xbf16, #tpu.memory_space<vmem>>, vector<128x256xbf16>
    %cst_82 = arith.constant dense<0.000000e+00> : vector<16x256xf32>
    %141 = tpu.matmul %139, %140, %cst_82 {dimension_numbers = #tpu.dot_dimension_numbers<[1], [0], [0], [1], [0, 0, 1, 1], [], []>} : vector<16x128xbf16>, vector<128x256xbf16>, vector<16x256xf32> -> vector<16x256xf32>
    %142 = arith.addf %138, %141 : vector<16x256xf32>
    %143 = vector.extract_strided_slice %93 {offsets = [192, 0], sizes = [16, 128], strides = [1, 1]} : vector<256x128xbf16> to vector<16x128xbf16>
    %c1536 = arith.constant 1536 : index
    %c0_83 = arith.constant 0 : index
    %144 = vector.load %arg8[%c1536, %c0_83] : memref<2048x256xbf16, #tpu.memory_space<vmem>>, vector<128x256xbf16>
    %cst_84 = arith.constant dense<0.000000e+00> : vector<16x256xf32>
    %145 = tpu.matmul %143, %144, %cst_84 {dimension_numbers = #tpu.dot_dimension_numbers<[1], [0], [0], [1], [0, 0, 1, 1], [], []>} : vector<16x128xbf16>, vector<128x256xbf16>, vector<16x256xf32> -> vector<16x256xf32>
    %146 = arith.addf %142, %145 : vector<16x256xf32>
    %147 = vector.extract_strided_slice %93 {offsets = [208, 0], sizes = [16, 128], strides = [1, 1]} : vector<256x128xbf16> to vector<16x128xbf16>
    %c1664 = arith.constant 1664 : index
    %c0_85 = arith.constant 0 : index
    %148 = vector.load %arg8[%c1664, %c0_85] : memref<2048x256xbf16, #tpu.memory_space<vmem>>, vector<128x256xbf16>
    %cst_86 = arith.constant dense<0.000000e+00> : vector<16x256xf32>
    %149 = tpu.matmul %147, %148, %cst_86 {dimension_numbers = #tpu.dot_dimension_numbers<[1], [0], [0], [1], [0, 0, 1, 1], [], []>} : vector<16x128xbf16>, vector<128x256xbf16>, vector<16x256xf32> -> vector<16x256xf32>
    %150 = arith.addf %146, %149 : vector<16x256xf32>
    %151 = vector.extract_strided_slice %93 {offsets = [224, 0], sizes = [16, 128], strides = [1, 1]} : vector<256x128xbf16> to vector<16x128xbf16>
    %c1792 = arith.constant 1792 : index
    %c0_87 = arith.constant 0 : index
    %152 = vector.load %arg8[%c1792, %c0_87] : memref<2048x256xbf16, #tpu.memory_space<vmem>>, vector<128x256xbf16>
    %cst_88 = arith.constant dense<0.000000e+00> : vector<16x256xf32>
    %153 = tpu.matmul %151, %152, %cst_88 {dimension_numbers = #tpu.dot_dimension_numbers<[1], [0], [0], [1], [0, 0, 1, 1], [], []>} : vector<16x128xbf16>, vector<128x256xbf16>, vector<16x256xf32> -> vector<16x256xf32>
    %154 = arith.addf %150, %153 : vector<16x256xf32>
    %155 = vector.extract_strided_slice %93 {offsets = [240, 0], sizes = [16, 128], strides = [1, 1]} : vector<256x128xbf16> to vector<16x128xbf16>
    %c1920 = arith.constant 1920 : index
    %c0_89 = arith.constant 0 : index
    %156 = vector.load %arg8[%c1920, %c0_89] : memref<2048x256xbf16, #tpu.memory_space<vmem>>, vector<128x256xbf16>
    %cst_90 = arith.constant dense<0.000000e+00> : vector<16x256xf32>
    %157 = tpu.matmul %155, %156, %cst_90 {dimension_numbers = #tpu.dot_dimension_numbers<[1], [0], [0], [1], [0, 0, 1, 1], [], []>} : vector<16x128xbf16>, vector<128x256xbf16>, vector<16x256xf32> -> vector<16x256xf32>
    %158 = arith.addf %154, %157 : vector<16x256xf32>
    %159 = vector.extract_strided_slice %0 {offsets = [2, 0], sizes = [1, 256], strides = [1, 1]} : vector<8x512xf32> to vector<1x256xf32>
    %160 = vector.broadcast %159 : vector<1x256xf32> to vector<16x256xf32>
    %161 = arith.addf %158, %160 : vector<16x256xf32>
    %cst_91 = arith.constant 0.000000e+00 : f32
    %162 = vector.broadcast %cst_91 : f32 to vector<16x256xf32>
    %163 = arith.cmpf oge, %161, %162 : vector<16x256xf32>
    %cst_92 = arith.constant 2.000000e-01 : f32
    %164 = vector.broadcast %cst_92 : f32 to vector<16x256xf32>
    %165 = arith.mulf %164, %161 : vector<16x256xf32>
    %166 = arith.select %163, %161, %165 : vector<16x256xi1>, vector<16x256xf32>
    %167 = arith.truncf %166 : vector<16x256xf32> to vector<16x256xbf16>
    %c0_93 = arith.constant 0 : index
    %c0_94 = arith.constant 0 : index
    %168 = vector.load %arg4[%c0_93, %c0_94] : memref<256x16xbf16, #tpu.memory_space<vmem>>, vector<256x16xbf16>
    %cst_95 = arith.constant dense<0.000000e+00> : vector<256x256xf32>
    %169 = tpu.matmul %168, %167, %cst_95 {dimension_numbers = #tpu.dot_dimension_numbers<[1], [0], [0], [1], [0, 0, 1, 1], [], []>} : vector<256x16xbf16>, vector<16x256xbf16>, vector<256x256xf32> -> vector<256x256xf32>
    %170 = arith.truncf %169 : vector<256x256xf32> to vector<256x256xbf16>
    %cst_96 = arith.constant 0.000000e+00 : f32
    %171 = vector.broadcast %cst_96 : f32 to vector<16x512xf32>
    %172 = vector.extract_strided_slice %170 {offsets = [0, 0], sizes = [16, 256], strides = [1, 1]} : vector<256x256xbf16> to vector<16x256xbf16>
    %c0_97 = arith.constant 0 : index
    %c0_98 = arith.constant 0 : index
    %173 = vector.load %arg9[%c0_97, %c0_98] : memref<4096x512xbf16, #tpu.memory_space<vmem>>, vector<256x512xbf16>
    %cst_99 = arith.constant dense<0.000000e+00> : vector<16x512xf32>
    %174 = tpu.matmul %172, %173, %cst_99 {dimension_numbers = #tpu.dot_dimension_numbers<[1], [0], [0], [1], [0, 0, 1, 1], [], []>} : vector<16x256xbf16>, vector<256x512xbf16>, vector<16x512xf32> -> vector<16x512xf32>
    %175 = arith.addf %171, %174 : vector<16x512xf32>
    %176 = vector.extract_strided_slice %170 {offsets = [16, 0], sizes = [16, 256], strides = [1, 1]} : vector<256x256xbf16> to vector<16x256xbf16>
    %c256_100 = arith.constant 256 : index
    %c0_101 = arith.constant 0 : index
    %177 = vector.load %arg9[%c256_100, %c0_101] : memref<4096x512xbf16, #tpu.memory_space<vmem>>, vector<256x512xbf16>
    %cst_102 = arith.constant dense<0.000000e+00> : vector<16x512xf32>
    %178 = tpu.matmul %176, %177, %cst_102 {dimension_numbers = #tpu.dot_dimension_numbers<[1], [0], [0], [1], [0, 0, 1, 1], [], []>} : vector<16x256xbf16>, vector<256x512xbf16>, vector<16x512xf32> -> vector<16x512xf32>
    %179 = arith.addf %175, %178 : vector<16x512xf32>
    %180 = vector.extract_strided_slice %170 {offsets = [32, 0], sizes = [16, 256], strides = [1, 1]} : vector<256x256xbf16> to vector<16x256xbf16>
    %c512_103 = arith.constant 512 : index
    %c0_104 = arith.constant 0 : index
    %181 = vector.load %arg9[%c512_103, %c0_104] : memref<4096x512xbf16, #tpu.memory_space<vmem>>, vector<256x512xbf16>
    %cst_105 = arith.constant dense<0.000000e+00> : vector<16x512xf32>
    %182 = tpu.matmul %180, %181, %cst_105 {dimension_numbers = #tpu.dot_dimension_numbers<[1], [0], [0], [1], [0, 0, 1, 1], [], []>} : vector<16x256xbf16>, vector<256x512xbf16>, vector<16x512xf32> -> vector<16x512xf32>
    %183 = arith.addf %179, %182 : vector<16x512xf32>
    %184 = vector.extract_strided_slice %170 {offsets = [48, 0], sizes = [16, 256], strides = [1, 1]} : vector<256x256xbf16> to vector<16x256xbf16>
    %c768_106 = arith.constant 768 : index
    %c0_107 = arith.constant 0 : index
    %185 = vector.load %arg9[%c768_106, %c0_107] : memref<4096x512xbf16, #tpu.memory_space<vmem>>, vector<256x512xbf16>
    %cst_108 = arith.constant dense<0.000000e+00> : vector<16x512xf32>
    %186 = tpu.matmul %184, %185, %cst_108 {dimension_numbers = #tpu.dot_dimension_numbers<[1], [0], [0], [1], [0, 0, 1, 1], [], []>} : vector<16x256xbf16>, vector<256x512xbf16>, vector<16x512xf32> -> vector<16x512xf32>
    %187 = arith.addf %183, %186 : vector<16x512xf32>
    %188 = vector.extract_strided_slice %170 {offsets = [64, 0], sizes = [16, 256], strides = [1, 1]} : vector<256x256xbf16> to vector<16x256xbf16>
    %c1024_109 = arith.constant 1024 : index
    %c0_110 = arith.constant 0 : index
    %189 = vector.load %arg9[%c1024_109, %c0_110] : memref<4096x512xbf16, #tpu.memory_space<vmem>>, vector<256x512xbf16>
    %cst_111 = arith.constant dense<0.000000e+00> : vector<16x512xf32>
    %190 = tpu.matmul %188, %189, %cst_111 {dimension_numbers = #tpu.dot_dimension_numbers<[1], [0], [0], [1], [0, 0, 1, 1], [], []>} : vector<16x256xbf16>, vector<256x512xbf16>, vector<16x512xf32> -> vector<16x512xf32>
    %191 = arith.addf %187, %190 : vector<16x512xf32>
    %192 = vector.extract_strided_slice %170 {offsets = [80, 0], sizes = [16, 256], strides = [1, 1]} : vector<256x256xbf16> to vector<16x256xbf16>
    %c1280_112 = arith.constant 1280 : index
    %c0_113 = arith.constant 0 : index
    %193 = vector.load %arg9[%c1280_112, %c0_113] : memref<4096x512xbf16, #tpu.memory_space<vmem>>, vector<256x512xbf16>
    %cst_114 = arith.constant dense<0.000000e+00> : vector<16x512xf32>
    %194 = tpu.matmul %192, %193, %cst_114 {dimension_numbers = #tpu.dot_dimension_numbers<[1], [0], [0], [1], [0, 0, 1, 1], [], []>} : vector<16x256xbf16>, vector<256x512xbf16>, vector<16x512xf32> -> vector<16x512xf32>
    %195 = arith.addf %191, %194 : vector<16x512xf32>
    %196 = vector.extract_strided_slice %170 {offsets = [96, 0], sizes = [16, 256], strides = [1, 1]} : vector<256x256xbf16> to vector<16x256xbf16>
    %c1536_115 = arith.constant 1536 : index
    %c0_116 = arith.constant 0 : index
    %197 = vector.load %arg9[%c1536_115, %c0_116] : memref<4096x512xbf16, #tpu.memory_space<vmem>>, vector<256x512xbf16>
    %cst_117 = arith.constant dense<0.000000e+00> : vector<16x512xf32>
    %198 = tpu.matmul %196, %197, %cst_117 {dimension_numbers = #tpu.dot_dimension_numbers<[1], [0], [0], [1], [0, 0, 1, 1], [], []>} : vector<16x256xbf16>, vector<256x512xbf16>, vector<16x512xf32> -> vector<16x512xf32>
    %199 = arith.addf %195, %198 : vector<16x512xf32>
    %200 = vector.extract_strided_slice %170 {offsets = [112, 0], sizes = [16, 256], strides = [1, 1]} : vector<256x256xbf16> to vector<16x256xbf16>
    %c1792_118 = arith.constant 1792 : index
    %c0_119 = arith.constant 0 : index
    %201 = vector.load %arg9[%c1792_118, %c0_119] : memref<4096x512xbf16, #tpu.memory_space<vmem>>, vector<256x512xbf16>
    %cst_120 = arith.constant dense<0.000000e+00> : vector<16x512xf32>
    %202 = tpu.matmul %200, %201, %cst_120 {dimension_numbers = #tpu.dot_dimension_numbers<[1], [0], [0], [1], [0, 0, 1, 1], [], []>} : vector<16x256xbf16>, vector<256x512xbf16>, vector<16x512xf32> -> vector<16x512xf32>
    %203 = arith.addf %199, %202 : vector<16x512xf32>
    %204 = vector.extract_strided_slice %170 {offsets = [128, 0], sizes = [16, 256], strides = [1, 1]} : vector<256x256xbf16> to vector<16x256xbf16>
    %c2048 = arith.constant 2048 : index
    %c0_121 = arith.constant 0 : index
    %205 = vector.load %arg9[%c2048, %c0_121] : memref<4096x512xbf16, #tpu.memory_space<vmem>>, vector<256x512xbf16>
    %cst_122 = arith.constant dense<0.000000e+00> : vector<16x512xf32>
    %206 = tpu.matmul %204, %205, %cst_122 {dimension_numbers = #tpu.dot_dimension_numbers<[1], [0], [0], [1], [0, 0, 1, 1], [], []>} : vector<16x256xbf16>, vector<256x512xbf16>, vector<16x512xf32> -> vector<16x512xf32>
    %207 = arith.addf %203, %206 : vector<16x512xf32>
    %208 = vector.extract_strided_slice %170 {offsets = [144, 0], sizes = [16, 256], strides = [1, 1]} : vector<256x256xbf16> to vector<16x256xbf16>
    %c2304 = arith.constant 2304 : index
    %c0_123 = arith.constant 0 : index
    %209 = vector.load %arg9[%c2304, %c0_123] : memref<4096x512xbf16, #tpu.memory_space<vmem>>, vector<256x512xbf16>
    %cst_124 = arith.constant dense<0.000000e+00> : vector<16x512xf32>
    %210 = tpu.matmul %208, %209, %cst_124 {dimension_numbers = #tpu.dot_dimension_numbers<[1], [0], [0], [1], [0, 0, 1, 1], [], []>} : vector<16x256xbf16>, vector<256x512xbf16>, vector<16x512xf32> -> vector<16x512xf32>
    %211 = arith.addf %207, %210 : vector<16x512xf32>
    %212 = vector.extract_strided_slice %170 {offsets = [160, 0], sizes = [16, 256], strides = [1, 1]} : vector<256x256xbf16> to vector<16x256xbf16>
    %c2560 = arith.constant 2560 : index
    %c0_125 = arith.constant 0 : index
    %213 = vector.load %arg9[%c2560, %c0_125] : memref<4096x512xbf16, #tpu.memory_space<vmem>>, vector<256x512xbf16>
    %cst_126 = arith.constant dense<0.000000e+00> : vector<16x512xf32>
    %214 = tpu.matmul %212, %213, %cst_126 {dimension_numbers = #tpu.dot_dimension_numbers<[1], [0], [0], [1], [0, 0, 1, 1], [], []>} : vector<16x256xbf16>, vector<256x512xbf16>, vector<16x512xf32> -> vector<16x512xf32>
    %215 = arith.addf %211, %214 : vector<16x512xf32>
    %216 = vector.extract_strided_slice %170 {offsets = [176, 0], sizes = [16, 256], strides = [1, 1]} : vector<256x256xbf16> to vector<16x256xbf16>
    %c2816 = arith.constant 2816 : index
    %c0_127 = arith.constant 0 : index
    %217 = vector.load %arg9[%c2816, %c0_127] : memref<4096x512xbf16, #tpu.memory_space<vmem>>, vector<256x512xbf16>
    %cst_128 = arith.constant dense<0.000000e+00> : vector<16x512xf32>
    %218 = tpu.matmul %216, %217, %cst_128 {dimension_numbers = #tpu.dot_dimension_numbers<[1], [0], [0], [1], [0, 0, 1, 1], [], []>} : vector<16x256xbf16>, vector<256x512xbf16>, vector<16x512xf32> -> vector<16x512xf32>
    %219 = arith.addf %215, %218 : vector<16x512xf32>
    %220 = vector.extract_strided_slice %170 {offsets = [192, 0], sizes = [16, 256], strides = [1, 1]} : vector<256x256xbf16> to vector<16x256xbf16>
    %c3072 = arith.constant 3072 : index
    %c0_129 = arith.constant 0 : index
    %221 = vector.load %arg9[%c3072, %c0_129] : memref<4096x512xbf16, #tpu.memory_space<vmem>>, vector<256x512xbf16>
    %cst_130 = arith.constant dense<0.000000e+00> : vector<16x512xf32>
    %222 = tpu.matmul %220, %221, %cst_130 {dimension_numbers = #tpu.dot_dimension_numbers<[1], [0], [0], [1], [0, 0, 1, 1], [], []>} : vector<16x256xbf16>, vector<256x512xbf16>, vector<16x512xf32> -> vector<16x512xf32>
    %223 = arith.addf %219, %222 : vector<16x512xf32>
    %224 = vector.extract_strided_slice %170 {offsets = [208, 0], sizes = [16, 256], strides = [1, 1]} : vector<256x256xbf16> to vector<16x256xbf16>
    %c3328 = arith.constant 3328 : index
    %c0_131 = arith.constant 0 : index
    %225 = vector.load %arg9[%c3328, %c0_131] : memref<4096x512xbf16, #tpu.memory_space<vmem>>, vector<256x512xbf16>
    %cst_132 = arith.constant dense<0.000000e+00> : vector<16x512xf32>
    %226 = tpu.matmul %224, %225, %cst_132 {dimension_numbers = #tpu.dot_dimension_numbers<[1], [0], [0], [1], [0, 0, 1, 1], [], []>} : vector<16x256xbf16>, vector<256x512xbf16>, vector<16x512xf32> -> vector<16x512xf32>
    %227 = arith.addf %223, %226 : vector<16x512xf32>
    %228 = vector.extract_strided_slice %170 {offsets = [224, 0], sizes = [16, 256], strides = [1, 1]} : vector<256x256xbf16> to vector<16x256xbf16>
    %c3584 = arith.constant 3584 : index
    %c0_133 = arith.constant 0 : index
    %229 = vector.load %arg9[%c3584, %c0_133] : memref<4096x512xbf16, #tpu.memory_space<vmem>>, vector<256x512xbf16>
    %cst_134 = arith.constant dense<0.000000e+00> : vector<16x512xf32>
    %230 = tpu.matmul %228, %229, %cst_134 {dimension_numbers = #tpu.dot_dimension_numbers<[1], [0], [0], [1], [0, 0, 1, 1], [], []>} : vector<16x256xbf16>, vector<256x512xbf16>, vector<16x512xf32> -> vector<16x512xf32>
    %231 = arith.addf %227, %230 : vector<16x512xf32>
    %232 = vector.extract_strided_slice %170 {offsets = [240, 0], sizes = [16, 256], strides = [1, 1]} : vector<256x256xbf16> to vector<16x256xbf16>
    %c3840 = arith.constant 3840 : index
    %c0_135 = arith.constant 0 : index
    %233 = vector.load %arg9[%c3840, %c0_135] : memref<4096x512xbf16, #tpu.memory_space<vmem>>, vector<256x512xbf16>
    %cst_136 = arith.constant dense<0.000000e+00> : vector<16x512xf32>
    %234 = tpu.matmul %232, %233, %cst_136 {dimension_numbers = #tpu.dot_dimension_numbers<[1], [0], [0], [1], [0, 0, 1, 1], [], []>} : vector<16x256xbf16>, vector<256x512xbf16>, vector<16x512xf32> -> vector<16x512xf32>
    %235 = arith.addf %231, %234 : vector<16x512xf32>
    %236 = vector.extract_strided_slice %0 {offsets = [3, 0], sizes = [1, 512], strides = [1, 1]} : vector<8x512xf32> to vector<1x512xf32>
    %237 = vector.broadcast %236 : vector<1x512xf32> to vector<16x512xf32>
    %238 = arith.addf %235, %237 : vector<16x512xf32>
    %cst_137 = arith.constant 0.000000e+00 : f32
    %239 = vector.broadcast %cst_137 : f32 to vector<16x512xf32>
    %240 = arith.cmpf oge, %238, %239 : vector<16x512xf32>
    %cst_138 = arith.constant 2.000000e-01 : f32
    %241 = vector.broadcast %cst_138 : f32 to vector<16x512xf32>
    %242 = arith.mulf %241, %238 : vector<16x512xf32>
    %243 = arith.select %240, %238, %242 : vector<16x512xi1>, vector<16x512xf32>
    %244 = arith.truncf %243 : vector<16x512xf32> to vector<16x512xbf16>
    %c0_139 = arith.constant 0 : index
    %c0_140 = arith.constant 0 : index
    %245 = vector.load %arg5[%c0_139, %c0_140] : memref<16x16xbf16, #tpu.memory_space<vmem>>, vector<16x16xbf16>
    %cst_141 = arith.constant dense<0.000000e+00> : vector<16x512xf32>
    %246 = tpu.matmul %245, %244, %cst_141 {dimension_numbers = #tpu.dot_dimension_numbers<[1], [0], [0], [1], [0, 0, 1, 1], [], []>} : vector<16x16xbf16>, vector<16x512xbf16>, vector<16x512xf32> -> vector<16x512xf32>
    %c0_142 = arith.constant 0 : index
    %c0_143 = arith.constant 0 : index
    %247 = vector.load %arg10[%c0_142, %c0_143] : memref<16x512xf32, #tpu.memory_space<vmem>>, vector<16x512xf32>
    %248 = arith.mulf %246, %247 : vector<16x512xf32>
    %c0_144 = arith.constant 0 : index
    %c0_145 = arith.constant 0 : index
    %249 = vector.load %arg11[%c0_144, %c0_145] : memref<1x16xf32, #tpu.memory_space<vmem>>, vector<1x16xf32>
    %cst_146 = arith.constant dense<0.000000e+00> : vector<1x512xf32>
    %250 = tpu.matmul %249, %248, %cst_146 {dimension_numbers = #tpu.dot_dimension_numbers<[1], [0], [0], [1], [0, 0, 1, 1], [], []>} : vector<1x16xf32>, vector<16x512xf32>, vector<1x512xf32> -> vector<1x512xf32>
    %cst_147 = arith.constant dense<0.000000e+00> : vector<1xf32>
    %251 = vector.multi_reduction <add>, %250, %cst_147 [1] : vector<1x512xf32> to vector<1xf32>
    %252 = vector.shape_cast %251 : vector<1xf32> to vector<1x1xf32>
    %253 = vector.extract_strided_slice %0 {offsets = [4, 0], sizes = [1, 1], strides = [1, 1]} : vector<8x512xf32> to vector<1x1xf32>
    %254 = arith.addf %252, %253 : vector<1x1xf32>
    %cst_148 = arith.constant 0.000000e+00 : f32
    %255 = vector.broadcast %cst_148 : f32 to vector<1x1xf32>
    %256 = arith.subf %255, %254 : vector<1x1xf32>
    %257 = math.exp %256 : vector<1x1xf32>
    %cst_149 = arith.constant 1.000000e+00 : f32
    %258 = vector.broadcast %cst_149 : f32 to vector<1x1xf32>
    %259 = arith.addf %258, %257 : vector<1x1xf32>
    %cst_150 = arith.constant 1.000000e+00 : f32
    %260 = vector.broadcast %cst_150 : f32 to vector<1x1xf32>
    %261 = arith.divf %260, %259 : vector<1x1xf32>
    %262 = vector.shape_cast %261 : vector<1x1xf32> to vector<1x1xf32>
    %263 = vector.broadcast %262 : vector<1x1xf32> to vector<1x128xf32>
    %c0_151 = arith.constant 0 : index
    %c0_152 = arith.constant 0 : index
    %c0_153 = arith.constant 0 : index
    %264 = vector.load %arg13[%c0_151, %c0_152, %c0_153] : memref<1x1x128xf32, #tpu.memory_space<vmem>>, vector<1x1x128xf32>
    %265 = vector.shape_cast %264 : vector<1x1x128xf32> to vector<1x128xf32>
    %266 = vector.shape_cast %263 : vector<1x128xf32> to vector<1x1x128xf32>
    tpu.vector_store %arg13[%c0_151, %c0_152, %c0_153], %266 {strides = array<i32>} : memref<1x1x128xf32, #tpu.memory_space<vmem>>, vector<1x1x128xf32>,
    return
  }
  func.func @transform_0(%arg0: i32) -> (i32, i32, i32) {
    %c0_i32 = arith.constant 0 : i32
    %c0_i32_0 = arith.constant 0 : i32
    %c0_i32_1 = arith.constant 0 : i32
    return %arg0, %c0_i32, %c0_i32_0 : i32, i32, i32
  }
  func.func @transform_1(%arg0: i32) -> (i32, i32) {
    %c0_i32 = arith.constant 0 : i32
    %c0_i32_0 = arith.constant 0 : i32
    %c0_i32_1 = arith.constant 0 : i32
    return %c0_i32, %c0_i32_0 : i32, i32
  }
  func.func @transform_2(%arg0: i32) -> (i32, i32) {
    %c0_i32 = arith.constant 0 : i32
    %c0_i32_0 = arith.constant 0 : i32
    %c0_i32_1 = arith.constant 0 : i32
    return %c0_i32, %c0_i32_0 : i32, i32
  }
  func.func @transform_3(%arg0: i32) -> (i32, i32) {
    %c0_i32 = arith.constant 0 : i32
    %c0_i32_0 = arith.constant 0 : i32
    %c0_i32_1 = arith.constant 0 : i32
    return %c0_i32, %c0_i32_0 : i32, i32
  }
  func.func @transform_4(%arg0: i32) -> (i32, i32) {
    %c0_i32 = arith.constant 0 : i32
    %c0_i32_0 = arith.constant 0 : i32
    %c0_i32_1 = arith.constant 0 : i32
    return %c0_i32, %c0_i32_0 : i32, i32
  }
  func.func @transform_5(%arg0: i32) -> (i32, i32) {
    %c0_i32 = arith.constant 0 : i32
    %c0_i32_0 = arith.constant 0 : i32
    %c0_i32_1 = arith.constant 0 : i32
    return %c0_i32, %c0_i32_0 : i32, i32
  }
  func.func @transform_6(%arg0: i32) -> (i32, i32) {
    %c0_i32 = arith.constant 0 : i32
    %c0_i32_0 = arith.constant 0 : i32
    %c0_i32_1 = arith.constant 0 : i32
    return %c0_i32, %c0_i32_0 : i32, i32
  }
  func.func @transform_7(%arg0: i32) -> (i32, i32) {
    %c0_i32 = arith.constant 0 : i32
    %c0_i32_0 = arith.constant 0 : i32
    %c0_i32_1 = arith.constant 0 : i32
    return %c0_i32, %c0_i32_0 : i32, i32
  }
  func.func @transform_8(%arg0: i32) -> (i32, i32) {
    %c0_i32 = arith.constant 0 : i32
    %c0_i32_0 = arith.constant 0 : i32
    %c0_i32_1 = arith.constant 0 : i32
    return %c0_i32, %c0_i32_0 : i32, i32
  }
  func.func @transform_9(%arg0: i32) -> (i32, i32) {
    %c0_i32 = arith.constant 0 : i32
    %c0_i32_0 = arith.constant 0 : i32
    %c0_i32_1 = arith.constant 0 : i32
    return %c0_i32, %c0_i32_0 : i32, i32
  }
  func.func @transform_10(%arg0: i32) -> (i32, i32) {
    %c0_i32 = arith.constant 0 : i32
    %c0_i32_0 = arith.constant 0 : i32
    %c0_i32_1 = arith.constant 0 : i32
    return %c0_i32, %c0_i32_0 : i32, i32
  }
  func.func @transform_11(%arg0: i32) -> (i32, i32) {
    %c0_i32 = arith.constant 0 : i32
    %c0_i32_0 = arith.constant 0 : i32
    %c0_i32_1 = arith.constant 0 : i32
    return %c0_i32, %c0_i32_0 : i32, i32
  }
  func.func @transform_12(%arg0: i32) -> (i32, i32, i32) {
    %c0_i32 = arith.constant 0 : i32
    %c0_i32_0 = arith.constant 0 : i32
    %c0_i32_1 = arith.constant 0 : i32
    return %arg0, %c0_i32, %c0_i32_0 : i32, i32, i32
  }
}

</mosaic_0001>

<bundles_post_ra>
// kernel: discriminator_forward.1
= control target key start
LH: loop header
LB: loop body
LE: loop exit
PB: predicated region body
PF: predicated region fallthrough
CT: control target
= control target key end

     0   :  { %s25314_s0 = inlined_call_operand.vmem [shape: bf16[2,256,64], index: 0, kind: input, shape index: {}]   ;;  %s25315_s1 = inlined_call_operand.vmem [shape: bf16[1024,256], index: 1, kind: input, shape index: {}]   ;;  %s25316_s2 = inlined_call_operand.hbm [shape: bf16[256,64], index: 2, kind: input, shape index: {}]   ;;  %s25317_s3 = inlined_call_operand.hbm [shape: bf16[256,16], index: 3, kind: input, shape index: {}]   ;;  %s25318_s4 = inlined_call_operand.vmem [shape: bf16[16,16], index: 4, kind: input, shape index: {}]   ;;  %s25319_s5 = inlined_call_operand.hbm [shape: bf16[64,64], index: 5, kind: input, shape index: {}]   ;;  %s25320_s6 = inlined_call_operand.vmem [shape: bf16[1024,128], index: 6, kind: input, shape index: {}]   ;;  %s25321_s7 = inlined_call_operand.hbm [shape: bf16[2048,256], index: 7, kind: input, shape index: {}]   ;;  %s25322_s8 = inlined_call_operand.vmem [shape: bf16[4096,512], index: 8, kind: input, shape index: {}]   ;;  %s25323_s9 = inlined_call_operand.hbm [shape: f32[16,512], index: 9, kind: input, shape index: {}]   ;;  %s25324_s10 = inlined_call_operand.vmem [shape: f32[1,16], index: 10, kind: input, shape index: {}]   ;;  %s25325_s11 = inlined_call_operand.hbm [shape: f32[8,512], index: 11, kind: input, shape index: {}]   ;;  %s25326_s12 = inlined_call_operand.vmem [shape: f32[2,1,128], index: 12, kind: output, shape index: {}]  }
   0x1   :  { %25358 = sst [smem:[#allocation38_spill]] %s25317_s3 }
   0x2   :  { %17 = vsyncpa [#allocation3], 0 }
   0x3   :  { %18 = vsyncpa [#allocation5], 0 }
   0x4   :  { %19 = vsyncpa [#allocation8], 0 }
   0x5   :  { %20 = vsyncpa [#allocation11], 0  ;;  %s20409_s21 = smov 0  }
   0x6 LB: > { %25359 = sst [smem:[#allocation16_spill]] %s20328_s21  ;;  %s20415_s22 = sadd.s32 4294967295, %s20328_s21   ;;  %s20328_s21 = sphi %s20409_s21, %s26_s21  }
   0x7   : > { %p15350_p0 = scmp.ge.s32.totalorder %s20328_s21, 1  ;;  %p314_p1 = scmp.lt.s32.totalorder %s20328_s21, 3 }
   0x8   : > { %p25332_p2 = scmp.eq.s32.totalorder %s20415_s22, 0  ;;  %s20330_s24 = smov [#allocation4]  }
   0x9   : > { %p20420_p3 = pnand %p15350_p0, %p314_p1  ;;  %s342_s25 = sshll.u32 %s20330_s24, 4  ;;  %s20424_s25 = int_to_ptr.vmem [resolvable:$true] %s342_s25 }
   0xa   : > { %s20331_s26 = smov [#allocation7]   ;;  %s20332_s29 = smov [#allocation2]  }
   0xb   : > { %s25360_s23 = scalar_select %p20420_p3, 1, 0 }
   0xc   : > { %p17847_p4 = pneg %p20420_p3  ;;  %s374_s27 = sshll.u32 %s20331_s26, 4  ;;  %s20428_s27 = int_to_ptr.vmem [resolvable:$true] %s374_s27 }
   0xd   : > { %s20436_s30 = sshll.u32 %s20332_s29, 4  ;;  %s25362_s3 = sld [smem:[#allocation38_spill]]  ;;  %s330_s30 = int_to_ptr.vmem [resolvable:$true] %s20436_s30 }
   0xe   : > { %p20432_p5 = pnand %p25332_p2, %p17847_p4 }
  0x10   : > { %p20446_p7 = pneg %p20432_p5 }
  0x13   : > { %s20138_s15 = scalar_lea.hbm %s25362_s3, 2048 }
  0x14   : > { %p20139_p6 = scmp.ne.s32.totalorder %s25362_s3, %s20138_s15  ;;  %p20145_p10 = scmp.lt.u32.totalorder %s20138_s15, %s25362_s3 }
  0x16   : > { %p20141_p8 = pnand %p20446_p7, %p20139_p6 }
  0x18   : > { %p20142_p9 = pneg %p20141_p8 }
  0x1a   : > { %p20147_p11 = pnand %p20145_p10, %p20142_p9 }
  0x1c   : > { %20150 = shalt.err (!%p20147_p11)
}
  0x1d   : > { %s20151_s24 = scalar_lea.vmem %s20424_s25, 2048  ;;  %p20159_p1 = scmp.lt.s32.totalorder %s20424_s25, %s20424_s25 }
  0x1e   : > { %p20152_p12 = scmp.ne.s32.totalorder %s20424_s25, %s20151_s24  ;;  %p20160_p4 = scmp.lt.s32.totalorder %s20151_s24, %s20151_s24 }
  0x20   : > { %p20154_p13 = pnand %p20152_p12, %p20446_p7  ;;  %p20161_p6 = por %p20160_p4, %p20159_p1 }
  0x22   : > { %p20155_p0 = pneg %p20154_p13 }
  0x24   : > { %p20162_p8 = pnand %p20161_p6, %p20155_p0 }
  0x26   : > { %20165 = shalt.err (!%p20162_p8)
}
  0x27   : > { %s25328_s26 = smov 64   ;;  %s25330_s29 = smov 4  }
  0x28   : > { %17853 = dma.hbm_to_vmem [thread:$0]  (!%p20432_p5), %s25362_s3, 2048, %s20424_s25, [#allocation5], %s25328_s26, %s25328_s26, %s25330_s29  }
  0x29   : > { %s20166_s17 = scalar_lea.hbm %s25321_s7, 32768 }
  0x2a   : > { %p20167_p9 = scmp.ne.s32.totalorder %s25321_s7, %s20166_s17  ;;  %p20173_p12 = scmp.lt.u32.totalorder %s20166_s17, %s25321_s7 }
  0x2c   : > { %p20169_p10 = pnand %p20167_p9, %p20446_p7 }
  0x2e   : > { %p20170_p11 = pneg %p20169_p10 }
  0x30   : > { %p20175_p13 = pnand %p20173_p12, %p20170_p11 }
  0x32   : > { %20178 = shalt.err (!%p20175_p13)
}
  0x33   : > { %s20179_s25 = scalar_lea.vmem %s20428_s27, 32768  ;;  %p20187_p6 = scmp.lt.s32.totalorder %s20428_s27, %s20428_s27 }
  0x34   : > { %p20180_p0 = scmp.ne.s32.totalorder %s20428_s27, %s20179_s25  ;;  %p20188_p8 = scmp.lt.s32.totalorder %s20179_s25, %s20179_s25 }
  0x36   : > { %p20182_p1 = pnand %p20180_p0, %p20446_p7  ;;  %p20189_p9 = por %p20188_p8, %p20187_p6 }
  0x38   : > { %p20183_p4 = pneg %p20182_p1 }
  0x3a   : > { %p20190_p10 = pnand %p20189_p9, %p20183_p4 }
  0x3c   : > { %20193 = shalt.err (!%p20190_p10)
}
  0x3d   : > { %s20335_s13 = smov 128   ;;  %s20336_s21 = smov 8  }
  0x3e   : > { %17859 = dma.hbm_to_vmem [thread:$0]  (!%p20432_p5), %s25321_s7, 32768, %s20428_s27, [#allocation8], %s20335_s13, %s20335_s13, %s20336_s21  }
  0x3f   : > { %s20337_s16 = smov [#allocation6]   ;;  %s20194_s24 = scalar_lea.hbm %s25316_s2, 2048 }
  0x40   : > { %s358_s17 = sshll.u32 %s20337_s16, 4  ;;  %p20195_p11 = scmp.ne.s32.totalorder %s25316_s2, %s20194_s24  ;;  %s359_s17 = int_to_ptr.vmem [resolvable:$true] %s358_s17 }
  0x41   : > { %p20201_p0 = scmp.lt.u32.totalorder %s20194_s24, %s25316_s2 }
  0x42   : > { %p20197_p12 = pnand %p20195_p11, %p20446_p7 }
  0x44   : > { %p20198_p13 = pneg %p20197_p12 }
  0x46   : > { %p20203_p1 = pnand %p20201_p0, %p20198_p13 }
  0x48   : > { %20206 = shalt.err (!%p20203_p1)
}
  0x49   : > { %s20207_s27 = scalar_lea.vmem %s330_s30, 2048  ;;  %p20215_p9 = scmp.lt.s32.totalorder %s330_s30, %s330_s30 }
  0x4a   : > { %p20208_p4 = scmp.ne.s32.totalorder %s330_s30, %s20207_s27  ;;  %p20216_p10 = scmp.lt.s32.totalorder %s20207_s27, %s20207_s27 }
  0x4c   : > { %p20210_p6 = pnand %p20208_p4, %p20446_p7  ;;  %p20217_p2 = por %p20216_p10, %p20215_p9 }
  0x4e   : > { %p20211_p8 = pneg %p20210_p6 }
  0x50   : > { %p20218_p3 = pnand %p20217_p2, %p20211_p8 }
  0x52   : > { %20221 = shalt.err (!%p20218_p3)
}
  0x53   : > { %s25364_s26 = smov 4   ;;  %s25365_s13 = smov 64  }
  0x54   : > { %17850 = dma.hbm_to_vmem [thread:$0]  (!%p20432_p5), %s25316_s2, 2048, %s330_s30, [#allocation3], %s25365_s13, %s25365_s13, %s25364_s26  }
  0x55   : > { %s20222_s15 = scalar_lea.hbm %s25319_s5, 512 }
  0x56   : > { %p20223_p2 = scmp.ne.s32.totalorder %s25319_s5, %s20222_s15  ;;  %p20229_p12 = scmp.lt.u32.totalorder %s20222_s15, %s25319_s5 }
  0x58   : > { %p20225_p3 = pnand %p20223_p2, %p20446_p7 }
  0x5a   : > { %p20226_p11 = pneg %p20225_p3 }
  0x5c   : > { %p20231_p13 = pnand %p20229_p12, %p20226_p11 }
  0x5e   : > { %20234 = shalt.err (!%p20231_p13)
}
  0x5f   : > { %s20235_s25 = scalar_lea.vmem %s359_s17, 512  ;;  %p20243_p6 = scmp.lt.s32.totalorder %s359_s17, %s359_s17 }
  0x60   : > { %p20236_p0 = scmp.ne.s32.totalorder %s359_s17, %s20235_s25  ;;  %p20244_p8 = scmp.lt.s32.totalorder %s20235_s25, %s20235_s25 }
  0x62   : > { %p20238_p1 = pnand %p20236_p0, %p20446_p7  ;;  %p20245_p9 = por %p20244_p8, %p20243_p6 }
  0x64   : > { %p20239_p4 = pneg %p20238_p1 }
  0x66   : > { %p20246_p10 = pnand %p20245_p9, %p20239_p4 }
  0x68   : > { %20249 = shalt.err (!%p20246_p10)
}
  0x69   : > { %17856 = dma.hbm_to_vmem [thread:$0]  (!%p20432_p5), %s25319_s5, 512, %s359_s17, [#allocation5], %s25365_s13, %s25365_s13, %s25364_s26  }
  0x6a   : > { %s20338_s3 = smov [#allocation9]   ;;  %s20250_s15 = scalar_lea.hbm %s25323_s9, 1024 }
  0x6b   : > { %s390_s29 = sshll.u32 %s20338_s3, 4  ;;  %p20251_p2 = scmp.ne.s32.totalorder %s25323_s9, %s20250_s15  ;;  %s391_s29 = int_to_ptr.vmem [resolvable:$true] %s390_s29 }
  0x6c   : > { %p20257_p12 = scmp.lt.u32.totalorder %s20250_s15, %s25323_s9 }
  0x6d   : > { %p20253_p3 = pnand %p20251_p2, %p20446_p7 }
  0x6f   : > { %p20254_p11 = pneg %p20253_p3 }
  0x71   : > { %p20259_p13 = pnand %p20257_p12, %p20254_p11 }
  0x73   : > { %20262 = shalt.err (!%p20259_p13)
}
  0x74   : > { %s20263_s17 = scalar_lea.vmem %s391_s29, 1024  ;;  %p20271_p6 = scmp.lt.s32.totalorder %s391_s29, %s391_s29 }
  0x75   : > { %p20264_p0 = scmp.ne.s32.totalorder %s391_s29, %s20263_s17  ;;  %p20272_p8 = scmp.lt.s32.totalorder %s20263_s17, %s20263_s17 }
  0x77   : > { %p20266_p1 = pnand %p20264_p0, %p20446_p7  ;;  %p20273_p9 = por %p20272_p8, %p20271_p6 }
  0x79   : > { %p20267_p4 = pneg %p20266_p1 }
  0x7b   : > { %p20274_p10 = pnand %p20273_p9, %p20267_p4 }
  0x7d   : > { %20277 = shalt.err (!%p20274_p10)
}
  0x7e   : > { %s20339_s26 = smov 512   ;;  %s20340_s13 = smov 32  }
  0x7f   : > { %17862 = dma.hbm_to_vmem [thread:$0]  (!%p20432_p5), %s25323_s9, 1024, %s391_s29, [#allocation8], %s20339_s26, %s20339_s26, %s20340_s13  }
  0x80   : > { %s20341_s27 = smov [#allocation10]   ;;  %s20278_s15 = scalar_lea.hbm %s25325_s11, 512 }
  0x81   : > { %s407_s3 = sshll.u32 %s20341_s27, 4  ;;  %p20279_p2 = scmp.ne.s32.totalorder %s25325_s11, %s20278_s15  ;;  %s408_s3 = int_to_ptr.vmem [resolvable:$true] %s407_s3 }
  0x82   : > { %p20285_p12 = scmp.lt.u32.totalorder %s20278_s15, %s25325_s11 }
  0x83   : > { %p20281_p3 = pnand %p20279_p2, %p20446_p7 }
  0x85   : > { %p20282_p11 = pneg %p20281_p3 }
  0x87   : > { %p20287_p13 = pnand %p20285_p12, %p20282_p11 }
  0x89   : > { %20290 = shalt.err (!%p20287_p13)
}
  0x8a   : > { %s20291_s29 = scalar_lea.vmem %s408_s3, 512  ;;  %p20299_p6 = scmp.lt.s32.totalorder %s408_s3, %s408_s3 }
  0x8b   : > { %p20292_p0 = scmp.ne.s32.totalorder %s408_s3, %s20291_s29  ;;  %p20300_p8 = scmp.lt.s32.totalorder %s20291_s29, %s20291_s29 }
  0x8d   : > { %p20294_p1 = pnand %p20292_p0, %p20446_p7  ;;  %p20301_p9 = por %p20300_p8, %p20299_p6 }
  0x8f   : > { %p20295_p4 = pneg %p20294_p1 }
  0x91   : > { %p20302_p10 = pnand %p20301_p9, %p20295_p4 }
  0x93   : > { %20305 = shalt.err (!%p20302_p10)
}
  0x94   : > { %17865 = dma.hbm_to_vmem [thread:$0]  (!%p20432_p5), %s25325_s11, 512, %s408_s3, [#allocation11]  }
  0x95   : > { %p25366_p2 = scmp.ne.s32.totalorder %s25360_s23, 0 }
  0x97   : > { %428 = sbr.rel (%p25366_p2) target bundleno = 5316 (0x14c4), region = 68 }
  0x9e   : > { %p25367_p3 = scmp.eq.s32.totalorder %s20415_s22, 0 }
  0xa0   : > { %20311 = dma.done.wait (%p25367_p3), [#allocation3], 2048   ;;  %p25368_p7 = pmov %p25367_p3 }
  0xa1   : > { %p25369_p11 = pmov %p25367_p3 }
  0xa2   : > { %20313 = vsyncadd (%p25368_p7), [#allocation3], 4294965248 }
  0xa3   : > { %20315 = dma.done.wait (%p25369_p11), [#allocation5], 2560   ;;  %p25370_p12 = pmov %p25367_p3 }
  0xa4   : > { %p25371_p13 = pmov %p25367_p3 }
  0xa5   : > { %20317 = vsyncadd (%p25370_p12), [#allocation5], 4294964736 }
  0xa6   : > { %20319 = dma.done.wait (%p25371_p13), [#allocation8], 33792   ;;  %p25372_p5 = pmov %p25367_p3 }
  0xa7   : > { %p25373_p0 = pmov %p25367_p3 }
  0xa8   : > { %20321 = vsyncadd (%p25372_p5), [#allocation8], 4294933504 }
  0xa9   : > { %20323 = dma.done.wait (%p25373_p0), [#allocation11], 512   ;;  %p25374_p1 = pmov %p25373_p0 }
  0xaa   : > { %p488_p4 = scmp.lt.s32.totalorder %s20415_s22, 1  ;;  %v17901_v0 = vld [vmem:[#allocation6] sm:$0xff]   ;;  %v17902_v1 = vld [vmem:[#allocation6 + $0x8] sm:$0xff]   ;;  %v17903_v2 = vld [vmem:[#allocation6 + $0x10] sm:$0xff]   ;;  %vm649_vm0 = vcmask 523264   ;;  %v25334_v20 = vmov 0   ;;  %v541_v22 = vlaneseq }
  0xab   : > { %20325 = vsyncadd (%p25374_p1), [#allocation11], 4294966784  ;;  %17179 = vmatprep.subr.bf16.mxu0 %v17901_v0  ;;  %v17904_v4 = vld [vmem:[#allocation6 + $0x18] sm:$0xff]   ;;  %17900 = vset.pattern.permute.xlu0 %v25334_v20  ;;  %v17923_v21 = vld [vmem:[%s25315_s1 + $0x4] ss:$8 sps:$4 sm:$0xff]  }
  0xac   : > { %s25459_s22 = smov (!%p488_p4, %s20415_s22), 1  ;;  %17180 = vmatpush3.bf16.msra.mxu0 %v17901_v0  ;;  %v20637_v23 = vshrl.u32 %v541_v22, 7  ;;  %v497_v25 = vld [vmem:[#allocation10] sm:$0xff] }
  0xad   : > { %s17010_s23 = sshll.u32 %s25459_s22, 7  ;;  %17181 = vmatprep.subr.bf16.mxu0 %v17902_v1  ;;  %s495_s19 = scalar_lea.vmem %s25326_s12, %s25459_s22 }
  0xae   : > { %s20598_s13 = scalar_lea.vmem %s25314_s0, %s17010_s23  ;;  %25375 = vst [vmem:[#allocation17_spill] sm:$0xff] %v20637_v23  ;;  %v543_v24 = vsub.s32 0, %v20637_v23  ;;  %v18090_v23 = vld [vmem:[%s25315_s1 + $0x374] ss:$8 sps:$4 sm:$0xff]  }
  0xaf   : > { %v17905_v3 = vld [vmem:[%s20598_s13] sm:$0xff]   ;;  %v17906_v5 = vld [vmem:[%s20598_s13 + $0x8] sm:$0xff]   ;;  %v17907_v6 = vld [vmem:[%s20598_s13 + $0x10] sm:$0xff]  }
  0xb0   : > { %17187 = vmatprep.mubr.msk.bf16.mxu0 %vm649_vm0, %v17905_v3  ;;  %17182 = vmatpush3.bf16.msra.mxu0 %v17902_v1  ;;  %v17908_v7 = vld [vmem:[%s20598_s13 + $0x18] sm:$0xff]   ;;  %v17909_v8 = vld [vmem:[%s20598_s13 + $0x20] sm:$0xff]   ;;  %v17910_v9 = vld [vmem:[%s20598_s13 + $0x28] sm:$0xff]   ;;  %v20640_v26 = vrot.slane %v497_v25, %v543_v24 }
  0xb1   : > { %17183 = vmatprep.subr.bf16.mxu0 %v17903_v2  ;;  %v17911_v10 = vld [vmem:[%s20598_s13 + $0x30] sm:$0xff]   ;;  %v17912_v11 = vld [vmem:[%s20598_s13 + $0x38] sm:$0xff]   ;;  %v17913_v12 = vld [vmem:[%s20598_s13 + $0x40] sm:$0xff]  }
  0xb2   : > { %v17914_v13 = vld [vmem:[%s20598_s13 + $0x48] sm:$0xff]   ;;  %v17915_v14 = vld [vmem:[%s20598_s13 + $0x50] sm:$0xff]   ;;  %v17916_v15 = vld [vmem:[%s20598_s13 + $0x58] sm:$0xff]  }
  0xb3   : > { %v17917_v16 = vld [vmem:[%s20598_s13 + $0x60] sm:$0xff]   ;;  %v17918_v17 = vld [vmem:[%s20598_s13 + $0x68] sm:$0xff]   ;;  %v17919_v18 = vld [vmem:[%s20598_s13 + $0x70] sm:$0xff]  }
  0xb4   : > { %17184 = vmatpush3.bf16.msra.mxu0 %v17903_v2  ;;  %v17920_v19 = vld [vmem:[%s20598_s13 + $0x78] sm:$0xff]  }
  0xb5   : > { %17185 = vmatprep.subr.bf16.mxu0 %v17904_v4 }
  0xb8   : > { %17186 = vmatpush3.bf16.msra.mxu0 %v17904_v4 }
  0xb9   : > { %1739 = vmatprep.subr.bf16.mxu0 %v25334_v20 }
  0xbb   : > { %17188 = vmatmul.mubr.msk.bf16.vlgmr.msra.gmra.mrb[0].mxu0 %vm649_vm0, %v17906_v5 }
  0xbc   : > { %17191 = vmatprep.mubr.msk.bf16.mxu0 %vm649_vm0, %v17907_v6 }
  0xc3   : > { %17192 = vmatmul.mubr.msk.bf16.gmra.mrb[4].mxu0 %vm649_vm0, %v17908_v7 }
  0xc4   : > { %17195 = vmatprep.mubr.msk.bf16.mxu0 %vm649_vm0, %v17909_v8 }
  0xcb   : > { %17196 = vmatmul.mubr.msk.bf16.gmra.mrb[8].mxu0 %vm649_vm0, %v17910_v9 }
  0xcc   : > { %17199 = vmatprep.mubr.msk.bf16.mxu0 %vm649_vm0, %v17911_v10 }
  0xd3   : > { %17200 = vmatmul.mubr.msk.bf16.gmra.mrb[12].mxu0 %vm649_vm0, %v17912_v11 }
  0xd4   : > { %17203 = vmatprep.mubr.msk.bf16.mxu0 %vm649_vm0, %v17913_v12 }
  0xdb   : > { %17204 = vmatmul.mubr.msk.bf16.gmra.mrb[16].mxu0 %vm649_vm0, %v17914_v13 }
  0xdc   : > { %17207 = vmatprep.mubr.msk.bf16.mxu0 %vm649_vm0, %v17915_v14 }
  0xe3   : > { %17208 = vmatmul.mubr.msk.bf16.gmra.mrb[20].mxu0 %vm649_vm0, %v17916_v15 }
  0xe4   : > { %17211 = vmatprep.mubr.msk.bf16.mxu0 %vm649_vm0, %v17917_v16 }
  0xeb   : > { %17212 = vmatmul.mubr.msk.bf16.gmra.mrb[24].mxu0 %vm649_vm0, %v17918_v17 }
  0xec   : > { %17215 = vmatprep.mubr.msk.bf16.mxu0 %vm649_vm0, %v17919_v18 }
  0xf3   : > { %17216 = vmatmul.mubr.msk.bf16.gmra.mrb[28].mxu0 %vm649_vm0, %v17920_v19 }
  0xf4   : > { %1771 = vmatprep.mubr.bf16.mxu0 %v17923_v21 }
 0x18e   : > { %v17189_v27 = vpop.f32.mrb[0].mxu0 }
 0x18f   : > { %v741_v28 = vadd.f32 %v17189_v27, %v20640_v26  ;;  %v732_v29 = vpop.f32.mrb[1].mxu0 }
 0x190   : > { %v733_v30 = vadd.f32 %v732_v29, %v20640_v26  ;;  %v17190_v31 = vpop.f32.mrb[2].mxu0 }
 0x191   : > { %vm861_vm1 = vcmp.ge.f32.partialorder %v741_v28, 0.0  ;;  %v893_v32 = vmul.f32 0.2, %v741_v28  ;;  %v744_v33 = vadd.f32 %v17190_v31, %v20640_v26  ;;  %v735_v34 = vpop.f32.mrb[3].mxu0 }
 0x192   : > { %vm859_vm2 = vcmp.ge.f32.partialorder %v733_v30, 0.0  ;;  %v891_v35 = vmul.f32 0.2, %v733_v30  ;;  %v736_v36 = vadd.f32 %v735_v34, %v20640_v26 }
 0x193   : > { %vm862_vm3 = vcmp.ge.f32.partialorder %v744_v33, 0.0  ;;  %v894_v37 = vmul.f32 0.2, %v744_v33  ;;  %v925_v39 = vsel %vm861_vm1, %v741_v28, %v893_v32 }
 0x194   : > { %vm860_vm4 = vcmp.ge.f32.partialorder %v736_v36, 0.0  ;;  %v892_v38 = vmul.f32 0.2, %v736_v36  ;;  %v923_v41 = vsel %vm859_vm2, %v733_v30, %v891_v35 }
 0x195   : > { %v926_v40 = vsel %vm862_vm3, %v744_v33, %v894_v37 }
 0x196   : > { %v924_v42 = vsel %vm860_vm4, %v736_v36, %v892_v38  ;;  %v17193_v43 = vpop.f32.mrb[4].mxu0  ;;  %v956_v44 = vpack.c.bf16 %v926_v40, %v925_v39 }
 0x197   : > { %v757_v45 = vadd.f32 %v17193_v43, %v20640_v26  ;;  %v748_v46 = vpop.f32.mrb[5].mxu0  ;;  %v955_v47 = vpack.c.bf16 %v924_v42, %v923_v41 }
 0x198   : > { %v749_v48 = vadd.f32 %v748_v46, %v20640_v26  ;;  %v17194_v49 = vpop.f32.mrb[6].mxu0 }
 0x199   : > { %vm865_vm5 = vcmp.ge.f32.partialorder %v757_v45, 0.0  ;;  %v897_v50 = vmul.f32 0.2, %v757_v45  ;;  %v760_v51 = vadd.f32 %v17194_v49, %v20640_v26  ;;  %v751_v52 = vpop.f32.mrb[7].mxu0  ;;  %1740 = vmatpush1.bf16.msra.mxu0 %v955_v47 }
 0x19a   : > { %vm863_vm6 = vcmp.ge.f32.partialorder %v749_v48, 0.0  ;;  %v895_v53 = vmul.f32 0.2, %v749_v48  ;;  %v752_v54 = vadd.f32 %v751_v52, %v20640_v26  ;;  %1741 = vmatprep.subr.bf16.mxu0 %v25334_v20 }
 0x19b   : > { %vm866_vm7 = vcmp.ge.f32.partialorder %v760_v51, 0.0  ;;  %v898_v55 = vmul.f32 0.2, %v760_v51  ;;  %v929_v57 = vsel %vm865_vm5, %v757_v45, %v897_v50 }
 0x19c   : > { %vm864_vm8 = vcmp.ge.f32.partialorder %v752_v54, 0.0  ;;  %v896_v56 = vmul.f32 0.2, %v752_v54  ;;  %v927_v59 = vsel %vm863_vm6, %v749_v48, %v895_v53 }
 0x19d   : > { %v930_v58 = vsel %vm866_vm7, %v760_v51, %v898_v55  ;;  %1742 = vmatpush1.bf16.msra.mxu0 %v956_v44 }
 0x19e   : > { %v928_v60 = vsel %vm864_vm8, %v752_v54, %v896_v56  ;;  %v17197_v61 = vpop.f32.mrb[8].mxu0  ;;  %1743 = vmatprep.subr.bf16.mxu0 %v25334_v20  ;;  %v958_v62 = vpack.c.bf16 %v930_v58, %v929_v57 }
 0x19f   : > { %v773_v63 = vadd.f32 %v17197_v61, %v20640_v26  ;;  %v764_v0 = vpop.f32.mrb[9].mxu0  ;;  %v957_v1 = vpack.c.bf16 %v928_v60, %v927_v59 }
 0x1a0   : > { %v765_v2 = vadd.f32 %v764_v0, %v20640_v26  ;;  %v17198_v3 = vpop.f32.mrb[10].mxu0 }
 0x1a1   : > { %vm869_vm9 = vcmp.ge.f32.partialorder %v773_v63, 0.0  ;;  %v901_v4 = vmul.f32 0.2, %v773_v63  ;;  %v776_v5 = vadd.f32 %v17198_v3, %v20640_v26  ;;  %v767_v6 = vpop.f32.mrb[11].mxu0  ;;  %1744 = vmatpush1.bf16.msra.mxu0 %v957_v1 }
 0x1a2   : > { %vm867_vm10 = vcmp.ge.f32.partialorder %v765_v2, 0.0  ;;  %v899_v7 = vmul.f32 0.2, %v765_v2  ;;  %v768_v8 = vadd.f32 %v767_v6, %v20640_v26  ;;  %1745 = vmatprep.subr.bf16.mxu0 %v25334_v20 }
 0x1a3   : > { %vm870_vm11 = vcmp.ge.f32.partialorder %v776_v5, 0.0  ;;  %v902_v9 = vmul.f32 0.2, %v776_v5  ;;  %v933_v11 = vsel %vm869_vm9, %v773_v63, %v901_v4 }
 0x1a4   : > { %vm868_vm12 = vcmp.ge.f32.partialorder %v768_v8, 0.0  ;;  %v900_v10 = vmul.f32 0.2, %v768_v8  ;;  %v931_v13 = vsel %vm867_vm10, %v765_v2, %v899_v7 }
 0x1a5   : > { %v934_v12 = vsel %vm870_vm11, %v776_v5, %v902_v9  ;;  %1746 = vmatpush1.bf16.msra.mxu0 %v958_v62 }
 0x1a6   : > { %v932_v14 = vsel %vm868_vm12, %v768_v8, %v900_v10  ;;  %v17201_v15 = vpop.f32.mrb[12].mxu0  ;;  %1747 = vmatprep.subr.bf16.mxu0 %v25334_v20  ;;  %v960_v16 = vpack.c.bf16 %v934_v12, %v933_v11 }
 0x1a7   : > { %v789_v17 = vadd.f32 %v17201_v15, %v20640_v26  ;;  %v780_v18 = vpop.f32.mrb[13].mxu0  ;;  %v959_v19 = vpack.c.bf16 %v932_v14, %v931_v13 }
 0x1a8   : > { %v781_v21 = vadd.f32 %v780_v18, %v20640_v26  ;;  %v17202_v22 = vpop.f32.mrb[14].mxu0 }
 0x1a9   : > { %vm873_vm13 = vcmp.ge.f32.partialorder %v789_v17, 0.0  ;;  %v905_v24 = vmul.f32 0.2, %v789_v17  ;;  %v792_v25 = vadd.f32 %v17202_v22, %v20640_v26  ;;  %v783_v27 = vpop.f32.mrb[15].mxu0  ;;  %1748 = vmatpush1.bf16.msra.mxu0 %v959_v19 }
 0x1aa   : > { %vm871_vm14 = vcmp.ge.f32.partialorder %v781_v21, 0.0  ;;  %v903_v28 = vmul.f32 0.2, %v781_v21  ;;  %v784_v29 = vadd.f32 %v783_v27, %v20640_v26  ;;  %1749 = vmatprep.subr.bf16.mxu0 %v25334_v20 }
 0x1ab   : > { %vm874_vm15 = vcmp.ge.f32.partialorder %v792_v25, 0.0  ;;  %v906_v30 = vmul.f32 0.2, %v792_v25  ;;  %v937_v32 = vsel %vm873_vm13, %v789_v17, %v905_v24 }
 0x1ac   : > { %vm872_vm1 = vcmp.ge.f32.partialorder %v784_v29, 0.0  ;;  %v904_v31 = vmul.f32 0.2, %v784_v29  ;;  %v935_v34 = vsel %vm871_vm14, %v781_v21, %v903_v28 }
 0x1ad   : > { %v938_v33 = vsel %vm874_vm15, %v792_v25, %v906_v30  ;;  %1750 = vmatpush1.bf16.msra.mxu0 %v960_v16 }
 0x1ae   : > { %v936_v35 = vsel %vm872_vm1, %v784_v29, %v904_v31  ;;  %v17205_v36 = vpop.f32.mrb[16].mxu0  ;;  %1751 = vmatprep.subr.bf16.mxu0 %v25334_v20  ;;  %v962_v37 = vpack.c.bf16 %v938_v33, %v937_v32 }
 0x1af   : > { %v805_v38 = vadd.f32 %v17205_v36, %v20640_v26  ;;  %v796_v39 = vpop.f32.mrb[17].mxu0  ;;  %v961_v40 = vpack.c.bf16 %v936_v35, %v935_v34 }
 0x1b0   : > { %v797_v41 = vadd.f32 %v796_v39, %v20640_v26  ;;  %v17206_v42 = vpop.f32.mrb[18].mxu0 }
 0x1b1   : > { %vm877_vm2 = vcmp.ge.f32.partialorder %v805_v38, 0.0  ;;  %v909_v43 = vmul.f32 0.2, %v805_v38  ;;  %v808_v44 = vadd.f32 %v17206_v42, %v20640_v26  ;;  %v799_v45 = vpop.f32.mrb[19].mxu0  ;;  %1752 = vmatpush1.bf16.msra.mxu0 %v961_v40 }
 0x1b2   : > { %vm875_vm3 = vcmp.ge.f32.partialorder %v797_v41, 0.0  ;;  %v907_v46 = vmul.f32 0.2, %v797_v41  ;;  %v800_v47 = vadd.f32 %v799_v45, %v20640_v26  ;;  %1753 = vmatprep.subr.bf16.mxu0 %v25334_v20 }
 0x1b3   : > { %vm878_vm4 = vcmp.ge.f32.partialorder %v808_v44, 0.0  ;;  %v910_v48 = vmul.f32 0.2, %v808_v44  ;;  %v941_v50 = vsel %vm877_vm2, %v805_v38, %v909_v43 }
 0x1b4   : > { %vm876_vm5 = vcmp.ge.f32.partialorder %v800_v47, 0.0  ;;  %v908_v49 = vmul.f32 0.2, %v800_v47  ;;  %v939_v52 = vsel %vm875_vm3, %v797_v41, %v907_v46 }
 0x1b5   : > { %v942_v51 = vsel %vm878_vm4, %v808_v44, %v910_v48  ;;  %1754 = vmatpush1.bf16.msra.mxu0 %v962_v37 }
 0x1b6   : > { %v940_v53 = vsel %vm876_vm5, %v800_v47, %v908_v49  ;;  %v17209_v54 = vpop.f32.mrb[20].mxu0  ;;  %1755 = vmatprep.subr.bf16.mxu0 %v25334_v20  ;;  %v964_v55 = vpack.c.bf16 %v942_v51, %v941_v50  ;;  %v17921_v49 = vld [vmem:[%s25315_s1] ss:$8 sps:$4 sm:$0xff]   ;;  %v17925_v50 = vld [vmem:[%s25315_s1 + $0x14] ss:$8 sps:$4 sm:$0xff]  }
 0x1b7   : > { %v821_v56 = vadd.f32 %v17209_v54, %v20640_v26  ;;  %v812_v57 = vpop.f32.mrb[21].mxu0  ;;  %v963_v58 = vpack.c.bf16 %v940_v53, %v939_v52  ;;  %v17973_v51 = vld [vmem:[%s25320_s6 + $0x28] sm:$0xff]   ;;  %v17927_v52 = vld [vmem:[%s25315_s1 + $0x10] ss:$8 sps:$4 sm:$0xff]  }
 0x1b8   : > { %v813_v59 = vadd.f32 %v812_v57, %v20640_v26  ;;  %v17210_v60 = vpop.f32.mrb[22].mxu0  ;;  %v17928_v53 = vld [vmem:[%s25315_s1 + $0x24] ss:$8 sps:$4 sm:$0xff]   ;;  %v17930_v54 = vld [vmem:[%s25315_s1 + $0x20] ss:$8 sps:$4 sm:$0xff]  }
 0x1b9   : > { %vm881_vm6 = vcmp.ge.f32.partialorder %v821_v56, 0.0  ;;  %v913_v61 = vmul.f32 0.2, %v821_v56  ;;  %v824_v62 = vadd.f32 %v17210_v60, %v20640_v26  ;;  %v815_v63 = vpop.f32.mrb[23].mxu0  ;;  %1756 = vmatpush1.bf16.msra.mxu0 %v963_v58  ;;  %v17934_v57 = vld [vmem:[%s25315_s1 + $0x44] ss:$8 sps:$4 sm:$0xff]  }
 0x1ba   : > { %vm879_vm7 = vcmp.ge.f32.partialorder %v813_v59, 0.0  ;;  %v911_v0 = vmul.f32 0.2, %v813_v59  ;;  %v816_v1 = vadd.f32 %v815_v63, %v20640_v26  ;;  %1757 = vmatprep.subr.bf16.mxu0 %v25334_v20  ;;  %v17936_v58 = vld [vmem:[%s25315_s1 + $0x40] ss:$8 sps:$4 sm:$0xff]  }
 0x1bb   : > { %vm882_vm8 = vcmp.ge.f32.partialorder %v824_v62, 0.0  ;;  %v914_v2 = vmul.f32 0.2, %v824_v62  ;;  %v945_v4 = vsel %vm881_vm6, %v821_v56, %v913_v61  ;;  %v17933_v56 = vld [vmem:[%s25315_s1 + $0x30] ss:$8 sps:$4 sm:$0xff]  }
 0x1bc   : > { %vm880_vm9 = vcmp.ge.f32.partialorder %v816_v1, 0.0  ;;  %v912_v3 = vmul.f32 0.2, %v816_v1  ;;  %v943_v6 = vsel %vm879_vm7, %v813_v59, %v911_v0  ;;  %v17937_v59 = vld [vmem:[%s25315_s1 + $0x54] ss:$8 sps:$4 sm:$0xff]  }
 0x1bd   : > { %v946_v5 = vsel %vm882_vm8, %v824_v62, %v914_v2  ;;  %1758 = vmatpush1.bf16.msra.mxu0 %v964_v55  ;;  %v17931_v55 = vld [vmem:[%s25315_s1 + $0x34] ss:$8 sps:$4 sm:$0xff]   ;;  %v17939_v60 = vld [vmem:[%s25315_s1 + $0x50] ss:$8 sps:$4 sm:$0xff]   ;;  %v17940_v61 = vld [vmem:[%s25315_s1 + $0x64] ss:$8 sps:$4 sm:$0xff]  }
 0x1be   : > { %v944_v7 = vsel %vm880_vm9, %v816_v1, %v912_v3  ;;  %v17213_v8 = vpop.f32.mrb[24].mxu0  ;;  %1759 = vmatprep.subr.bf16.mxu0 %v25334_v20  ;;  %v966_v9 = vpack.c.bf16 %v946_v5, %v945_v4  ;;  %v17942_v62 = vld [vmem:[%s25315_s1 + $0x60] ss:$8 sps:$4 sm:$0xff]   ;;  %v17943_v63 = vld [vmem:[%s25315_s1 + $0x74] ss:$8 sps:$4 sm:$0xff]  }
 0x1bf   : > { %v837_v10 = vadd.f32 %v17213_v8, %v20640_v26  ;;  %v828_v11 = vpop.f32.mrb[25].mxu0  ;;  %v965_v12 = vpack.c.bf16 %v944_v7, %v943_v6  ;;  %v17945_v0 = vld [vmem:[%s25315_s1 + $0x70] ss:$8 sps:$4 sm:$0xff]   ;;  %v17946_v1 = vld [vmem:[%s25315_s1 + $0x84] ss:$8 sps:$4 sm:$0xff]  }
 0x1c0   : > { %v829_v13 = vadd.f32 %v828_v11, %v20640_v26  ;;  %v17214_v14 = vpop.f32.mrb[26].mxu0  ;;  %v17948_v2 = vld [vmem:[%s25315_s1 + $0x80] ss:$8 sps:$4 sm:$0xff]   ;;  %v17949_v3 = vld [vmem:[%s25315_s1 + $0x94] ss:$8 sps:$4 sm:$0xff]  }
 0x1c1   : > { %vm885_vm10 = vcmp.ge.f32.partialorder %v837_v10, 0.0  ;;  %v917_v15 = vmul.f32 0.2, %v837_v10  ;;  %v840_v16 = vadd.f32 %v17214_v14, %v20640_v26  ;;  %v831_v17 = vpop.f32.mrb[27].mxu0  ;;  %1760 = vmatpush1.bf16.msra.mxu0 %v965_v12  ;;  %v17951_v4 = vld [vmem:[%s25315_s1 + $0x90] ss:$8 sps:$4 sm:$0xff]  }
 0x1c2   : > { %vm883_vm11 = vcmp.ge.f32.partialorder %v829_v13, 0.0  ;;  %v915_v18 = vmul.f32 0.2, %v829_v13  ;;  %v832_v19 = vadd.f32 %v831_v17, %v20640_v26  ;;  %1761 = vmatprep.subr.bf16.mxu0 %v25334_v20  ;;  %v17952_v5 = vld [vmem:[%s25315_s1 + $0xa4] ss:$8 sps:$4 sm:$0xff]  }
 0x1c3   : > { %vm886_vm12 = vcmp.ge.f32.partialorder %v840_v16, 0.0  ;;  %v918_v21 = vmul.f32 0.2, %v840_v16  ;;  %v949_v24 = vsel %vm885_vm10, %v837_v10, %v917_v15  ;;  %v17954_v6 = vld [vmem:[%s25315_s1 + $0xa0] ss:$8 sps:$4 sm:$0xff]  }
 0x1c4   : > { %vm884_vm13 = vcmp.ge.f32.partialorder %v832_v19, 0.0  ;;  %v916_v22 = vmul.f32 0.2, %v832_v19  ;;  %v947_v27 = vsel %vm883_vm11, %v829_v13, %v915_v18  ;;  %v17955_v7 = vld [vmem:[%s25315_s1 + $0xb4] ss:$8 sps:$4 sm:$0xff]  }
 0x1c5   : > { %v950_v25 = vsel %vm886_vm12, %v840_v16, %v918_v21  ;;  %1762 = vmatpush1.bf16.msra.mxu0 %v966_v9  ;;  %v17957_v8 = vld [vmem:[%s25315_s1 + $0xb0] ss:$8 sps:$4 sm:$0xff]   ;;  %v17958_v9 = vld [vmem:[%s25315_s1 + $0xc4] ss:$8 sps:$4 sm:$0xff]   ;;  %v17960_v10 = vld [vmem:[%s25315_s1 + $0xc0] ss:$8 sps:$4 sm:$0xff]  }
 0x1c6   : > { %v948_v28 = vsel %vm884_vm13, %v832_v19, %v916_v22  ;;  %v17217_v29 = vpop.f32.mrb[28].mxu0  ;;  %1763 = vmatprep.subr.bf16.mxu0 %v25334_v20  ;;  %v968_v30 = vpack.c.bf16 %v950_v25, %v949_v24  ;;  %v17961_v11 = vld [vmem:[%s25315_s1 + $0xd4] ss:$8 sps:$4 sm:$0xff]   ;;  %v17963_v12 = vld [vmem:[%s25315_s1 + $0xd0] ss:$8 sps:$4 sm:$0xff]  }
 0x1c7   : > { %v853_v31 = vadd.f32 %v17217_v29, %v20640_v26  ;;  %v844_v32 = vpop.f32.mrb[29].mxu0  ;;  %v967_v33 = vpack.c.bf16 %v948_v28, %v947_v27  ;;  %v17964_v13 = vld [vmem:[%s25315_s1 + $0xe4] ss:$8 sps:$4 sm:$0xff]   ;;  %v17966_v14 = vld [vmem:[%s25315_s1 + $0xe0] ss:$8 sps:$4 sm:$0xff]   ;;  %v18022_v22 = vld [vmem:[%s25320_s6 + $0x30] sm:$0xff]  }
 0x1c8   : > { %v845_v34 = vadd.f32 %v844_v32, %v20640_v26  ;;  %v17218_v35 = vpop.f32.mrb[30].mxu0  ;;  %v17967_v15 = vld [vmem:[%s25315_s1 + $0xf4] ss:$8 sps:$4 sm:$0xff]   ;;  %v17969_v16 = vld [vmem:[%s25315_s1 + $0xf0] ss:$8 sps:$4 sm:$0xff]  }
 0x1c9   : > { %vm889_vm14 = vcmp.ge.f32.partialorder %v853_v31, 0.0  ;;  %v921_v36 = vmul.f32 0.2, %v853_v31  ;;  %v856_v37 = vadd.f32 %v17218_v35, %v20640_v26  ;;  %v847_v38 = vpop.f32.mrb[31].mxu0  ;;  %1764 = vmatpush1.bf16.msra.mxu0 %v967_v33  ;;  %v17970_v17 = vld [vmem:[%s25315_s1 + $0x104] ss:$8 sps:$4 sm:$0xff]  }
 0x1ca   : > { %vm887_vm15 = vcmp.ge.f32.partialorder %v845_v34, 0.0  ;;  %v919_v39 = vmul.f32 0.2, %v845_v34  ;;  %v848_v40 = vadd.f32 %v847_v38, %v20640_v26  ;;  %1765 = vmatprep.subr.bf16.mxu0 %v25334_v20  ;;  %v17924_v26 = vld [vmem:[%s25320_s6 + $0x20] sm:$0xff]   ;;  %v17974_v19 = vld [vmem:[%s25315_s1 + $0x114] ss:$8 sps:$4 sm:$0xff]  }
 0x1cb   : > { %vm890_vm1 = vcmp.ge.f32.partialorder %v856_v37, 0.0  ;;  %v922_v41 = vmul.f32 0.2, %v856_v37  ;;  %v953_v43 = vsel %vm889_vm14, %v853_v31, %v921_v36  ;;  %v17972_v18 = vld [vmem:[%s25315_s1 + $0x100] ss:$8 sps:$4 sm:$0xff]   ;;  %vm6999_vm14 = vcmask 130048  }
 0x1cc   : > { %vm888_vm2 = vcmp.ge.f32.partialorder %v848_v40, 0.0  ;;  %v920_v42 = vmul.f32 0.2, %v848_v40  ;;  %v951_v45 = vsel %vm887_vm15, %v845_v34, %v919_v39  ;;  %v17976_v21 = vld [vmem:[%s25315_s1 + $0x110] ss:$8 sps:$4 sm:$0xff]  }
 0x1cd   : > { %v954_v44 = vsel %vm890_vm1, %v856_v37, %v922_v41  ;;  %1766 = vmatpush1.bf16.msra.mxu0 %v968_v30  ;;  %v17977_v24 = vld [vmem:[%s25315_s1 + $0x124] ss:$8 sps:$4 sm:$0xff]   ;;  %v17979_v25 = vld [vmem:[%s25315_s1 + $0x120] ss:$8 sps:$4 sm:$0xff]   ;;  %v17980_v27 = vld [vmem:[%s25315_s1 + $0x134] ss:$8 sps:$4 sm:$0xff]  }
 0x1ce   : > { %v952_v46 = vsel %vm888_vm2, %v848_v40, %v920_v42  ;;  %1767 = vmatprep.subr.bf16.mxu0 %v25334_v20  ;;  %v970_v47 = vpack.c.bf16 %v954_v44, %v953_v43  ;;  %v17982_v28 = vld [vmem:[%s25315_s1 + $0x130] ss:$8 sps:$4 sm:$0xff]   ;;  %v17983_v29 = vld [vmem:[%s25315_s1 + $0x144] ss:$8 sps:$4 sm:$0xff]   ;;  %v17985_v30 = vld [vmem:[%s25315_s1 + $0x140] ss:$8 sps:$4 sm:$0xff]  }
 0x1cf   : > { %v969_v48 = vpack.c.bf16 %v952_v46, %v951_v45  ;;  %v17986_v31 = vld [vmem:[%s25315_s1 + $0x154] ss:$8 sps:$4 sm:$0xff]   ;;  %v17988_v32 = vld [vmem:[%s25315_s1 + $0x150] ss:$8 sps:$4 sm:$0xff]   ;;  %v17989_v33 = vld [vmem:[%s25315_s1 + $0x164] ss:$8 sps:$4 sm:$0xff]  }
 0x1d0   : > { %v17991_v34 = vld [vmem:[%s25315_s1 + $0x160] ss:$8 sps:$4 sm:$0xff]   ;;  %v17992_v35 = vld [vmem:[%s25315_s1 + $0x174] ss:$8 sps:$4 sm:$0xff]   ;;  %v17994_v36 = vld [vmem:[%s25315_s1 + $0x170] ss:$8 sps:$4 sm:$0xff]  }
 0x1d1   : > { %1768 = vmatpush1.bf16.msra.mxu0 %v969_v48  ;;  %v17995_v37 = vld [vmem:[%s25315_s1 + $0x184] ss:$8 sps:$4 sm:$0xff]   ;;  %v17997_v38 = vld [vmem:[%s25315_s1 + $0x180] ss:$8 sps:$4 sm:$0xff]   ;;  %v17998_v39 = vld [vmem:[%s25315_s1 + $0x194] ss:$8 sps:$4 sm:$0xff]  }
 0x1d2   : > { %1769 = vmatprep.subr.bf16.mxu0 %v25334_v20  ;;  %v18000_v40 = vld [vmem:[%s25315_s1 + $0x190] ss:$8 sps:$4 sm:$0xff]   ;;  %v18001_v41 = vld [vmem:[%s25315_s1 + $0x1a4] ss:$8 sps:$4 sm:$0xff]   ;;  %v18003_v42 = vld [vmem:[%s25315_s1 + $0x1a0] ss:$8 sps:$4 sm:$0xff]  }
 0x1d3   : > { %v18004_v43 = vld [vmem:[%s25315_s1 + $0x1b4] ss:$8 sps:$4 sm:$0xff]   ;;  %v18006_v44 = vld [vmem:[%s25315_s1 + $0x1b0] ss:$8 sps:$4 sm:$0xff]   ;;  %v18007_v48 = vld [vmem:[%s25315_s1 + $0x1c4] ss:$8 sps:$4 sm:$0xff]  }
 0x1d5   : > { %1770 = vmatpush1.bf16.msra.mxu0 %v970_v47 }
 0x1d6   : > { %17219 = vmatprep.subr.bf16.mxu0 %v17924_v26 }
 0x1d8   : > { %1772 = vmatmul.mubr.bf16.vlgmr.msra.gmra.mrb[32].mxu0 %v17921_v49 }
 0x1d9   : > { %17220 = vmatpush3.bf16.msra.mxu0 %v17924_v26  ;;  %1779 = vmatprep.mubr.bf16.mxu0 %v17925_v50  ;;  %v18009_v50 = vld [vmem:[%s25315_s1 + $0x1c0] ss:$8 sps:$4 sm:$0xff]  }
 0x1da   : > { %17221 = vmatprep.subr.bf16.mxu0 %v17973_v51 }
 0x1dd   : > { %17222 = vmatpush3.bf16.msra.mxu0 %v17973_v51 }
 0x1de   : > { %17223 = vmatprep.subr.bf16.mxu0 %v18022_v22 }
 0x1e0   : > { %1780 = vmatmul.mubr.bf16.gmra.mrb[36].mxu0 %v17927_v52 }
 0x1e1   : > { %1787 = vmatprep.mubr.bf16.mxu0 %v17928_v53  ;;  %17224 = vmatpush3.bf16.msra.mxu0 %v18022_v22  ;;  %v18025_v22 = vld [vmem:[%s25315_s1 + $0x210] ss:$8 sps:$4 sm:$0xff]  }
 0x1e8   : > { %1788 = vmatmul.mubr.bf16.gmra.mrb[40].mxu0 %v17930_v54  ;;  %v18010_v54 = vld [vmem:[%s25315_s1 + $0x1d4] ss:$8 sps:$4 sm:$0xff]  }
 0x1e9   : > { %1795 = vmatprep.mubr.bf16.mxu0 %v17931_v55 }
 0x1f0   : > { %1796 = vmatmul.mubr.bf16.gmra.mrb[44].mxu0 %v17933_v56  ;;  %v18081_v56 = vld [vmem:[%s25315_s1 + $0x344] ss:$8 sps:$4 sm:$0xff]  }
 0x1f1   : > { %1803 = vmatprep.mubr.bf16.mxu0 %v17934_v57  ;;  %v18012_v57 = vld [vmem:[%s25315_s1 + $0x1d0] ss:$8 sps:$4 sm:$0xff]  }
 0x1f8   : > { %1804 = vmatmul.mubr.bf16.gmra.mrb[48].mxu0 %v17936_v58 }
 0x1f9   : > { %1811 = vmatprep.mubr.bf16.mxu0 %v17937_v59 }
 0x200   : > { %1812 = vmatmul.mubr.bf16.gmra.mrb[52].mxu0 %v17939_v60 }
 0x201   : > { %1819 = vmatprep.mubr.bf16.mxu0 %v17940_v61  ;;  %v18013_v61 = vld [vmem:[%s25315_s1 + $0x1e4] ss:$8 sps:$4 sm:$0xff]  }
 0x208   : > { %1820 = vmatmul.mubr.bf16.gmra.mrb[56].mxu0 %v17942_v62 }
 0x209   : > { %1827 = vmatprep.mubr.bf16.mxu0 %v17943_v63 }
 0x210   : > { %1828 = vmatmul.mubr.bf16.gmra.mrb[60].mxu0 %v17945_v0  ;;  %v18015_v0 = vld [vmem:[%s25315_s1 + $0x1e0] ss:$8 sps:$4 sm:$0xff]  }
 0x211   : > { %1835 = vmatprep.mubr.bf16.mxu0 %v17946_v1 }
 0x218   : > { %1836 = vmatmul.mubr.bf16.gmra.mrb[64].mxu0 %v17948_v2 }
 0x219   : > { %1843 = vmatprep.mubr.bf16.mxu0 %v17949_v3 }
 0x220   : > { %1844 = vmatmul.mubr.bf16.gmra.mrb[68].mxu0 %v17951_v4  ;;  %v18016_v4 = vld [vmem:[%s25315_s1 + $0x1f4] ss:$8 sps:$4 sm:$0xff]  }
 0x221   : > { %1851 = vmatprep.mubr.bf16.mxu0 %v17952_v5  ;;  %v18078_v5 = vld [vmem:[%s25315_s1 + $0x334] ss:$8 sps:$4 sm:$0xff]  }
 0x228   : > { %1852 = vmatmul.mubr.bf16.gmra.mrb[72].mxu0 %v17954_v6 }
 0x229   : > { %1859 = vmatprep.mubr.bf16.mxu0 %v17955_v7  ;;  %v18018_v7 = vld [vmem:[%s25315_s1 + $0x1f0] ss:$8 sps:$4 sm:$0xff]  }
 0x230   : > { %1860 = vmatmul.mubr.bf16.gmra.mrb[76].mxu0 %v17957_v8 }
 0x231   : > { %1867 = vmatprep.mubr.bf16.mxu0 %v17958_v9 }
 0x238   : > { %1868 = vmatmul.mubr.bf16.gmra.mrb[80].mxu0 %v17960_v10 }
 0x239   : > { %1875 = vmatprep.mubr.bf16.mxu0 %v17961_v11  ;;  %v18019_v11 = vld [vmem:[%s25315_s1 + $0x204] ss:$8 sps:$4 sm:$0xff]  }
 0x240   : > { %1876 = vmatmul.mubr.bf16.gmra.mrb[84].mxu0 %v17963_v12 }
 0x241   : > { %1883 = vmatprep.mubr.bf16.mxu0 %v17964_v13 }
 0x248   : > { %1884 = vmatmul.mubr.bf16.gmra.mrb[88].mxu0 %v17966_v14  ;;  %v18021_v14 = vld [vmem:[%s25315_s1 + $0x200] ss:$8 sps:$4 sm:$0xff]  }
 0x249   : > { %1891 = vmatprep.mubr.bf16.mxu0 %v17967_v15 }
 0x250   : > { %1892 = vmatmul.mubr.bf16.gmra.mrb[92].mxu0 %v17969_v16 }
 0x251   : > { %1899 = vmatprep.mubr.bf16.mxu0 %v17970_v17 }
 0x258   : > { %1900 = vmatmul.mubr.bf16.gmra.mrb[96].mxu0 %v17972_v18  ;;  %v18023_v18 = vld [vmem:[%s25315_s1 + $0x214] ss:$8 sps:$4 sm:$0xff]  }
 0x259   : > { %1907 = vmatprep.mubr.bf16.mxu0 %v17974_v19  ;;  %v18087_v19 = vld [vmem:[%s25315_s1 + $0x364] ss:$8 sps:$4 sm:$0xff]  }
 0x260   : > { %1908 = vmatmul.mubr.bf16.gmra.mrb[100].mxu0 %v17976_v21 }
 0x261   : > { %1915 = vmatprep.mubr.bf16.mxu0 %v17977_v24 }
 0x268   : > { %1916 = vmatmul.mubr.bf16.gmra.mrb[104].mxu0 %v17979_v25 }
 0x269   : > { %1923 = vmatprep.mubr.bf16.mxu0 %v17980_v27  ;;  %v18071_v27 = vld [vmem:[%s25320_s6 + $0x38] sm:$0xff]  }
 0x26a   : > { %17225 = vmatprep.subr.bf16.mxu0 %v18071_v27 }
 0x26b   : > { %17226 = vmatpush3.bf16.msra.mxu0 %v18071_v27 }
 0x270   : > { %1924 = vmatmul.mubr.bf16.gmra.mrb[108].mxu0 %v17982_v28 }
 0x271   : > { %1931 = vmatprep.mubr.bf16.mxu0 %v17983_v29  ;;  %v18026_v29 = vld [vmem:[%s25315_s1 + $0x224] ss:$8 sps:$4 sm:$0xff]  }
 0x278   : > { %1932 = vmatmul.mubr.bf16.gmra.mrb[112].mxu0 %v17985_v30 }
 0x279   : > { %1939 = vmatprep.mubr.bf16.mxu0 %v17986_v31 }
 0x280   : > { %1940 = vmatmul.mubr.bf16.gmra.mrb[116].mxu0 %v17988_v32  ;;  %v18028_v32 = vld [vmem:[%s25315_s1 + $0x220] ss:$8 sps:$4 sm:$0xff]  }
 0x281   : > { %1947 = vmatprep.mubr.bf16.mxu0 %v17989_v33 }
 0x288   : > { %1948 = vmatmul.mubr.bf16.gmra.mrb[120].mxu0 %v17991_v34 }
 0x289   : > { %1955 = vmatprep.mubr.bf16.mxu0 %v17992_v35 }
 0x290   : > { %1956 = vmatmul.mubr.bf16.gmra.mrb[124].mxu0 %v17994_v36  ;;  %v18029_v36 = vld [vmem:[%s25315_s1 + $0x234] ss:$8 sps:$4 sm:$0xff]  }
 0x291   : > { %1963 = vmatprep.mubr.bf16.mxu0 %v17995_v37  ;;  %v18084_v37 = vld [vmem:[%s25315_s1 + $0x354] ss:$8 sps:$4 sm:$0xff]  }
 0x298   : > { %1964 = vmatmul.mubr.bf16.gmra.mrb[128].mxu0 %v17997_v38 }
 0x299   : > { %1971 = vmatprep.mubr.bf16.mxu0 %v17998_v39  ;;  %v18031_v39 = vld [vmem:[%s25315_s1 + $0x230] ss:$8 sps:$4 sm:$0xff]  }
 0x2a0   : > { %1972 = vmatmul.mubr.bf16.gmra.mrb[132].mxu0 %v18000_v40 }
 0x2a1   : > { %1979 = vmatprep.mubr.bf16.mxu0 %v18001_v41 }
 0x2a8   : > { %1980 = vmatmul.mubr.bf16.gmra.mrb[136].mxu0 %v18003_v42 }
 0x2a9   : > { %1987 = vmatprep.mubr.bf16.mxu0 %v18004_v43  ;;  %v18032_v43 = vld [vmem:[%s25315_s1 + $0x244] ss:$8 sps:$4 sm:$0xff]  }
 0x2ab   : > { %v20863_v45 = vpop.f32.mrb[32].mxu0 }
 0x2ac   : > { %v1775_v46 = vpop.f32.mrb[33].mxu0 }
 0x2ad   : > { %v20865_v47 = vpop.f32.mrb[34].mxu0 }
 0x2ae   : > { %v1778_v26 = vpop.f32.mrb[35].mxu0 }
 0x2b0   : > { %1988 = vmatmul.mubr.bf16.gmra.mrb[140].mxu0 %v18006_v44 }
 0x2b1   : > { %1995 = vmatprep.mubr.bf16.mxu0 %v18007_v48  ;;  %v18034_v48 = vld [vmem:[%s25315_s1 + $0x240] ss:$8 sps:$4 sm:$0xff]  }
 0x2b3   : > { %v20875_v51 = vpop.f32.mrb[36].mxu0 }
 0x2b4   : > { %v1783_v52 = vpop.f32.mrb[37].mxu0 }
 0x2b5   : > { %v20877_v53 = vpop.f32.mrb[38].mxu0 }
 0x2b6   : > { %v1786_v55 = vpop.f32.mrb[39].mxu0 }
 0x2b8   : > { %1996 = vmatmul.mubr.bf16.gmra.mrb[144].mxu0 %v18009_v50 }
 0x2b9   : > { %2003 = vmatprep.mubr.bf16.mxu0 %v18010_v54  ;;  %v18035_v54 = vld [vmem:[%s25315_s1 + $0x254] ss:$8 sps:$4 sm:$0xff]  }
 0x2bb   : > { %v20887_v58 = vpop.f32.mrb[40].mxu0 }
 0x2bc   : > { %v1791_v59 = vpop.f32.mrb[41].mxu0 }
 0x2bd   : > { %v20889_v60 = vpop.f32.mrb[42].mxu0  ;;  %v18037_v59 = vld [vmem:[%s25315_s1 + $0x250] ss:$8 sps:$4 sm:$0xff]  }
 0x2be   : > { %v1794_v63 = vpop.f32.mrb[43].mxu0 }
 0x2c0   : > { %2004 = vmatmul.mubr.bf16.gmra.mrb[148].mxu0 %v18012_v57 }
 0x2c1   : > { %2011 = vmatprep.mubr.bf16.mxu0 %v18013_v61 }
 0x2c3   : > { %v20899_v1 = vpop.f32.mrb[44].mxu0 }
 0x2c4   : > { %v1799_v2 = vpop.f32.mrb[45].mxu0 }
 0x2c5   : > { %v20901_v3 = vpop.f32.mrb[46].mxu0  ;;  %v18038_v2 = vld [vmem:[%s25315_s1 + $0x264] ss:$8 sps:$4 sm:$0xff]  }
 0x2c6   : > { %v1802_v6 = vpop.f32.mrb[47].mxu0 }
 0x2c8   : > { %2012 = vmatmul.mubr.bf16.gmra.mrb[152].mxu0 %v18015_v0 }
 0x2c9   : > { %2019 = vmatprep.mubr.bf16.mxu0 %v18016_v4 }
 0x2cb   : > { %v20911_v8 = vpop.f32.mrb[48].mxu0 }
 0x2cc   : > { %v1807_v9 = vpop.f32.mrb[49].mxu0 }
 0x2cd   : > { %v20913_v10 = vpop.f32.mrb[50].mxu0 }
 0x2ce   : > { %v1810_v13 = vpop.f32.mrb[51].mxu0 }
 0x2d0   : > { %2020 = vmatmul.mubr.bf16.gmra.mrb[156].mxu0 %v18018_v7 }
 0x2d1   : > { %2027 = vmatprep.mubr.bf16.mxu0 %v18019_v11  ;;  %v18040_v11 = vld [vmem:[%s25315_s1 + $0x260] ss:$8 sps:$4 sm:$0xff]  }
 0x2d3   : > { %v20923_v15 = vpop.f32.mrb[52].mxu0 }
 0x2d4   : > { %v1815_v16 = vpop.f32.mrb[53].mxu0 }
 0x2d5   : > { %v20925_v17 = vpop.f32.mrb[54].mxu0 }
 0x2d6   : > { %v1818_v21 = vpop.f32.mrb[55].mxu0 }
 0x2d8   : > { %2028 = vmatmul.mubr.bf16.gmra.mrb[160].mxu0 %v18021_v14  ;;  %v18041_v14 = vld [vmem:[%s25315_s1 + $0x274] ss:$8 sps:$4 sm:$0xff]  }
 0x2d9   : > { %2035 = vmatprep.mubr.bf16.mxu0 %v18023_v18 }
 0x2db   : > { %v20935_v24 = vpop.f32.mrb[56].mxu0 }
 0x2dc   : > { %v1823_v25 = vpop.f32.mrb[57].mxu0 }
 0x2dd   : > { %v20940_v28 = vpop.f32.mrb[58].mxu0  ;;  %v18043_v25 = vld [vmem:[%s25315_s1 + $0x270] ss:$8 sps:$4 sm:$0xff]  }
 0x2de   : > { %v1826_v31 = vpop.f32.mrb[59].mxu0 }
 0x2df   : > { %v18072_v31 = vld [vmem:[%s25315_s1 + $0x314] ss:$8 sps:$4 sm:$0xff]  }
 0x2e0   : > { %2036 = vmatmul.mubr.bf16.gmra.mrb[164].mxu0 %v18025_v22 }
 0x2e1   : > { %2043 = vmatprep.mubr.bf16.mxu0 %v18026_v29  ;;  %v18044_v29 = vld [vmem:[%s25315_s1 + $0x284] ss:$8 sps:$4 sm:$0xff]  }
 0x2e3   : > { %v20950_v33 = vpop.f32.mrb[60].mxu0 }
 0x2e4   : > { %v1831_v34 = vpop.f32.mrb[61].mxu0 }
 0x2e5   : > { %v20952_v35 = vpop.f32.mrb[62].mxu0 }
 0x2e6   : > { %v1834_v38 = vpop.f32.mrb[63].mxu0 }
 0x2e7   : > { %v18046_v38 = vld [vmem:[%s25315_s1 + $0x280] ss:$8 sps:$4 sm:$0xff]  }
 0x2e8   : > { %2044 = vmatmul.mubr.bf16.gmra.mrb[168].mxu0 %v18028_v32 }
 0x2e9   : > { %2051 = vmatprep.mubr.bf16.mxu0 %v18029_v36 }
 0x2eb   : > { %v20962_v40 = vpop.f32.mrb[64].mxu0 }
 0x2ec   : > { %v1839_v41 = vpop.f32.mrb[65].mxu0 }
 0x2ed   : > { %v20964_v42 = vpop.f32.mrb[66].mxu0  ;;  %v18047_v41 = vld [vmem:[%s25315_s1 + $0x294] ss:$8 sps:$4 sm:$0xff]  }
 0x2ee   : > { %v1842_v46 = vpop.f32.mrb[67].mxu0 }
 0x2f0   : > { %2052 = vmatmul.mubr.bf16.gmra.mrb[172].mxu0 %v18031_v39 }
 0x2f1   : > { %2059 = vmatprep.mubr.bf16.mxu0 %v18032_v43 }
 0x2f3   : > { %v20974_v26 = vpop.f32.mrb[68].mxu0 }
 0x2f4   : > { %v1847_v50 = vpop.f32.mrb[69].mxu0 }
 0x2f5   : > { %v20976_v52 = vpop.f32.mrb[70].mxu0 }
 0x2f6   : > { %v1850_v57 = vpop.f32.mrb[71].mxu0 }
 0x2f8   : > { %2060 = vmatmul.mubr.bf16.gmra.mrb[176].mxu0 %v18034_v48 }
 0x2f9   : > { %2067 = vmatprep.mubr.bf16.mxu0 %v18035_v54  ;;  %v18049_v54 = vld [vmem:[%s25315_s1 + $0x290] ss:$8 sps:$4 sm:$0xff]  }
 0x2fb   : > { %v20986_v61 = vpop.f32.mrb[72].mxu0 }
 0x2fc   : > { %v1855_v63 = vpop.f32.mrb[73].mxu0 }
 0x2fd   : > { %v20988_v0 = vpop.f32.mrb[74].mxu0  ;;  %v18068_v63 = vld [vmem:[%s25315_s1 + $0x304] ss:$8 sps:$4 sm:$0xff]  }
 0x2fe   : > { %v1858_v4 = vpop.f32.mrb[75].mxu0 }
 0x300   : > { %2068 = vmatmul.mubr.bf16.gmra.mrb[180].mxu0 %v18037_v59  ;;  %v18050_v59 = vld [vmem:[%s25315_s1 + $0x2a4] ss:$8 sps:$4 sm:$0xff]  }
 0x301   : > { %2075 = vmatprep.mubr.bf16.mxu0 %v18038_v2 }
 0x303   : > { %v20995_v7 = vpop.f32.mrb[76].mxu0 }
 0x304   : > { %v1863_v9 = vpop.f32.mrb[77].mxu0 }
 0x305   : > { %v21000_v13 = vpop.f32.mrb[78].mxu0 }
 0x306   : > { %v1866_v18 = vpop.f32.mrb[79].mxu0 }
 0x307   : > { %v18053_v18 = vld [vmem:[%s25315_s1 + $0x2b4] ss:$8 sps:$4 sm:$0xff]  }
 0x308   : > { %2076 = vmatmul.mubr.bf16.gmra.mrb[184].mxu0 %v18040_v11  ;;  %v18052_v11 = vld [vmem:[%s25315_s1 + $0x2a0] ss:$8 sps:$4 sm:$0xff]  }
 0x309   : > { %2083 = vmatprep.mubr.bf16.mxu0 %v18041_v14 }
 0x30b   : > { %v21007_v21 = vpop.f32.mrb[80].mxu0 }
 0x30c   : > { %v1871_v22 = vpop.f32.mrb[81].mxu0 }
 0x30d   : > { %v21012_v27 = vpop.f32.mrb[82].mxu0 }
 0x30e   : > { %v1874_v32 = vpop.f32.mrb[83].mxu0 }
 0x310   : > { %2084 = vmatmul.mubr.bf16.gmra.mrb[188].mxu0 %v18043_v25 }
 0x311   : > { %2091 = vmatprep.mubr.bf16.mxu0 %v18044_v29 }
 0x313   : > { %v21019_v34 = vpop.f32.mrb[84].mxu0 }
 0x314   : > { %v1879_v36 = vpop.f32.mrb[85].mxu0 }
 0x315   : > { %v21024_v39 = vpop.f32.mrb[86].mxu0  ;;  %v18055_v36 = vld [vmem:[%s25315_s1 + $0x2b0] ss:$8 sps:$4 sm:$0xff]  }
 0x316   : > { %v1882_v46 = vpop.f32.mrb[87].mxu0 }
 0x317   : > { %v18065_v46 = vld [vmem:[%s25315_s1 + $0x2f4] ss:$8 sps:$4 sm:$0xff]  }
 0x318   : > { %2092 = vmatmul.mubr.bf16.gmra.mrb[192].mxu0 %v18046_v38 }
 0x319   : > { %2099 = vmatprep.mubr.bf16.mxu0 %v18047_v41  ;;  %v18056_v41 = vld [vmem:[%s25315_s1 + $0x2c4] ss:$8 sps:$4 sm:$0xff]  }
 0x31b   : > { %v21031_v48 = vpop.f32.mrb[88].mxu0 }
 0x31c   : > { %v1887_v50 = vpop.f32.mrb[89].mxu0 }
 0x31d   : > { %v21036_v57 = vpop.f32.mrb[90].mxu0 }
 0x31e   : > { %v1890_v2 = vpop.f32.mrb[91].mxu0 }
 0x31f   : > { %v18058_v2 = vld [vmem:[%s25315_s1 + $0x2c0] ss:$8 sps:$4 sm:$0xff]  }
 0x320   : > { %2100 = vmatmul.mubr.bf16.gmra.mrb[196].mxu0 %v18049_v54 }
 0x321   : > { %2107 = vmatprep.mubr.bf16.mxu0 %v18050_v59 }
 0x323   : > { %v21043_v4 = vpop.f32.mrb[92].mxu0 }
 0x324   : > { %v1895_v9 = vpop.f32.mrb[93].mxu0 }
 0x325   : > { %v21048_v14 = vpop.f32.mrb[94].mxu0 }
 0x326   : > { %v1898_v25 = vpop.f32.mrb[95].mxu0 }
 0x328   : > { %2108 = vmatmul.mubr.bf16.gmra.mrb[200].mxu0 %v18052_v11  ;;  %v18059_v11 = vld [vmem:[%s25315_s1 + $0x2d4] ss:$8 sps:$4 sm:$0xff]  }
 0x329   : > { %2115 = vmatprep.mubr.bf16.mxu0 %v18053_v18 }
 0x32b   : > { %v21055_v29 = vpop.f32.mrb[96].mxu0 }
 0x32c   : > { %v1903_v32 = vpop.f32.mrb[97].mxu0 }
 0x32d   : > { %v21060_v38 = vpop.f32.mrb[98].mxu0 }
 0x32e   : > { %v1906_v50 = vpop.f32.mrb[99].mxu0 }
 0x330   : > { %2116 = vmatmul.mubr.bf16.gmra.mrb[204].mxu0 %v18055_v36 }
 0x331   : > { %2123 = vmatprep.mubr.bf16.mxu0 %v18056_v41  ;;  %v18061_v41 = vld [vmem:[%s25315_s1 + $0x2d0] ss:$8 sps:$4 sm:$0xff]  }
 0x333   : > { %v21067_v54 = vpop.f32.mrb[100].mxu0 }
 0x334   : > { %v1911_v59 = vpop.f32.mrb[101].mxu0 }
 0x335   : > { %v21072_v9 = vpop.f32.mrb[102].mxu0  ;;  %v18062_v59 = vld [vmem:[%s25315_s1 + $0x2e4] ss:$8 sps:$4 sm:$0xff]  }
 0x336   : > { %v1914_v25 = vpop.f32.mrb[103].mxu0 }
 0x337   : > { %v18064_v25 = vld [vmem:[%s25315_s1 + $0x2e0] ss:$8 sps:$4 sm:$0xff]  }
 0x338   : > { %2124 = vmatmul.mubr.bf16.gmra.mrb[208].mxu0 %v18058_v2 }
 0x339   : > { %2131 = vmatprep.mubr.bf16.mxu0 %v18059_v11 }
 0x33b   : > { %v21079_v32 = vpop.f32.mrb[104].mxu0 }
 0x33c   : > { %v1919_v36 = vpop.f32.mrb[105].mxu0 }
 0x33d   : > { %v21084_v50 = vpop.f32.mrb[106].mxu0 }
 0x33e   : > { %v1922_v18 = vpop.f32.mrb[107].mxu0 }
 0x340   : > { %2132 = vmatmul.mubr.bf16.gmra.mrb[212].mxu0 %v18061_v41 }
 0x341   : > { %2139 = vmatprep.mubr.bf16.mxu0 %v18062_v59  ;;  %v18067_v59 = vld [vmem:[%s25315_s1 + $0x2f0] ss:$8 sps:$4 sm:$0xff]  }
 0x343   : > { %v21091_v2 = vpop.f32.mrb[108].mxu0 }
 0x344   : > { %v1927_v11 = vpop.f32.mrb[109].mxu0 }
 0x345   : > { %v21096_v36 = vpop.f32.mrb[110].mxu0 }
 0x346   : > { %v1930_v20 = vpop.f32.mrb[111].mxu0 }
 0x348   : > { %2140 = vmatmul.mubr.bf16.gmra.mrb[216].mxu0 %v18064_v25  ;;  %v18070_v25 = vld [vmem:[%s25315_s1 + $0x300] ss:$8 sps:$4 sm:$0xff]  }
 0x349   : > { %2147 = vmatprep.mubr.bf16.mxu0 %v18065_v46 }
 0x34b   : > { %v21103_v18 = vpop.f32.mrb[112].mxu0 }
 0x34c   : > { %v1935_v41 = vpop.f32.mrb[113].mxu0 }
 0x34d   : > { %v21108_v11 = vpop.f32.mrb[114].mxu0 }
 0x34e   : > { %v1938_v22 = vpop.f32.mrb[115].mxu0 }
 0x350   : > { %2148 = vmatmul.mubr.bf16.gmra.mrb[220].mxu0 %v18067_v59 }
 0x351   : > { %2155 = vmatprep.mubr.bf16.mxu0 %v18068_v63  ;;  %v21130_v63 = vld [vmem:[%s25320_s6] sm:$0xff]  }
 0x352   : > { %17235 = vmatprep.subr.bf16.mxu0 %v21130_v63 }
 0x353   : > { %v21115_v20 = vpop.f32.mrb[116].mxu0 }
 0x354   : > { %v1943_v46 = vpop.f32.mrb[117].mxu0 }
 0x355   : > { %v21120_v41 = vpop.f32.mrb[118].mxu0  ;;  %v18074_v46 = vld [vmem:[%s25315_s1 + $0x310] ss:$8 sps:$4 sm:$0xff]  }
 0x356   : > { %v1946_v43 = vpop.f32.mrb[119].mxu0 }
 0x357   : > { %v18075_v43 = vld [vmem:[%s25315_s1 + $0x324] ss:$8 sps:$4 sm:$0xff]  }
 0x358   : > { %2156 = vmatmul.mubr.bf16.gmra.mrb[224].mxu0 %v18070_v25 }
 0x359   : > { %2163 = vmatprep.mubr.bf16.mxu0 %v18072_v31 }
 0x35b   : > { %v21133_v22 = vpop.f32.mrb[120].mxu0 }
 0x35c   : > { %v1951_v59 = vpop.f32.mrb[121].mxu0 }
 0x35d   : > { %v21138_v6 = vpop.f32.mrb[122].mxu0  ;;  %v18077_v59 = vld [vmem:[%s25315_s1 + $0x320] ss:$8 sps:$4 sm:$0xff]  }
 0x35e   : > { %v1954_v25 = vpop.f32.mrb[123].mxu0 }
 0x360   : > { %2164 = vmatmul.mubr.bf16.gmra.mrb[228].mxu0 %v18074_v46 }
 0x361   : > { %2171 = vmatprep.mubr.bf16.mxu0 %v18075_v43 }
 0x363   : > { %v21145_v31 = vpop.f32.mrb[124].mxu0 }
 0x364   : > { %v1959_v55 = vpop.f32.mrb[125].mxu0 }
 0x365   : > { %v21150_v44 = vpop.f32.mrb[126].mxu0  ;;  %v18080_v55 = vld [vmem:[%s25315_s1 + $0x330] ss:$8 sps:$4 sm:$0xff]  }
 0x366   : > { %v1962_v16 = vpop.f32.mrb[127].mxu0 }
 0x368   : > { %2172 = vmatmul.mubr.bf16.gmra.mrb[232].mxu0 %v18077_v59  ;;  %v18083_v59 = vld [vmem:[%s25315_s1 + $0x340] ss:$8 sps:$4 sm:$0xff]  }
 0x369   : > { %2179 = vmatprep.mubr.bf16.mxu0 %v18078_v5 }
 0x36b   : > { %v21157_v46 = vpop.f32.mrb[128].mxu0 }
 0x36c   : > { %v1967_v43 = vpop.f32.mrb[129].mxu0 }
 0x36d   : > { %v21162_v25 = vpop.f32.mrb[130].mxu0 }
 0x36e   : > { %v1970_v62 = vpop.f32.mrb[131].mxu0 }
 0x370   : > { %2180 = vmatmul.mubr.bf16.gmra.mrb[236].mxu0 %v18080_v55  ;;  %v18086_v55 = vld [vmem:[%s25315_s1 + $0x350] ss:$8 sps:$4 sm:$0xff]  }
 0x371   : > { %2187 = vmatprep.mubr.bf16.mxu0 %v18081_v56 }
 0x373   : > { %v21169_v5 = vpop.f32.mrb[132].mxu0 }
 0x374   : > { %25376 = vst [vmem:[#allocation18_spill] sm:$0xff] %v21169_v5  ;;  %v1975_v16 = vpop.f32.mrb[133].mxu0 }
 0x375   : > { %v21174_v43 = vpop.f32.mrb[134].mxu0 }
 0x376   : > { %v1978_v49 = vpop.f32.mrb[135].mxu0 }
 0x378   : > { %2188 = vmatmul.mubr.bf16.gmra.mrb[240].mxu0 %v18083_v59  ;;  %v18089_v59 = vld [vmem:[%s25315_s1 + $0x360] ss:$8 sps:$4 sm:$0xff]  }
 0x379   : > { %2195 = vmatprep.mubr.bf16.mxu0 %v18084_v37 }
 0x37b   : > { %v21181_v56 = vpop.f32.mrb[136].mxu0 }
 0x37c   : > { %25377 = vst [vmem:[#allocation19_spill] sm:$0xff] %v21181_v56  ;;  %v1983_v62 = vpop.f32.mrb[137].mxu0  ;;  %v18095_v56 = vld [vmem:[%s25315_s1 + $0x384] ss:$8 sps:$4 sm:$0xff]  }
 0x37d   : > { %v21186_v16 = vpop.f32.mrb[138].mxu0 }
 0x37e   : > { %25378 = vst [vmem:[#allocation20_spill] sm:$0xff] %v21186_v16  ;;  %v1986_v30 = vpop.f32.mrb[139].mxu0 }
 0x380   : > { %2196 = vmatmul.mubr.bf16.gmra.mrb[244].mxu0 %v18086_v55  ;;  %v18092_v55 = vld [vmem:[%s25315_s1 + $0x370] ss:$8 sps:$4 sm:$0xff]  }
 0x381   : > { %2203 = vmatprep.mubr.bf16.mxu0 %v18087_v19 }
 0x383   : > { %v21193_v49 = vpop.f32.mrb[140].mxu0 }
 0x384   : > { %25379 = vst [vmem:[#allocation21_spill] sm:$0xff] %v21193_v49  ;;  %v1991_v37 = vpop.f32.mrb[141].mxu0  ;;  %v18098_v49 = vld [vmem:[%s25315_s1 + $0x394] ss:$8 sps:$4 sm:$0xff]  }
 0x385   : > { %v21198_v62 = vpop.f32.mrb[142].mxu0 }
 0x386   : > { %25380 = vst [vmem:[#allocation22_spill] sm:$0xff] %v21198_v62  ;;  %v1994_v12 = vpop.f32.mrb[143].mxu0 }
 0x388   : > { %2204 = vmatmul.mubr.bf16.gmra.mrb[248].mxu0 %v18089_v59  ;;  %v18093_v59 = vld [vmem:[%s25315_s1 + $0x380] ss:$8 sps:$4 sm:$0xff]  }
 0x389   : > { %2211 = vmatprep.mubr.bf16.mxu0 %v18090_v23 }
 0x38b   : > { %v21205_v19 = vpop.f32.mrb[144].mxu0 }
 0x38c   : > { %25381 = vst [vmem:[#allocation23_spill] sm:$0xff] %v21205_v19  ;;  %v1999_v30 = vpop.f32.mrb[145].mxu0  ;;  %v18101_v19 = vld [vmem:[%s25315_s1 + $0x3a4] ss:$8 sps:$4 sm:$0xff]  }
 0x38d   : > { %v21210_v37 = vpop.f32.mrb[146].mxu0 }
 0x38e   : > { %25382 = vst [vmem:[#allocation24_spill] sm:$0xff] %v21210_v37  ;;  %v2002_v5 = vpop.f32.mrb[147].mxu0 }
 0x390   : > { %2212 = vmatmul.mubr.bf16.gmra.mrb[252].mxu0 %v18092_v55  ;;  %v18096_v55 = vld [vmem:[%s25315_s1 + $0x390] ss:$8 sps:$4 sm:$0xff]  }
 0x391   : > { %2219 = vmatprep.mubr.bf16.mxu0 %v18095_v56 }
 0x393   : > { %v21217_v23 = vpop.f32.mrb[148].mxu0 }
 0x394   : > { %25383 = vst [vmem:[#allocation25_spill] sm:$0xff] %v21217_v23  ;;  %v2007_v12 = vpop.f32.mrb[149].mxu0  ;;  %v18104_v23 = vld [vmem:[%s25315_s1 + $0x3b4] ss:$8 sps:$4 sm:$0xff]  }
 0x395   : > { %v21222_v30 = vpop.f32.mrb[150].mxu0 }
 0x396   : > { %25384 = vst [vmem:[#allocation26_spill] sm:$0xff] %v21222_v30  ;;  %v2010_v16 = vpop.f32.mrb[151].mxu0 }
 0x398   : > { %2220 = vmatmul.mubr.bf16.gmra.mrb[0].mxu0 %v18093_v59  ;;  %v18099_v59 = vld [vmem:[%s25315_s1 + $0x3a0] ss:$8 sps:$4 sm:$0xff]  }
 0x399   : > { %2227 = vmatprep.mubr.bf16.mxu0 %v18098_v49 }
 0x39b   : > { %v21229_v5 = vpop.f32.mrb[152].mxu0 }
 0x39c   : > { %25385 = vst [vmem:[#allocation27_spill] sm:$0xff] %v21229_v5  ;;  %v2015_v56 = vpop.f32.mrb[153].mxu0  ;;  %v18107_v5 = vld [vmem:[%s25315_s1 + $0x3c4] ss:$8 sps:$4 sm:$0xff]  }
 0x39d   : > { %v21234_v12 = vpop.f32.mrb[154].mxu0 }
 0x39e   : > { %25386 = vst [vmem:[#allocation28_spill] sm:$0xff] %v21234_v12  ;;  %v2018_v62 = vpop.f32.mrb[155].mxu0 }
 0x3a0   : > { %2228 = vmatmul.mubr.bf16.gmra.mrb[4].mxu0 %v18096_v55  ;;  %v18102_v55 = vld [vmem:[%s25315_s1 + $0x3b0] ss:$8 sps:$4 sm:$0xff]  }
 0x3a1   : > { %2235 = vmatprep.mubr.bf16.mxu0 %v18101_v19 }
 0x3a3   : > { %v21241_v16 = vpop.f32.mrb[156].mxu0 }
 0x3a4   : > { %25387 = vst [vmem:[#allocation29_spill] sm:$0xff] %v21241_v16  ;;  %v2023_v49 = vpop.f32.mrb[157].mxu0  ;;  %v18110_v16 = vld [vmem:[%s25315_s1 + $0x3d4] ss:$8 sps:$4 sm:$0xff]  }
 0x3a5   : > { %v21246_v56 = vpop.f32.mrb[158].mxu0 }
 0x3a6   : > { %25388 = vst [vmem:[#allocation30_spill] sm:$0xff] %v21246_v56  ;;  %v2026_v37 = vpop.f32.mrb[159].mxu0 }
 0x3a8   : > { %2236 = vmatmul.mubr.bf16.gmra.mrb[8].mxu0 %v18099_v59  ;;  %v18105_v59 = vld [vmem:[%s25315_s1 + $0x3c0] ss:$8 sps:$4 sm:$0xff]  }
 0x3a9   : > { %2243 = vmatprep.mubr.bf16.mxu0 %v18104_v23 }
 0x3ab   : > { %v21253_v62 = vpop.f32.mrb[160].mxu0 }
 0x3ac   : > { %25389 = vst [vmem:[#allocation31_spill] sm:$0xff] %v21253_v62  ;;  %v2031_v19 = vpop.f32.mrb[161].mxu0  ;;  %v18113_v62 = vld [vmem:[%s25315_s1 + $0x3e4] ss:$8 sps:$4 sm:$0xff]  }
 0x3ad   : > { %v21258_v49 = vpop.f32.mrb[162].mxu0 }
 0x3ae   : > { %25390 = vst [vmem:[#allocation32_spill] sm:$0xff] %v21258_v49  ;;  %v2034_v30 = vpop.f32.mrb[163].mxu0 }
 0x3b0   : > { %2244 = vmatmul.mubr.bf16.gmra.mrb[12].mxu0 %v18102_v55  ;;  %v18108_v55 = vld [vmem:[%s25315_s1 + $0x3d0] ss:$8 sps:$4 sm:$0xff]  }
 0x3b1   : > { %2251 = vmatprep.mubr.bf16.mxu0 %v18107_v5 }
 0x3b3   : > { %v21265_v37 = vpop.f32.mrb[164].mxu0 }
 0x3b4   : > { %25391 = vst [vmem:[#allocation33_spill] sm:$0xff] %v21265_v37  ;;  %v2039_v23 = vpop.f32.mrb[165].mxu0  ;;  %v18116_v37 = vld [vmem:[%s25315_s1 + $0x3f4] ss:$8 sps:$4 sm:$0xff]  }
 0x3b5   : > { %v21270_v19 = vpop.f32.mrb[166].mxu0 }
 0x3b6   : > { %25392 = vst [vmem:[#allocation34_spill] sm:$0xff] %v21270_v19  ;;  %v2042_v12 = vpop.f32.mrb[167].mxu0  ;;  %v25396_v19 = vpack.c.bf16 %v20913_v10, %v20911_v8  ;;  %v25398_v8 = vpack.c.bf16 %v20940_v28, %v20935_v24  ;;  %v18119_v10 = vld [vmem:[%s25320_s6 + $0x10] sm:$0xff]   ;;  %v18120_v24 = vld [vmem:[%s25320_s6 + $0x18] sm:$0xff]   ;;  %v25399_v28 = vpack.c.bf16 %v20952_v35, %v20950_v33 }
 0x3b8   : > { %2252 = vmatmul.mubr.bf16.gmra.mrb[16].mxu0 %v18105_v59  ;;  %v18111_v59 = vld [vmem:[%s25315_s1 + $0x3e0] ss:$8 sps:$4 sm:$0xff]  }
 0x3b9   : > { %2259 = vmatprep.mubr.bf16.mxu0 %v18110_v16 }
 0x3bb   : > { %v21277_v30 = vpop.f32.mrb[168].mxu0 }
 0x3bc   : > { %25393 = vst [vmem:[#allocation35_spill] sm:$0xff] %v21277_v30  ;;  %v2047_v5 = vpop.f32.mrb[169].mxu0  ;;  %v18118_v30 = vld [vmem:[%s25320_s6 + $0x8] sm:$0xff]  }
 0x3bd   : > { %v21282_v23 = vpop.f32.mrb[170].mxu0 }
 0x3be   : > { %25394 = vst [vmem:[#allocation36_spill] sm:$0xff] %v21282_v23  ;;  %v2050_v56 = vpop.f32.mrb[171].mxu0 }
 0x3c0   : > { %2260 = vmatmul.mubr.bf16.gmra.mrb[20].mxu0 %v18108_v55  ;;  %v18114_v55 = vld [vmem:[%s25315_s1 + $0x3f0] ss:$8 sps:$4 sm:$0xff]  }
 0x3c1   : > { %2267 = vmatprep.mubr.bf16.mxu0 %v18113_v62 }
 0x3c3   : > { %v21289_v12 = vpop.f32.mrb[172].mxu0 }
 0x3c4   : > { %25395 = vst [vmem:[#allocation37_spill] sm:$0xff] %v21289_v12  ;;  %v2055_v16 = vpop.f32.mrb[173].mxu0 }
 0x3c5   : > { %v21294_v5 = vpop.f32.mrb[174].mxu0 }
 0x3c6   : > { %v2058_v49 = vpop.f32.mrb[175].mxu0 }
 0x3c8   : > { %2268 = vmatmul.mubr.bf16.gmra.mrb[24].mxu0 %v18111_v59 }
 0x3c9   : > { %2275 = vmatprep.mubr.bf16.mxu0 %v18116_v37 }
 0x3cb   : > { %v21301_v56 = vpop.f32.mrb[176].mxu0 }
 0x3cc   : > { %v2063_v62 = vpop.f32.mrb[177].mxu0 }
 0x3cd   : > { %v21306_v16 = vpop.f32.mrb[178].mxu0 }
 0x3ce   : > { %v2066_v23 = vpop.f32.mrb[179].mxu0 }
 0x3cf   : > { %v25397_v23 = vpack.c.bf16 %v20925_v17, %v20923_v15 }
 0x3d0   : > { %2276 = vmatmul.mubr.bf16.gmra.mrb[28].mxu0 %v18114_v55 }
 0x3d1   : > { %17227 = vmatprep.mubr.msk.bf16.mxu0 %vm649_vm0, %v25396_v19 }
 0x3d3   : > { %v21314_v49 = vpop.f32.mrb[180].mxu0 }
 0x3d4   : > { %v2071_v37 = vpop.f32.mrb[181].mxu0 }
 0x3d5   : > { %v21316_v59 = vpop.f32.mrb[182].mxu0 }
 0x3d6   : > { %v2321_v62 = vpack.c.bf16 %v21316_v59, %v21314_v49  ;;  %v2074_v12 = vpop.f32.mrb[183].mxu0 }
 0x3d8   : > { %17228 = vmatmul.mubr.msk.bf16.vlgmr.msra.gmra.mrb[32].mxu0 %vm649_vm0, %v25397_v23 }
 0x3d9   : > { %17231 = vmatprep.mubr.msk.bf16.mxu0 %vm649_vm0, %v25398_v8  ;;  %17236 = vmatpush3.bf16.msra.mxu0 %v21130_v63  ;;  %v25400_v63 = vpack.c.bf16 %v20865_v47, %v20863_v45  ;;  %v18122_v45 = vld [vmem:[%s25320_s6 + $0x48] sm:$0xff]   ;;  %v25401_v47 = vpack.c.bf16 %v20877_v53, %v20875_v51 }
 0x3da   : > { %17237 = vmatprep.subr.bf16.mxu0 %v18118_v30 }
 0x3db   : > { %v21335_v19 = vpop.f32.mrb[184].mxu0 }
 0x3dc   : > { %v2079_v12 = vpop.f32.mrb[185].mxu0 }
 0x3dd   : > { %v21337_v55 = vpop.f32.mrb[186].mxu0  ;;  %17238 = vmatpush3.bf16.msra.mxu0 %v18118_v30  ;;  %v18121_v30 = vld [vmem:[%s25320_s6 + $0x40] sm:$0xff]   ;;  %v18123_v12 = vld [vmem:[%s25320_s6 + $0x50] sm:$0xff]  }
 0x3de   : > { %v2322_v15 = vpack.c.bf16 %v21337_v55, %v21335_v19  ;;  %v2082_v17 = vpop.f32.mrb[187].mxu0  ;;  %17239 = vmatprep.subr.bf16.mxu0 %v18119_v10  ;;  %v18157_v19 = vld [vmem:[%s25320_s6 + $0x160] sm:$0xff]  }
 0x3e0   : > { %17232 = vmatmul.mubr.msk.bf16.gmra.mrb[36].mxu0 %vm649_vm0, %v25399_v28 }
 0x3e1   : > { %17240 = vmatpush3.bf16.msra.mxu0 %v18119_v10  ;;  %17243 = vmatprep.mubr.msk.bf16.mxu0 %vm649_vm0, %v25400_v63  ;;  %v25402_v10 = vpack.c.bf16 %v20889_v60, %v20887_v58  ;;  %v18124_v58 = vld [vmem:[%s25320_s6 + $0x58] sm:$0xff]   ;;  %v25403_v60 = vpack.c.bf16 %v20901_v3, %v20899_v1  ;;  %v25404_v63 = vpack.c.bf16 %v20964_v42, %v20962_v40  ;;  %v18126_v40 = vld [vmem:[%s25320_s6 + $0x68] sm:$0xff]  }
 0x3e2   : > { %17241 = vmatprep.subr.bf16.mxu0 %v18120_v24  ;;  %v25405_v42 = vpack.c.bf16 %v20976_v52, %v20974_v26 }
 0x3e3   : > { %v21355_v37 = vpop.f32.mrb[188].mxu0 }
 0x3e4   : > { %v2087_v23 = vpop.f32.mrb[189].mxu0 }
 0x3e5   : > { %v21357_v8 = vpop.f32.mrb[190].mxu0  ;;  %17242 = vmatpush3.bf16.msra.mxu0 %v18120_v24 }
 0x3e6   : > { %v2323_v33 = vpack.c.bf16 %v21357_v8, %v21355_v37  ;;  %v2090_v35 = vpop.f32.mrb[191].mxu0  ;;  %17251 = vmatprep.subr.bf16.mxu0 %v18121_v30 }
 0x3e8   : > { %17244 = vmatmul.mubr.msk.bf16.vlgmr.msra.gmra.mrb[32].mxu0 %vm649_vm0, %v25401_v47  ;;  %v25406_v47 = vpack.c.bf16 %v20988_v0, %v20986_v61  ;;  %v18128_v61 = vld [vmem:[%s25320_s6 + $0x78] sm:$0xff]   ;;  %v25407_v0 = vpack.c.bf16 %v21000_v13, %v20995_v7 }
 0x3e9   : > { %17247 = vmatprep.mubr.msk.bf16.mxu0 %vm649_vm0, %v25402_v10  ;;  %17252 = vmatpush3.bf16.msra.mxu0 %v18121_v30  ;;  %v18125_v30 = vld [vmem:[%s25320_s6 + $0x60] sm:$0xff]   ;;  %v18127_v10 = vld [vmem:[%s25320_s6 + $0x70] sm:$0xff]  }
 0x3ea   : > { %17253 = vmatprep.subr.bf16.mxu0 %v18122_v45 }
 0x3eb   : > { %v21375_v17 = vpop.f32.mrb[192].mxu0 }
 0x3ec   : > { %v2095_v24 = vpop.f32.mrb[193].mxu0 }
 0x3ed   : > { %v21377_v28 = vpop.f32.mrb[194].mxu0  ;;  %17254 = vmatpush3.bf16.msra.mxu0 %v18122_v45 }
 0x3ee   : > { %v2324_v51 = vpack.c.bf16 %v21377_v28, %v21375_v17  ;;  %v2098_v53 = vpop.f32.mrb[195].mxu0  ;;  %17255 = vmatprep.subr.bf16.mxu0 %v18123_v12  ;;  %v18159_v17 = vld [vmem:[%s25320_s6 + $0x170] sm:$0xff]  }
 0x3f0   : > { %17248 = vmatmul.mubr.msk.bf16.gmra.mrb[36].mxu0 %vm649_vm0, %v25403_v60  ;;  %v18129_v60 = vld [vmem:[%s25320_s6 + $0x80] sm:$0xff]  }
 0x3f1   : > { %17256 = vmatpush3.bf16.msra.mxu0 %v18123_v12  ;;  %17259 = vmatprep.mubr.msk.bf16.mxu0 %vm649_vm0, %v25404_v63 }
 0x3f2   : > { %17257 = vmatprep.subr.bf16.mxu0 %v18124_v58 }
 0x3f3   : > { %v21395_v23 = vpop.f32.mrb[196].mxu0 }
 0x3f4   : > { %v2103_v35 = vpop.f32.mrb[197].mxu0 }
 0x3f5   : > { %v21397_v45 = vpop.f32.mrb[198].mxu0  ;;  %17258 = vmatpush3.bf16.msra.mxu0 %v18124_v58  ;;  %v25408_v58 = vpack.c.bf16 %v21012_v27, %v21007_v21  ;;  %v18130_v21 = vld [vmem:[%s25320_s6 + $0x88] sm:$0xff]   ;;  %v25409_v27 = vpack.c.bf16 %v21024_v39, %v21019_v34 }
 0x3f6   : > { %v2325_v1 = vpack.c.bf16 %v21397_v45, %v21395_v23  ;;  %v2106_v3 = vpop.f32.mrb[199].mxu0  ;;  %17267 = vmatprep.subr.bf16.mxu0 %v18125_v30 }
 0x3f7   : > { %v25410_v3 = vpack.c.bf16 %v21036_v57, %v21031_v48  ;;  %v18132_v48 = vld [vmem:[%s25320_s6 + $0x98] sm:$0xff]   ;;  %v25411_v57 = vpack.c.bf16 %v21048_v14, %v21043_v4 }
 0x3f8   : > { %17260 = vmatmul.mubr.msk.bf16.vlgmr.msra.gmra.mrb[32].mxu0 %vm649_vm0, %v25405_v42 }
 0x3f9   : > { %17263 = vmatprep.mubr.msk.bf16.mxu0 %vm649_vm0, %v25406_v47  ;;  %17268 = vmatpush3.bf16.msra.mxu0 %v18125_v30 }
 0x3fa   : > { %17269 = vmatprep.subr.bf16.mxu0 %v18126_v40 }
 0x3fb   : > { %v21415_v12 = vpop.f32.mrb[200].mxu0 }
 0x3fc   : > { %v2111_v24 = vpop.f32.mrb[201].mxu0 }
 0x3fd   : > { %v21417_v53 = vpop.f32.mrb[202].mxu0  ;;  %17270 = vmatpush3.bf16.msra.mxu0 %v18126_v40  ;;  %v18131_v40 = vld [vmem:[%s25320_s6 + $0x90] sm:$0xff]   ;;  %v25412_v24 = vpack.c.bf16 %v21060_v38, %v21055_v29  ;;  %v18134_v29 = vld [vmem:[%s25320_s6 + $0xa8] sm:$0xff]   ;;  %v25413_v38 = vpack.c.bf16 %v21072_v9, %v21067_v54 }
 0x3fe   : > { %v2326_v26 = vpack.c.bf16 %v21417_v53, %v21415_v12  ;;  %v2114_v52 = vpop.f32.mrb[203].mxu0  ;;  %17271 = vmatprep.subr.bf16.mxu0 %v18127_v10  ;;  %v18161_v12 = vld [vmem:[%s25320_s6 + $0x180] sm:$0xff]  }
 0x3ff   : > { %v18133_v52 = vld [vmem:[%s25320_s6 + $0xa0] sm:$0xff]  }
 0x400   : > { %17264 = vmatmul.mubr.msk.bf16.gmra.mrb[36].mxu0 %vm649_vm0, %v25407_v0 }
 0x401   : > { %17272 = vmatpush3.bf16.msra.mxu0 %v18127_v10  ;;  %17275 = vmatprep.mubr.msk.bf16.mxu0 %vm649_vm0, %v25408_v58 }
 0x402   : > { %17273 = vmatprep.subr.bf16.mxu0 %v18128_v61 }
 0x403   : > { %v21435_v63 = vpop.f32.mrb[204].mxu0 }
 0x404   : > { %v2119_v30 = vpop.f32.mrb[205].mxu0 }
 0x405   : > { %v21437_v35 = vpop.f32.mrb[206].mxu0  ;;  %17274 = vmatpush3.bf16.msra.mxu0 %v18128_v61  ;;  %v18135_v30 = vld [vmem:[%s25320_s6 + $0xb0] sm:$0xff]  }
 0x406   : > { %v2327_v7 = vpack.c.bf16 %v21437_v35, %v21435_v63  ;;  %v2122_v13 = vpop.f32.mrb[207].mxu0  ;;  %17283 = vmatprep.subr.bf16.mxu0 %v18129_v60 }
 0x408   : > { %17276 = vmatmul.mubr.msk.bf16.vlgmr.msra.gmra.mrb[32].mxu0 %vm649_vm0, %v25409_v27 }
 0x409   : > { %17279 = vmatprep.mubr.msk.bf16.mxu0 %vm649_vm0, %v25410_v3  ;;  %17284 = vmatpush3.bf16.msra.mxu0 %v18129_v60  ;;  %v25414_v60 = vpack.c.bf16 %v21084_v50, %v21079_v32  ;;  %v18136_v32 = vld [vmem:[%s25320_s6 + $0xb8] sm:$0xff]   ;;  %v25415_v50 = vpack.c.bf16 %v21096_v36, %v21091_v2  ;;  %v25416_v3 = vpack.c.bf16 %v21108_v11, %v21103_v18  ;;  %v18138_v18 = vld [vmem:[%s25320_s6 + $0xc8] sm:$0xff]  }
 0x40a   : > { %17285 = vmatprep.subr.bf16.mxu0 %v18130_v21  ;;  %v25417_v11 = vpack.c.bf16 %v21120_v41, %v21115_v20 }
 0x40b   : > { %v21455_v42 = vpop.f32.mrb[208].mxu0 }
 0x40c   : > { %v2127_v47 = vpop.f32.mrb[209].mxu0 }
 0x40d   : > { %v21457_v10 = vpop.f32.mrb[210].mxu0  ;;  %17286 = vmatpush3.bf16.msra.mxu0 %v18130_v21 }
 0x40e   : > { %v2328_v34 = vpack.c.bf16 %v21457_v10, %v21455_v42  ;;  %v2130_v39 = vpop.f32.mrb[211].mxu0  ;;  %17287 = vmatprep.subr.bf16.mxu0 %v18131_v40  ;;  %v18163_v42 = vld [vmem:[%s25320_s6 + $0x190] sm:$0xff]  }
 0x410   : > { %17280 = vmatmul.mubr.msk.bf16.gmra.mrb[36].mxu0 %vm649_vm0, %v25411_v57  ;;  %v25418_v57 = vpack.c.bf16 %v21138_v6, %v21133_v22  ;;  %v18140_v6 = vld [vmem:[%s25320_s6 + $0xd8] sm:$0xff]   ;;  %v25419_v22 = vpack.c.bf16 %v21150_v44, %v21145_v31 }
 0x411   : > { %17288 = vmatpush3.bf16.msra.mxu0 %v18131_v40  ;;  %17291 = vmatprep.mubr.msk.bf16.mxu0 %vm649_vm0, %v25412_v24  ;;  %v18137_v40 = vld [vmem:[%s25320_s6 + $0xc0] sm:$0xff]   ;;  %v18139_v24 = vld [vmem:[%s25320_s6 + $0xd0] sm:$0xff]  }
 0x412   : > { %17289 = vmatprep.subr.bf16.mxu0 %v18132_v48 }
 0x413   : > { %v21475_v61 = vpop.f32.mrb[212].mxu0 }
 0x414   : > { %v2135_v0 = vpop.f32.mrb[213].mxu0 }
 0x415   : > { %v21477_v58 = vpop.f32.mrb[214].mxu0  ;;  %17290 = vmatpush3.bf16.msra.mxu0 %v18132_v48 }
 0x416   : > { %v2329_v4 = vpack.c.bf16 %v21477_v58, %v21475_v61  ;;  %v2138_v14 = vpop.f32.mrb[215].mxu0  ;;  %17299 = vmatprep.subr.bf16.mxu0 %v18133_v52 }
 0x418   : > { %17292 = vmatmul.mubr.msk.bf16.vlgmr.msra.gmra.mrb[32].mxu0 %vm649_vm0, %v25413_v38  ;;  %v18141_v38 = vld [vmem:[%s25320_s6 + $0xe0] sm:$0xff]  }
 0x419   : > { %17295 = vmatprep.mubr.msk.bf16.mxu0 %vm649_vm0, %v25414_v60  ;;  %17300 = vmatpush3.bf16.msra.mxu0 %v18133_v52 }
 0x41a   : > { %17301 = vmatprep.subr.bf16.mxu0 %v18134_v29 }
 0x41b   : > { %v21495_v13 = vpop.f32.mrb[216].mxu0 }
 0x41c   : > { %v2143_v21 = vpop.f32.mrb[217].mxu0 }
 0x41d   : > { %v21497_v27 = vpop.f32.mrb[218].mxu0  ;;  %17302 = vmatpush3.bf16.msra.mxu0 %v18134_v29  ;;  %v25420_v29 = vpack.c.bf16 %v21162_v25, %v21157_v46  ;;  %v18142_v46 = vld [vmem:[%s25320_s6 + $0xe8] sm:$0xff]  }
 0x41e   : > { %v2330_v54 = vpack.c.bf16 %v21497_v27, %v21495_v13  ;;  %v2146_v9 = vpop.f32.mrb[219].mxu0  ;;  %17303 = vmatprep.subr.bf16.mxu0 %v18135_v30  ;;  %v25421_v25 = vld [vmem:[#allocation18_spill] sm:$0xff]  ;;  %v18165_v13 = vld [vmem:[%s25320_s6 + $0x1a0] sm:$0xff]  }
 0x41f   : > { %v25422_v9 = vpack.c.bf16 %v21174_v43, %v25421_v25 }
 0x420   : > { %17296 = vmatmul.mubr.msk.bf16.gmra.mrb[36].mxu0 %vm649_vm0, %v25415_v50  ;;  %v25424_v50 = vld [vmem:[#allocation19_spill] sm:$0xff] }
 0x421   : > { %17304 = vmatpush3.bf16.msra.mxu0 %v18135_v30  ;;  %17307 = vmatprep.mubr.msk.bf16.mxu0 %vm649_vm0, %v25416_v3 }
 0x422   : > { %17305 = vmatprep.subr.bf16.mxu0 %v18136_v32 }
 0x423   : > { %v21515_v47 = vpop.f32.mrb[220].mxu0 }
 0x424   : > { %v2151_v39 = vpop.f32.mrb[221].mxu0 }
 0x425   : > { %v21517_v48 = vpop.f32.mrb[222].mxu0  ;;  %17306 = vmatpush3.bf16.msra.mxu0 %v18136_v32  ;;  %v25423_v32 = vld [vmem:[#allocation20_spill] sm:$0xff] }
 0x426   : > { %v2331_v2 = vpack.c.bf16 %v21517_v48, %v21515_v47  ;;  %v2154_v36 = vpop.f32.mrb[223].mxu0  ;;  %17315 = vmatprep.subr.bf16.mxu0 %v18137_v40  ;;  %v25425_v3 = vpack.c.bf16 %v25423_v32, %v25424_v50  ;;  %v18146_v32 = vld [vmem:[%s25320_s6 + $0x108] sm:$0xff]  }
 0x427   : > { %v25432_v50 = vld [vmem:[#allocation26_spill] sm:$0xff] }
 0x428   : > { %17308 = vmatmul.mubr.msk.bf16.vlgmr.msra.gmra.mrb[32].mxu0 %vm649_vm0, %v25417_v11 }
 0x429   : > { %17311 = vmatprep.mubr.msk.bf16.mxu0 %vm649_vm0, %v25418_v57  ;;  %17316 = vmatpush3.bf16.msra.mxu0 %v18137_v40  ;;  %v18143_v40 = vld [vmem:[%s25320_s6 + $0xf0] sm:$0xff]   ;;  %v18144_v57 = vld [vmem:[%s25320_s6 + $0xf8] sm:$0xff]  }
 0x42a   : > { %17317 = vmatprep.subr.bf16.mxu0 %v18138_v18 }
 0x42b   : > { %v21535_v52 = vpop.f32.mrb[224].mxu0 }
 0x42c   : > { %v2159_v0 = vpop.f32.mrb[225].mxu0 }
 0x42d   : > { %v21537_v14 = vpop.f32.mrb[226].mxu0  ;;  %17318 = vmatpush3.bf16.msra.mxu0 %v18138_v18  ;;  %v25427_v0 = vld [vmem:[#allocation21_spill] sm:$0xff] }
 0x42e   : > { %v2332_v20 = vpack.c.bf16 %v21537_v14, %v21535_v52  ;;  %v2162_v41 = vpop.f32.mrb[227].mxu0  ;;  %17319 = vmatprep.subr.bf16.mxu0 %v18139_v24  ;;  %v18167_v52 = vld [vmem:[%s25320_s6 + $0x1b0] sm:$0xff]  }
 0x430   : > { %17312 = vmatmul.mubr.msk.bf16.gmra.mrb[36].mxu0 %vm649_vm0, %v25419_v22  ;;  %v25430_v22 = vld [vmem:[#allocation23_spill] sm:$0xff] }
 0x431   : > { %17320 = vmatpush3.bf16.msra.mxu0 %v18139_v24  ;;  %17323 = vmatprep.mubr.msk.bf16.mxu0 %vm649_vm0, %v25420_v29  ;;  %v25426_v24 = vld [vmem:[#allocation22_spill] sm:$0xff] }
 0x432   : > { %17321 = vmatprep.subr.bf16.mxu0 %v18140_v6  ;;  %v25428_v41 = vpack.c.bf16 %v25426_v24, %v25427_v0 }
 0x433   : > { %v21555_v60 = vpop.f32.mrb[228].mxu0 }
 0x434   : > { %v2167_v30 = vpop.f32.mrb[229].mxu0 }
 0x435   : > { %v21557_v21 = vpop.f32.mrb[230].mxu0  ;;  %17322 = vmatpush3.bf16.msra.mxu0 %v18140_v6  ;;  %v25429_v6 = vld [vmem:[#allocation24_spill] sm:$0xff] }
 0x436   : > { %v2333_v44 = vpack.c.bf16 %v21557_v21, %v21555_v60  ;;  %v2170_v31 = vpop.f32.mrb[231].mxu0  ;;  %17331 = vmatprep.subr.bf16.mxu0 %v18141_v38  ;;  %v25431_v29 = vpack.c.bf16 %v25429_v6, %v25430_v22  ;;  %v18168_v60 = vld [vmem:[%s25320_s6 + $0x1b8] sm:$0xff]  }
 0x438   : > { %17324 = vmatmul.mubr.msk.bf16.vlgmr.msra.gmra.mrb[32].mxu0 %vm649_vm0, %v25422_v9 }
 0x439   : > { %17327 = vmatprep.mubr.msk.bf16.mxu0 %vm649_vm0, %v25425_v3  ;;  %17332 = vmatpush3.bf16.msra.mxu0 %v18141_v38  ;;  %v18145_v38 = vld [vmem:[%s25320_s6 + $0x100] sm:$0xff]  }
 0x43a   : > { %17333 = vmatprep.subr.bf16.mxu0 %v18142_v46  ;;  %v25433_v3 = vld [vmem:[#allocation25_spill] sm:$0xff] }
 0x43b   : > { %v21575_v39 = vpop.f32.mrb[232].mxu0 }
 0x43c   : > { %v2175_v36 = vpop.f32.mrb[233].mxu0 }
 0x43d   : > { %v21577_v18 = vpop.f32.mrb[234].mxu0  ;;  %17334 = vmatpush3.bf16.msra.mxu0 %v18142_v46  ;;  %v25435_v36 = vld [vmem:[#allocation28_spill] sm:$0xff] }
 0x43e   : > { %v2334_v43 = vpack.c.bf16 %v21577_v18, %v21575_v39  ;;  %v2178_v11 = vpop.f32.mrb[235].mxu0  ;;  %17335 = vmatprep.subr.bf16.mxu0 %v18143_v40 }
 0x43f   : > { %v25436_v11 = vld [vmem:[#allocation27_spill] sm:$0xff] }
 0x440   : > { %17328 = vmatmul.mubr.msk.bf16.gmra.mrb[36].mxu0 %vm649_vm0, %v25428_v41  ;;  %v25437_v24 = vpack.c.bf16 %v25435_v36, %v25436_v11 }
 0x441   : > { %17336 = vmatpush3.bf16.msra.mxu0 %v18143_v40  ;;  %17339 = vmatprep.mubr.msk.bf16.mxu0 %vm649_vm0, %v25431_v29  ;;  %v25434_v40 = vpack.c.bf16 %v25432_v50, %v25433_v3  ;;  %v25441_v3 = vld [vmem:[#allocation32_spill] sm:$0xff] }
 0x442   : > { %17337 = vmatprep.subr.bf16.mxu0 %v18144_v57 }
 0x443   : > { %v21595_v30 = vpop.f32.mrb[236].mxu0 }
 0x444   : > { %v2183_v31 = vpop.f32.mrb[237].mxu0 }
 0x445   : > { %v21597_v46 = vpop.f32.mrb[238].mxu0  ;;  %17338 = vmatpush3.bf16.msra.mxu0 %v18144_v57  ;;  %v18147_v57 = vld [vmem:[%s25320_s6 + $0x110] sm:$0xff]   ;;  %v25438_v31 = vld [vmem:[#allocation30_spill] sm:$0xff] }
 0x446   : > { %v2335_v25 = vpack.c.bf16 %v21597_v46, %v21595_v30  ;;  %v2186_v9 = vpop.f32.mrb[239].mxu0  ;;  %17347 = vmatprep.subr.bf16.mxu0 %v18145_v38  ;;  %v18170_v30 = vld [vmem:[%s25320_s6 + $0x1c8] sm:$0xff]  }
 0x447   : > { %v25439_v9 = vld [vmem:[#allocation29_spill] sm:$0xff] }
 0x448   : > { %17340 = vmatmul.mubr.msk.bf16.vlgmr.msra.gmra.mrb[32].mxu0 %vm649_vm0, %v25434_v40  ;;  %v25440_v50 = vpack.c.bf16 %v25438_v31, %v25439_v9  ;;  %v25442_v40 = vld [vmem:[#allocation31_spill] sm:$0xff]  ;;  %v18150_v31 = vld [vmem:[%s25320_s6 + $0x128] sm:$0xff]  }
 0x449   : > { %17343 = vmatprep.mubr.msk.bf16.mxu0 %vm649_vm0, %v25437_v24  ;;  %17348 = vmatpush3.bf16.msra.mxu0 %v18145_v38  ;;  %v18148_v38 = vld [vmem:[%s25320_s6 + $0x118] sm:$0xff]   ;;  %v25443_v36 = vpack.c.bf16 %v25441_v3, %v25442_v40  ;;  %v25444_v9 = vld [vmem:[#allocation34_spill] sm:$0xff] }
 0x44a   : > { %17349 = vmatprep.subr.bf16.mxu0 %v18146_v32  ;;  %v25447_v40 = vld [vmem:[#allocation36_spill] sm:$0xff] }
 0x44b   : > { %v21615_v0 = vpop.f32.mrb[240].mxu0 }
 0x44c   : > { %v2191_v41 = vpop.f32.mrb[241].mxu0 }
 0x44d   : > { %v21617_v6 = vpop.f32.mrb[242].mxu0  ;;  %17350 = vmatpush3.bf16.msra.mxu0 %v18146_v32  ;;  %v18149_v32 = vld [vmem:[%s25320_s6 + $0x120] sm:$0xff]  }
 0x44e   : > { %v2194_v29 = vpop.f32.mrb[243].mxu0  ;;  %17351 = vmatprep.subr.bf16.mxu0 %v18147_v57  ;;  %v25453_v21 = vpack.c.bf16 %v21617_v6, %v21615_v0  ;;  %v18172_v0 = vld [vmem:[%s25320_s6 + $0x1d8] sm:$0xff]   ;;  %v18173_v6 = vld [vmem:[%s25320_s6 + $0x1e0] sm:$0xff]  }
 0x450   : > { %17344 = vmatmul.mubr.msk.bf16.gmra.mrb[36].mxu0 %vm649_vm0, %v25440_v50  ;;  %v25445_v50 = vld [vmem:[#allocation33_spill] sm:$0xff] }
 0x451   : > { %17352 = vmatpush3.bf16.msra.mxu0 %v18147_v57  ;;  %17355 = vmatprep.mubr.msk.bf16.mxu0 %vm649_vm0, %v25443_v36  ;;  %v25446_v3 = vpack.c.bf16 %v25444_v9, %v25445_v50  ;;  %v25448_v36 = vld [vmem:[#allocation35_spill] sm:$0xff] }
 0x452   : > { %17353 = vmatprep.subr.bf16.mxu0 %v18148_v38 }
 0x453   : > { %v21635_v11 = vpop.f32.mrb[244].mxu0 }
 0x454   : > { %v2199_v24 = vpop.f32.mrb[245].mxu0 }
 0x455   : > { %v21637_v41 = vpop.f32.mrb[246].mxu0  ;;  %17354 = vmatpush3.bf16.msra.mxu0 %v18148_v38  ;;  %v25449_v24 = vpack.c.bf16 %v25447_v40, %v25448_v36  ;;  %v18151_v38 = vld [vmem:[%s25320_s6 + $0x130] sm:$0xff]  }
 0x456   : > { %v2202_v57 = vpop.f32.mrb[247].mxu0  ;;  %17363 = vmatprep.subr.bf16.mxu0 %v18149_v32  ;;  %v25454_v46 = vpack.c.bf16 %v21637_v41, %v21635_v11  ;;  %v18175_v11 = vld [vmem:[%s25320_s6 + $0x1f0] sm:$0xff]   ;;  %v18176_v41 = vld [vmem:[%s25320_s6 + $0x1f8] sm:$0xff]  }
 0x458   : > { %17356 = vmatmul.mubr.msk.bf16.vlgmr.msra.gmra.mrb[32].mxu0 %vm649_vm0, %v25446_v3  ;;  %v25450_v3 = vld [vmem:[#allocation37_spill] sm:$0xff] }
 0x459   : > { %17359 = vmatprep.mubr.msk.bf16.mxu0 %vm649_vm0, %v25449_v24  ;;  %17364 = vmatpush3.bf16.msra.mxu0 %v18149_v32  ;;  %v18152_v32 = vld [vmem:[%s25320_s6 + $0x138] sm:$0xff]   ;;  %v25451_v40 = vpack.c.bf16 %v21294_v5, %v25450_v3 }
 0x45a   : > { %17365 = vmatprep.subr.bf16.mxu0 %v18150_v31 }
 0x45b   : > { %v21655_v57 = vpop.f32.mrb[248].mxu0 }
 0x45c   : > { %v2207_v29 = vpop.f32.mrb[249].mxu0 }
 0x45d   : > { %v21657_v22 = vpop.f32.mrb[250].mxu0  ;;  %17366 = vmatpush3.bf16.msra.mxu0 %v18150_v31  ;;  %v25452_v29 = vpack.c.bf16 %v21306_v16, %v21301_v56  ;;  %v18153_v31 = vld [vmem:[%s25320_s6 + $0x140] sm:$0xff]   ;;  %v18154_v56 = vld [vmem:[%s25320_s6 + $0x148] sm:$0xff]   ;;  %v18155_v16 = vld [vmem:[%s25320_s6 + $0x150] sm:$0xff]  }
 0x45e   : > { %v2338_v9 = vpack.c.bf16 %v21657_v22, %v21655_v57  ;;  %v2210_v50 = vpop.f32.mrb[251].mxu0  ;;  %17367 = vmatprep.subr.bf16.mxu0 %v18151_v38  ;;  %v18174_v22 = vld [vmem:[%s25320_s6 + $0x1e8] sm:$0xff]   ;;  %v18177_v57 = vld [vmem:[#allocation2] sm:$0xff]  }
 0x460   : > { %17360 = vmatmul.mubr.msk.bf16.gmra.mrb[36].mxu0 %vm649_vm0, %v25451_v40 }
 0x461   : > { %17368 = vmatpush3.bf16.msra.mxu0 %v18151_v38  ;;  %17371 = vmatprep.mubr.msk.bf16.mxu0 %vm649_vm0, %v25452_v29 }
 0x462   : > { %17369 = vmatprep.subr.bf16.mxu0 %v18152_v32 }
 0x463   : > { %v21675_v36 = vpop.f32.mrb[252].mxu0 }
 0x464   : > { %v2215_v24 = vpop.f32.mrb[253].mxu0 }
 0x465   : > { %v21677_v50 = vpop.f32.mrb[254].mxu0  ;;  %17370 = vmatpush3.bf16.msra.mxu0 %v18152_v32 }
 0x466   : > { %v2339_v5 = vpack.c.bf16 %v21677_v50, %v21675_v36  ;;  %v2218_v38 = vpop.f32.mrb[255].mxu0  ;;  %17379 = vmatprep.subr.bf16.mxu0 %v18153_v31  ;;  %v20134_v50 = vld [vmem:[#allocation10] sm:$0xff] }
 0x468   : > { %17372 = vmatmul.mubr.msk.bf16.vlgmr.msra.gmra.mrb[32].mxu0 %vm649_vm0, %v2321_v62  ;;  %v18156_v62 = vld [vmem:[%s25320_s6 + $0x158] sm:$0xff]  }
 0x469   : > { %17375 = vmatprep.mubr.msk.bf16.mxu0 %vm649_vm0, %v2322_v15  ;;  %17380 = vmatpush3.bf16.msra.mxu0 %v18153_v31 }
 0x46a   : > { %17381 = vmatprep.subr.bf16.mxu0 %v18154_v56 }
 0x46b   : > { %v21695_v32 = vpop.f32.mrb[0].mxu0 }
 0x46c   : > { %v2223_v3 = vpop.f32.mrb[1].mxu0 }
 0x46d   : > { %v21697_v40 = vpop.f32.mrb[2].mxu0  ;;  %17382 = vmatpush3.bf16.msra.mxu0 %v18154_v56 }
 0x46e   : > { %v2340_v49 = vpack.c.bf16 %v21697_v40, %v21695_v32  ;;  %v2226_v59 = vpop.f32.mrb[3].mxu0  ;;  %17383 = vmatprep.subr.bf16.mxu0 %v18155_v16 }
 0x470   : > { %17376 = vmatmul.mubr.msk.bf16.gmra.mrb[36].mxu0 %vm649_vm0, %v2323_v33  ;;  %v18158_v33 = vld [vmem:[%s25320_s6 + $0x168] sm:$0xff]  }
 0x471   : > { %17384 = vmatpush3.bf16.msra.mxu0 %v18155_v16  ;;  %17387 = vmatprep.mubr.msk.bf16.mxu0 %vm649_vm0, %v2324_v51 }
 0x472   : > { %17385 = vmatprep.subr.bf16.mxu0 %v18156_v62 }
 0x473   : > { %v21715_v55 = vpop.f32.mrb[4].mxu0 }
 0x474   : > { %v2231_v15 = vpop.f32.mrb[5].mxu0 }
 0x475   : > { %v21717_v29 = vpop.f32.mrb[6].mxu0  ;;  %17386 = vmatpush3.bf16.msra.mxu0 %v18156_v62 }
 0x476   : > { %v2341_v37 = vpack.c.bf16 %v21717_v29, %v21715_v55  ;;  %v2234_v8 = vpop.f32.mrb[7].mxu0  ;;  %17395 = vmatprep.subr.bf16.mxu0 %v18157_v19 }
 0x478   : > { %17388 = vmatmul.mubr.msk.bf16.vlgmr.msra.gmra.mrb[32].mxu0 %vm649_vm0, %v2325_v1  ;;  %v18160_v1 = vld [vmem:[%s25320_s6 + $0x178] sm:$0xff]  }
 0x479   : > { %17391 = vmatprep.mubr.msk.bf16.mxu0 %vm649_vm0, %v2326_v26  ;;  %17396 = vmatpush3.bf16.msra.mxu0 %v18157_v19 }
 0x47a   : > { %17397 = vmatprep.subr.bf16.mxu0 %v18158_v33 }
 0x47b   : > { %v21735_v28 = vpop.f32.mrb[8].mxu0 }
 0x47c   : > { %v2239_v51 = vpop.f32.mrb[9].mxu0 }
 0x47d   : > { %v21737_v31 = vpop.f32.mrb[10].mxu0  ;;  %17398 = vmatpush3.bf16.msra.mxu0 %v18158_v33 }
 0x47e   : > { %v2342_v23 = vpack.c.bf16 %v21737_v31, %v21735_v28  ;;  %v2242_v45 = vpop.f32.mrb[11].mxu0  ;;  %17399 = vmatprep.subr.bf16.mxu0 %v18159_v17 }
 0x480   : > { %17392 = vmatmul.mubr.msk.bf16.gmra.mrb[36].mxu0 %vm649_vm0, %v2327_v7  ;;  %v18162_v7 = vld [vmem:[%s25320_s6 + $0x188] sm:$0xff]  }
 0x481   : > { %17400 = vmatpush3.bf16.msra.mxu0 %v18159_v17  ;;  %17403 = vmatprep.mubr.msk.bf16.mxu0 %vm649_vm0, %v2328_v34 }
 0x482   : > { %17401 = vmatprep.subr.bf16.mxu0 %v18160_v1 }
 0x483   : > { %v21755_v53 = vpop.f32.mrb[12].mxu0 }
 0x484   : > { %v2247_v26 = vpop.f32.mrb[13].mxu0 }
 0x485   : > { %v21757_v24 = vpop.f32.mrb[14].mxu0  ;;  %17402 = vmatpush3.bf16.msra.mxu0 %v18160_v1 }
 0x486   : > { %v2343_v63 = vpack.c.bf16 %v21757_v24, %v21755_v53  ;;  %v2250_v35 = vpop.f32.mrb[15].mxu0  ;;  %17411 = vmatprep.subr.bf16.mxu0 %v18161_v12 }
 0x488   : > { %17404 = vmatmul.mubr.msk.bf16.vlgmr.msra.gmra.mrb[32].mxu0 %vm649_vm0, %v2329_v4  ;;  %v18164_v4 = vld [vmem:[%s25320_s6 + $0x198] sm:$0xff]  }
 0x489   : > { %17407 = vmatprep.mubr.msk.bf16.mxu0 %vm649_vm0, %v2330_v54  ;;  %17412 = vmatpush3.bf16.msra.mxu0 %v18161_v12 }
 0x48a   : > { %17413 = vmatprep.subr.bf16.mxu0 %v18162_v7 }
 0x48b   : > { %v21775_v10 = vpop.f32.mrb[16].mxu0 }
 0x48c   : > { %v2255_v34 = vpop.f32.mrb[17].mxu0 }
 0x48d   : > { %v21777_v38 = vpop.f32.mrb[18].mxu0  ;;  %17414 = vmatpush3.bf16.msra.mxu0 %v18162_v7 }
 0x48e   : > { %v2344_v61 = vpack.c.bf16 %v21777_v38, %v21775_v10  ;;  %v2258_v58 = vpop.f32.mrb[19].mxu0  ;;  %17415 = vmatprep.subr.bf16.mxu0 %v18163_v42 }
 0x490   : > { %17408 = vmatmul.mubr.msk.bf16.gmra.mrb[36].mxu0 %vm649_vm0, %v2331_v2  ;;  %v18166_v2 = vld [vmem:[%s25320_s6 + $0x1a8] sm:$0xff]  }
 0x491   : > { %17416 = vmatpush3.bf16.msra.mxu0 %v18163_v42  ;;  %17419 = vmatprep.mubr.msk.bf16.mxu0 %vm649_vm0, %v2332_v20 }
 0x492   : > { %17417 = vmatprep.subr.bf16.mxu0 %v18164_v4 }
 0x493   : > { %v21795_v27 = vpop.f32.mrb[20].mxu0 }
 0x494   : > { %v2263_v54 = vpop.f32.mrb[21].mxu0 }
 0x495   : > { %v2264_v56 = vpop.f32.mrb[22].mxu0  ;;  %17418 = vmatpush3.bf16.msra.mxu0 %v18164_v4 }
 0x496   : > { %v2345_v47 = vpack.c.bf16 %v2264_v56, %v21795_v27  ;;  %v2266_v48 = vpop.f32.mrb[23].mxu0  ;;  %17427 = vmatprep.subr.bf16.mxu0 %v18165_v13 }
 0x498   : > { %17420 = vmatmul.mubr.msk.bf16.vlgmr.msra.gmra.mrb[32].mxu0 %vm649_vm0, %v2333_v44  ;;  %v18169_v44 = vld [vmem:[%s25320_s6 + $0x1c0] sm:$0xff]  }
 0x499   : > { %17423 = vmatprep.mubr.msk.bf16.mxu0 %vm649_vm0, %v2334_v43  ;;  %17428 = vmatpush3.bf16.msra.mxu0 %v18165_v13 }
 0x49a   : > { %17429 = vmatprep.subr.bf16.mxu0 %v18166_v2 }
 0x49b   : > { %v2269_v14 = vpop.f32.mrb[24].mxu0 }
 0x49c   : > { %v2271_v20 = vpop.f32.mrb[25].mxu0 }
 0x49d   : > { %v2272_v16 = vpop.f32.mrb[26].mxu0  ;;  %17430 = vmatpush3.bf16.msra.mxu0 %v18166_v2  ;;  %v18185_v2 = vld [vmem:[#allocation7 + $0x84] ss:$8 sps:$4 sm:$0xff]   ;;  %v18183_v20 = vld [vmem:[#allocation7 + $0x80] ss:$8 sps:$4 sm:$0xff]  }
 0x49e   : > { %v2346_v3 = vpack.c.bf16 %v2272_v16, %v2269_v14  ;;  %v2274_v59 = vpop.f32.mrb[27].mxu0  ;;  %17431 = vmatprep.subr.bf16.mxu0 %v18167_v52  ;;  %v18179_v14 = vld [vmem:[#allocation2 + $0x10] sm:$0xff]  }
 0x49f   : > { %v18188_v16 = vld [vmem:[#allocation7 + $0x94] ss:$8 sps:$4 sm:$0xff]   ;;  %v18192_v59 = vld [vmem:[#allocation7 + $0xa4] ss:$8 sps:$4 sm:$0xff]  }
 0x4a0   : > { %17424 = vmatmul.mubr.msk.bf16.gmra.mrb[36].mxu0 %vm649_vm0, %v2335_v25  ;;  %v18171_v25 = vld [vmem:[%s25320_s6 + $0x1d0] sm:$0xff]  }
 0x4a1   : > { %17432 = vmatpush3.bf16.msra.mxu0 %v18167_v52  ;;  %17435 = vmatprep.mubr.msk.bf16.mxu0 %vm649_vm0, %v25453_v21  ;;  %v18178_v52 = vld [vmem:[#allocation2 + $0x8] sm:$0xff]   ;;  %v18181_v21 = vld [vmem:[#allocation2 + $0x20] sm:$0xff]  }
 0x4a2   : > { %17433 = vmatprep.subr.bf16.mxu0 %v18168_v60 }
 0x4a3   : > { %v2277_v39 = vpop.f32.mrb[28].mxu0 }
 0x4a4   : > { %v2279_v18 = vpop.f32.mrb[29].mxu0 }
 0x4a5   : > { %v2280_v43 = vpop.f32.mrb[30].mxu0  ;;  %17434 = vmatpush3.bf16.msra.mxu0 %v18168_v60  ;;  %v18180_v60 = vld [vmem:[#allocation2 + $0x18] sm:$0xff]  }
 0x4a6   : > { %v2347_v62 = vpack.c.bf16 %v2280_v43, %v2277_v39  ;;  %v2282_v19 = vpop.f32.mrb[31].mxu0  ;;  %17443 = vmatprep.subr.bf16.mxu0 %v18169_v44  ;;  %v18197_v39 = vld [vmem:[#allocation7 + $0xb4] ss:$8 sps:$4 sm:$0xff]   ;;  %v18195_v18 = vld [vmem:[#allocation7 + $0xb0] ss:$8 sps:$4 sm:$0xff]  }
 0x4a7   : > { %v18202_v43 = vld [vmem:[#allocation7 + $0xc4] ss:$8 sps:$4 sm:$0xff]   ;;  %v18189_v19 = vld [vmem:[#allocation2 + $0x30] sm:$0xff]  }
 0x4a8   : > { %17436 = vmatmul.mubr.msk.bf16.vlgmr.msra.gmra.mrb[32].mxu0 %vm649_vm0, %v25454_v46  ;;  %v18207_v46 = vld [vmem:[#allocation7 + $0xd4] ss:$8 sps:$4 sm:$0xff]  }
 0x4a9   : > { %17439 = vmatprep.mubr.msk.bf16.mxu0 %vm649_vm0, %v2338_v9  ;;  %17444 = vmatpush3.bf16.msra.mxu0 %v18169_v44  ;;  %v25455_v9 = vld [vmem:[#allocation17_spill] sm:$0xff] }
 0x4aa   : > { %17445 = vmatprep.subr.bf16.mxu0 %v18170_v30  ;;  %v4206_v36 = vsub.s32 1, %v25455_v9  ;;  %v18190_v44 = vld [vmem:[#allocation7 + $0xa0] ss:$8 sps:$4 sm:$0xff]  }
 0x4ad   : > { %17446 = vmatpush3.bf16.msra.mxu0 %v18170_v30  ;;  %v18200_v30 = vld [vmem:[#allocation7 + $0xc0] ss:$8 sps:$4 sm:$0xff]  }
 0x4ae   : > { %17447 = vmatprep.subr.bf16.mxu0 %v18171_v25 }
 0x4b0   : > { %17440 = vmatmul.mubr.msk.bf16.gmra.mrb[36].mxu0 %vm649_vm0, %v2339_v5  ;;  %v4207_v5 = vrot.slane %v20134_v50, %v4206_v36  ;;  %v18203_v36 = vld [vmem:[#allocation2 + $0x58] sm:$0xff]   ;;  %v18204_v50 = vld [vmem:[#allocation2 + $0x60] sm:$0xff]  }
 0x4b1   : > { %17448 = vmatpush3.bf16.msra.mxu0 %v18171_v25  ;;  %17451 = vmatprep.mubr.msk.bf16.mxu0 %vm649_vm0, %v2340_v49  ;;  %v18205_v25 = vld [vmem:[#allocation7 + $0xd0] ss:$8 sps:$4 sm:$0xff]  }
 0x4b2   : > { %17449 = vmatprep.subr.bf16.mxu0 %v18172_v0 }
 0x4b5   : > { %17450 = vmatpush3.bf16.msra.mxu0 %v18172_v0  ;;  %v18212_v0 = vld [vmem:[#allocation7 + $0xe4] ss:$8 sps:$4 sm:$0xff]  }
 0x4b6   : > { %17459 = vmatprep.subr.bf16.mxu0 %v18173_v6 }
 0x4b8   : > { %17452 = vmatmul.mubr.msk.bf16.vlgmr.msra.gmra.mrb[32].mxu0 %vm649_vm0, %v2341_v37 }
 0x4b9   : > { %17455 = vmatprep.mubr.msk.bf16.mxu0 %vm649_vm0, %v2342_v23  ;;  %17460 = vmatpush3.bf16.msra.mxu0 %v18173_v6  ;;  %v18193_v6 = vld [vmem:[#allocation2 + $0x38] sm:$0xff]  }
 0x4ba   : > { %17461 = vmatprep.subr.bf16.mxu0 %v18174_v22 }
 0x4bd   : > { %17462 = vmatpush3.bf16.msra.mxu0 %v18174_v22  ;;  %v18194_v22 = vld [vmem:[#allocation2 + $0x40] sm:$0xff]  }
 0x4be   : > { %17463 = vmatprep.subr.bf16.mxu0 %v18175_v11 }
 0x4c0   : > { %17456 = vmatmul.mubr.msk.bf16.gmra.mrb[36].mxu0 %vm649_vm0, %v2343_v63 }
 0x4c1   : > { %17464 = vmatpush3.bf16.msra.mxu0 %v18175_v11  ;;  %17467 = vmatprep.mubr.msk.bf16.mxu0 %vm649_vm0, %v2344_v61  ;;  %v18210_v11 = vld [vmem:[#allocation7 + $0xe0] ss:$8 sps:$4 sm:$0xff]  }
 0x4c2   : > { %17465 = vmatprep.subr.bf16.mxu0 %v18176_v41 }
 0x4c5   : > { %17466 = vmatpush3.bf16.msra.mxu0 %v18176_v41  ;;  %v18198_v41 = vld [vmem:[#allocation2 + $0x48] sm:$0xff]  }
 0x4c8   : > { %17468 = vmatmul.mubr.msk.bf16.vlgmr.msra.gmra.mrb[32].mxu0 %vm649_vm0, %v2345_v47 }
 0x4c9   : > { %17471 = vmatprep.mubr.msk.bf16.mxu0 %vm649_vm0, %v2346_v3  ;;  %v18186_v3 = vld [vmem:[#allocation7 + $0x90] ss:$8 sps:$4 sm:$0xff]  }
 0x4d0   : > { %17472 = vmatmul.mubr.msk.bf16.gmra.mrb[36].mxu0 %vm649_vm0, %v2347_v62  ;;  %v18182_v62 = vld [vmem:[#allocation2 + $0x28] sm:$0xff]  }
 0x4d1   : > { %17483 = vmatprep.mubr.msk.bf16.mxu0 %vm649_vm0, %v18177_v57  ;;  %v18199_v57 = vld [vmem:[#allocation2 + $0x50] sm:$0xff]  }
 0x59b   : > { %v17469_v32 = vpop.f32.mrb[32].mxu0 }
 0x59c   : > { %v4210_v40 = vadd.f32 %v17469_v32, %v4207_v5  ;;  %v4165_v49 = vpop.f32.mrb[33].mxu0  ;;  %v18209_v32 = vld [vmem:[#allocation2 + $0x70] sm:$0xff]  }
 0x59d   : > { %v4208_v55 = vadd.f32 %v4207_v5, %v4165_v49  ;;  %v17470_v15 = vpop.f32.mrb[34].mxu0  ;;  %v25456_v49 = vmov 0  }
 0x59e   : > { %v4226_v29 = vmul.f32 0.2, %v4210_v40  ;;  %v4211_v37 = vadd.f32 %v17470_v15, %v4207_v5  ;;  %v4168_v8 = vpop.f32.mrb[35].mxu0  ;;  %vm4218_vm3 = vcmp.ge.f32.partialorder %v4210_v40, 0.0  ;;  %v18214_v15 = vld [vmem:[#allocation7 + $0xf0] ss:$8 sps:$4 sm:$0xff]  }
 0x59f   : > { %v4224_v33 = vmul.f32 0.2, %v4208_v55  ;;  %v4209_v17 = vadd.f32 %v4207_v5, %v4168_v8  ;;  %vm4216_vm4 = vcmp.ge.f32.partialorder %v4208_v55, 0.0 }
 0x5a0   : > { %vm4219_vm5 = vcmp.ge.f32.partialorder %v4211_v37, 0.0  ;;  %v4227_v28 = vmul.f32 0.2, %v4211_v37  ;;  %v4234_v31 = vsel %vm4218_vm3, %v4210_v40, %v4226_v29  ;;  %v18213_v40 = vld [vmem:[#allocation2 + $0x78] sm:$0xff]   ;;  %v18219_v29 = vld [vmem:[#allocation7 + $0x4] ss:$8 sps:$4 sm:$0xff]  }
 0x5a1   : > { %vm4217_vm6 = vcmp.ge.f32.partialorder %v4209_v17, 0.0  ;;  %v4225_v51 = vmul.f32 0.2, %v4209_v17  ;;  %v4232_v1 = vsel %vm4216_vm4, %v4208_v55, %v4224_v33  ;;  %v18216_v55 = vld [vmem:[#allocation7 + $0xf4] ss:$8 sps:$4 sm:$0xff]  }
 0x5a2   : > { %v4235_v23 = vsel %vm4219_vm5, %v4211_v37, %v4227_v28 }
 0x5a3   : > { %v17473_v45 = vpop.f32.mrb[36].mxu0  ;;  %v4233_v12 = vsel %vm4217_vm6, %v4209_v17, %v4225_v51  ;;  %v4241_v53 = vpack.c.bf16 %v4235_v23, %v4234_v31  ;;  %v18217_v17 = vld [vmem:[#allocation7] ss:$8 sps:$4 sm:$0xff]   ;;  %v18222_v31 = vld [vmem:[#allocation7 + $0x14] ss:$8 sps:$4 sm:$0xff]  }
 0x5a4   : > { %v4214_v26 = vadd.f32 %v17473_v45, %v4207_v5  ;;  %v4181_v24 = vpop.f32.mrb[37].mxu0  ;;  %v4240_v63 = vpack.c.bf16 %v4233_v12, %v4232_v1  ;;  %v18220_v45 = vld [vmem:[#allocation7 + $0x10] ss:$8 sps:$4 sm:$0xff]   ;;  %v18225_v1 = vld [vmem:[#allocation7 + $0x24] ss:$8 sps:$4 sm:$0xff]  }
 0x5a5   : > { %v4212_v35 = vadd.f32 %v4207_v5, %v4181_v24  ;;  %v17474_v7 = vpop.f32.mrb[38].mxu0 }
 0x5a6   : > { %v4230_v42 = vmul.f32 0.2, %v4214_v26  ;;  %v4215_v10 = vadd.f32 %v17474_v7, %v4207_v5  ;;  %v4184_v34 = vpop.f32.mrb[39].mxu0  ;;  %17475 = vmatprep.subr.bf16.mxu0 %v4240_v63  ;;  %vm4222_vm7 = vcmp.ge.f32.partialorder %v4214_v26, 0.0 }
 0x5a7   : > { %v4228_v38 = vmul.f32 0.2, %v4212_v35  ;;  %v4213_v61 = vadd.f32 %v4207_v5, %v4184_v34  ;;  %17476 = vmatpush3.bf16.msra.mxu0 %v4240_v63  ;;  %vm4220_vm8 = vcmp.ge.f32.partialorder %v4212_v35, 0.0  ;;  %v18208_v5 = vld [vmem:[#allocation2 + $0x68] sm:$0xff]   ;;  %v18228_v63 = vld [vmem:[#allocation7 + $0x34] ss:$8 sps:$4 sm:$0xff]  }
 0x5a8   : > { %vm4223_vm9 = vcmp.ge.f32.partialorder %v4215_v10, 0.0  ;;  %v4231_v58 = vmul.f32 0.2, %v4215_v10  ;;  %17477 = vmatprep.subr.bf16.mxu0 %v4241_v53  ;;  %v4238_v13 = vsel %vm4222_vm7, %v4214_v26, %v4230_v42  ;;  %v18223_v26 = vld [vmem:[#allocation7 + $0x20] ss:$8 sps:$4 sm:$0xff]  }
 0x5a9   : > { %vm4221_vm10 = vcmp.ge.f32.partialorder %v4213_v61, 0.0  ;;  %v4229_v4 = vmul.f32 0.2, %v4213_v61  ;;  %v4236_v54 = vsel %vm4220_vm8, %v4212_v35, %v4228_v38  ;;  %v18231_v34 = vld [vmem:[#allocation7 + $0x44] ss:$8 sps:$4 sm:$0xff]   ;;  %vm15215_vm8 = vcmask 1040384  }
 0x5aa   : > { %v4239_v27 = vsel %vm4223_vm9, %v4215_v10, %v4231_v58  ;;  %v18226_v10 = vld [vmem:[#allocation7 + $0x30] ss:$8 sps:$4 sm:$0xff]   ;;  %v18229_v58 = vld [vmem:[#allocation7 + $0x40] ss:$8 sps:$4 sm:$0xff]  }
 0x5ab   : > { %17478 = vmatpush3.bf16.msra.mxu0 %v4241_v53  ;;  %v4237_v56 = vsel %vm4221_vm10, %v4213_v61, %v4229_v4  ;;  %v4243_v47 = vpack.c.bf16 %v4239_v27, %v4238_v13  ;;  %v18234_v13 = vld [vmem:[#allocation7 + $0x54] ss:$8 sps:$4 sm:$0xff]  }
 0x5ac   : > { %v4242_v48 = vpack.c.bf16 %v4237_v56, %v4236_v54 }
 0x5ae   : > { %17479 = vmatprep.subr.bf16.mxu0 %v4242_v48 }
 0x5af   : > { %17480 = vmatpush3.bf16.msra.mxu0 %v4242_v48  ;;  %v18237_v48 = vld [vmem:[#allocation7 + $0x64] ss:$8 sps:$4 sm:$0xff]  }
 0x5b0   : > { %17481 = vmatprep.subr.bf16.mxu0 %v4243_v47 }
 0x5b3   : > { %17482 = vmatpush3.bf16.msra.mxu0 %v4243_v47  ;;  %v18232_v47 = vld [vmem:[#allocation7 + $0x50] ss:$8 sps:$4 sm:$0xff]  }
 0x5b4   : > { %4693 = vmatprep.subr.bf16.mxu0 %v18185_v2  ;;  %v18235_v2 = vld [vmem:[#allocation7 + $0x60] ss:$8 sps:$4 sm:$0xff]  }
 0x5b6   : > { %17484 = vmatmul.mubr.msk.bf16.vlgmr.msra.gmra.mrb[40].mxu0 %vm649_vm0, %v18178_v52  ;;  %v18240_v52 = vld [vmem:[#allocation7 + $0x74] ss:$8 sps:$4 sm:$0xff]  }
 0x5b7   : > { %17487 = vmatprep.mubr.msk.bf16.mxu0 %vm649_vm0, %v18179_v14  ;;  %4694 = vmatpush1.bf16.msra.mxu0 %v18183_v20  ;;  %v18238_v14 = vld [vmem:[#allocation7 + $0x70] ss:$8 sps:$4 sm:$0xff]   ;;  %v18243_v20 = vld [vmem:[#allocation7 + $0x104] ss:$8 sps:$4 sm:$0xff]  }
 0x5b8   : > { %4695 = vmatprep.subr.bf16.mxu0 %v18188_v16  ;;  %v18241_v16 = vld [vmem:[#allocation7 + $0x100] ss:$8 sps:$4 sm:$0xff]  }
 0x5bb   : > { %4696 = vmatpush1.bf16.msra.mxu0 %v18186_v3  ;;  %v18246_v3 = vld [vmem:[#allocation7 + $0x114] ss:$8 sps:$4 sm:$0xff]  }
 0x5bc   : > { %4697 = vmatprep.subr.bf16.mxu0 %v18192_v59  ;;  %v18244_v59 = vld [vmem:[#allocation7 + $0x110] ss:$8 sps:$4 sm:$0xff]  }
 0x5be   : > { %17488 = vmatmul.mubr.msk.bf16.gmra.mrb[44].mxu0 %vm649_vm0, %v18180_v60  ;;  %v18249_v60 = vld [vmem:[#allocation7 + $0x124] ss:$8 sps:$4 sm:$0xff]  }
 0x5bf   : > { %17491 = vmatprep.mubr.msk.bf16.mxu0 %vm649_vm0, %v18181_v21  ;;  %4698 = vmatpush1.bf16.msra.mxu0 %v18190_v44  ;;  %v18247_v21 = vld [vmem:[#allocation7 + $0x120] ss:$8 sps:$4 sm:$0xff]   ;;  %v18252_v44 = vld [vmem:[#allocation7 + $0x134] ss:$8 sps:$4 sm:$0xff]  }
 0x5c0   : > { %4699 = vmatprep.subr.bf16.mxu0 %v18197_v39 }
 0x5c3   : > { %4700 = vmatpush1.bf16.msra.mxu0 %v18195_v18  ;;  %v18250_v18 = vld [vmem:[#allocation7 + $0x130] ss:$8 sps:$4 sm:$0xff]  }
 0x5c4   : > { %4701 = vmatprep.subr.bf16.mxu0 %v18202_v43 }
 0x5c6   : > { %17492 = vmatmul.mubr.msk.bf16.gmra.mrb[48].mxu0 %vm649_vm0, %v18182_v62  ;;  %v18255_v62 = vld [vmem:[#allocation7 + $0x144] ss:$8 sps:$4 sm:$0xff]  }
 0x5c7   : > { %17495 = vmatprep.mubr.msk.bf16.mxu0 %vm649_vm0, %v18189_v19  ;;  %4702 = vmatpush1.bf16.msra.mxu0 %v18200_v30 }
 0x5c8   : > { %4703 = vmatprep.subr.bf16.mxu0 %v18207_v46 }
 0x5cb   : > { %4704 = vmatpush1.bf16.msra.mxu0 %v18205_v25 }
 0x5cc   : > { %4705 = vmatprep.subr.bf16.mxu0 %v18212_v0  ;;  %v18253_v0 = vld [vmem:[#allocation7 + $0x140] ss:$8 sps:$4 sm:$0xff]  }
 0x5ce   : > { %17496 = vmatmul.mubr.msk.bf16.gmra.mrb[52].mxu0 %vm649_vm0, %v18193_v6  ;;  %v18258_v6 = vld [vmem:[#allocation7 + $0x154] ss:$8 sps:$4 sm:$0xff]  }
 0x5cf   : > { %17499 = vmatprep.mubr.msk.bf16.mxu0 %vm649_vm0, %v18194_v22  ;;  %4706 = vmatpush1.bf16.msra.mxu0 %v18210_v11  ;;  %v18256_v11 = vld [vmem:[#allocation7 + $0x150] ss:$8 sps:$4 sm:$0xff]  }
 0x5d0   : > { %4707 = vmatprep.subr.bf16.mxu0 %v18216_v55  ;;  %v18264_v55 = vld [vmem:[#allocation7 + $0x174] ss:$8 sps:$4 sm:$0xff]  }
 0x5d3   : > { %4708 = vmatpush1.bf16.msra.mxu0 %v18214_v15 }
 0x5d4   : > { %4816 = vmatprep.subr.bf16.mxu0 %v18219_v29  ;;  %v18262_v29 = vld [vmem:[#allocation7 + $0x170] ss:$8 sps:$4 sm:$0xff]  }
 0x5d6   : > { %17500 = vmatmul.mubr.msk.bf16.gmra.mrb[56].mxu0 %vm649_vm0, %v18198_v41 }
 0x5d7   : > { %17503 = vmatprep.mubr.msk.bf16.mxu0 %vm649_vm0, %v18199_v57  ;;  %v18261_v57 = vld [vmem:[#allocation7 + $0x164] ss:$8 sps:$4 sm:$0xff]  }
 0x5de   : > { %17504 = vmatmul.mubr.msk.bf16.gmra.mrb[60].mxu0 %vm649_vm0, %v18203_v36 }
 0x5df   : > { %17507 = vmatprep.mubr.msk.bf16.mxu0 %vm649_vm0, %v18204_v50 }
 0x5e6   : > { %17508 = vmatmul.mubr.msk.bf16.gmra.mrb[64].mxu0 %vm649_vm0, %v18208_v5 }
 0x5e7   : > { %17511 = vmatprep.mubr.msk.bf16.mxu0 %vm649_vm0, %v18209_v32 }
 0x5ee   : > { %17512 = vmatmul.mubr.msk.bf16.gmra.mrb[68].mxu0 %vm649_vm0, %v18213_v40  ;;  %v18259_v40 = vld [vmem:[#allocation7 + $0x160] ss:$8 sps:$4 sm:$0xff]  }
 0x5ef   : > { %4725 = vmatprep.mubr.bf16.mxu0 %v25456_v49 }
 0x689   : > { %v17485_v37 = vpop.f32.mrb[40].mxu0 }
 0x68a   : > { %v4438_v8 = vpop.f32.mrb[41].mxu0 }
 0x68b   : > { %v17486_v33 = vpop.f32.mrb[42].mxu0 }
 0x68c   : > { %v4566_v28 = vpack.c.bf16 %v17486_v33, %v17485_v37  ;;  %v4441_v51 = vpop.f32.mrb[43].mxu0 }
 0x68d   : > { %v4565_v23 = vpack.c.bf16 %v4441_v51, %v4438_v8  ;;  %v18267_v8 = vld [vmem:[#allocation7 + $0x184] ss:$8 sps:$4 sm:$0xff]  }
 0x68e   : > { %4726 = vmatmul.mubr.bf16.vlgmr.msra.gmra.mrb[72].mxu0 %v4566_v28 }
 0x68f   : > { %4817 = vmatpush1.bf16.msra.mxu0 %v18217_v17  ;;  %4848 = vmatprep.mubr.bf16.mxu0 %v25456_v49 }
 0x690   : > { %4818 = vmatprep.subr.bf16.mxu0 %v18222_v31  ;;  %v18265_v31 = vld [vmem:[#allocation7 + $0x180] ss:$8 sps:$4 sm:$0xff]  }
 0x691   : > { %v21901_v12 = vpop.f32.mrb[44].mxu0 }
 0x692   : > { %v21903_v53 = vpop.f32.mrb[45].mxu0 }
 0x693   : > { %4819 = vmatpush1.bf16.msra.mxu0 %v18220_v45  ;;  %v21905_v24 = vpop.f32.mrb[46].mxu0 }
 0x694   : > { %4820 = vmatprep.subr.bf16.mxu0 %v18225_v1  ;;  %v4568_v35 = vpack.c.bf16 %v21905_v24, %v21901_v12  ;;  %v21909_v7 = vpop.f32.mrb[47].mxu0  ;;  %v18268_v1 = vld [vmem:[#allocation7 + $0x190] ss:$8 sps:$4 sm:$0xff]   ;;  %v18309_v24 = vld [vmem:[#allocation7 + $0x264] ss:$8 sps:$4 sm:$0xff]  }
 0x695   : > { %v4567_v42 = vpack.c.bf16 %v21909_v7, %v21903_v53  ;;  %v18271_v7 = vld [vmem:[#allocation7 + $0x1a0] ss:$8 sps:$4 sm:$0xff]   ;;  %v18304_v12 = vld [vmem:[#allocation7 + $0x250] ss:$8 sps:$4 sm:$0xff]  }
 0x697   : > { %4821 = vmatpush1.bf16.msra.mxu0 %v18223_v26 }
 0x698   : > { %4822 = vmatprep.subr.bf16.mxu0 %v18228_v63  ;;  %v18273_v63 = vld [vmem:[#allocation7 + $0x1a4] ss:$8 sps:$4 sm:$0xff]  }
 0x699   : > { %v21913_v38 = vpop.f32.mrb[48].mxu0 }
 0x69a   : > { %v21915_v61 = vpop.f32.mrb[49].mxu0 }
 0x69b   : > { %4823 = vmatpush1.bf16.msra.mxu0 %v18226_v10  ;;  %v21917_v4 = vpop.f32.mrb[50].mxu0 }
 0x69c   : > { %4824 = vmatprep.subr.bf16.mxu0 %v18231_v34  ;;  %v4570_v27 = vpack.c.bf16 %v21917_v4, %v21913_v38  ;;  %v21921_v54 = vpop.f32.mrb[51].mxu0  ;;  %v18352_v38 = vld [vmem:[#allocation7 + $0x350] ss:$8 sps:$4 sm:$0xff]   ;;  %v18357_v4 = vld [vmem:[#allocation7 + $0x364] ss:$8 sps:$4 sm:$0xff]  }
 0x69d   : > { %v4569_v56 = vpack.c.bf16 %v21921_v54, %v21915_v61  ;;  %v18328_v61 = vld [vmem:[#allocation7 + $0x2d0] ss:$8 sps:$4 sm:$0xff]   ;;  %v18333_v54 = vld [vmem:[#allocation7 + $0x2e4] ss:$8 sps:$4 sm:$0xff]  }
 0x69f   : > { %4825 = vmatpush1.bf16.msra.mxu0 %v18229_v58 }
 0x6a0   : > { %4826 = vmatprep.subr.bf16.mxu0 %v18234_v13 }
 0x6a1   : > { %v21926_v39 = vpop.f32.mrb[52].mxu0 }
 0x6a2   : > { %v21928_v43 = vpop.f32.mrb[53].mxu0 }
 0x6a3   : > { %4827 = vmatpush1.bf16.msra.mxu0 %v18232_v47  ;;  %v21930_v19 = vpop.f32.mrb[54].mxu0  ;;  %v18274_v47 = vld [vmem:[#allocation7 + $0x1b0] ss:$8 sps:$4 sm:$0xff]  }
 0x6a4   : > { %4828 = vmatprep.subr.bf16.mxu0 %v18237_v48  ;;  %v4572_v30 = vpack.c.bf16 %v21930_v19, %v21926_v39  ;;  %v21934_v46 = vpop.f32.mrb[55].mxu0  ;;  %v18400_v39 = vld [vmem:[#allocation7 + $0x450] ss:$8 sps:$4 sm:$0xff]   ;;  %v18405_v19 = vld [vmem:[#allocation7 + $0x464] ss:$8 sps:$4 sm:$0xff]  }
 0x6a5   : > { %v4571_v25 = vpack.c.bf16 %v21934_v46, %v21928_v43  ;;  %v18376_v43 = vld [vmem:[#allocation7 + $0x3d0] ss:$8 sps:$4 sm:$0xff]   ;;  %v18381_v46 = vld [vmem:[#allocation7 + $0x3e4] ss:$8 sps:$4 sm:$0xff]  }
 0x6a7   : > { %4829 = vmatpush1.bf16.msra.mxu0 %v18235_v2  ;;  %v18279_v2 = vld [vmem:[#allocation7 + $0x1c4] ss:$8 sps:$4 sm:$0xff]  }
 0x6a8   : > { %4830 = vmatprep.subr.bf16.mxu0 %v18240_v52 }
 0x6a9   : > { %v21938_v22 = vpop.f32.mrb[56].mxu0 }
 0x6aa   : > { %v21940_v41 = vpop.f32.mrb[57].mxu0 }
 0x6ab   : > { %4831 = vmatpush1.bf16.msra.mxu0 %v18238_v14  ;;  %v21942_v36 = vpop.f32.mrb[58].mxu0 }
 0x6ac   : > { %4955 = vmatprep.subr.bf16.mxu0 %v18243_v20  ;;  %v4574_v50 = vpack.c.bf16 %v21942_v36, %v21938_v22  ;;  %v21946_v5 = vpop.f32.mrb[59].mxu0  ;;  %v18448_v22 = vld [vmem:[#allocation7 + $0x550] ss:$8 sps:$4 sm:$0xff]   ;;  %v18453_v36 = vld [vmem:[#allocation7 + $0x564] ss:$8 sps:$4 sm:$0xff]  }
 0x6ad   : > { %v4573_v32 = vpack.c.bf16 %v21946_v5, %v21940_v41  ;;  %v18424_v41 = vld [vmem:[#allocation7 + $0x4d0] ss:$8 sps:$4 sm:$0xff]   ;;  %v18429_v5 = vld [vmem:[#allocation7 + $0x4e4] ss:$8 sps:$4 sm:$0xff]  }
 0x6ae   : > { %4849 = vmatmul.mubr.bf16.vlgmr.msra.gmra.mrb[72].mxu0 %v4565_v23  ;;  %v18270_v23 = vld [vmem:[#allocation7 + $0x194] ss:$8 sps:$4 sm:$0xff]  }
 0x6af   : > { %4956 = vmatpush1.bf16.msra.mxu0 %v18241_v16  ;;  %4987 = vmatprep.mubr.bf16.mxu0 %v25456_v49 }
 0x6b0   : > { %4957 = vmatprep.subr.bf16.mxu0 %v18246_v3  ;;  %v18277_v3 = vld [vmem:[#allocation7 + $0x1c0] ss:$8 sps:$4 sm:$0xff]  }
 0x6b1   : > { %v21950_v15 = vpop.f32.mrb[60].mxu0 }
 0x6b2   : > { %v21952_v37 = vpop.f32.mrb[61].mxu0 }
 0x6b3   : > { %4958 = vmatpush1.bf16.msra.mxu0 %v18244_v59  ;;  %v21954_v33 = vpop.f32.mrb[62].mxu0  ;;  %v18282_v59 = vld [vmem:[#allocation7 + $0x1d4] ss:$8 sps:$4 sm:$0xff]  }
 0x6b4   : > { %4959 = vmatprep.subr.bf16.mxu0 %v18249_v60  ;;  %v4576_v17 = vpack.c.bf16 %v21954_v33, %v21950_v15  ;;  %v21958_v28 = vpop.f32.mrb[63].mxu0  ;;  %v18280_v60 = vld [vmem:[#allocation7 + $0x1d0] ss:$8 sps:$4 sm:$0xff]   ;;  %v18501_v33 = vld [vmem:[#allocation7 + $0x664] ss:$8 sps:$4 sm:$0xff]  }
 0x6b5   : > { %v4575_v51 = vpack.c.bf16 %v21958_v28, %v21952_v37  ;;  %v18472_v37 = vld [vmem:[#allocation7 + $0x5d0] ss:$8 sps:$4 sm:$0xff]   ;;  %v18477_v28 = vld [vmem:[#allocation7 + $0x5e4] ss:$8 sps:$4 sm:$0xff]  }
 0x6b6   : > { %v18496_v15 = vld [vmem:[#allocation7 + $0x650] ss:$8 sps:$4 sm:$0xff]  }
 0x6b7   : > { %4960 = vmatpush1.bf16.msra.mxu0 %v18247_v21  ;;  %v18285_v21 = vld [vmem:[#allocation7 + $0x1e4] ss:$8 sps:$4 sm:$0xff]  }
 0x6b8   : > { %4961 = vmatprep.subr.bf16.mxu0 %v18252_v44  ;;  %v18283_v44 = vld [vmem:[#allocation7 + $0x1e0] ss:$8 sps:$4 sm:$0xff]  }
 0x6b9   : > { %v21965_v45 = vpop.f32.mrb[64].mxu0 }
 0x6ba   : > { %v21968_v26 = vpop.f32.mrb[65].mxu0 }
 0x6bb   : > { %4962 = vmatpush1.bf16.msra.mxu0 %v18250_v18  ;;  %v21970_v10 = vpop.f32.mrb[66].mxu0  ;;  %v18288_v18 = vld [vmem:[#allocation7 + $0x1f4] ss:$8 sps:$4 sm:$0xff]  }
 0x6bc   : > { %4963 = vmatprep.subr.bf16.mxu0 %v18255_v62  ;;  %v4578_v34 = vpack.c.bf16 %v21970_v10, %v21965_v45  ;;  %v21974_v58 = vpop.f32.mrb[67].mxu0  ;;  %v18286_v62 = vld [vmem:[#allocation7 + $0x1f0] ss:$8 sps:$4 sm:$0xff]   ;;  %v18549_v10 = vld [vmem:[#allocation7 + $0x764] ss:$8 sps:$4 sm:$0xff]  }
 0x6bd   : > { %v4577_v53 = vpack.c.bf16 %v21974_v58, %v21968_v26  ;;  %v18520_v26 = vld [vmem:[#allocation7 + $0x6d0] ss:$8 sps:$4 sm:$0xff]   ;;  %v18525_v58 = vld [vmem:[#allocation7 + $0x6e4] ss:$8 sps:$4 sm:$0xff]  }
 0x6be   : > { %v18544_v45 = vld [vmem:[#allocation7 + $0x750] ss:$8 sps:$4 sm:$0xff]  }
 0x6bf   : > { %4964 = vmatpush1.bf16.msra.mxu0 %v18253_v0  ;;  %v18291_v0 = vld [vmem:[#allocation7 + $0x204] ss:$8 sps:$4 sm:$0xff]  }
 0x6c0   : > { %4965 = vmatprep.subr.bf16.mxu0 %v18258_v6  ;;  %v18289_v6 = vld [vmem:[#allocation7 + $0x200] ss:$8 sps:$4 sm:$0xff]  }
 0x6c1   : > { %v21978_v13 = vpop.f32.mrb[68].mxu0 }
 0x6c2   : > { %v21980_v48 = vpop.f32.mrb[69].mxu0 }
 0x6c3   : > { %4966 = vmatpush1.bf16.msra.mxu0 %v18256_v11  ;;  %v21982_v52 = vpop.f32.mrb[70].mxu0  ;;  %v18294_v11 = vld [vmem:[#allocation7 + $0x214] ss:$8 sps:$4 sm:$0xff]  }
 0x6c4   : > { %4967 = vmatprep.subr.bf16.mxu0 %v18261_v57  ;;  %v4580_v14 = vpack.c.bf16 %v21982_v52, %v21978_v13  ;;  %v21986_v20 = vpop.f32.mrb[71].mxu0  ;;  %v18292_v57 = vld [vmem:[#allocation7 + $0x210] ss:$8 sps:$4 sm:$0xff]   ;;  %v18608_v52 = vld [vmem:[%s25322_s8 + $0x444] ss:$16 sps:$4 sm:$0xff]  }
 0x6c5   : > { %v4579_v16 = vpack.c.bf16 %v21986_v20, %v21980_v48  ;;  %v18568_v48 = vld [vmem:[#allocation7 + $0x7d0] ss:$8 sps:$4 sm:$0xff]   ;;  %v18573_v20 = vld [vmem:[#allocation7 + $0x7e4] ss:$8 sps:$4 sm:$0xff]  }
 0x6c6   : > { %v18604_v13 = vld [vmem:[%s25322_s8 + $0x420] ss:$16 sps:$4 sm:$0xff]  }
 0x6c7   : > { %4968 = vmatpush1.bf16.msra.mxu0 %v18259_v40  ;;  %v18297_v40 = vld [vmem:[#allocation7 + $0x224] ss:$8 sps:$4 sm:$0xff]  }
 0x6c8   : > { %4969 = vmatprep.subr.bf16.mxu0 %v18264_v55  ;;  %v18295_v55 = vld [vmem:[#allocation7 + $0x220] ss:$8 sps:$4 sm:$0xff]  }
 0x6cb   : > { %4970 = vmatpush1.bf16.msra.mxu0 %v18262_v29  ;;  %v18300_v29 = vld [vmem:[#allocation7 + $0x234] ss:$8 sps:$4 sm:$0xff]  }
 0x6cc   : > { %5098 = vmatprep.subr.bf16.mxu0 %v18267_v8  ;;  %v18298_v8 = vld [vmem:[#allocation7 + $0x230] ss:$8 sps:$4 sm:$0xff]  }
 0x6ce   : > { %4988 = vmatmul.mubr.bf16.vlgmr.msra.gmra.mrb[72].mxu0 %v4567_v42  ;;  %v18276_v42 = vld [vmem:[#allocation7 + $0x1b4] ss:$8 sps:$4 sm:$0xff]  }
 0x6cf   : > { %5099 = vmatpush1.bf16.msra.mxu0 %v18265_v31  ;;  %5130 = vmatprep.mubr.bf16.mxu0 %v25456_v49  ;;  %v18303_v31 = vld [vmem:[#allocation7 + $0x244] ss:$8 sps:$4 sm:$0xff]  }
 0x6d0   : > { %5100 = vmatprep.subr.bf16.mxu0 %v18270_v23  ;;  %v18301_v23 = vld [vmem:[#allocation7 + $0x240] ss:$8 sps:$4 sm:$0xff]  }
 0x6d3   : > { %5101 = vmatpush1.bf16.msra.mxu0 %v18268_v1  ;;  %v18306_v1 = vld [vmem:[#allocation7 + $0x254] ss:$8 sps:$4 sm:$0xff]  }
 0x6d4   : > { %5102 = vmatprep.subr.bf16.mxu0 %v18273_v63  ;;  %v18312_v63 = vld [vmem:[#allocation7 + $0x274] ss:$8 sps:$4 sm:$0xff]  }
 0x6d7   : > { %5103 = vmatpush1.bf16.msra.mxu0 %v18271_v7  ;;  %v18310_v7 = vld [vmem:[#allocation7 + $0x270] ss:$8 sps:$4 sm:$0xff]  }
 0x6d8   : > { %5104 = vmatprep.subr.bf16.mxu0 %v18276_v42  ;;  %v18315_v42 = vld [vmem:[#allocation7 + $0x284] ss:$8 sps:$4 sm:$0xff]  }
 0x6db   : > { %5105 = vmatpush1.bf16.msra.mxu0 %v18274_v47  ;;  %v18313_v47 = vld [vmem:[#allocation7 + $0x280] ss:$8 sps:$4 sm:$0xff]  }
 0x6dc   : > { %5106 = vmatprep.subr.bf16.mxu0 %v18279_v2  ;;  %v18318_v2 = vld [vmem:[#allocation7 + $0x294] ss:$8 sps:$4 sm:$0xff]  }
 0x6df   : > { %5107 = vmatpush1.bf16.msra.mxu0 %v18277_v3  ;;  %v18316_v3 = vld [vmem:[#allocation7 + $0x290] ss:$8 sps:$4 sm:$0xff]  }
 0x6e0   : > { %5108 = vmatprep.subr.bf16.mxu0 %v18282_v59  ;;  %v18321_v59 = vld [vmem:[#allocation7 + $0x2a4] ss:$8 sps:$4 sm:$0xff]  }
 0x6e3   : > { %5109 = vmatpush1.bf16.msra.mxu0 %v18280_v60  ;;  %v18319_v60 = vld [vmem:[#allocation7 + $0x2a0] ss:$8 sps:$4 sm:$0xff]  }
 0x6e4   : > { %5110 = vmatprep.subr.bf16.mxu0 %v18285_v21  ;;  %v18324_v21 = vld [vmem:[#allocation7 + $0x2b4] ss:$8 sps:$4 sm:$0xff]  }
 0x6e7   : > { %5111 = vmatpush1.bf16.msra.mxu0 %v18283_v44  ;;  %v18322_v44 = vld [vmem:[#allocation7 + $0x2b0] ss:$8 sps:$4 sm:$0xff]  }
 0x6e8   : > { %5112 = vmatprep.subr.bf16.mxu0 %v18288_v18  ;;  %v18327_v18 = vld [vmem:[#allocation7 + $0x2c4] ss:$8 sps:$4 sm:$0xff]  }
 0x6eb   : > { %5113 = vmatpush1.bf16.msra.mxu0 %v18286_v62  ;;  %v18325_v62 = vld [vmem:[#allocation7 + $0x2c0] ss:$8 sps:$4 sm:$0xff]  }
 0x6ec   : > { %5241 = vmatprep.subr.bf16.mxu0 %v18291_v0  ;;  %v18330_v0 = vld [vmem:[#allocation7 + $0x2d4] ss:$8 sps:$4 sm:$0xff]  }
 0x6ee   : > { %5131 = vmatmul.mubr.bf16.vlgmr.msra.gmra.mrb[72].mxu0 %v4568_v35  ;;  %v18307_v35 = vld [vmem:[#allocation7 + $0x260] ss:$8 sps:$4 sm:$0xff]  }
 0x6ef   : > { %5242 = vmatpush1.bf16.msra.mxu0 %v18289_v6  ;;  %5273 = vmatprep.mubr.bf16.mxu0 %v25456_v49  ;;  %v18336_v6 = vld [vmem:[#allocation7 + $0x2f4] ss:$8 sps:$4 sm:$0xff]  }
 0x6f0   : > { %5243 = vmatprep.subr.bf16.mxu0 %v18294_v11  ;;  %v18334_v11 = vld [vmem:[#allocation7 + $0x2f0] ss:$8 sps:$4 sm:$0xff]  }
 0x6f3   : > { %5244 = vmatpush1.bf16.msra.mxu0 %v18292_v57  ;;  %v18339_v57 = vld [vmem:[#allocation7 + $0x304] ss:$8 sps:$4 sm:$0xff]  }
 0x6f4   : > { %5245 = vmatprep.subr.bf16.mxu0 %v18297_v40  ;;  %v18337_v40 = vld [vmem:[#allocation7 + $0x300] ss:$8 sps:$4 sm:$0xff]  }
 0x6f7   : > { %5246 = vmatpush1.bf16.msra.mxu0 %v18295_v55  ;;  %v18342_v55 = vld [vmem:[#allocation7 + $0x314] ss:$8 sps:$4 sm:$0xff]  }
 0x6f8   : > { %5247 = vmatprep.subr.bf16.mxu0 %v18300_v29  ;;  %v18340_v29 = vld [vmem:[#allocation7 + $0x310] ss:$8 sps:$4 sm:$0xff]  }
 0x6fb   : > { %5248 = vmatpush1.bf16.msra.mxu0 %v18298_v8  ;;  %v18345_v8 = vld [vmem:[#allocation7 + $0x324] ss:$8 sps:$4 sm:$0xff]  }
 0x6fc   : > { %5249 = vmatprep.subr.bf16.mxu0 %v18303_v31  ;;  %v18343_v31 = vld [vmem:[#allocation7 + $0x320] ss:$8 sps:$4 sm:$0xff]  }
 0x6ff   : > { %5250 = vmatpush1.bf16.msra.mxu0 %v18301_v23  ;;  %v18348_v23 = vld [vmem:[#allocation7 + $0x334] ss:$8 sps:$4 sm:$0xff]  }
 0x700   : > { %5251 = vmatprep.subr.bf16.mxu0 %v18306_v1  ;;  %v18346_v1 = vld [vmem:[#allocation7 + $0x330] ss:$8 sps:$4 sm:$0xff]  }
 0x703   : > { %5252 = vmatpush1.bf16.msra.mxu0 %v18304_v12  ;;  %v18351_v12 = vld [vmem:[#allocation7 + $0x344] ss:$8 sps:$4 sm:$0xff]  }
 0x704   : > { %5253 = vmatprep.subr.bf16.mxu0 %v18309_v24  ;;  %v18349_v24 = vld [vmem:[#allocation7 + $0x340] ss:$8 sps:$4 sm:$0xff]  }
 0x707   : > { %5254 = vmatpush1.bf16.msra.mxu0 %v18307_v35  ;;  %v18354_v35 = vld [vmem:[#allocation7 + $0x354] ss:$8 sps:$4 sm:$0xff]  }
 0x708   : > { %5255 = vmatprep.subr.bf16.mxu0 %v18312_v63  ;;  %v18360_v63 = vld [vmem:[#allocation7 + $0x374] ss:$8 sps:$4 sm:$0xff]  }
 0x70b   : > { %5256 = vmatpush1.bf16.msra.mxu0 %v18310_v7  ;;  %v18358_v7 = vld [vmem:[#allocation7 + $0x370] ss:$8 sps:$4 sm:$0xff]  }
 0x70c   : > { %5384 = vmatprep.subr.bf16.mxu0 %v18315_v42  ;;  %v18363_v42 = vld [vmem:[#allocation7 + $0x384] ss:$8 sps:$4 sm:$0xff]  }
 0x70e   : > { %5274 = vmatmul.mubr.bf16.vlgmr.msra.gmra.mrb[72].mxu0 %v4569_v56  ;;  %v18331_v56 = vld [vmem:[#allocation7 + $0x2e0] ss:$8 sps:$4 sm:$0xff]  }
 0x70f   : > { %5385 = vmatpush1.bf16.msra.mxu0 %v18313_v47  ;;  %5416 = vmatprep.mubr.bf16.mxu0 %v25456_v49  ;;  %v18361_v47 = vld [vmem:[#allocation7 + $0x380] ss:$8 sps:$4 sm:$0xff]  }
 0x710   : > { %5386 = vmatprep.subr.bf16.mxu0 %v18318_v2  ;;  %v18366_v2 = vld [vmem:[#allocation7 + $0x394] ss:$8 sps:$4 sm:$0xff]  }
 0x713   : > { %5387 = vmatpush1.bf16.msra.mxu0 %v18316_v3  ;;  %v18364_v3 = vld [vmem:[#allocation7 + $0x390] ss:$8 sps:$4 sm:$0xff]  }
 0x714   : > { %5388 = vmatprep.subr.bf16.mxu0 %v18321_v59  ;;  %v18369_v59 = vld [vmem:[#allocation7 + $0x3a4] ss:$8 sps:$4 sm:$0xff]  }
 0x717   : > { %5389 = vmatpush1.bf16.msra.mxu0 %v18319_v60  ;;  %v18367_v60 = vld [vmem:[#allocation7 + $0x3a0] ss:$8 sps:$4 sm:$0xff]  }
 0x718   : > { %5390 = vmatprep.subr.bf16.mxu0 %v18324_v21  ;;  %v18372_v21 = vld [vmem:[#allocation7 + $0x3b4] ss:$8 sps:$4 sm:$0xff]  }
 0x71b   : > { %5391 = vmatpush1.bf16.msra.mxu0 %v18322_v44  ;;  %v18370_v44 = vld [vmem:[#allocation7 + $0x3b0] ss:$8 sps:$4 sm:$0xff]  }
 0x71c   : > { %5392 = vmatprep.subr.bf16.mxu0 %v18327_v18  ;;  %v18375_v18 = vld [vmem:[#allocation7 + $0x3c4] ss:$8 sps:$4 sm:$0xff]  }
 0x71f   : > { %5393 = vmatpush1.bf16.msra.mxu0 %v18325_v62  ;;  %v18373_v62 = vld [vmem:[#allocation7 + $0x3c0] ss:$8 sps:$4 sm:$0xff]  }
 0x720   : > { %5394 = vmatprep.subr.bf16.mxu0 %v18330_v0  ;;  %v18378_v0 = vld [vmem:[#allocation7 + $0x3d4] ss:$8 sps:$4 sm:$0xff]  }
 0x723   : > { %5395 = vmatpush1.bf16.msra.mxu0 %v18328_v61  ;;  %v18384_v61 = vld [vmem:[#allocation7 + $0x3f4] ss:$8 sps:$4 sm:$0xff]  }
 0x724   : > { %5396 = vmatprep.subr.bf16.mxu0 %v18333_v54  ;;  %v18382_v54 = vld [vmem:[#allocation7 + $0x3f0] ss:$8 sps:$4 sm:$0xff]  }
 0x727   : > { %5397 = vmatpush1.bf16.msra.mxu0 %v18331_v56  ;;  %v18387_v56 = vld [vmem:[#allocation7 + $0x404] ss:$8 sps:$4 sm:$0xff]  }
 0x728   : > { %5398 = vmatprep.subr.bf16.mxu0 %v18336_v6  ;;  %v18385_v6 = vld [vmem:[#allocation7 + $0x400] ss:$8 sps:$4 sm:$0xff]  }
 0x72b   : > { %5399 = vmatpush1.bf16.msra.mxu0 %v18334_v11  ;;  %v18390_v11 = vld [vmem:[#allocation7 + $0x414] ss:$8 sps:$4 sm:$0xff]  }
 0x72c   : > { %5527 = vmatprep.subr.bf16.mxu0 %v18339_v57  ;;  %v18388_v57 = vld [vmem:[#allocation7 + $0x410] ss:$8 sps:$4 sm:$0xff]  }
 0x72e   : > { %5417 = vmatmul.mubr.bf16.vlgmr.msra.gmra.mrb[72].mxu0 %v4570_v27  ;;  %v18355_v27 = vld [vmem:[#allocation7 + $0x360] ss:$8 sps:$4 sm:$0xff]  }
 0x72f   : > { %5528 = vmatpush1.bf16.msra.mxu0 %v18337_v40  ;;  %5559 = vmatprep.mubr.bf16.mxu0 %v25456_v49  ;;  %v18393_v40 = vld [vmem:[#allocation7 + $0x424] ss:$8 sps:$4 sm:$0xff]  }
 0x730   : > { %5529 = vmatprep.subr.bf16.mxu0 %v18342_v55  ;;  %v18391_v55 = vld [vmem:[#allocation7 + $0x420] ss:$8 sps:$4 sm:$0xff]  }
 0x733   : > { %5530 = vmatpush1.bf16.msra.mxu0 %v18340_v29  ;;  %v18396_v29 = vld [vmem:[#allocation7 + $0x434] ss:$8 sps:$4 sm:$0xff]  }
 0x734   : > { %5531 = vmatprep.subr.bf16.mxu0 %v18345_v8  ;;  %v18394_v8 = vld [vmem:[#allocation7 + $0x430] ss:$8 sps:$4 sm:$0xff]  }
 0x737   : > { %5532 = vmatpush1.bf16.msra.mxu0 %v18343_v31  ;;  %v18399_v31 = vld [vmem:[#allocation7 + $0x444] ss:$8 sps:$4 sm:$0xff]  }
 0x738   : > { %5533 = vmatprep.subr.bf16.mxu0 %v18348_v23  ;;  %v18397_v23 = vld [vmem:[#allocation7 + $0x440] ss:$8 sps:$4 sm:$0xff]  }
 0x73b   : > { %5534 = vmatpush1.bf16.msra.mxu0 %v18346_v1  ;;  %v18402_v1 = vld [vmem:[#allocation7 + $0x454] ss:$8 sps:$4 sm:$0xff]  }
 0x73c   : > { %5535 = vmatprep.subr.bf16.mxu0 %v18351_v12  ;;  %v18408_v12 = vld [vmem:[#allocation7 + $0x474] ss:$8 sps:$4 sm:$0xff]  }
 0x73f   : > { %5536 = vmatpush1.bf16.msra.mxu0 %v18349_v24  ;;  %v18406_v24 = vld [vmem:[#allocation7 + $0x470] ss:$8 sps:$4 sm:$0xff]  }
 0x740   : > { %5537 = vmatprep.subr.bf16.mxu0 %v18354_v35  ;;  %v18411_v35 = vld [vmem:[#allocation7 + $0x484] ss:$8 sps:$4 sm:$0xff]  }
 0x743   : > { %5538 = vmatpush1.bf16.msra.mxu0 %v18352_v38  ;;  %v18409_v38 = vld [vmem:[#allocation7 + $0x480] ss:$8 sps:$4 sm:$0xff]  }
 0x744   : > { %5539 = vmatprep.subr.bf16.mxu0 %v18357_v4  ;;  %v18414_v4 = vld [vmem:[#allocation7 + $0x494] ss:$8 sps:$4 sm:$0xff]  }
 0x747   : > { %5540 = vmatpush1.bf16.msra.mxu0 %v18355_v27  ;;  %v18412_v27 = vld [vmem:[#allocation7 + $0x490] ss:$8 sps:$4 sm:$0xff]  }
 0x748   : > { %5541 = vmatprep.subr.bf16.mxu0 %v18360_v63  ;;  %v18417_v63 = vld [vmem:[#allocation7 + $0x4a4] ss:$8 sps:$4 sm:$0xff]  }
 0x74b   : > { %5542 = vmatpush1.bf16.msra.mxu0 %v18358_v7  ;;  %v18415_v7 = vld [vmem:[#allocation7 + $0x4a0] ss:$8 sps:$4 sm:$0xff]  }
 0x74c   : > { %5670 = vmatprep.subr.bf16.mxu0 %v18363_v42  ;;  %v18420_v42 = vld [vmem:[#allocation7 + $0x4b4] ss:$8 sps:$4 sm:$0xff]  }
 0x74e   : > { %5560 = vmatmul.mubr.bf16.vlgmr.msra.gmra.mrb[72].mxu0 %v4571_v25  ;;  %v18379_v25 = vld [vmem:[#allocation7 + $0x3e0] ss:$8 sps:$4 sm:$0xff]  }
 0x74f   : > { %5671 = vmatpush1.bf16.msra.mxu0 %v18361_v47  ;;  %5702 = vmatprep.mubr.bf16.mxu0 %v25456_v49  ;;  %v18418_v47 = vld [vmem:[#allocation7 + $0x4b0] ss:$8 sps:$4 sm:$0xff]  }
 0x750   : > { %5672 = vmatprep.subr.bf16.mxu0 %v18366_v2  ;;  %v18423_v2 = vld [vmem:[#allocation7 + $0x4c4] ss:$8 sps:$4 sm:$0xff]  }
 0x753   : > { %5673 = vmatpush1.bf16.msra.mxu0 %v18364_v3  ;;  %v18421_v3 = vld [vmem:[#allocation7 + $0x4c0] ss:$8 sps:$4 sm:$0xff]  }
 0x754   : > { %5674 = vmatprep.subr.bf16.mxu0 %v18369_v59  ;;  %v18426_v59 = vld [vmem:[#allocation7 + $0x4d4] ss:$8 sps:$4 sm:$0xff]  }
 0x757   : > { %5675 = vmatpush1.bf16.msra.mxu0 %v18367_v60  ;;  %v18432_v60 = vld [vmem:[#allocation7 + $0x4f4] ss:$8 sps:$4 sm:$0xff]  }
 0x758   : > { %5676 = vmatprep.subr.bf16.mxu0 %v18372_v21  ;;  %v18430_v21 = vld [vmem:[#allocation7 + $0x4f0] ss:$8 sps:$4 sm:$0xff]  }
 0x75b   : > { %5677 = vmatpush1.bf16.msra.mxu0 %v18370_v44  ;;  %v18435_v44 = vld [vmem:[#allocation7 + $0x504] ss:$8 sps:$4 sm:$0xff]  }
 0x75c   : > { %5678 = vmatprep.subr.bf16.mxu0 %v18375_v18  ;;  %v18433_v18 = vld [vmem:[#allocation7 + $0x500] ss:$8 sps:$4 sm:$0xff]  }
 0x75f   : > { %5679 = vmatpush1.bf16.msra.mxu0 %v18373_v62  ;;  %v18438_v62 = vld [vmem:[#allocation7 + $0x514] ss:$8 sps:$4 sm:$0xff]  }
 0x760   : > { %5680 = vmatprep.subr.bf16.mxu0 %v18378_v0  ;;  %v18436_v0 = vld [vmem:[#allocation7 + $0x510] ss:$8 sps:$4 sm:$0xff]  }
 0x763   : > { %5681 = vmatpush1.bf16.msra.mxu0 %v18376_v43  ;;  %v18441_v43 = vld [vmem:[#allocation7 + $0x524] ss:$8 sps:$4 sm:$0xff]  }
 0x764   : > { %5682 = vmatprep.subr.bf16.mxu0 %v18381_v46  ;;  %v18439_v46 = vld [vmem:[#allocation7 + $0x520] ss:$8 sps:$4 sm:$0xff]  }
 0x767   : > { %5683 = vmatpush1.bf16.msra.mxu0 %v18379_v25  ;;  %v18444_v25 = vld [vmem:[#allocation7 + $0x534] ss:$8 sps:$4 sm:$0xff]  }
 0x768   : > { %5684 = vmatprep.subr.bf16.mxu0 %v18384_v61  ;;  %v18442_v61 = vld [vmem:[#allocation7 + $0x530] ss:$8 sps:$4 sm:$0xff]  }
 0x76b   : > { %5685 = vmatpush1.bf16.msra.mxu0 %v18382_v54  ;;  %v18447_v54 = vld [vmem:[#allocation7 + $0x544] ss:$8 sps:$4 sm:$0xff]  }
 0x76c   : > { %5813 = vmatprep.subr.bf16.mxu0 %v18387_v56  ;;  %v18445_v56 = vld [vmem:[#allocation7 + $0x540] ss:$8 sps:$4 sm:$0xff]  }
 0x76e   : > { %5703 = vmatmul.mubr.bf16.vlgmr.msra.gmra.mrb[72].mxu0 %v4572_v30  ;;  %v18403_v30 = vld [vmem:[#allocation7 + $0x460] ss:$8 sps:$4 sm:$0xff]  }
 0x76f   : > { %5814 = vmatpush1.bf16.msra.mxu0 %v18385_v6  ;;  %5845 = vmatprep.mubr.bf16.mxu0 %v25456_v49  ;;  %v18450_v6 = vld [vmem:[#allocation7 + $0x554] ss:$8 sps:$4 sm:$0xff]  }
 0x770   : > { %5815 = vmatprep.subr.bf16.mxu0 %v18390_v11  ;;  %v18456_v11 = vld [vmem:[#allocation7 + $0x574] ss:$8 sps:$4 sm:$0xff]  }
 0x773   : > { %5816 = vmatpush1.bf16.msra.mxu0 %v18388_v57  ;;  %v18454_v57 = vld [vmem:[#allocation7 + $0x570] ss:$8 sps:$4 sm:$0xff]  }
 0x774   : > { %5817 = vmatprep.subr.bf16.mxu0 %v18393_v40  ;;  %v18459_v40 = vld [vmem:[#allocation7 + $0x584] ss:$8 sps:$4 sm:$0xff]  }
 0x777   : > { %5818 = vmatpush1.bf16.msra.mxu0 %v18391_v55  ;;  %v18457_v55 = vld [vmem:[#allocation7 + $0x580] ss:$8 sps:$4 sm:$0xff]  }
 0x778   : > { %5819 = vmatprep.subr.bf16.mxu0 %v18396_v29  ;;  %v18462_v29 = vld [vmem:[#allocation7 + $0x594] ss:$8 sps:$4 sm:$0xff]  }
 0x77b   : > { %5820 = vmatpush1.bf16.msra.mxu0 %v18394_v8  ;;  %v18460_v8 = vld [vmem:[#allocation7 + $0x590] ss:$8 sps:$4 sm:$0xff]  }
 0x77c   : > { %5821 = vmatprep.subr.bf16.mxu0 %v18399_v31  ;;  %v18465_v31 = vld [vmem:[#allocation7 + $0x5a4] ss:$8 sps:$4 sm:$0xff]  }
 0x77f   : > { %5822 = vmatpush1.bf16.msra.mxu0 %v18397_v23  ;;  %v18463_v23 = vld [vmem:[#allocation7 + $0x5a0] ss:$8 sps:$4 sm:$0xff]  }
 0x780   : > { %5823 = vmatprep.subr.bf16.mxu0 %v18402_v1  ;;  %v18468_v1 = vld [vmem:[#allocation7 + $0x5b4] ss:$8 sps:$4 sm:$0xff]  }
 0x783   : > { %5824 = vmatpush1.bf16.msra.mxu0 %v18400_v39  ;;  %v18466_v39 = vld [vmem:[#allocation7 + $0x5b0] ss:$8 sps:$4 sm:$0xff]  }
 0x784   : > { %5825 = vmatprep.subr.bf16.mxu0 %v18405_v19  ;;  %v18471_v19 = vld [vmem:[#allocation7 + $0x5c4] ss:$8 sps:$4 sm:$0xff]  }
 0x787   : > { %5826 = vmatpush1.bf16.msra.mxu0 %v18403_v30  ;;  %v18469_v30 = vld [vmem:[#allocation7 + $0x5c0] ss:$8 sps:$4 sm:$0xff]  }
 0x788   : > { %5827 = vmatprep.subr.bf16.mxu0 %v18408_v12  ;;  %v18474_v12 = vld [vmem:[#allocation7 + $0x5d4] ss:$8 sps:$4 sm:$0xff]  }
 0x78b   : > { %5828 = vmatpush1.bf16.msra.mxu0 %v18406_v24  ;;  %v18480_v24 = vld [vmem:[#allocation7 + $0x5f4] ss:$8 sps:$4 sm:$0xff]  }
 0x78c   : > { %5956 = vmatprep.subr.bf16.mxu0 %v18411_v35  ;;  %v18478_v35 = vld [vmem:[#allocation7 + $0x5f0] ss:$8 sps:$4 sm:$0xff]  }
 0x78e   : > { %5846 = vmatmul.mubr.bf16.vlgmr.msra.gmra.mrb[72].mxu0 %v4573_v32  ;;  %v18427_v32 = vld [vmem:[#allocation7 + $0x4e0] ss:$8 sps:$4 sm:$0xff]  }
 0x78f   : > { %5957 = vmatpush1.bf16.msra.mxu0 %v18409_v38  ;;  %5988 = vmatprep.mubr.bf16.mxu0 %v25456_v49  ;;  %v18483_v38 = vld [vmem:[#allocation7 + $0x604] ss:$8 sps:$4 sm:$0xff]  }
 0x790   : > { %5958 = vmatprep.subr.bf16.mxu0 %v18414_v4  ;;  %v18481_v4 = vld [vmem:[#allocation7 + $0x600] ss:$8 sps:$4 sm:$0xff]  }
 0x793   : > { %5959 = vmatpush1.bf16.msra.mxu0 %v18412_v27  ;;  %v18486_v27 = vld [vmem:[#allocation7 + $0x614] ss:$8 sps:$4 sm:$0xff]  }
 0x794   : > { %5960 = vmatprep.subr.bf16.mxu0 %v18417_v63  ;;  %v18484_v63 = vld [vmem:[#allocation7 + $0x610] ss:$8 sps:$4 sm:$0xff]  }
 0x797   : > { %5961 = vmatpush1.bf16.msra.mxu0 %v18415_v7  ;;  %v18489_v7 = vld [vmem:[#allocation7 + $0x624] ss:$8 sps:$4 sm:$0xff]  }
 0x798   : > { %5962 = vmatprep.subr.bf16.mxu0 %v18420_v42  ;;  %v18487_v42 = vld [vmem:[#allocation7 + $0x620] ss:$8 sps:$4 sm:$0xff]  }
 0x79b   : > { %5963 = vmatpush1.bf16.msra.mxu0 %v18418_v47  ;;  %v18492_v47 = vld [vmem:[#allocation7 + $0x634] ss:$8 sps:$4 sm:$0xff]  }
 0x79c   : > { %5964 = vmatprep.subr.bf16.mxu0 %v18423_v2  ;;  %v18490_v2 = vld [vmem:[#allocation7 + $0x630] ss:$8 sps:$4 sm:$0xff]  }
 0x79f   : > { %5965 = vmatpush1.bf16.msra.mxu0 %v18421_v3  ;;  %v18495_v3 = vld [vmem:[#allocation7 + $0x644] ss:$8 sps:$4 sm:$0xff]  }
 0x7a0   : > { %5966 = vmatprep.subr.bf16.mxu0 %v18426_v59  ;;  %v18493_v59 = vld [vmem:[#allocation7 + $0x640] ss:$8 sps:$4 sm:$0xff]  }
 0x7a3   : > { %5967 = vmatpush1.bf16.msra.mxu0 %v18424_v41  ;;  %v18498_v41 = vld [vmem:[#allocation7 + $0x654] ss:$8 sps:$4 sm:$0xff]  }
 0x7a4   : > { %5968 = vmatprep.subr.bf16.mxu0 %v18429_v5  ;;  %v18504_v5 = vld [vmem:[#allocation7 + $0x674] ss:$8 sps:$4 sm:$0xff]  }
 0x7a7   : > { %5969 = vmatpush1.bf16.msra.mxu0 %v18427_v32  ;;  %v18502_v32 = vld [vmem:[#allocation7 + $0x670] ss:$8 sps:$4 sm:$0xff]  }
 0x7a8   : > { %5970 = vmatprep.subr.bf16.mxu0 %v18432_v60  ;;  %v18507_v60 = vld [vmem:[#allocation7 + $0x684] ss:$8 sps:$4 sm:$0xff]  }
 0x7ab   : > { %5971 = vmatpush1.bf16.msra.mxu0 %v18430_v21  ;;  %v18505_v21 = vld [vmem:[#allocation7 + $0x680] ss:$8 sps:$4 sm:$0xff]  }
 0x7ac   : > { %6099 = vmatprep.subr.bf16.mxu0 %v18435_v44  ;;  %v18510_v44 = vld [vmem:[#allocation7 + $0x694] ss:$8 sps:$4 sm:$0xff]  }
 0x7ae   : > { %5989 = vmatmul.mubr.bf16.vlgmr.msra.gmra.mrb[72].mxu0 %v4574_v50  ;;  %v18451_v50 = vld [vmem:[#allocation7 + $0x560] ss:$8 sps:$4 sm:$0xff]  }
 0x7af   : > { %6100 = vmatpush1.bf16.msra.mxu0 %v18433_v18  ;;  %6131 = vmatprep.mubr.bf16.mxu0 %v25456_v49  ;;  %v18508_v18 = vld [vmem:[#allocation7 + $0x690] ss:$8 sps:$4 sm:$0xff]  }
 0x7b0   : > { %6101 = vmatprep.subr.bf16.mxu0 %v18438_v62  ;;  %v18513_v62 = vld [vmem:[#allocation7 + $0x6a4] ss:$8 sps:$4 sm:$0xff]  }
 0x7b3   : > { %6102 = vmatpush1.bf16.msra.mxu0 %v18436_v0  ;;  %v18511_v0 = vld [vmem:[#allocation7 + $0x6a0] ss:$8 sps:$4 sm:$0xff]  }
 0x7b4   : > { %6103 = vmatprep.subr.bf16.mxu0 %v18441_v43  ;;  %v18516_v43 = vld [vmem:[#allocation7 + $0x6b4] ss:$8 sps:$4 sm:$0xff]  }
 0x7b7   : > { %6104 = vmatpush1.bf16.msra.mxu0 %v18439_v46  ;;  %v18514_v46 = vld [vmem:[#allocation7 + $0x6b0] ss:$8 sps:$4 sm:$0xff]  }
 0x7b8   : > { %6105 = vmatprep.subr.bf16.mxu0 %v18444_v25  ;;  %v18519_v25 = vld [vmem:[#allocation7 + $0x6c4] ss:$8 sps:$4 sm:$0xff]  }
 0x7bb   : > { %6106 = vmatpush1.bf16.msra.mxu0 %v18442_v61  ;;  %v18517_v61 = vld [vmem:[#allocation7 + $0x6c0] ss:$8 sps:$4 sm:$0xff]  }
 0x7bc   : > { %6107 = vmatprep.subr.bf16.mxu0 %v18447_v54  ;;  %v18522_v54 = vld [vmem:[#allocation7 + $0x6d4] ss:$8 sps:$4 sm:$0xff]  }
 0x7bf   : > { %6108 = vmatpush1.bf16.msra.mxu0 %v18445_v56  ;;  %v18528_v56 = vld [vmem:[#allocation7 + $0x6f4] ss:$8 sps:$4 sm:$0xff]  }
 0x7c0   : > { %6109 = vmatprep.subr.bf16.mxu0 %v18450_v6  ;;  %v18526_v6 = vld [vmem:[#allocation7 + $0x6f0] ss:$8 sps:$4 sm:$0xff]  }
 0x7c3   : > { %6110 = vmatpush1.bf16.msra.mxu0 %v18448_v22  ;;  %v18531_v22 = vld [vmem:[#allocation7 + $0x704] ss:$8 sps:$4 sm:$0xff]  }
 0x7c4   : > { %6111 = vmatprep.subr.bf16.mxu0 %v18453_v36  ;;  %v18529_v36 = vld [vmem:[#allocation7 + $0x700] ss:$8 sps:$4 sm:$0xff]  }
 0x7c7   : > { %6112 = vmatpush1.bf16.msra.mxu0 %v18451_v50  ;;  %v18534_v50 = vld [vmem:[#allocation7 + $0x714] ss:$8 sps:$4 sm:$0xff]  }
 0x7c8   : > { %6113 = vmatprep.subr.bf16.mxu0 %v18456_v11  ;;  %v18532_v11 = vld [vmem:[#allocation7 + $0x710] ss:$8 sps:$4 sm:$0xff]  }
 0x7cb   : > { %6114 = vmatpush1.bf16.msra.mxu0 %v18454_v57  ;;  %v18537_v57 = vld [vmem:[#allocation7 + $0x724] ss:$8 sps:$4 sm:$0xff]  }
 0x7cc   : > { %6242 = vmatprep.subr.bf16.mxu0 %v18459_v40  ;;  %v18535_v40 = vld [vmem:[#allocation7 + $0x720] ss:$8 sps:$4 sm:$0xff]  }
 0x7ce   : > { %6132 = vmatmul.mubr.bf16.vlgmr.msra.gmra.mrb[72].mxu0 %v4575_v51  ;;  %v18475_v51 = vld [vmem:[#allocation7 + $0x5e0] ss:$8 sps:$4 sm:$0xff]  }
 0x7cf   : > { %6243 = vmatpush1.bf16.msra.mxu0 %v18457_v55  ;;  %6274 = vmatprep.mubr.bf16.mxu0 %v25456_v49  ;;  %v18540_v55 = vld [vmem:[#allocation7 + $0x734] ss:$8 sps:$4 sm:$0xff]  }
 0x7d0   : > { %6244 = vmatprep.subr.bf16.mxu0 %v18462_v29  ;;  %v18538_v29 = vld [vmem:[#allocation7 + $0x730] ss:$8 sps:$4 sm:$0xff]  }
 0x7d3   : > { %6245 = vmatpush1.bf16.msra.mxu0 %v18460_v8  ;;  %v18543_v8 = vld [vmem:[#allocation7 + $0x744] ss:$8 sps:$4 sm:$0xff]  }
 0x7d4   : > { %6246 = vmatprep.subr.bf16.mxu0 %v18465_v31  ;;  %v18541_v31 = vld [vmem:[#allocation7 + $0x740] ss:$8 sps:$4 sm:$0xff]  }
 0x7d7   : > { %6247 = vmatpush1.bf16.msra.mxu0 %v18463_v23  ;;  %v18546_v23 = vld [vmem:[#allocation7 + $0x754] ss:$8 sps:$4 sm:$0xff]  }
 0x7d8   : > { %6248 = vmatprep.subr.bf16.mxu0 %v18468_v1  ;;  %v18552_v1 = vld [vmem:[#allocation7 + $0x774] ss:$8 sps:$4 sm:$0xff]  }
 0x7db   : > { %6249 = vmatpush1.bf16.msra.mxu0 %v18466_v39  ;;  %v18550_v39 = vld [vmem:[#allocation7 + $0x770] ss:$8 sps:$4 sm:$0xff]  }
 0x7dc   : > { %6250 = vmatprep.subr.bf16.mxu0 %v18471_v19  ;;  %v18555_v19 = vld [vmem:[#allocation7 + $0x784] ss:$8 sps:$4 sm:$0xff]  }
 0x7df   : > { %6251 = vmatpush1.bf16.msra.mxu0 %v18469_v30  ;;  %v18553_v30 = vld [vmem:[#allocation7 + $0x780] ss:$8 sps:$4 sm:$0xff]  }
 0x7e0   : > { %6252 = vmatprep.subr.bf16.mxu0 %v18474_v12  ;;  %v18558_v12 = vld [vmem:[#allocation7 + $0x794] ss:$8 sps:$4 sm:$0xff]  }
 0x7e3   : > { %6253 = vmatpush1.bf16.msra.mxu0 %v18472_v37  ;;  %v18556_v37 = vld [vmem:[#allocation7 + $0x790] ss:$8 sps:$4 sm:$0xff]  }
 0x7e4   : > { %6254 = vmatprep.subr.bf16.mxu0 %v18477_v28  ;;  %v18561_v28 = vld [vmem:[#allocation7 + $0x7a4] ss:$8 sps:$4 sm:$0xff]  }
 0x7e7   : > { %6255 = vmatpush1.bf16.msra.mxu0 %v18475_v51  ;;  %v18559_v51 = vld [vmem:[#allocation7 + $0x7a0] ss:$8 sps:$4 sm:$0xff]  }
 0x7e8   : > { %6256 = vmatprep.subr.bf16.mxu0 %v18480_v24  ;;  %v18564_v24 = vld [vmem:[#allocation7 + $0x7b4] ss:$8 sps:$4 sm:$0xff]  }
 0x7eb   : > { %6257 = vmatpush1.bf16.msra.mxu0 %v18478_v35  ;;  %v18562_v35 = vld [vmem:[#allocation7 + $0x7b0] ss:$8 sps:$4 sm:$0xff]  }
 0x7ec   : > { %6385 = vmatprep.subr.bf16.mxu0 %v18483_v38  ;;  %v18567_v38 = vld [vmem:[#allocation7 + $0x7c4] ss:$8 sps:$4 sm:$0xff]  }
 0x7ee   : > { %6275 = vmatmul.mubr.bf16.vlgmr.msra.gmra.mrb[72].mxu0 %v4576_v17  ;;  %v18499_v17 = vld [vmem:[#allocation7 + $0x660] ss:$8 sps:$4 sm:$0xff]  }
 0x7ef   : > { %6386 = vmatpush1.bf16.msra.mxu0 %v18481_v4  ;;  %6417 = vmatprep.mubr.bf16.mxu0 %v25456_v49  ;;  %v18565_v4 = vld [vmem:[#allocation7 + $0x7c0] ss:$8 sps:$4 sm:$0xff]  }
 0x7f0   : > { %6387 = vmatprep.subr.bf16.mxu0 %v18486_v27  ;;  %v18570_v27 = vld [vmem:[#allocation7 + $0x7d4] ss:$8 sps:$4 sm:$0xff]  }
 0x7f3   : > { %6388 = vmatpush1.bf16.msra.mxu0 %v18484_v63  ;;  %v18576_v63 = vld [vmem:[#allocation7 + $0x7f4] ss:$8 sps:$4 sm:$0xff]  }
 0x7f4   : > { %6389 = vmatprep.subr.bf16.mxu0 %v18489_v7  ;;  %v18574_v7 = vld [vmem:[#allocation7 + $0x7f0] ss:$8 sps:$4 sm:$0xff]  }
 0x7f7   : > { %6390 = vmatpush1.bf16.msra.mxu0 %v18487_v42  ;;  %v18595_v42 = vld [vmem:[%s25322_s8 + $0x404] ss:$16 sps:$4 sm:$0xff]  }
 0x7f8   : > { %6391 = vmatprep.subr.bf16.mxu0 %v18492_v47  ;;  %8597 = vmatprep.subr.bf16.mxu1 %v18595_v42  ;;  %v18598_v47 = vld [vmem:[%s25322_s8 + $0x400] ss:$16 sps:$4 sm:$0xff]  }
 0x7f9   : > { %8598 = vmatpush1.bf16.msra.mxu1 %v18598_v47  ;;  %v18618_v42 = vld [vmem:[%s25322_s8 + $0x2c0] ss:$16 sps:$4 sm:$0xff]   ;;  %v18627_v47 = vld [vmem:[%s25322_s8 + $0x2e4] ss:$16 sps:$4 sm:$0xff]  }
 0x7fb   : > { %6392 = vmatpush1.bf16.msra.mxu0 %v18490_v2  ;;  %v18602_v2 = vld [vmem:[%s25322_s8 + $0x424] ss:$16 sps:$4 sm:$0xff]  }
 0x7fc   : > { %6393 = vmatprep.subr.bf16.mxu0 %v18495_v3  ;;  %8599 = vmatprep.subr.bf16.mxu1 %v18602_v2  ;;  %v18615_v3 = vld [vmem:[%s25322_s8 + $0x464] ss:$16 sps:$4 sm:$0xff]   ;;  %v18625_v2 = vld [vmem:[%s25322_s8 + $0x2e0] ss:$16 sps:$4 sm:$0xff]  }
 0x7fd   : > { %8600 = vmatpush1.bf16.msra.mxu1 %v18604_v13  ;;  %v18633_v13 = vld [vmem:[%s25322_s8 + $0x304] ss:$16 sps:$4 sm:$0xff]  }
 0x7fe   : > { %8601 = vmatprep.subr.bf16.mxu1 %v18608_v52  ;;  %v18581_v52 = vld [vmem:[#allocation4 + $0x20] sm:$0xff]  }
 0x7ff   : > { %6394 = vmatpush1.bf16.msra.mxu0 %v18493_v59  ;;  %v18617_v59 = vld [vmem:[%s25322_s8 + $0x460] ss:$16 sps:$4 sm:$0xff]  }
 0x800   : > { %6395 = vmatprep.subr.bf16.mxu0 %v18498_v41  ;;  %v18621_v41 = vld [vmem:[%s25322_s8 + $0x484] ss:$16 sps:$4 sm:$0xff]  }
 0x803   : > { %6396 = vmatpush1.bf16.msra.mxu0 %v18496_v15  ;;  %v18624_v15 = vld [vmem:[%s25322_s8 + $0x480] ss:$16 sps:$4 sm:$0xff]  }
 0x804   : > { %6397 = vmatprep.subr.bf16.mxu0 %v18501_v33  ;;  %v18628_v33 = vld [vmem:[%s25322_s8 + $0x4a4] ss:$16 sps:$4 sm:$0xff]  }
 0x807   : > { %6398 = vmatpush1.bf16.msra.mxu0 %v18499_v17  ;;  %v18630_v17 = vld [vmem:[%s25322_s8 + $0x4a0] ss:$16 sps:$4 sm:$0xff]  }
 0x808   : > { %6399 = vmatprep.subr.bf16.mxu0 %v18504_v5  ;;  %v18634_v5 = vld [vmem:[%s25322_s8 + $0x4c4] ss:$16 sps:$4 sm:$0xff]  }
 0x80b   : > { %6400 = vmatpush1.bf16.msra.mxu0 %v18502_v32  ;;  %v18637_v32 = vld [vmem:[%s25322_s8 + $0x4c0] ss:$16 sps:$4 sm:$0xff]  }
 0x80c   : > { %6528 = vmatprep.subr.bf16.mxu0 %v18507_v60  ;;  %v18641_v60 = vld [vmem:[%s25322_s8 + $0x4e4] ss:$16 sps:$4 sm:$0xff]  }
 0x80e   : > { %6418 = vmatmul.mubr.bf16.vlgmr.msra.gmra.mrb[72].mxu0 %v4577_v53  ;;  %v18523_v53 = vld [vmem:[#allocation7 + $0x6e0] ss:$8 sps:$4 sm:$0xff]  }
 0x80f   : > { %6529 = vmatpush1.bf16.msra.mxu0 %v18505_v21  ;;  %6560 = vmatprep.mubr.bf16.mxu0 %v25456_v49  ;;  %v18643_v21 = vld [vmem:[%s25322_s8 + $0x4e0] ss:$16 sps:$4 sm:$0xff]  }
 0x810   : > { %6530 = vmatprep.subr.bf16.mxu0 %v18510_v44  ;;  %v18647_v44 = vld [vmem:[%s25322_s8 + $0x504] ss:$16 sps:$4 sm:$0xff]  }
 0x813   : > { %6531 = vmatpush1.bf16.msra.mxu0 %v18508_v18  ;;  %v18650_v18 = vld [vmem:[%s25322_s8 + $0x500] ss:$16 sps:$4 sm:$0xff]  }
 0x814   : > { %6532 = vmatprep.subr.bf16.mxu0 %v18513_v62  ;;  %v18654_v62 = vld [vmem:[%s25322_s8 + $0x524] ss:$16 sps:$4 sm:$0xff]  }
 0x817   : > { %6533 = vmatpush1.bf16.msra.mxu0 %v18511_v0  ;;  %v6863_v0 = vsub.s32 2, %v25455_v9 }
 0x818   : > { %6534 = vmatprep.subr.bf16.mxu0 %v18516_v43  ;;  %v18656_v43 = vld [vmem:[%s25322_s8 + $0x520] ss:$16 sps:$4 sm:$0xff]  }
 0x81b   : > { %6535 = vmatpush1.bf16.msra.mxu0 %v18514_v46  ;;  %v18660_v46 = vld [vmem:[%s25322_s8 + $0x544] ss:$16 sps:$4 sm:$0xff]  }
 0x81c   : > { %6536 = vmatprep.subr.bf16.mxu0 %v18519_v25  ;;  %v498_v25 = vld [vmem:[#allocation10 + $0x8] sm:$0xff] }
 0x81f   : > { %6537 = vmatpush1.bf16.msra.mxu0 %v18517_v61  ;;  %v20135_v61 = vld [vmem:[#allocation10] sm:$0xff] }
 0x820   : > { %6538 = vmatprep.subr.bf16.mxu0 %v18522_v54  ;;  %v6864_v54 = vrot.slane %v20135_v61, %v6863_v0  ;;  %v18664_v61 = vld [vmem:[%s25322_s8 + $0x3a0] ss:$16 sps:$4 sm:$0xff]  }
 0x823   : > { %6539 = vmatpush1.bf16.msra.mxu0 %v18520_v26  ;;  %v6868_v26 = vrot.slane %v498_v25, %v6863_v0  ;;  %v18610_v0 = vld [vmem:[#allocation4 + $0x50] sm:$0xff]   ;;  %v18623_v25 = vld [vmem:[#allocation4 + $0x58] sm:$0xff]  }
 0x824   : > { %6540 = vmatprep.subr.bf16.mxu0 %v18525_v58  ;;  %v18663_v58 = vld [vmem:[%s25322_s8 + $0x540] ss:$16 sps:$4 sm:$0xff]  }
 0x827   : > { %6541 = vmatpush1.bf16.msra.mxu0 %v18523_v53 }
 0x828   : > { %6542 = vmatprep.subr.bf16.mxu0 %v18528_v56 }
 0x82b   : > { %6543 = vmatpush1.bf16.msra.mxu0 %v18526_v6 }
 0x82c   : > { %6671 = vmatprep.subr.bf16.mxu0 %v18531_v22 }
 0x82e   : > { %6561 = vmatmul.mubr.bf16.vlgmr.msra.gmra.mrb[72].mxu0 %v4578_v34  ;;  %v18547_v34 = vld [vmem:[#allocation7 + $0x760] ss:$8 sps:$4 sm:$0xff]  }
 0x82f   : > { %6672 = vmatpush1.bf16.msra.mxu0 %v18529_v36  ;;  %6703 = vmatprep.mubr.bf16.mxu0 %v25456_v49 }
 0x830   : > { %6673 = vmatprep.subr.bf16.mxu0 %v18534_v50 }
 0x833   : > { %6674 = vmatpush1.bf16.msra.mxu0 %v18532_v11 }
 0x834   : > { %6675 = vmatprep.subr.bf16.mxu0 %v18537_v57 }
 0x837   : > { %6676 = vmatpush1.bf16.msra.mxu0 %v18535_v40 }
 0x838   : > { %6677 = vmatprep.subr.bf16.mxu0 %v18540_v55 }
 0x83b   : > { %6678 = vmatpush1.bf16.msra.mxu0 %v18538_v29 }
 0x83c   : > { %6679 = vmatprep.subr.bf16.mxu0 %v18543_v8 }
 0x83f   : > { %6680 = vmatpush1.bf16.msra.mxu0 %v18541_v31 }
 0x840   : > { %6681 = vmatprep.subr.bf16.mxu0 %v18546_v23 }
 0x843   : > { %6682 = vmatpush1.bf16.msra.mxu0 %v18544_v45 }
 0x844   : > { %6683 = vmatprep.subr.bf16.mxu0 %v18549_v10 }
 0x847   : > { %6684 = vmatpush1.bf16.msra.mxu0 %v18547_v34 }
 0x848   : > { %6685 = vmatprep.subr.bf16.mxu0 %v18552_v1 }
 0x84b   : > { %6686 = vmatpush1.bf16.msra.mxu0 %v18550_v39  ;;  %v18587_v39 = vld [vmem:[%s25322_s8 + $0x204] ss:$16 sps:$4 sm:$0xff]  }
 0x84c   : > { %6814 = vmatprep.subr.bf16.mxu0 %v18555_v19  ;;  %v18577_v19 = vld [vmem:[#allocation4] sm:$0xff]  }
 0x84e   : > { %6704 = vmatmul.mubr.bf16.vlgmr.msra.gmra.mrb[72].mxu0 %v4579_v16  ;;  %v18571_v16 = vld [vmem:[#allocation7 + $0x7e0] ss:$8 sps:$4 sm:$0xff]  }
 0x84f   : > { %6815 = vmatpush1.bf16.msra.mxu0 %v18553_v30  ;;  %6846 = vmatprep.mubr.bf16.mxu0 %v25456_v49  ;;  %v18585_v30 = vld [vmem:[%s25322_s8 + $0x200] ss:$16 sps:$4 sm:$0xff]  }
 0x850   : > { %6816 = vmatprep.subr.bf16.mxu0 %v18558_v12  ;;  %v18591_v12 = vld [vmem:[%s25322_s8 + $0x224] ss:$16 sps:$4 sm:$0xff]  }
 0x853   : > { %6817 = vmatpush1.bf16.msra.mxu0 %v18556_v37  ;;  %v18589_v37 = vld [vmem:[%s25322_s8 + $0x220] ss:$16 sps:$4 sm:$0xff]  }
 0x854   : > { %6818 = vmatprep.subr.bf16.mxu0 %v18561_v28  ;;  %v18594_v28 = vld [vmem:[%s25322_s8 + $0x244] ss:$16 sps:$4 sm:$0xff]  }
 0x857   : > { %6819 = vmatpush1.bf16.msra.mxu0 %v18559_v51  ;;  %v18578_v51 = vld [vmem:[#allocation4 + $0x8] sm:$0xff]  }
 0x858   : > { %6820 = vmatprep.subr.bf16.mxu0 %v18564_v24  ;;  %v18592_v24 = vld [vmem:[%s25322_s8 + $0x240] ss:$16 sps:$4 sm:$0xff]  }
 0x85b   : > { %6821 = vmatpush1.bf16.msra.mxu0 %v18562_v35  ;;  %v18601_v35 = vld [vmem:[%s25322_s8 + $0x264] ss:$16 sps:$4 sm:$0xff]  }
 0x85c   : > { %6822 = vmatprep.subr.bf16.mxu0 %v18567_v38  ;;  %v18599_v38 = vld [vmem:[%s25322_s8 + $0x260] ss:$16 sps:$4 sm:$0xff]  }
 0x85f   : > { %6823 = vmatpush1.bf16.msra.mxu0 %v18565_v4  ;;  %v18607_v4 = vld [vmem:[%s25322_s8 + $0x284] ss:$16 sps:$4 sm:$0xff]  }
 0x860   : > { %6824 = vmatprep.subr.bf16.mxu0 %v18570_v27  ;;  %v18579_v27 = vld [vmem:[#allocation4 + $0x10] sm:$0xff]  }
 0x863   : > { %6825 = vmatpush1.bf16.msra.mxu0 %v18568_v48  ;;  %v18605_v48 = vld [vmem:[%s25322_s8 + $0x280] ss:$16 sps:$4 sm:$0xff]  }
 0x864   : > { %6826 = vmatprep.subr.bf16.mxu0 %v18573_v20  ;;  %v18614_v20 = vld [vmem:[%s25322_s8 + $0x2a4] ss:$16 sps:$4 sm:$0xff]  }
 0x867   : > { %6827 = vmatpush1.bf16.msra.mxu0 %v18571_v16  ;;  %v18612_v16 = vld [vmem:[%s25322_s8 + $0x2a0] ss:$16 sps:$4 sm:$0xff]  }
 0x868   : > { %6828 = vmatprep.subr.bf16.mxu0 %v18576_v63  ;;  %v18620_v63 = vld [vmem:[%s25322_s8 + $0x2c4] ss:$16 sps:$4 sm:$0xff]  }
 0x86b   : > { %6829 = vmatpush1.bf16.msra.mxu0 %v18574_v7  ;;  %v18580_v7 = vld [vmem:[#allocation4 + $0x18] sm:$0xff]  }
 0x86e   : > { %6847 = vmatmul.mubr.bf16.vlgmr.msra.gmra.mrb[72].mxu0 %v4580_v14  ;;  %v18611_v14 = vld [vmem:[%s25322_s8 + $0x440] ss:$16 sps:$4 sm:$0xff]  }
 0x86f   : > { %7080 = vmatprep.mubr.bf16.mxu0 %v25456_v49  ;;  %8602 = vmatpush1.bf16.msra.mxu1 %v18611_v14  ;;  %v18631_v14 = vld [vmem:[%s25322_s8 + $0x300] ss:$16 sps:$4 sm:$0xff]  }
 0x870   : > { %8603 = vmatprep.subr.bf16.mxu1 %v18615_v3  ;;  %v18640_v3 = vld [vmem:[%s25322_s8 + $0x324] ss:$16 sps:$4 sm:$0xff]  }
 0x873   : > { %8604 = vmatpush1.bf16.msra.mxu1 %v18617_v59  ;;  %v18638_v59 = vld [vmem:[%s25322_s8 + $0x320] ss:$16 sps:$4 sm:$0xff]  }
 0x874   : > { %8605 = vmatprep.subr.bf16.mxu1 %v18621_v41  ;;  %v18646_v41 = vld [vmem:[%s25322_s8 + $0x344] ss:$16 sps:$4 sm:$0xff]  }
 0x877   : > { %8606 = vmatpush1.bf16.msra.mxu1 %v18624_v15  ;;  %v18582_v15 = vld [vmem:[#allocation4 + $0x28] sm:$0xff]  }
 0x878   : > { %8607 = vmatprep.subr.bf16.mxu1 %v18628_v33  ;;  %v18644_v33 = vld [vmem:[%s25322_s8 + $0x340] ss:$16 sps:$4 sm:$0xff]  }
 0x87b   : > { %8608 = vmatpush1.bf16.msra.mxu1 %v18630_v17  ;;  %v18653_v17 = vld [vmem:[%s25322_s8 + $0x364] ss:$16 sps:$4 sm:$0xff]  }
 0x87c   : > { %8609 = vmatprep.subr.bf16.mxu1 %v18634_v5  ;;  %v18651_v5 = vld [vmem:[%s25322_s8 + $0x360] ss:$16 sps:$4 sm:$0xff]  }
 0x87f   : > { %8610 = vmatpush1.bf16.msra.mxu1 %v18637_v32  ;;  %v18659_v32 = vld [vmem:[%s25322_s8 + $0x384] ss:$16 sps:$4 sm:$0xff]  }
 0x880   : > { %8611 = vmatprep.subr.bf16.mxu1 %v18641_v60  ;;  %v18583_v60 = vld [vmem:[#allocation4 + $0x30] sm:$0xff]  }
 0x883   : > { %8612 = vmatpush1.bf16.msra.mxu1 %v18643_v21  ;;  %v18657_v21 = vld [vmem:[%s25322_s8 + $0x380] ss:$16 sps:$4 sm:$0xff]  }
 0x884   : > { %8613 = vmatprep.subr.bf16.mxu1 %v18647_v44  ;;  %v18584_v44 = vld [vmem:[#allocation4 + $0x38] sm:$0xff]  }
 0x887   : > { %8614 = vmatpush1.bf16.msra.mxu1 %v18650_v18  ;;  %v18588_v18 = vld [vmem:[#allocation4 + $0x40] sm:$0xff]  }
 0x888   : > { %8615 = vmatprep.subr.bf16.mxu1 %v18654_v62  ;;  %v18597_v62 = vld [vmem:[#allocation4 + $0x48] sm:$0xff]  }
 0x88b   : > { %8616 = vmatpush1.bf16.msra.mxu1 %v18656_v43  ;;  %v18666_v43 = vld [vmem:[%s25322_s8 + $0x3a4] ss:$16 sps:$4 sm:$0xff]  }
 0x88c   : > { %8617 = vmatprep.subr.bf16.mxu1 %v18660_v46  ;;  %v18667_v46 = vld [vmem:[%s25322_s8 + $0x564] ss:$16 sps:$4 sm:$0xff]  }
 0x88f   : > { %8618 = vmatpush1.bf16.msra.mxu1 %v18663_v58  ;;  %v18672_v58 = vld [vmem:[%s25322_s8 + $0x3c4] ss:$16 sps:$4 sm:$0xff]  }
 0x890   : > { %8619 = vmatprep.subr.bf16.mxu1 %v18667_v46  ;;  %v18713_v46 = vld [vmem:[%s25322_s8 + $0x2a8] ss:$16 sps:$4 sm:$0xff]  }
 0x941   : > { %v6848_v53 = vpop.f32.mrb[72].mxu0 }
 0x942   : > { %v6869_v56 = vadd.f32 %v6864_v54, %v6848_v53  ;;  %v6850_v6 = vpop.f32.mrb[73].mxu0  ;;  %v18673_v53 = vld [vmem:[%s25322_s8 + $0x584] ss:$16 sps:$4 sm:$0xff]  }
 0x943   : > { %v6870_v22 = vadd.f32 %v6868_v26, %v6850_v6  ;;  %v6852_v36 = vpop.f32.mrb[74].mxu0  ;;  %v18679_v6 = vld [vmem:[%s25322_s8 + $0x3e4] ss:$16 sps:$4 sm:$0xff]  }
 0x944   : > { %v6877_v50 = vmul.f32 0.2, %v6869_v56  ;;  %v6871_v11 = vadd.f32 %v6864_v54, %v6852_v36  ;;  %v6854_v57 = vpop.f32.mrb[75].mxu0  ;;  %vm6873_vm0 = vcmp.ge.f32.partialorder %v6869_v56, 0.0  ;;  %v18669_v54 = vld [vmem:[%s25322_s8 + $0x560] ss:$16 sps:$4 sm:$0xff]  }
 0x945   : > { %v6878_v40 = vmul.f32 0.2, %v6870_v22  ;;  %v6872_v55 = vadd.f32 %v6868_v26, %v6854_v57  ;;  %vm6874_vm11 = vcmp.ge.f32.partialorder %v6870_v22, 0.0  ;;  %8620 = vmatpush1.bf16.msra.mxu1 %v18669_v54  ;;  %v18670_v26 = vld [vmem:[%s25322_s8 + $0x3c0] ss:$16 sps:$4 sm:$0xff]  }
 0x946   : > { %vm6875_vm12 = vcmp.ge.f32.partialorder %v6871_v11, 0.0  ;;  %v6879_v29 = vmul.f32 0.2, %v6871_v11  ;;  %v6881_v31 = vsel %vm6873_vm0, %v6869_v56, %v6877_v50  ;;  %v18676_v56 = vld [vmem:[%s25322_s8 + $0x580] ss:$16 sps:$4 sm:$0xff]   ;;  %8621 = vmatprep.subr.bf16.mxu1 %v18673_v53 }
 0x947   : > { %vm6876_vm13 = vcmp.ge.f32.partialorder %v6872_v55, 0.0  ;;  %v6880_v8 = vmul.f32 0.2, %v6872_v55  ;;  %v6882_v10 = vsel %vm6874_vm11, %v6870_v22, %v6878_v40  ;;  %v18680_v22 = vld [vmem:[%s25322_s8 + $0x5a4] ss:$16 sps:$4 sm:$0xff]  }
 0x948   : > { %v6883_v23 = vsel %vm6875_vm12, %v6871_v11, %v6879_v29  ;;  %v18636_v36 = vld [vmem:[#allocation4 + $0x60] sm:$0xff]   ;;  %v18685_v57 = vld [vmem:[%s25322_s8 + $0x20c] ss:$16 sps:$4 sm:$0xff]  }
 0x949   : > { %v6885_v45 = vpack.c.bf16 %v6883_v23, %v6881_v31  ;;  %v6884_v34 = vsel %vm6876_vm13, %v6872_v55, %v6880_v8  ;;  %8622 = vmatpush1.bf16.msra.mxu1 %v18676_v56  ;;  %v18677_v50 = vld [vmem:[%s25322_s8 + $0x3e0] ss:$16 sps:$4 sm:$0xff]   ;;  %v18686_v40 = vld [vmem:[%s25322_s8 + $0x5c4] ss:$16 sps:$4 sm:$0xff]   ;;  %v18649_v29 = vld [vmem:[#allocation4 + $0x68] sm:$0xff]  }
 0x94a   : > { %v6886_v1 = vpack.c.bf16 %v6884_v34, %v6882_v10  ;;  %v18682_v11 = vld [vmem:[%s25322_s8 + $0x5a0] ss:$16 sps:$4 sm:$0xff]   ;;  %8623 = vmatprep.subr.bf16.mxu1 %v18680_v22  ;;  %v18692_v8 = vld [vmem:[%s25322_s8 + $0x5e4] ss:$16 sps:$4 sm:$0xff]   ;;  %v18700_v23 = vld [vmem:[%s25322_s8 + $0x40c] ss:$16 sps:$4 sm:$0xff]  }
 0x94b   : > { %v18688_v55 = vld [vmem:[%s25322_s8 + $0x5c0] ss:$16 sps:$4 sm:$0xff]   ;;  %v18675_v10 = vld [vmem:[#allocation4 + $0x78] sm:$0xff]  }
 0x94c   : > { %7048 = vmatprep.subr.bf16.mxu0 %v6886_v1  ;;  %v18694_v31 = vld [vmem:[%s25322_s8 + $0x5e0] ss:$16 sps:$4 sm:$0xff]   ;;  %v18724_v54 = vld [vmem:[%s25322_s8 + $0x48c] ss:$16 sps:$4 sm:$0xff]   ;;  %v18728_v22 = vld [vmem:[%s25322_s8 + $0x4a8] ss:$16 sps:$4 sm:$0xff]  }
 0x94d   : > { %7049 = vmatpush1.bf16.msra.mxu0 %v6885_v45  ;;  %8624 = vmatpush1.bf16.msra.mxu1 %v18682_v11  ;;  %v18662_v45 = vld [vmem:[#allocation4 + $0x70] sm:$0xff]   ;;  %v18727_v53 = vld [vmem:[%s25322_s8 + $0x2ec] ss:$16 sps:$4 sm:$0xff]   ;;  %v18731_v11 = vld [vmem:[%s25322_s8 + $0x308] ss:$16 sps:$4 sm:$0xff]  }
 0x94e   : > { %7721 = vmatprep.subr.bf16.mxu0 %v18587_v39  ;;  %8625 = vmatprep.subr.bf16.mxu1 %v18686_v40  ;;  %v18730_v56 = vld [vmem:[%s25322_s8 + $0x4ac] ss:$16 sps:$4 sm:$0xff]  }
 0x94f   : > { %v18739_v40 = vld [vmem:[%s25322_s8 + $0x32c] ss:$16 sps:$4 sm:$0xff]  }
 0x950   : > { %15963 = vmatmul.mubr.msk.bf16.vlgmr.msra.gmra.mrb[76].mxu0 %vm6999_vm14, %v18577_v19 }
 0x951   : > { %7090 = vmatprep.mubr.bf16.mxu0 %v25456_v49  ;;  %7722 = vmatpush1.bf16.msra.mxu0 %v18585_v30 }
 0x952   : > { %7723 = vmatprep.subr.bf16.mxu0 %v18591_v12  ;;  %8626 = vmatpush1.bf16.msra.mxu1 %v18688_v55  ;;  %v18742_v55 = vld [vmem:[%s25322_s8 + $0x4ec] ss:$16 sps:$4 sm:$0xff]  }
 0x953   : > { %8627 = vmatprep.subr.bf16.mxu1 %v18692_v8  ;;  %v18740_v8 = vld [vmem:[%s25322_s8 + $0x4e8] ss:$16 sps:$4 sm:$0xff]  }
 0x955   : > { %7724 = vmatpush1.bf16.msra.mxu0 %v18589_v37 }
 0x956   : > { %7725 = vmatprep.subr.bf16.mxu0 %v18594_v28  ;;  %8628 = vmatpush1.bf16.msra.mxu1 %v18694_v31  ;;  %v18745_v31 = vld [vmem:[%s25322_s8 + $0x34c] ss:$16 sps:$4 sm:$0xff]  }
 0x957   : > { %8640 = vmatprep.subr.bf16.mxu1 %v18700_v23  ;;  %v18748_v23 = vld [vmem:[%s25322_s8 + $0x50c] ss:$16 sps:$4 sm:$0xff]  }
 0x958   : > { %15964 = vmatmul.mubr.msk.bf16.gmra.mrb[80].mxu0 %vm6999_vm14, %v18578_v51 }
 0x959   : > { %7100 = vmatprep.mubr.bf16.mxu0 %v25456_v49  ;;  %7726 = vmatpush1.bf16.msra.mxu0 %v18592_v24 }
 0x95a   : > { %7727 = vmatprep.subr.bf16.mxu0 %v18601_v35 }
 0x95d   : > { %7728 = vmatpush1.bf16.msra.mxu0 %v18599_v38 }
 0x95e   : > { %7729 = vmatprep.subr.bf16.mxu0 %v18607_v4  ;;  %v18683_v4 = vld [vmem:[%s25322_s8 + $0x208] ss:$16 sps:$4 sm:$0xff]  }
 0x960   : > { %15965 = vmatmul.mubr.msk.bf16.gmra.mrb[84].mxu0 %vm6999_vm14, %v18579_v27  ;;  %v18691_v27 = vld [vmem:[%s25322_s8 + $0x22c] ss:$16 sps:$4 sm:$0xff]  }
 0x961   : > { %7110 = vmatprep.mubr.bf16.mxu0 %v25456_v49  ;;  %7730 = vmatpush1.bf16.msra.mxu0 %v18605_v48 }
 0x962   : > { %7731 = vmatprep.subr.bf16.mxu0 %v18614_v20  ;;  %v18689_v20 = vld [vmem:[%s25322_s8 + $0x228] ss:$16 sps:$4 sm:$0xff]  }
 0x965   : > { %7732 = vmatpush1.bf16.msra.mxu0 %v18612_v16 }
 0x966   : > { %7733 = vmatprep.subr.bf16.mxu0 %v18620_v63  ;;  %v18697_v63 = vld [vmem:[%s25322_s8 + $0x24c] ss:$16 sps:$4 sm:$0xff]  }
 0x968   : > { %15966 = vmatmul.mubr.msk.bf16.gmra.mrb[88].mxu0 %vm6999_vm14, %v18580_v7 }
 0x969   : > { %7120 = vmatprep.mubr.bf16.mxu0 %v25456_v49  ;;  %7734 = vmatpush1.bf16.msra.mxu0 %v18618_v42 }
 0x96a   : > { %7735 = vmatprep.subr.bf16.mxu0 %v18627_v47 }
 0x96d   : > { %7736 = vmatpush1.bf16.msra.mxu0 %v18625_v2 }
 0x96e   : > { %7737 = vmatprep.subr.bf16.mxu0 %v18633_v13  ;;  %v18695_v13 = vld [vmem:[%s25322_s8 + $0x248] ss:$16 sps:$4 sm:$0xff]  }
 0x970   : > { %15967 = vmatmul.mubr.msk.bf16.gmra.mrb[92].mxu0 %vm6999_vm14, %v18581_v52  ;;  %v18698_v52 = vld [vmem:[%s25322_s8 + $0x408] ss:$16 sps:$4 sm:$0xff]  }
 0x971   : > { %7130 = vmatprep.mubr.bf16.mxu0 %v25456_v49  ;;  %7738 = vmatpush1.bf16.msra.mxu0 %v18631_v14  ;;  %v18703_v14 = vld [vmem:[%s25322_s8 + $0x26c] ss:$16 sps:$4 sm:$0xff]  }
 0x972   : > { %7739 = vmatprep.subr.bf16.mxu0 %v18640_v3  ;;  %v18706_v3 = vld [vmem:[%s25322_s8 + $0x42c] ss:$16 sps:$4 sm:$0xff]  }
 0x975   : > { %7740 = vmatpush1.bf16.msra.mxu0 %v18638_v59  ;;  %v18701_v59 = vld [vmem:[%s25322_s8 + $0x268] ss:$16 sps:$4 sm:$0xff]  }
 0x976   : > { %7741 = vmatprep.subr.bf16.mxu0 %v18646_v41  ;;  %v18704_v41 = vld [vmem:[%s25322_s8 + $0x428] ss:$16 sps:$4 sm:$0xff]  }
 0x978   : > { %15968 = vmatmul.mubr.msk.bf16.gmra.mrb[96].mxu0 %vm6999_vm14, %v18582_v15 }
 0x979   : > { %7140 = vmatprep.mubr.bf16.mxu0 %v25456_v49  ;;  %7742 = vmatpush1.bf16.msra.mxu0 %v18644_v33  ;;  %v18709_v33 = vld [vmem:[%s25322_s8 + $0x28c] ss:$16 sps:$4 sm:$0xff]  }
 0x97a   : > { %7743 = vmatprep.subr.bf16.mxu0 %v18653_v17  ;;  %v18712_v17 = vld [vmem:[%s25322_s8 + $0x44c] ss:$16 sps:$4 sm:$0xff]  }
 0x97d   : > { %7744 = vmatpush1.bf16.msra.mxu0 %v18651_v5 }
 0x97e   : > { %7745 = vmatprep.subr.bf16.mxu0 %v18659_v32 }
 0x980   : > { %15969 = vmatmul.mubr.msk.bf16.gmra.mrb[100].mxu0 %vm6999_vm14, %v18583_v60 }
 0x981   : > { %7150 = vmatprep.mubr.bf16.mxu0 %v25456_v49  ;;  %7746 = vmatpush1.bf16.msra.mxu0 %v18657_v21 }
 0x982   : > { %7747 = vmatprep.subr.bf16.mxu0 %v18666_v43  ;;  %v18718_v43 = vld [vmem:[%s25322_s8 + $0x46c] ss:$16 sps:$4 sm:$0xff]  }
 0x985   : > { %7748 = vmatpush1.bf16.msra.mxu0 %v18664_v61  ;;  %v18721_v61 = vld [vmem:[%s25322_s8 + $0x2cc] ss:$16 sps:$4 sm:$0xff]  }
 0x986   : > { %7749 = vmatprep.subr.bf16.mxu0 %v18672_v58  ;;  %v18722_v58 = vld [vmem:[%s25322_s8 + $0x488] ss:$16 sps:$4 sm:$0xff]  }
 0x988   : > { %15970 = vmatmul.mubr.msk.bf16.gmra.mrb[104].mxu0 %vm6999_vm14, %v18584_v44  ;;  %v18707_v44 = vld [vmem:[%s25322_s8 + $0x288] ss:$16 sps:$4 sm:$0xff]  }
 0x989   : > { %7160 = vmatprep.mubr.bf16.mxu0 %v25456_v49  ;;  %7750 = vmatpush1.bf16.msra.mxu0 %v18670_v26  ;;  %v18719_v26 = vld [vmem:[%s25322_s8 + $0x2c8] ss:$16 sps:$4 sm:$0xff]  }
 0x98a   : > { %7751 = vmatprep.subr.bf16.mxu0 %v18679_v6  ;;  %v18725_v6 = vld [vmem:[%s25322_s8 + $0x2e8] ss:$16 sps:$4 sm:$0xff]  }
 0x98d   : > { %7752 = vmatpush1.bf16.msra.mxu0 %v18677_v50  ;;  %v18736_v50 = vld [vmem:[%s25322_s8 + $0x4cc] ss:$16 sps:$4 sm:$0xff]  }
 0x98e   : > { %7764 = vmatprep.subr.bf16.mxu0 %v18685_v57  ;;  %v18734_v57 = vld [vmem:[%s25322_s8 + $0x4c8] ss:$16 sps:$4 sm:$0xff]  }
 0x990   : > { %15971 = vmatmul.mubr.msk.bf16.gmra.mrb[108].mxu0 %vm6999_vm14, %v18588_v18  ;;  %v18710_v18 = vld [vmem:[%s25322_s8 + $0x448] ss:$16 sps:$4 sm:$0xff]  }
 0x991   : > { %7170 = vmatprep.mubr.bf16.mxu0 %v25456_v49 }
 0x998   : > { %15972 = vmatmul.mubr.msk.bf16.gmra.mrb[112].mxu0 %vm6999_vm14, %v18597_v62 }
 0x999   : > { %7180 = vmatprep.mubr.bf16.mxu0 %v25456_v49 }
 0x9a0   : > { %15973 = vmatmul.mubr.msk.bf16.gmra.mrb[116].mxu0 %vm6999_vm14, %v18610_v0  ;;  %v18715_v0 = vld [vmem:[%s25322_s8 + $0x2ac] ss:$16 sps:$4 sm:$0xff]  }
 0x9a1   : > { %7190 = vmatprep.mubr.bf16.mxu0 %v25456_v49 }
 0x9a8   : > { %15974 = vmatmul.mubr.msk.bf16.gmra.mrb[120].mxu0 %vm6999_vm14, %v18623_v25  ;;  %v18716_v25 = vld [vmem:[%s25322_s8 + $0x468] ss:$16 sps:$4 sm:$0xff]  }
 0x9a9   : > { %7200 = vmatprep.mubr.bf16.mxu0 %v25456_v49 }
 0x9b0   : > { %15975 = vmatmul.mubr.msk.bf16.gmra.mrb[124].mxu0 %vm6999_vm14, %v18636_v36  ;;  %v18733_v36 = vld [vmem:[%s25322_s8 + $0x30c] ss:$16 sps:$4 sm:$0xff]  }
 0x9b1   : > { %7210 = vmatprep.mubr.bf16.mxu0 %v25456_v49 }
 0x9b8   : > { %15976 = vmatmul.mubr.msk.bf16.gmra.mrb[128].mxu0 %vm6999_vm14, %v18649_v29  ;;  %v18737_v29 = vld [vmem:[%s25322_s8 + $0x328] ss:$16 sps:$4 sm:$0xff]  }
 0x9b9   : > { %7220 = vmatprep.mubr.bf16.mxu0 %v25456_v49 }
 0x9c0   : > { %15977 = vmatmul.mubr.msk.bf16.gmra.mrb[132].mxu0 %vm6999_vm14, %v18662_v45  ;;  %v18743_v45 = vld [vmem:[%s25322_s8 + $0x348] ss:$16 sps:$4 sm:$0xff]  }
 0x9c1   : > { %7230 = vmatprep.mubr.bf16.mxu0 %v25456_v49 }
 0x9c8   : > { %15978 = vmatmul.mubr.msk.bf16.gmra.mrb[136].mxu0 %vm6999_vm14, %v18675_v10  ;;  %v18746_v10 = vld [vmem:[%s25322_s8 + $0x508] ss:$16 sps:$4 sm:$0xff]  }
 0xa23   : > { %v7082_v34 = vpop.f32.mrb[76].mxu0 }
 0xa24   : > { %v7084_v1 = vpop.f32.mrb[77].mxu0 }
 0xa25   : > { %v7086_v39 = vpop.f32.mrb[78].mxu0 }
 0xa26   : > { %v22272_v19 = vpack.c.bf16 %v7086_v39, %v7082_v34  ;;  %v7088_v30 = vpop.f32.mrb[79].mxu0  ;;  %v18751_v34 = vld [vmem:[%s25322_s8 + $0x36c] ss:$16 sps:$4 sm:$0xff]   ;;  %v18749_v39 = vld [vmem:[%s25322_s8 + $0x368] ss:$16 sps:$4 sm:$0xff]  }
 0xa27   : > { %v22274_v12 = vpack.c.bf16 %v7088_v30, %v7084_v1  ;;  %v18754_v1 = vld [vmem:[%s25322_s8 + $0x52c] ss:$16 sps:$4 sm:$0xff]   ;;  %v18752_v30 = vld [vmem:[%s25322_s8 + $0x528] ss:$16 sps:$4 sm:$0xff]  }
 0xa2b   : > { %v7092_v37 = vpop.f32.mrb[80].mxu0 }
 0xa2c   : > { %v7094_v28 = vpop.f32.mrb[81].mxu0 }
 0xa2d   : > { %v7096_v51 = vpop.f32.mrb[82].mxu0 }
 0xa2e   : > { %v22276_v24 = vpack.c.bf16 %v7096_v51, %v7092_v37  ;;  %v7098_v35 = vpop.f32.mrb[83].mxu0  ;;  %v18757_v37 = vld [vmem:[%s25322_s8 + $0x38c] ss:$16 sps:$4 sm:$0xff]   ;;  %v18755_v51 = vld [vmem:[%s25322_s8 + $0x388] ss:$16 sps:$4 sm:$0xff]  }
 0xa2f   : > { %v7244_v38 = vpack.c.bf16 %v7098_v35, %v7094_v28  ;;  %v18760_v28 = vld [vmem:[%s25322_s8 + $0x54c] ss:$16 sps:$4 sm:$0xff]   ;;  %v18758_v35 = vld [vmem:[%s25322_s8 + $0x548] ss:$16 sps:$4 sm:$0xff]  }
 0xa31   : > { %7753 = vmatprep.mubr.bf16.mxu0 %v7244_v38 }
 0xa32   : > { %7754 = vmatmul.mubr.bf16.vlgmr.msra.gmra.mrb[140].mxu0 %v22276_v24 }
 0xa33   : > { %7765 = vmatpush1.bf16.msra.mxu0 %v18683_v4  ;;  %v7102_v48 = vpop.f32.mrb[84].mxu0  ;;  %7796 = vmatprep.mubr.bf16.mxu0 %v7244_v38  ;;  %v18763_v38 = vld [vmem:[%s25322_s8 + $0x3ac] ss:$16 sps:$4 sm:$0xff]  }
 0xa34   : > { %v7104_v16 = vpop.f32.mrb[85].mxu0  ;;  %7766 = vmatprep.subr.bf16.mxu0 %v18691_v27  ;;  %v18766_v4 = vld [vmem:[%s25322_s8 + $0x56c] ss:$16 sps:$4 sm:$0xff]   ;;  %v18761_v27 = vld [vmem:[%s25322_s8 + $0x3a8] ss:$16 sps:$4 sm:$0xff]  }
 0xa35   : > { %v7106_v7 = vpop.f32.mrb[86].mxu0 }
 0xa36   : > { %v22291_v42 = vpack.c.bf16 %v7106_v7, %v7102_v48  ;;  %v7108_v47 = vpop.f32.mrb[87].mxu0  ;;  %v18764_v48 = vld [vmem:[%s25322_s8 + $0x568] ss:$16 sps:$4 sm:$0xff]  }
 0xa37   : > { %v7246_v2 = vpack.c.bf16 %v7108_v47, %v7104_v16  ;;  %7767 = vmatpush1.bf16.msra.mxu0 %v18689_v20  ;;  %v18769_v20 = vld [vmem:[%s25322_s8 + $0x3cc] ss:$16 sps:$4 sm:$0xff]   ;;  %v18770_v7 = vld [vmem:[%s25322_s8 + $0x588] ss:$16 sps:$4 sm:$0xff]  }
 0xa38   : > { %7768 = vmatprep.subr.bf16.mxu0 %v18697_v63  ;;  %v18772_v16 = vld [vmem:[%s25322_s8 + $0x58c] ss:$16 sps:$4 sm:$0xff]   ;;  %v18767_v63 = vld [vmem:[%s25322_s8 + $0x3c8] ss:$16 sps:$4 sm:$0xff]  }
 0xa39   : > { %8629 = vmatprep.mubr.bf16.mxu1 %v7246_v2  ;;  %v18775_v47 = vld [vmem:[%s25322_s8 + $0x3ec] ss:$16 sps:$4 sm:$0xff]  }
 0xa3a   : > { %8630 = vmatmul.mubr.bf16.vlgmr.msra.gmra.mrb[0].mxu1 %v22291_v42 }
 0xa3b   : > { %7769 = vmatpush1.bf16.msra.mxu0 %v18695_v13  ;;  %8641 = vmatpush1.bf16.msra.mxu1 %v18698_v52  ;;  %v7112_v15 = vpop.f32.mrb[88].mxu0  ;;  %v18773_v13 = vld [vmem:[%s25322_s8 + $0x3e8] ss:$16 sps:$4 sm:$0xff]  }
 0xa3c   : > { %8672 = vmatprep.mubr.bf16.mxu1 %v7246_v2  ;;  %7770 = vmatprep.subr.bf16.mxu0 %v18703_v14  ;;  %v7114_v5 = vpop.f32.mrb[89].mxu0  ;;  %v18778_v2 = vld [vmem:[%s25322_s8 + $0x5ac] ss:$16 sps:$4 sm:$0xff]   ;;  %v18776_v52 = vld [vmem:[%s25322_s8 + $0x5a8] ss:$16 sps:$4 sm:$0xff]  }
 0xa3d   : > { %8642 = vmatprep.subr.bf16.mxu1 %v18706_v3  ;;  %v7116_v32 = vpop.f32.mrb[90].mxu0  ;;  %v18781_v14 = vld [vmem:[%s25322_s8 + $0x4] ss:$16 sps:$4 sm:$0xff]   ;;  %v18784_v3 = vld [vmem:[%s25322_s8 + $0x5cc] ss:$16 sps:$4 sm:$0xff]  }
 0xa3e   : > { %v22318_v60 = vpack.c.bf16 %v7116_v32, %v7112_v15  ;;  %v7118_v21 = vpop.f32.mrb[91].mxu0  ;;  %v18787_v15 = vld [vmem:[%s25322_s8 + $0x24] ss:$16 sps:$4 sm:$0xff]  }
 0xa3f   : > { %7771 = vmatpush1.bf16.msra.mxu0 %v18701_v59  ;;  %8643 = vmatpush1.bf16.msra.mxu1 %v18704_v41  ;;  %v22326_v62 = vpack.c.bf16 %v7118_v21, %v7114_v5  ;;  %v18779_v59 = vld [vmem:[%s25322_s8] ss:$16 sps:$4 sm:$0xff]   ;;  %v18782_v41 = vld [vmem:[%s25322_s8 + $0x5c8] ss:$16 sps:$4 sm:$0xff]   ;;  %v18793_v32 = vld [vmem:[%s25322_s8 + $0x44] ss:$16 sps:$4 sm:$0xff]  }
 0xa40   : > { %7772 = vmatprep.subr.bf16.mxu0 %v18709_v33  ;;  %8644 = vmatprep.subr.bf16.mxu1 %v18712_v17  ;;  %v18790_v33 = vld [vmem:[%s25322_s8 + $0x5ec] ss:$16 sps:$4 sm:$0xff]   ;;  %v18785_v17 = vld [vmem:[%s25322_s8 + $0x20] ss:$16 sps:$4 sm:$0xff]   ;;  %v18788_v5 = vld [vmem:[%s25322_s8 + $0x5e8] ss:$16 sps:$4 sm:$0xff]  }
 0xa41   : > { %v18791_v21 = vld [vmem:[%s25322_s8 + $0x40] ss:$16 sps:$4 sm:$0xff]  }
 0xa43   : > { %7773 = vmatpush1.bf16.msra.mxu0 %v18707_v44  ;;  %8645 = vmatpush1.bf16.msra.mxu1 %v18710_v18  ;;  %v18794_v44 = vld [vmem:[%s25322_s8 + $0x600] ss:$16 sps:$4 sm:$0xff]   ;;  %v18799_v18 = vld [vmem:[%s25322_s8 + $0x64] ss:$16 sps:$4 sm:$0xff]  }
 0xa44   : > { %7774 = vmatprep.subr.bf16.mxu0 %v18715_v0  ;;  %8646 = vmatprep.subr.bf16.mxu1 %v18718_v43  ;;  %v18802_v0 = vld [vmem:[%s25322_s8 + $0x624] ss:$16 sps:$4 sm:$0xff]   ;;  %v18797_v43 = vld [vmem:[%s25322_s8 + $0x60] ss:$16 sps:$4 sm:$0xff]  }
 0xa47   : > { %7775 = vmatpush1.bf16.msra.mxu0 %v18713_v46  ;;  %8647 = vmatpush1.bf16.msra.mxu1 %v18716_v25  ;;  %v18800_v46 = vld [vmem:[%s25322_s8 + $0x620] ss:$16 sps:$4 sm:$0xff]   ;;  %v18805_v25 = vld [vmem:[%s25322_s8 + $0x84] ss:$16 sps:$4 sm:$0xff]  }
 0xa48   : > { %7776 = vmatprep.subr.bf16.mxu0 %v18721_v61  ;;  %8648 = vmatprep.subr.bf16.mxu1 %v18724_v54  ;;  %v18803_v61 = vld [vmem:[%s25322_s8 + $0x80] ss:$16 sps:$4 sm:$0xff]  }
 0xa49   : > { %v18806_v54 = vld [vmem:[%s25322_s8 + $0x640] ss:$16 sps:$4 sm:$0xff]  }
 0xa4b   : > { %7777 = vmatpush1.bf16.msra.mxu0 %v18719_v26  ;;  %8649 = vmatpush1.bf16.msra.mxu1 %v18722_v58  ;;  %v18811_v26 = vld [vmem:[%s25322_s8 + $0xa4] ss:$16 sps:$4 sm:$0xff]  }
 0xa4c   : > { %7778 = vmatprep.subr.bf16.mxu0 %v18727_v53  ;;  %8650 = vmatprep.subr.bf16.mxu1 %v18730_v56  ;;  %v18814_v58 = vld [vmem:[%s25322_s8 + $0x664] ss:$16 sps:$4 sm:$0xff]   ;;  %v18809_v53 = vld [vmem:[%s25322_s8 + $0xa0] ss:$16 sps:$4 sm:$0xff]  }
 0xa4d   : > { %v18812_v56 = vld [vmem:[%s25322_s8 + $0x660] ss:$16 sps:$4 sm:$0xff]  }
 0xa4f   : > { %7779 = vmatpush1.bf16.msra.mxu0 %v18725_v6  ;;  %8651 = vmatpush1.bf16.msra.mxu1 %v18728_v22  ;;  %v18817_v6 = vld [vmem:[%s25322_s8 + $0xc4] ss:$16 sps:$4 sm:$0xff]  }
 0xa50   : > { %7780 = vmatprep.subr.bf16.mxu0 %v18733_v36  ;;  %8652 = vmatprep.subr.bf16.mxu1 %v18736_v50  ;;  %v18820_v22 = vld [vmem:[%s25322_s8 + $0x684] ss:$16 sps:$4 sm:$0xff]   ;;  %v18815_v36 = vld [vmem:[%s25322_s8 + $0xc0] ss:$16 sps:$4 sm:$0xff]  }
 0xa51   : > { %v18818_v50 = vld [vmem:[%s25322_s8 + $0x680] ss:$16 sps:$4 sm:$0xff]  }
 0xa53   : > { %7781 = vmatpush1.bf16.msra.mxu0 %v18731_v11  ;;  %8653 = vmatpush1.bf16.msra.mxu1 %v18734_v57  ;;  %v18823_v11 = vld [vmem:[%s25322_s8 + $0xe4] ss:$16 sps:$4 sm:$0xff]  }
 0xa54   : > { %7782 = vmatprep.subr.bf16.mxu0 %v18739_v40  ;;  %8654 = vmatprep.subr.bf16.mxu1 %v18742_v55  ;;  %v18826_v57 = vld [vmem:[%s25322_s8 + $0x6a4] ss:$16 sps:$4 sm:$0xff]   ;;  %v18821_v40 = vld [vmem:[%s25322_s8 + $0xe0] ss:$16 sps:$4 sm:$0xff]  }
 0xa55   : > { %v18824_v55 = vld [vmem:[%s25322_s8 + $0x6a0] ss:$16 sps:$4 sm:$0xff]  }
 0xa57   : > { %7783 = vmatpush1.bf16.msra.mxu0 %v18737_v29  ;;  %8655 = vmatpush1.bf16.msra.mxu1 %v18740_v8  ;;  %v18829_v29 = vld [vmem:[%s25322_s8 + $0x104] ss:$16 sps:$4 sm:$0xff]  }
 0xa58   : > { %7784 = vmatprep.subr.bf16.mxu0 %v18745_v31  ;;  %8656 = vmatprep.subr.bf16.mxu1 %v18748_v23  ;;  %v18832_v8 = vld [vmem:[%s25322_s8 + $0x6c4] ss:$16 sps:$4 sm:$0xff]   ;;  %v18827_v31 = vld [vmem:[%s25322_s8 + $0x100] ss:$16 sps:$4 sm:$0xff]  }
 0xa59   : > { %v18830_v23 = vld [vmem:[%s25322_s8 + $0x6c0] ss:$16 sps:$4 sm:$0xff]  }
 0xa5b   : > { %7785 = vmatpush1.bf16.msra.mxu0 %v18743_v45  ;;  %8657 = vmatpush1.bf16.msra.mxu1 %v18746_v10  ;;  %v18835_v45 = vld [vmem:[%s25322_s8 + $0x124] ss:$16 sps:$4 sm:$0xff]  }
 0xa5c   : > { %7786 = vmatprep.subr.bf16.mxu0 %v18751_v34  ;;  %8658 = vmatprep.subr.bf16.mxu1 %v18754_v1  ;;  %v18838_v10 = vld [vmem:[%s25322_s8 + $0x6e4] ss:$16 sps:$4 sm:$0xff]   ;;  %v18833_v34 = vld [vmem:[%s25322_s8 + $0x120] ss:$16 sps:$4 sm:$0xff]  }
 0xa5d   : > { %v18836_v1 = vld [vmem:[%s25322_s8 + $0x6e0] ss:$16 sps:$4 sm:$0xff]  }
 0xa5f   : > { %7787 = vmatpush1.bf16.msra.mxu0 %v18749_v39  ;;  %8659 = vmatpush1.bf16.msra.mxu1 %v18752_v30  ;;  %v18841_v39 = vld [vmem:[%s25322_s8 + $0x144] ss:$16 sps:$4 sm:$0xff]  }
 0xa60   : > { %7788 = vmatprep.subr.bf16.mxu0 %v18757_v37  ;;  %8660 = vmatprep.subr.bf16.mxu1 %v18760_v28  ;;  %v18844_v30 = vld [vmem:[%s25322_s8 + $0x704] ss:$16 sps:$4 sm:$0xff]   ;;  %v18839_v37 = vld [vmem:[%s25322_s8 + $0x140] ss:$16 sps:$4 sm:$0xff]  }
 0xa61   : > { %v18842_v28 = vld [vmem:[%s25322_s8 + $0x700] ss:$16 sps:$4 sm:$0xff]  }
 0xa63   : > { %7789 = vmatpush1.bf16.msra.mxu0 %v18755_v51  ;;  %8661 = vmatpush1.bf16.msra.mxu1 %v18758_v35  ;;  %v18847_v51 = vld [vmem:[%s25322_s8 + $0x164] ss:$16 sps:$4 sm:$0xff]  }
 0xa64   : > { %7790 = vmatprep.subr.bf16.mxu0 %v18763_v38  ;;  %8662 = vmatprep.subr.bf16.mxu1 %v18766_v4  ;;  %v18850_v35 = vld [vmem:[%s25322_s8 + $0x724] ss:$16 sps:$4 sm:$0xff]   ;;  %v18845_v38 = vld [vmem:[%s25322_s8 + $0x160] ss:$16 sps:$4 sm:$0xff]  }
 0xa65   : > { %v18848_v4 = vld [vmem:[%s25322_s8 + $0x720] ss:$16 sps:$4 sm:$0xff]  }
 0xa67   : > { %7791 = vmatpush1.bf16.msra.mxu0 %v18761_v27  ;;  %8663 = vmatpush1.bf16.msra.mxu1 %v18764_v48  ;;  %v18853_v27 = vld [vmem:[%s25322_s8 + $0x184] ss:$16 sps:$4 sm:$0xff]  }
 0xa68   : > { %7792 = vmatprep.subr.bf16.mxu0 %v18769_v20  ;;  %8664 = vmatprep.subr.bf16.mxu1 %v18772_v16  ;;  %v18856_v48 = vld [vmem:[%s25322_s8 + $0x744] ss:$16 sps:$4 sm:$0xff]   ;;  %v18851_v20 = vld [vmem:[%s25322_s8 + $0x180] ss:$16 sps:$4 sm:$0xff]  }
 0xa69   : > { %v18854_v16 = vld [vmem:[%s25322_s8 + $0x740] ss:$16 sps:$4 sm:$0xff]  }
 0xa6b   : > { %7793 = vmatpush1.bf16.msra.mxu0 %v18767_v63  ;;  %8665 = vmatpush1.bf16.msra.mxu1 %v18770_v7  ;;  %v18859_v63 = vld [vmem:[%s25322_s8 + $0x1a4] ss:$16 sps:$4 sm:$0xff]  }
 0xa6c   : > { %7794 = vmatprep.subr.bf16.mxu0 %v18775_v47  ;;  %8666 = vmatprep.subr.bf16.mxu1 %v18778_v2  ;;  %v18862_v7 = vld [vmem:[%s25322_s8 + $0x764] ss:$16 sps:$4 sm:$0xff]   ;;  %v18857_v47 = vld [vmem:[%s25322_s8 + $0x1a0] ss:$16 sps:$4 sm:$0xff]  }
 0xa6d   : > { %v18860_v2 = vld [vmem:[%s25322_s8 + $0x760] ss:$16 sps:$4 sm:$0xff]  }
 0xa6f   : > { %7795 = vmatpush1.bf16.msra.mxu0 %v18773_v13  ;;  %8667 = vmatpush1.bf16.msra.mxu1 %v18776_v52  ;;  %v18865_v13 = vld [vmem:[%s25322_s8 + $0x1c4] ss:$16 sps:$4 sm:$0xff]  }
 0xa70   : > { %8127 = vmatprep.subr.bf16.mxu0 %v18781_v14  ;;  %8668 = vmatprep.subr.bf16.mxu1 %v18784_v3  ;;  %v18868_v52 = vld [vmem:[%s25322_s8 + $0x784] ss:$16 sps:$4 sm:$0xff]   ;;  %v18863_v14 = vld [vmem:[%s25322_s8 + $0x1c0] ss:$16 sps:$4 sm:$0xff]  }
 0xa71   : > { %v18866_v3 = vld [vmem:[%s25322_s8 + $0x780] ss:$16 sps:$4 sm:$0xff]  }
 0xa72   : > { %7797 = vmatmul.mubr.bf16.vlgmr.msra.gmra.mrb[144].mxu0 %v22276_v24  ;;  %v18796_v24 = vld [vmem:[%s25322_s8 + $0x604] ss:$16 sps:$4 sm:$0xff]  }
 0xa73   : > { %8128 = vmatpush1.bf16.msra.mxu0 %v18779_v59  ;;  %8159 = vmatprep.mubr.bf16.mxu0 %v22274_v12  ;;  %v18871_v59 = vld [vmem:[%s25322_s8 + $0x1e4] ss:$16 sps:$4 sm:$0xff]  }
 0xa74   : > { %8669 = vmatpush1.bf16.msra.mxu1 %v18782_v41  ;;  %8129 = vmatprep.subr.bf16.mxu0 %v18787_v15  ;;  %v18874_v41 = vld [vmem:[%s25322_s8 + $0x7a4] ss:$16 sps:$4 sm:$0xff]   ;;  %v18869_v15 = vld [vmem:[%s25322_s8 + $0x1e0] ss:$16 sps:$4 sm:$0xff]  }
 0xa75   : > { %8670 = vmatprep.subr.bf16.mxu1 %v18790_v33  ;;  %v18872_v33 = vld [vmem:[%s25322_s8 + $0x7a0] ss:$16 sps:$4 sm:$0xff]  }
 0xa77   : > { %8130 = vmatpush1.bf16.msra.mxu0 %v18785_v17  ;;  %v18877_v17 = vld [vmem:[%s25322_s8 + $0xc] ss:$16 sps:$4 sm:$0xff]  }
 0xa78   : > { %8671 = vmatpush1.bf16.msra.mxu1 %v18788_v5  ;;  %8131 = vmatprep.subr.bf16.mxu0 %v18793_v32  ;;  %v18880_v5 = vld [vmem:[%s25322_s8 + $0x7c4] ss:$16 sps:$4 sm:$0xff]   ;;  %v18875_v32 = vld [vmem:[%s25322_s8 + $0x8] ss:$16 sps:$4 sm:$0xff]  }
 0xa79   : > { %9075 = vmatprep.subr.bf16.mxu1 %v18796_v24  ;;  %v18878_v24 = vld [vmem:[%s25322_s8 + $0x7c0] ss:$16 sps:$4 sm:$0xff]  }
 0xa7b   : > { %8673 = vmatmul.mubr.bf16.vlgmr.msra.gmra.mrb[4].mxu1 %v22291_v42  ;;  %8132 = vmatpush1.bf16.msra.mxu0 %v18791_v21  ;;  %v18808_v42 = vld [vmem:[%s25322_s8 + $0x644] ss:$16 sps:$4 sm:$0xff]   ;;  %v18883_v21 = vld [vmem:[%s25322_s8 + $0x2c] ss:$16 sps:$4 sm:$0xff]  }
 0xa7c   : > { %9076 = vmatpush1.bf16.msra.mxu1 %v18794_v44  ;;  %8133 = vmatprep.subr.bf16.mxu0 %v18799_v18  ;;  %v7122_v44 = vpop.f32.mrb[92].mxu0  ;;  %v18886_v18 = vld [vmem:[%s25322_s8 + $0x7e4] ss:$16 sps:$4 sm:$0xff]  }
 0xa7d   : > { %9077 = vmatprep.subr.bf16.mxu1 %v18802_v0  ;;  %9107 = vmatprep.mubr.bf16.mxu1 %v22326_v62  ;;  %v7124_v0 = vpop.f32.mrb[93].mxu0 }
 0xa7f   : > { %8134 = vmatpush1.bf16.msra.mxu0 %v18797_v43  ;;  %v7126_v43 = vpop.f32.mrb[94].mxu0 }
 0xa80   : > { %9078 = vmatpush1.bf16.msra.mxu1 %v18800_v46  ;;  %8135 = vmatprep.subr.bf16.mxu0 %v18805_v25  ;;  %v18881_v46 = vld [vmem:[%s25322_s8 + $0x28] ss:$16 sps:$4 sm:$0xff]   ;;  %v22679_v25 = vpack.c.bf16 %v7126_v43, %v7122_v44 }
 0xa81   : > { %9079 = vmatprep.subr.bf16.mxu1 %v18808_v42  ;;  %v18884_v42 = vld [vmem:[%s25322_s8 + $0x7e0] ss:$16 sps:$4 sm:$0xff]  }
 0xa83   : > { %8136 = vmatpush1.bf16.msra.mxu0 %v18803_v61  ;;  %v18889_v61 = vld [vmem:[%s25322_s8 + $0x4c] ss:$16 sps:$4 sm:$0xff]  }
 0xa84   : > { %9080 = vmatpush1.bf16.msra.mxu1 %v18806_v54  ;;  %8137 = vmatprep.subr.bf16.mxu0 %v18811_v26  ;;  %v7128_v54 = vpop.f32.mrb[95].mxu0 }
 0xa85   : > { %9081 = vmatprep.subr.bf16.mxu1 %v18814_v58  ;;  %v22690_v26 = vpack.c.bf16 %v7128_v54, %v7124_v0  ;;  %v18887_v58 = vld [vmem:[%s25322_s8 + $0x48] ss:$16 sps:$4 sm:$0xff]   ;;  %v18955_v0 = vld [vmem:[%s25322_s8 + $0x1ac] ss:$16 sps:$4 sm:$0xff]  }
 0xa87   : > { %8138 = vmatpush1.bf16.msra.mxu0 %v18809_v53  ;;  %v18890_v53 = vld [vmem:[%s25322_s8 + $0x608] ss:$16 sps:$4 sm:$0xff]  }
 0xa88   : > { %9082 = vmatpush1.bf16.msra.mxu1 %v18812_v56  ;;  %8139 = vmatprep.subr.bf16.mxu0 %v18817_v6  ;;  %v18895_v56 = vld [vmem:[%s25322_s8 + $0x6c] ss:$16 sps:$4 sm:$0xff]  }
 0xa89   : > { %9083 = vmatprep.subr.bf16.mxu1 %v18820_v22  ;;  %v18898_v6 = vld [vmem:[%s25322_s8 + $0x62c] ss:$16 sps:$4 sm:$0xff]   ;;  %v18893_v22 = vld [vmem:[%s25322_s8 + $0x68] ss:$16 sps:$4 sm:$0xff]  }
 0xa8b   : > { %8140 = vmatpush1.bf16.msra.mxu0 %v18815_v36  ;;  %v18896_v36 = vld [vmem:[%s25322_s8 + $0x628] ss:$16 sps:$4 sm:$0xff]  }
 0xa8c   : > { %9084 = vmatpush1.bf16.msra.mxu1 %v18818_v50  ;;  %8141 = vmatprep.subr.bf16.mxu0 %v18823_v11  ;;  %v18901_v50 = vld [vmem:[%s25322_s8 + $0x8c] ss:$16 sps:$4 sm:$0xff]  }
 0xa8d   : > { %9085 = vmatprep.subr.bf16.mxu1 %v18826_v57  ;;  %v18904_v11 = vld [vmem:[%s25322_s8 + $0x64c] ss:$16 sps:$4 sm:$0xff]   ;;  %v18899_v57 = vld [vmem:[%s25322_s8 + $0x88] ss:$16 sps:$4 sm:$0xff]  }
 0xa8f   : > { %8142 = vmatpush1.bf16.msra.mxu0 %v18821_v40  ;;  %v18907_v40 = vld [vmem:[%s25322_s8 + $0xac] ss:$16 sps:$4 sm:$0xff]  }
 0xa90   : > { %9086 = vmatpush1.bf16.msra.mxu1 %v18824_v55  ;;  %8143 = vmatprep.subr.bf16.mxu0 %v18829_v29  ;;  %v18910_v55 = vld [vmem:[%s25322_s8 + $0x66c] ss:$16 sps:$4 sm:$0xff]   ;;  %v18905_v29 = vld [vmem:[%s25322_s8 + $0xa8] ss:$16 sps:$4 sm:$0xff]  }
 0xa91   : > { %9087 = vmatprep.subr.bf16.mxu1 %v18832_v8  ;;  %v18908_v8 = vld [vmem:[%s25322_s8 + $0x668] ss:$16 sps:$4 sm:$0xff]  }
 0xa93   : > { %8144 = vmatpush1.bf16.msra.mxu0 %v18827_v31  ;;  %v18913_v31 = vld [vmem:[%s25322_s8 + $0xcc] ss:$16 sps:$4 sm:$0xff]  }
 0xa94   : > { %9088 = vmatpush1.bf16.msra.mxu1 %v18830_v23  ;;  %8145 = vmatprep.subr.bf16.mxu0 %v18835_v45  ;;  %v18916_v23 = vld [vmem:[%s25322_s8 + $0x68c] ss:$16 sps:$4 sm:$0xff]   ;;  %v18911_v45 = vld [vmem:[%s25322_s8 + $0xc8] ss:$16 sps:$4 sm:$0xff]  }
 0xa95   : > { %9089 = vmatprep.subr.bf16.mxu1 %v18838_v10  ;;  %v18914_v10 = vld [vmem:[%s25322_s8 + $0x688] ss:$16 sps:$4 sm:$0xff]  }
 0xa97   : > { %8146 = vmatpush1.bf16.msra.mxu0 %v18833_v34  ;;  %v18919_v34 = vld [vmem:[%s25322_s8 + $0xec] ss:$16 sps:$4 sm:$0xff]  }
 0xa98   : > { %9090 = vmatpush1.bf16.msra.mxu1 %v18836_v1  ;;  %8147 = vmatprep.subr.bf16.mxu0 %v18841_v39  ;;  %v18922_v1 = vld [vmem:[%s25322_s8 + $0x6ac] ss:$16 sps:$4 sm:$0xff]   ;;  %v18917_v39 = vld [vmem:[%s25322_s8 + $0xe8] ss:$16 sps:$4 sm:$0xff]  }
 0xa99   : > { %9091 = vmatprep.subr.bf16.mxu1 %v18844_v30  ;;  %v18920_v30 = vld [vmem:[%s25322_s8 + $0x6a8] ss:$16 sps:$4 sm:$0xff]  }
 0xa9b   : > { %8148 = vmatpush1.bf16.msra.mxu0 %v18839_v37  ;;  %v18925_v37 = vld [vmem:[%s25322_s8 + $0x10c] ss:$16 sps:$4 sm:$0xff]  }
 0xa9c   : > { %9092 = vmatpush1.bf16.msra.mxu1 %v18842_v28  ;;  %8149 = vmatprep.subr.bf16.mxu0 %v18847_v51  ;;  %v18928_v28 = vld [vmem:[%s25322_s8 + $0x6cc] ss:$16 sps:$4 sm:$0xff]   ;;  %v18923_v51 = vld [vmem:[%s25322_s8 + $0x108] ss:$16 sps:$4 sm:$0xff]  }
 0xa9d   : > { %9093 = vmatprep.subr.bf16.mxu1 %v18850_v35  ;;  %v18926_v35 = vld [vmem:[%s25322_s8 + $0x6c8] ss:$16 sps:$4 sm:$0xff]  }
 0xa9f   : > { %8150 = vmatpush1.bf16.msra.mxu0 %v18845_v38  ;;  %v18931_v38 = vld [vmem:[%s25322_s8 + $0x12c] ss:$16 sps:$4 sm:$0xff]  }
 0xaa0   : > { %9094 = vmatpush1.bf16.msra.mxu1 %v18848_v4  ;;  %8151 = vmatprep.subr.bf16.mxu0 %v18853_v27  ;;  %v18934_v4 = vld [vmem:[%s25322_s8 + $0x6ec] ss:$16 sps:$4 sm:$0xff]   ;;  %v18929_v27 = vld [vmem:[%s25322_s8 + $0x128] ss:$16 sps:$4 sm:$0xff]  }
 0xaa1   : > { %9095 = vmatprep.subr.bf16.mxu1 %v18856_v48  ;;  %v18932_v48 = vld [vmem:[%s25322_s8 + $0x6e8] ss:$16 sps:$4 sm:$0xff]  }
 0xaa3   : > { %8152 = vmatpush1.bf16.msra.mxu0 %v18851_v20  ;;  %v18937_v20 = vld [vmem:[%s25322_s8 + $0x14c] ss:$16 sps:$4 sm:$0xff]  }
 0xaa4   : > { %9096 = vmatpush1.bf16.msra.mxu1 %v18854_v16  ;;  %8153 = vmatprep.subr.bf16.mxu0 %v18859_v63  ;;  %v18940_v16 = vld [vmem:[%s25322_s8 + $0x70c] ss:$16 sps:$4 sm:$0xff]   ;;  %v18935_v63 = vld [vmem:[%s25322_s8 + $0x148] ss:$16 sps:$4 sm:$0xff]  }
 0xaa5   : > { %9097 = vmatprep.subr.bf16.mxu1 %v18862_v7  ;;  %v18938_v7 = vld [vmem:[%s25322_s8 + $0x708] ss:$16 sps:$4 sm:$0xff]  }
 0xaa7   : > { %8154 = vmatpush1.bf16.msra.mxu0 %v18857_v47  ;;  %v18943_v47 = vld [vmem:[%s25322_s8 + $0x16c] ss:$16 sps:$4 sm:$0xff]  }
 0xaa8   : > { %9098 = vmatpush1.bf16.msra.mxu1 %v18860_v2  ;;  %8155 = vmatprep.subr.bf16.mxu0 %v18865_v13  ;;  %v7132_v2 = vpop.f32.mrb[96].mxu0  ;;  %v18946_v13 = vld [vmem:[%s25322_s8 + $0x72c] ss:$16 sps:$4 sm:$0xff]  }
 0xaa9   : > { %9099 = vmatprep.subr.bf16.mxu1 %v18868_v52  ;;  %v7134_v52 = vpop.f32.mrb[97].mxu0 }
 0xaab   : > { %8156 = vmatpush1.bf16.msra.mxu0 %v18863_v14  ;;  %v7136_v14 = vpop.f32.mrb[98].mxu0 }
 0xaac   : > { %9100 = vmatpush1.bf16.msra.mxu1 %v18866_v3  ;;  %8157 = vmatprep.subr.bf16.mxu0 %v18871_v59  ;;  %v18941_v3 = vld [vmem:[%s25322_s8 + $0x168] ss:$16 sps:$4 sm:$0xff]   ;;  %v22805_v59 = vpack.c.bf16 %v7136_v14, %v7132_v2 }
 0xaad   : > { %9101 = vmatprep.subr.bf16.mxu1 %v18874_v41  ;;  %v18944_v41 = vld [vmem:[%s25322_s8 + $0x728] ss:$16 sps:$4 sm:$0xff]  }
 0xaae   : > { %v18974_v14 = vld [vmem:[%s25322_s8 + $0x7e8] ss:$16 sps:$4 sm:$0xff]  }
 0xaaf   : > { %8158 = vmatpush1.bf16.msra.mxu0 %v18869_v15  ;;  %v18949_v15 = vld [vmem:[%s25322_s8 + $0x18c] ss:$16 sps:$4 sm:$0xff]  }
 0xab0   : > { %9102 = vmatpush1.bf16.msra.mxu1 %v18872_v33  ;;  %8170 = vmatprep.subr.bf16.mxu0 %v18877_v17  ;;  %v7138_v33 = vpop.f32.mrb[99].mxu0  ;;  %v18952_v17 = vld [vmem:[%s25322_s8 + $0x74c] ss:$16 sps:$4 sm:$0xff]  }
 0xab1   : > { %9103 = vmatprep.subr.bf16.mxu1 %v18880_v5  ;;  %v22816_v5 = vpack.c.bf16 %v7138_v33, %v7134_v52 }
 0xab2   : > { %8160 = vmatmul.mubr.bf16.vlgmr.msra.gmra.mrb[140].mxu0 %v22272_v19 }
 0xab3   : > { %8171 = vmatpush1.bf16.msra.mxu0 %v18875_v32  ;;  %8202 = vmatprep.mubr.bf16.mxu0 %v22274_v12  ;;  %v18892_v12 = vld [vmem:[%s25322_s8 + $0x60c] ss:$16 sps:$4 sm:$0xff]   ;;  %v7142_v32 = vpop.f32.mrb[100].mxu0 }
 0xab4   : > { %9104 = vmatpush1.bf16.msra.mxu1 %v18878_v24  ;;  %8172 = vmatprep.subr.bf16.mxu0 %v18883_v21  ;;  %v7144_v24 = vpop.f32.mrb[101].mxu0  ;;  %v18947_v21 = vld [vmem:[%s25322_s8 + $0x188] ss:$16 sps:$4 sm:$0xff]  }
 0xab5   : > { %9105 = vmatprep.subr.bf16.mxu1 %v18886_v18  ;;  %v7146_v44 = vpop.f32.mrb[102].mxu0  ;;  %v18950_v18 = vld [vmem:[%s25322_s8 + $0x748] ss:$16 sps:$4 sm:$0xff]  }
 0xab6   : > { %v22827_v43 = vpack.c.bf16 %v7146_v44, %v7142_v32 }
 0xab7   : > { %8173 = vmatpush1.bf16.msra.mxu0 %v18881_v46  ;;  %v7148_v46 = vpop.f32.mrb[103].mxu0 }
 0xab8   : > { %9106 = vmatpush1.bf16.msra.mxu1 %v18884_v42  ;;  %8174 = vmatprep.subr.bf16.mxu0 %v18889_v61  ;;  %v18958_v42 = vld [vmem:[%s25322_s8 + $0x76c] ss:$16 sps:$4 sm:$0xff]   ;;  %v22832_v61 = vpack.c.bf16 %v7148_v46, %v7144_v24  ;;  %v7152_v54 = vpop.f32.mrb[104].mxu0  ;;  %v18977_v24 = vld [vmem:[%s25322_s8 + $0x800] ss:$16 sps:$4 sm:$0xff]  }
 0xab9   : > { %9118 = vmatprep.subr.bf16.mxu1 %v18892_v12  ;;  %v7154_v12 = vpop.f32.mrb[105].mxu0 }
 0xabb   : > { %9108 = vmatmul.mubr.bf16.vlgmr.msra.gmra.mrb[0].mxu1 %v22318_v60  ;;  %8175 = vmatpush1.bf16.msra.mxu0 %v18887_v58  ;;  %v18953_v58 = vld [vmem:[%s25322_s8 + $0x1a8] ss:$16 sps:$4 sm:$0xff]  }
 0xabc   : > { %9119 = vmatpush1.bf16.msra.mxu1 %v18890_v53  ;;  %9150 = vmatprep.mubr.bf16.mxu1 %v22326_v62  ;;  %v18902_v62 = vld [vmem:[%s25322_s8 + $0x648] ss:$16 sps:$4 sm:$0xff]   ;;  %v7156_v53 = vpop.f32.mrb[106].mxu0 }
 0xabd   : > { %8176 = vmatprep.subr.bf16.mxu0 %v18895_v56  ;;  %9120 = vmatprep.subr.bf16.mxu1 %v18898_v6  ;;  %v18956_v56 = vld [vmem:[%s25322_s8 + $0x768] ss:$16 sps:$4 sm:$0xff]   ;;  %v18961_v6 = vld [vmem:[%s25322_s8 + $0x1cc] ss:$16 sps:$4 sm:$0xff]  }
 0xabf   : > { %8177 = vmatpush1.bf16.msra.mxu0 %v18893_v22  ;;  %v22843_v22 = vpack.c.bf16 %v7156_v53, %v7152_v54 }
 0xac0   : > { %9121 = vmatpush1.bf16.msra.mxu1 %v18896_v36  ;;  %8178 = vmatprep.subr.bf16.mxu0 %v18901_v50  ;;  %v7158_v36 = vpop.f32.mrb[107].mxu0  ;;  %v18964_v50 = vld [vmem:[%s25322_s8 + $0x78c] ss:$16 sps:$4 sm:$0xff]  }
 0xac1   : > { %9122 = vmatprep.subr.bf16.mxu1 %v18904_v11  ;;  %v22848_v11 = vpack.c.bf16 %v7158_v36, %v7154_v12  ;;  %v18980_v12 = vld [vmem:[%s25322_s8 + $0x820] ss:$16 sps:$4 sm:$0xff]  }
 0xac3   : > { %8179 = vmatpush1.bf16.msra.mxu0 %v18899_v57  ;;  %v7162_v57 = vpop.f32.mrb[108].mxu0 }
 0xac4   : > { %9123 = vmatpush1.bf16.msra.mxu1 %v18902_v62  ;;  %8180 = vmatprep.subr.bf16.mxu0 %v18907_v40  ;;  %v7164_v62 = vpop.f32.mrb[109].mxu0  ;;  %v18959_v40 = vld [vmem:[%s25322_s8 + $0x1c8] ss:$16 sps:$4 sm:$0xff]  }
 0xac5   : > { %9124 = vmatprep.subr.bf16.mxu1 %v18910_v55  ;;  %v7166_v55 = vpop.f32.mrb[110].mxu0 }
 0xac7   : > { %8181 = vmatpush1.bf16.msra.mxu0 %v18905_v29  ;;  %v18962_v29 = vld [vmem:[%s25322_s8 + $0x788] ss:$16 sps:$4 sm:$0xff]  }
 0xac8   : > { %9125 = vmatpush1.bf16.msra.mxu1 %v18908_v8  ;;  %8182 = vmatprep.subr.bf16.mxu0 %v18913_v31  ;;  %v18967_v8 = vld [vmem:[%s25322_s8 + $0x1ec] ss:$16 sps:$4 sm:$0xff]   ;;  %v22859_v31 = vpack.c.bf16 %v7166_v55, %v7162_v57  ;;  %v18983_v57 = vld [vmem:[%s25322_s8 + $0x840] ss:$16 sps:$4 sm:$0xff]   ;;  %v18988_v55 = vld [vmem:[%s25322_s8 + $0x864] ss:$16 sps:$4 sm:$0xff]  }
 0xac9   : > { %9126 = vmatprep.subr.bf16.mxu1 %v18916_v23  ;;  %v7168_v23 = vpop.f32.mrb[111].mxu0 }
 0xacb   : > { %8183 = vmatpush1.bf16.msra.mxu0 %v18911_v45  ;;  %v18970_v45 = vld [vmem:[%s25322_s8 + $0x7ac] ss:$16 sps:$4 sm:$0xff]  }
 0xacc   : > { %9127 = vmatpush1.bf16.msra.mxu1 %v18914_v10  ;;  %8184 = vmatprep.subr.bf16.mxu0 %v18919_v34  ;;  %v22864_v10 = vpack.c.bf16 %v7168_v23, %v7164_v62  ;;  %v7172_v34 = vpop.f32.mrb[112].mxu0 }
 0xacd   : > { %9128 = vmatprep.subr.bf16.mxu1 %v18922_v1  ;;  %v7174_v1 = vpop.f32.mrb[113].mxu0 }
 0xacf   : > { %8185 = vmatpush1.bf16.msra.mxu0 %v18917_v39  ;;  %v18965_v39 = vld [vmem:[%s25322_s8 + $0x1e8] ss:$16 sps:$4 sm:$0xff]  }
 0xad0   : > { %9129 = vmatpush1.bf16.msra.mxu1 %v18920_v30  ;;  %8186 = vmatprep.subr.bf16.mxu0 %v18925_v37  ;;  %v7176_v30 = vpop.f32.mrb[114].mxu0  ;;  %v18968_v37 = vld [vmem:[%s25322_s8 + $0x7a8] ss:$16 sps:$4 sm:$0xff]  }
 0xad1   : > { %9130 = vmatprep.subr.bf16.mxu1 %v18928_v28  ;;  %v22872_v28 = vpack.c.bf16 %v7176_v30, %v7172_v34  ;;  %v18986_v34 = vld [vmem:[%s25322_s8 + $0x860] ss:$16 sps:$4 sm:$0xff]   ;;  %v18991_v30 = vld [vmem:[%s25322_s8 + $0x884] ss:$16 sps:$4 sm:$0xff]  }
 0xad3   : > { %8187 = vmatpush1.bf16.msra.mxu0 %v18923_v51  ;;  %v7178_v51 = vpop.f32.mrb[115].mxu0 }
 0xad4   : > { %9131 = vmatpush1.bf16.msra.mxu1 %v18926_v35  ;;  %8188 = vmatprep.subr.bf16.mxu0 %v18931_v38  ;;  %v18973_v35 = vld [vmem:[%s25322_s8 + $0x7cc] ss:$16 sps:$4 sm:$0xff]   ;;  %v22877_v38 = vpack.c.bf16 %v7178_v51, %v7174_v1  ;;  %v18989_v51 = vld [vmem:[%s25322_s8 + $0x880] ss:$16 sps:$4 sm:$0xff]  }
 0xad5   : > { %9132 = vmatprep.subr.bf16.mxu1 %v18934_v4  ;;  %v7182_v4 = vpop.f32.mrb[116].mxu0 }
 0xad7   : > { %8189 = vmatpush1.bf16.msra.mxu0 %v18929_v27  ;;  %v7184_v27 = vpop.f32.mrb[117].mxu0 }
 0xad8   : > { %9133 = vmatpush1.bf16.msra.mxu1 %v18932_v48  ;;  %8190 = vmatprep.subr.bf16.mxu0 %v18937_v20  ;;  %v7186_v48 = vpop.f32.mrb[118].mxu0  ;;  %v18971_v20 = vld [vmem:[%s25322_s8 + $0x7c8] ss:$16 sps:$4 sm:$0xff]  }
 0xad9   : > { %9134 = vmatprep.subr.bf16.mxu1 %v18940_v16  ;;  %v22882_v16 = vpack.c.bf16 %v7186_v48, %v7182_v4  ;;  %v18992_v4 = vld [vmem:[%s25322_s8 + $0x8a0] ss:$16 sps:$4 sm:$0xff]  }
 0xada   : > { %v18995_v48 = vld [vmem:[%s25322_s8 + $0x8c0] ss:$16 sps:$4 sm:$0xff]  }
 0xadb   : > { %8191 = vmatpush1.bf16.msra.mxu0 %v18935_v63  ;;  %v7188_v63 = vpop.f32.mrb[119].mxu0 }
 0xadc   : > { %9135 = vmatpush1.bf16.msra.mxu1 %v18938_v7  ;;  %8192 = vmatprep.subr.bf16.mxu0 %v18943_v47  ;;  %v18976_v7 = vld [vmem:[%s25322_s8 + $0x7ec] ss:$16 sps:$4 sm:$0xff]   ;;  %v22887_v47 = vpack.c.bf16 %v7188_v63, %v7184_v27  ;;  %v7192_v2 = vpop.f32.mrb[120].mxu0  ;;  %v18997_v27 = vld [vmem:[%s25322_s8 + $0x8c4] ss:$16 sps:$4 sm:$0xff]  }
 0xadd   : > { %9136 = vmatprep.subr.bf16.mxu1 %v18946_v13  ;;  %v7194_v13 = vpop.f32.mrb[121].mxu0  ;;  %v18998_v63 = vld [vmem:[%s25322_s8 + $0x8e0] ss:$16 sps:$4 sm:$0xff]  }
 0xade   : > { %v7196_v52 = vpop.f32.mrb[122].mxu0 }
 0xadf   : > { %8193 = vmatpush1.bf16.msra.mxu0 %v18941_v3  ;;  %v22894_v3 = vpack.c.bf16 %v7196_v52, %v7192_v2  ;;  %v19001_v2 = vld [vmem:[%s25322_s8 + $0x900] ss:$16 sps:$4 sm:$0xff]  }
 0xae0   : > { %9137 = vmatpush1.bf16.msra.mxu1 %v18944_v41  ;;  %8194 = vmatprep.subr.bf16.mxu0 %v18949_v15  ;;  %v7198_v41 = vpop.f32.mrb[123].mxu0  ;;  %v18979_v15 = vld [vmem:[%s25322_s8 + $0x804] ss:$16 sps:$4 sm:$0xff]   ;;  %v19004_v52 = vld [vmem:[%s25322_s8 + $0x920] ss:$16 sps:$4 sm:$0xff]  }
 0xae1   : > { %9138 = vmatprep.subr.bf16.mxu1 %v18952_v17  ;;  %v22899_v33 = vpack.c.bf16 %v7198_v41, %v7194_v13  ;;  %v19006_v13 = vld [vmem:[%s25322_s8 + $0x924] ss:$16 sps:$4 sm:$0xff]   ;;  %v19007_v41 = vld [vmem:[%s25322_s8 + $0x940] ss:$16 sps:$4 sm:$0xff]  }
 0xae3   : > { %8195 = vmatpush1.bf16.msra.mxu0 %v18947_v21 }
 0xae4   : > { %9139 = vmatpush1.bf16.msra.mxu1 %v18950_v18  ;;  %8196 = vmatprep.subr.bf16.mxu0 %v18955_v0  ;;  %v18982_v18 = vld [vmem:[%s25322_s8 + $0x824] ss:$16 sps:$4 sm:$0xff]  }
 0xae5   : > { %9140 = vmatprep.subr.bf16.mxu1 %v18958_v42 }
 0xae7   : > { %8197 = vmatpush1.bf16.msra.mxu0 %v18953_v58 }
 0xae8   : > { %9141 = vmatpush1.bf16.msra.mxu1 %v18956_v56  ;;  %8198 = vmatprep.subr.bf16.mxu0 %v18961_v6  ;;  %v18985_v56 = vld [vmem:[%s25322_s8 + $0x844] ss:$16 sps:$4 sm:$0xff]  }
 0xae9   : > { %9142 = vmatprep.subr.bf16.mxu1 %v18964_v50 }
 0xaeb   : > { %8199 = vmatpush1.bf16.msra.mxu0 %v18959_v40 }
 0xaec   : > { %9143 = vmatpush1.bf16.msra.mxu1 %v18962_v29  ;;  %8200 = vmatprep.subr.bf16.mxu0 %v18967_v8 }
 0xaed   : > { %9144 = vmatprep.subr.bf16.mxu1 %v18970_v45 }
 0xaef   : > { %8201 = vmatpush1.bf16.msra.mxu0 %v18965_v39 }
 0xaf0   : > { %9145 = vmatpush1.bf16.msra.mxu1 %v18968_v37 }
 0xaf1   : > { %9146 = vmatprep.subr.bf16.mxu1 %v18973_v35  ;;  %v18994_v35 = vld [vmem:[%s25322_s8 + $0x8a4] ss:$16 sps:$4 sm:$0xff]  }
 0xaf2   : > { %8203 = vmatmul.mubr.bf16.vlgmr.msra.gmra.mrb[144].mxu0 %v22272_v19  ;;  %v7202_v19 = vpop.f32.mrb[124].mxu0 }
 0xaf3   : > { %14999 = vmatprep.mubr.bf16.mxu0 %v25456_v49  ;;  %v7204_v17 = vpop.f32.mrb[125].mxu0 }
 0xaf4   : > { %9147 = vmatpush1.bf16.msra.mxu1 %v18971_v20  ;;  %v7206_v32 = vpop.f32.mrb[126].mxu0  ;;  %v19000_v20 = vld [vmem:[%s25322_s8 + $0x8e4] ss:$16 sps:$4 sm:$0xff]  }
 0xaf5   : > { %9148 = vmatprep.subr.bf16.mxu1 %v18976_v7  ;;  %v22904_v21 = vpack.c.bf16 %v7206_v32, %v7202_v19  ;;  %v7208_v44 = vpop.f32.mrb[127].mxu0  ;;  %v19003_v7 = vld [vmem:[%s25322_s8 + $0x904] ss:$16 sps:$4 sm:$0xff]   ;;  %v19010_v19 = vld [vmem:[%s25322_s8 + $0x960] ss:$16 sps:$4 sm:$0xff]  }
 0xaf6   : > { %v22909_v0 = vpack.c.bf16 %v7208_v44, %v7204_v17  ;;  %v7212_v46 = vpop.f32.mrb[128].mxu0  ;;  %v19015_v17 = vld [vmem:[%s25322_s8 + $0x984] ss:$16 sps:$4 sm:$0xff]   ;;  %v19013_v32 = vld [vmem:[%s25322_s8 + $0x980] ss:$16 sps:$4 sm:$0xff]  }
 0xaf7   : > { %v7214_v42 = vpop.f32.mrb[129].mxu0  ;;  %v19016_v44 = vld [vmem:[%s25322_s8 + $0x9a0] ss:$16 sps:$4 sm:$0xff]  }
 0xaf8   : > { %9149 = vmatpush1.bf16.msra.mxu1 %v18974_v14  ;;  %v7216_v54 = vpop.f32.mrb[130].mxu0  ;;  %v19009_v14 = vld [vmem:[%s25322_s8 + $0x944] ss:$16 sps:$4 sm:$0xff]  }
 0xaf9   : > { %9553 = vmatprep.subr.bf16.mxu1 %v18979_v15  ;;  %v22916_v58 = vpack.c.bf16 %v7216_v54, %v7212_v46  ;;  %v7218_v53 = vpop.f32.mrb[131].mxu0  ;;  %v19012_v15 = vld [vmem:[%s25322_s8 + $0x964] ss:$16 sps:$4 sm:$0xff]   ;;  %v19019_v46 = vld [vmem:[%s25322_s8 + $0x9c0] ss:$16 sps:$4 sm:$0xff]  }
 0xafa   : > { %v22921_v6 = vpack.c.bf16 %v7218_v53, %v7214_v42  ;;  %v7222_v36 = vpop.f32.mrb[132].mxu0  ;;  %v19024_v42 = vld [vmem:[%s25322_s8 + $0x9e4] ss:$16 sps:$4 sm:$0xff]   ;;  %v19022_v54 = vld [vmem:[%s25322_s8 + $0x9e0] ss:$16 sps:$4 sm:$0xff]  }
 0xafb   : > { %9151 = vmatmul.mubr.bf16.vlgmr.msra.gmra.mrb[4].mxu1 %v22318_v60  ;;  %v7224_v60 = vpop.f32.mrb[133].mxu0  ;;  %v19025_v53 = vld [vmem:[%s25322_s8 + $0x808] ss:$16 sps:$4 sm:$0xff]  }
 0xafc   : > { %9554 = vmatpush1.bf16.msra.mxu1 %v18977_v24  ;;  %9585 = vmatprep.mubr.bf16.mxu1 %v22690_v26  ;;  %v7226_v50 = vpop.f32.mrb[134].mxu0  ;;  %v19018_v24 = vld [vmem:[%s25322_s8 + $0x9a4] ss:$16 sps:$4 sm:$0xff]  }
 0xafd   : > { %9555 = vmatprep.subr.bf16.mxu1 %v18982_v18  ;;  %v22926_v62 = vpack.c.bf16 %v7226_v50, %v7222_v36  ;;  %v7228_v40 = vpop.f32.mrb[135].mxu0  ;;  %v19021_v18 = vld [vmem:[%s25322_s8 + $0x9c4] ss:$16 sps:$4 sm:$0xff]   ;;  %v19028_v36 = vld [vmem:[%s25322_s8 + $0x828] ss:$16 sps:$4 sm:$0xff]  }
 0xafe   : > { %v22931_v29 = vpack.c.bf16 %v7228_v40, %v7224_v60  ;;  %v7232_v8 = vpop.f32.mrb[136].mxu0  ;;  %v19033_v60 = vld [vmem:[%s25322_s8 + $0x84c] ss:$16 sps:$4 sm:$0xff]   ;;  %v19031_v50 = vld [vmem:[%s25322_s8 + $0x848] ss:$16 sps:$4 sm:$0xff]  }
 0xaff   : > { %v7234_v23 = vpop.f32.mrb[137].mxu0  ;;  %v19039_v40 = vld [vmem:[%s25322_s8 + $0x88c] ss:$16 sps:$4 sm:$0xff]  }
 0xb00   : > { %9556 = vmatpush1.bf16.msra.mxu1 %v18980_v12  ;;  %v7236_v45 = vpop.f32.mrb[138].mxu0  ;;  %v19027_v12 = vld [vmem:[%s25322_s8 + $0x80c] ss:$16 sps:$4 sm:$0xff]  }
 0xb01   : > { %9557 = vmatprep.subr.bf16.mxu1 %v18985_v56  ;;  %v22936_v1 = vpack.c.bf16 %v7236_v45, %v7232_v8  ;;  %v7238_v39 = vpop.f32.mrb[139].mxu0  ;;  %v19030_v56 = vld [vmem:[%s25322_s8 + $0x82c] ss:$16 sps:$4 sm:$0xff]  }
 0xb02   : > { %v22941_v37 = vpack.c.bf16 %v7238_v39, %v7234_v23  ;;  %v19042_v8 = vld [vmem:[%s25322_s8 + $0x8ac] ss:$16 sps:$4 sm:$0xff]   ;;  %v19040_v23 = vld [vmem:[%s25322_s8 + $0x8a8] ss:$16 sps:$4 sm:$0xff]  }
 0xb03   : > { %v19045_v45 = vld [vmem:[%s25322_s8 + $0x8cc] ss:$16 sps:$4 sm:$0xff]  }
 0xb04   : > { %9558 = vmatpush1.bf16.msra.mxu1 %v18983_v57  ;;  %v19036_v57 = vld [vmem:[%s25322_s8 + $0x86c] ss:$16 sps:$4 sm:$0xff]  }
 0xb05   : > { %9559 = vmatprep.subr.bf16.mxu1 %v18988_v55  ;;  %v19037_v55 = vld [vmem:[%s25322_s8 + $0x888] ss:$16 sps:$4 sm:$0xff]   ;;  %v19048_v39 = vld [vmem:[%s25322_s8 + $0x8ec] ss:$16 sps:$4 sm:$0xff]  }
 0xb08   : > { %9560 = vmatpush1.bf16.msra.mxu1 %v18986_v34  ;;  %v19043_v34 = vld [vmem:[%s25322_s8 + $0x8c8] ss:$16 sps:$4 sm:$0xff]  }
 0xb09   : > { %9561 = vmatprep.subr.bf16.mxu1 %v18991_v30  ;;  %v19046_v30 = vld [vmem:[%s25322_s8 + $0x8e8] ss:$16 sps:$4 sm:$0xff]  }
 0xb0c   : > { %9562 = vmatpush1.bf16.msra.mxu1 %v18989_v51  ;;  %v19051_v51 = vld [vmem:[%s25322_s8 + $0x90c] ss:$16 sps:$4 sm:$0xff]  }
 0xb0d   : > { %9563 = vmatprep.subr.bf16.mxu1 %v18994_v35  ;;  %v19049_v35 = vld [vmem:[%s25322_s8 + $0x908] ss:$16 sps:$4 sm:$0xff]  }
 0xb10   : > { %9564 = vmatpush1.bf16.msra.mxu1 %v18992_v4  ;;  %v19054_v4 = vld [vmem:[%s25322_s8 + $0x92c] ss:$16 sps:$4 sm:$0xff]  }
 0xb11   : > { %9565 = vmatprep.subr.bf16.mxu1 %v18997_v27  ;;  %v19052_v27 = vld [vmem:[%s25322_s8 + $0x928] ss:$16 sps:$4 sm:$0xff]  }
 0xb14   : > { %9566 = vmatpush1.bf16.msra.mxu1 %v18995_v48  ;;  %v19057_v48 = vld [vmem:[%s25322_s8 + $0x94c] ss:$16 sps:$4 sm:$0xff]  }
 0xb15   : > { %9567 = vmatprep.subr.bf16.mxu1 %v19000_v20  ;;  %v19055_v20 = vld [vmem:[%s25322_s8 + $0x948] ss:$16 sps:$4 sm:$0xff]  }
 0xb18   : > { %9568 = vmatpush1.bf16.msra.mxu1 %v18998_v63  ;;  %v19060_v63 = vld [vmem:[%s25322_s8 + $0x96c] ss:$16 sps:$4 sm:$0xff]  }
 0xb19   : > { %9569 = vmatprep.subr.bf16.mxu1 %v19003_v7  ;;  %v19058_v7 = vld [vmem:[%s25322_s8 + $0x968] ss:$16 sps:$4 sm:$0xff]  }
 0xb1c   : > { %9570 = vmatpush1.bf16.msra.mxu1 %v19001_v2  ;;  %v19063_v2 = vld [vmem:[%s25322_s8 + $0x98c] ss:$16 sps:$4 sm:$0xff]  }
 0xb1d   : > { %9571 = vmatprep.subr.bf16.mxu1 %v19006_v13  ;;  %v19061_v13 = vld [vmem:[%s25322_s8 + $0x988] ss:$16 sps:$4 sm:$0xff]  }
 0xb20   : > { %9572 = vmatpush1.bf16.msra.mxu1 %v19004_v52  ;;  %v19066_v52 = vld [vmem:[%s25322_s8 + $0x9ac] ss:$16 sps:$4 sm:$0xff]  }
 0xb21   : > { %9573 = vmatprep.subr.bf16.mxu1 %v19009_v14  ;;  %v19064_v14 = vld [vmem:[%s25322_s8 + $0x9a8] ss:$16 sps:$4 sm:$0xff]  }
 0xb24   : > { %9574 = vmatpush1.bf16.msra.mxu1 %v19007_v41  ;;  %v19069_v41 = vld [vmem:[%s25322_s8 + $0x9cc] ss:$16 sps:$4 sm:$0xff]  }
 0xb25   : > { %9575 = vmatprep.subr.bf16.mxu1 %v19012_v15  ;;  %v19067_v15 = vld [vmem:[%s25322_s8 + $0x9c8] ss:$16 sps:$4 sm:$0xff]  }
 0xb28   : > { %9576 = vmatpush1.bf16.msra.mxu1 %v19010_v19  ;;  %v19072_v19 = vld [vmem:[%s25322_s8 + $0x9ec] ss:$16 sps:$4 sm:$0xff]  }
 0xb29   : > { %9577 = vmatprep.subr.bf16.mxu1 %v19015_v17  ;;  %v19070_v17 = vld [vmem:[%s25322_s8 + $0x9e8] ss:$16 sps:$4 sm:$0xff]  }
 0xb2c   : > { %9578 = vmatpush1.bf16.msra.mxu1 %v19013_v32  ;;  %v19075_v32 = vld [vmem:[%s25322_s8 + $0xa04] ss:$16 sps:$4 sm:$0xff]  }
 0xb2d   : > { %9579 = vmatprep.subr.bf16.mxu1 %v19018_v24  ;;  %v19073_v24 = vld [vmem:[%s25322_s8 + $0xa00] ss:$16 sps:$4 sm:$0xff]  }
 0xb30   : > { %9580 = vmatpush1.bf16.msra.mxu1 %v19016_v44  ;;  %v19078_v44 = vld [vmem:[%s25322_s8 + $0xa24] ss:$16 sps:$4 sm:$0xff]  }
 0xb31   : > { %9581 = vmatprep.subr.bf16.mxu1 %v19021_v18  ;;  %v19076_v18 = vld [vmem:[%s25322_s8 + $0xa20] ss:$16 sps:$4 sm:$0xff]  }
 0xb34   : > { %9582 = vmatpush1.bf16.msra.mxu1 %v19019_v46  ;;  %v19081_v46 = vld [vmem:[%s25322_s8 + $0xa44] ss:$16 sps:$4 sm:$0xff]  }
 0xb35   : > { %9583 = vmatprep.subr.bf16.mxu1 %v19024_v42  ;;  %v19079_v42 = vld [vmem:[%s25322_s8 + $0xa40] ss:$16 sps:$4 sm:$0xff]  }
 0xb38   : > { %9584 = vmatpush1.bf16.msra.mxu1 %v19022_v54  ;;  %v19082_v54 = vld [vmem:[%s25322_s8 + $0xa60] ss:$16 sps:$4 sm:$0xff]  }
 0xb39   : > { %9596 = vmatprep.subr.bf16.mxu1 %v19027_v12 }
 0xb3b   : > { %9586 = vmatmul.mubr.bf16.vlgmr.msra.gmra.mrb[0].mxu1 %v22679_v25 }
 0xb3c   : > { %9597 = vmatpush1.bf16.msra.mxu1 %v19025_v53  ;;  %9628 = vmatprep.mubr.bf16.mxu1 %v22690_v26  ;;  %v19034_v26 = vld [vmem:[%s25322_s8 + $0x868] ss:$16 sps:$4 sm:$0xff]   ;;  %v19087_v53 = vld [vmem:[%s25322_s8 + $0xa84] ss:$16 sps:$4 sm:$0xff]  }
 0xb3d   : > { %9598 = vmatprep.subr.bf16.mxu1 %v19030_v56 }
 0xb40   : > { %9599 = vmatpush1.bf16.msra.mxu1 %v19028_v36 }
 0xb41   : > { %9600 = vmatprep.subr.bf16.mxu1 %v19033_v60 }
 0xb44   : > { %9601 = vmatpush1.bf16.msra.mxu1 %v19031_v50  ;;  %v19085_v50 = vld [vmem:[%s25322_s8 + $0xa80] ss:$16 sps:$4 sm:$0xff]  }
 0xb45   : > { %9602 = vmatprep.subr.bf16.mxu1 %v19036_v57  ;;  %v19090_v57 = vld [vmem:[%s25322_s8 + $0xaa4] ss:$16 sps:$4 sm:$0xff]  }
 0xb48   : > { %9603 = vmatpush1.bf16.msra.mxu1 %v19034_v26  ;;  %v19088_v26 = vld [vmem:[%s25322_s8 + $0xaa0] ss:$16 sps:$4 sm:$0xff]  }
 0xb49   : > { %9604 = vmatprep.subr.bf16.mxu1 %v19039_v40  ;;  %v19093_v40 = vld [vmem:[%s25322_s8 + $0xac4] ss:$16 sps:$4 sm:$0xff]  }
 0xb4c   : > { %9605 = vmatpush1.bf16.msra.mxu1 %v19037_v55  ;;  %v19091_v55 = vld [vmem:[%s25322_s8 + $0xac0] ss:$16 sps:$4 sm:$0xff]  }
 0xb4d   : > { %9606 = vmatprep.subr.bf16.mxu1 %v19042_v8  ;;  %v19096_v8 = vld [vmem:[%s25322_s8 + $0xae4] ss:$16 sps:$4 sm:$0xff]  }
 0xb50   : > { %9607 = vmatpush1.bf16.msra.mxu1 %v19040_v23  ;;  %v19094_v23 = vld [vmem:[%s25322_s8 + $0xae0] ss:$16 sps:$4 sm:$0xff]  }
 0xb51   : > { %9608 = vmatprep.subr.bf16.mxu1 %v19045_v45  ;;  %v19099_v45 = vld [vmem:[%s25322_s8 + $0xb04] ss:$16 sps:$4 sm:$0xff]  }
 0xb54   : > { %9609 = vmatpush1.bf16.msra.mxu1 %v19043_v34  ;;  %v19097_v34 = vld [vmem:[%s25322_s8 + $0xb00] ss:$16 sps:$4 sm:$0xff]  }
 0xb55   : > { %9610 = vmatprep.subr.bf16.mxu1 %v19048_v39  ;;  %v19102_v39 = vld [vmem:[%s25322_s8 + $0xb24] ss:$16 sps:$4 sm:$0xff]  }
 0xb58   : > { %9611 = vmatpush1.bf16.msra.mxu1 %v19046_v30  ;;  %v19100_v30 = vld [vmem:[%s25322_s8 + $0xb20] ss:$16 sps:$4 sm:$0xff]  }
 0xb59   : > { %9612 = vmatprep.subr.bf16.mxu1 %v19051_v51  ;;  %v19105_v51 = vld [vmem:[%s25322_s8 + $0xb44] ss:$16 sps:$4 sm:$0xff]  }
 0xb5c   : > { %9613 = vmatpush1.bf16.msra.mxu1 %v19049_v35  ;;  %v19103_v35 = vld [vmem:[%s25322_s8 + $0xb40] ss:$16 sps:$4 sm:$0xff]  }
 0xb5d   : > { %9614 = vmatprep.subr.bf16.mxu1 %v19054_v4  ;;  %v19108_v4 = vld [vmem:[%s25322_s8 + $0xb64] ss:$16 sps:$4 sm:$0xff]  }
 0xb60   : > { %9615 = vmatpush1.bf16.msra.mxu1 %v19052_v27  ;;  %v19106_v27 = vld [vmem:[%s25322_s8 + $0xb60] ss:$16 sps:$4 sm:$0xff]  }
 0xb61   : > { %9616 = vmatprep.subr.bf16.mxu1 %v19057_v48  ;;  %v19111_v48 = vld [vmem:[%s25322_s8 + $0xb84] ss:$16 sps:$4 sm:$0xff]  }
 0xb64   : > { %9617 = vmatpush1.bf16.msra.mxu1 %v19055_v20  ;;  %v19109_v20 = vld [vmem:[%s25322_s8 + $0xb80] ss:$16 sps:$4 sm:$0xff]  }
 0xb65   : > { %9618 = vmatprep.subr.bf16.mxu1 %v19060_v63  ;;  %v19114_v63 = vld [vmem:[%s25322_s8 + $0xba4] ss:$16 sps:$4 sm:$0xff]  }
 0xb68   : > { %9619 = vmatpush1.bf16.msra.mxu1 %v19058_v7  ;;  %v19112_v7 = vld [vmem:[%s25322_s8 + $0xba0] ss:$16 sps:$4 sm:$0xff]  }
 0xb69   : > { %9620 = vmatprep.subr.bf16.mxu1 %v19063_v2  ;;  %v19117_v2 = vld [vmem:[%s25322_s8 + $0xbc4] ss:$16 sps:$4 sm:$0xff]  }
 0xb6c   : > { %9621 = vmatpush1.bf16.msra.mxu1 %v19061_v13  ;;  %v19115_v13 = vld [vmem:[%s25322_s8 + $0xbc0] ss:$16 sps:$4 sm:$0xff]  }
 0xb6d   : > { %9622 = vmatprep.subr.bf16.mxu1 %v19066_v52  ;;  %v19120_v52 = vld [vmem:[%s25322_s8 + $0xbe4] ss:$16 sps:$4 sm:$0xff]  }
 0xb70   : > { %9623 = vmatpush1.bf16.msra.mxu1 %v19064_v14  ;;  %v19118_v14 = vld [vmem:[%s25322_s8 + $0xbe0] ss:$16 sps:$4 sm:$0xff]  }
 0xb71   : > { %9624 = vmatprep.subr.bf16.mxu1 %v19069_v41  ;;  %v19123_v41 = vld [vmem:[%s25322_s8 + $0xa0c] ss:$16 sps:$4 sm:$0xff]  }
 0xb74   : > { %9625 = vmatpush1.bf16.msra.mxu1 %v19067_v15  ;;  %v19121_v15 = vld [vmem:[%s25322_s8 + $0xa08] ss:$16 sps:$4 sm:$0xff]  }
 0xb75   : > { %9626 = vmatprep.subr.bf16.mxu1 %v19072_v19  ;;  %v19126_v19 = vld [vmem:[%s25322_s8 + $0xa2c] ss:$16 sps:$4 sm:$0xff]  }
 0xb78   : > { %9627 = vmatpush1.bf16.msra.mxu1 %v19070_v17  ;;  %v19124_v17 = vld [vmem:[%s25322_s8 + $0xa28] ss:$16 sps:$4 sm:$0xff]  }
 0xb79   : > { %10031 = vmatprep.subr.bf16.mxu1 %v19075_v32  ;;  %v19129_v32 = vld [vmem:[%s25322_s8 + $0xa4c] ss:$16 sps:$4 sm:$0xff]  }
 0xb7b   : > { %9629 = vmatmul.mubr.bf16.vlgmr.msra.gmra.mrb[4].mxu1 %v22679_v25  ;;  %v19084_v25 = vld [vmem:[%s25322_s8 + $0xa64] ss:$16 sps:$4 sm:$0xff]  }
 0xb7c   : > { %10032 = vmatpush1.bf16.msra.mxu1 %v19073_v24  ;;  %10063 = vmatprep.mubr.bf16.mxu1 %v22816_v5  ;;  %v19127_v24 = vld [vmem:[%s25322_s8 + $0xa48] ss:$16 sps:$4 sm:$0xff]  }
 0xb7d   : > { %10033 = vmatprep.subr.bf16.mxu1 %v19078_v44  ;;  %v19132_v44 = vld [vmem:[%s25322_s8 + $0xa6c] ss:$16 sps:$4 sm:$0xff]  }
 0xb80   : > { %10034 = vmatpush1.bf16.msra.mxu1 %v19076_v18 }
 0xb81   : > { %10035 = vmatprep.subr.bf16.mxu1 %v19081_v46  ;;  %v19135_v46 = vld [vmem:[%s25322_s8 + $0xa8c] ss:$16 sps:$4 sm:$0xff]  }
 0xb84   : > { %10036 = vmatpush1.bf16.msra.mxu1 %v19079_v42 }
 0xb85   : > { %v23136_v12 = vpop.f32.mrb[140].mxu0  ;;  %10037 = vmatprep.subr.bf16.mxu1 %v19084_v25 }
 0xb86   : > { %v23141_v56 = vpop.f32.mrb[141].mxu0 }
 0xb87   : > { %v23143_v36 = vpop.f32.mrb[142].mxu0 }
 0xb88   : > { %10038 = vmatpush1.bf16.msra.mxu1 %v19082_v54  ;;  %v23145_v60 = vpop.f32.mrb[143].mxu0 }
 0xb89   : > { %10039 = vmatprep.subr.bf16.mxu1 %v19087_v53  ;;  %v19133_v53 = vld [vmem:[%s25322_s8 + $0xa88] ss:$16 sps:$4 sm:$0xff]  }
 0xb8c   : > { %10040 = vmatpush1.bf16.msra.mxu1 %v19085_v50  ;;  %v19138_v50 = vld [vmem:[%s25322_s8 + $0xaac] ss:$16 sps:$4 sm:$0xff]  }
 0xb8d   : > { %10041 = vmatprep.subr.bf16.mxu1 %v19090_v57  ;;  %v19136_v57 = vld [vmem:[%s25322_s8 + $0xaa8] ss:$16 sps:$4 sm:$0xff]  }
 0xb90   : > { %10042 = vmatpush1.bf16.msra.mxu1 %v19088_v26  ;;  %v19141_v26 = vld [vmem:[%s25322_s8 + $0xacc] ss:$16 sps:$4 sm:$0xff]  }
 0xb91   : > { %10043 = vmatprep.subr.bf16.mxu1 %v19093_v40  ;;  %v19139_v40 = vld [vmem:[%s25322_s8 + $0xac8] ss:$16 sps:$4 sm:$0xff]  }
 0xb94   : > { %10044 = vmatpush1.bf16.msra.mxu1 %v19091_v55  ;;  %v19144_v55 = vld [vmem:[%s25322_s8 + $0xaec] ss:$16 sps:$4 sm:$0xff]  }
 0xb95   : > { %10045 = vmatprep.subr.bf16.mxu1 %v19096_v8  ;;  %v19142_v8 = vld [vmem:[%s25322_s8 + $0xae8] ss:$16 sps:$4 sm:$0xff]  }
 0xb98   : > { %10046 = vmatpush1.bf16.msra.mxu1 %v19094_v23  ;;  %v19147_v23 = vld [vmem:[%s25322_s8 + $0xb0c] ss:$16 sps:$4 sm:$0xff]  }
 0xb99   : > { %10047 = vmatprep.subr.bf16.mxu1 %v19099_v45  ;;  %v19145_v45 = vld [vmem:[%s25322_s8 + $0xb08] ss:$16 sps:$4 sm:$0xff]  }
 0xb9c   : > { %10048 = vmatpush1.bf16.msra.mxu1 %v19097_v34  ;;  %v19150_v34 = vld [vmem:[%s25322_s8 + $0xb2c] ss:$16 sps:$4 sm:$0xff]  }
 0xb9d   : > { %10049 = vmatprep.subr.bf16.mxu1 %v19102_v39  ;;  %v19148_v39 = vld [vmem:[%s25322_s8 + $0xb28] ss:$16 sps:$4 sm:$0xff]  }
 0xba0   : > { %10050 = vmatpush1.bf16.msra.mxu1 %v19100_v30  ;;  %v19153_v30 = vld [vmem:[%s25322_s8 + $0xb4c] ss:$16 sps:$4 sm:$0xff]  }
 0xba1   : > { %10051 = vmatprep.subr.bf16.mxu1 %v19105_v51  ;;  %v19151_v51 = vld [vmem:[%s25322_s8 + $0xb48] ss:$16 sps:$4 sm:$0xff]  }
 0xba4   : > { %10052 = vmatpush1.bf16.msra.mxu1 %v19103_v35  ;;  %v19156_v35 = vld [vmem:[%s25322_s8 + $0xb6c] ss:$16 sps:$4 sm:$0xff]  }
 0xba5   : > { %10053 = vmatprep.subr.bf16.mxu1 %v19108_v4  ;;  %v19154_v4 = vld [vmem:[%s25322_s8 + $0xb68] ss:$16 sps:$4 sm:$0xff]  }
 0xba8   : > { %10054 = vmatpush1.bf16.msra.mxu1 %v19106_v27  ;;  %v19159_v27 = vld [vmem:[%s25322_s8 + $0xb8c] ss:$16 sps:$4 sm:$0xff]  }
 0xba9   : > { %10055 = vmatprep.subr.bf16.mxu1 %v19111_v48  ;;  %v19157_v48 = vld [vmem:[%s25322_s8 + $0xb88] ss:$16 sps:$4 sm:$0xff]  }
 0xbac   : > { %10056 = vmatpush1.bf16.msra.mxu1 %v19109_v20  ;;  %v19162_v20 = vld [vmem:[%s25322_s8 + $0xbac] ss:$16 sps:$4 sm:$0xff]  }
 0xbad   : > { %10057 = vmatprep.subr.bf16.mxu1 %v19114_v63  ;;  %v19160_v63 = vld [vmem:[%s25322_s8 + $0xba8] ss:$16 sps:$4 sm:$0xff]  }
 0xbb0   : > { %10058 = vmatpush1.bf16.msra.mxu1 %v19112_v7  ;;  %v19165_v7 = vld [vmem:[%s25322_s8 + $0xbcc] ss:$16 sps:$4 sm:$0xff]  }
 0xbb1   : > { %10059 = vmatprep.subr.bf16.mxu1 %v19117_v2  ;;  %v19163_v2 = vld [vmem:[%s25322_s8 + $0xbc8] ss:$16 sps:$4 sm:$0xff]  }
 0xbb4   : > { %10060 = vmatpush1.bf16.msra.mxu1 %v19115_v13  ;;  %v19168_v13 = vld [vmem:[%s25322_s8 + $0xbec] ss:$16 sps:$4 sm:$0xff]  }
 0xbb5   : > { %10061 = vmatprep.subr.bf16.mxu1 %v19120_v52  ;;  %v19166_v52 = vld [vmem:[%s25322_s8 + $0xbe8] ss:$16 sps:$4 sm:$0xff]  }
 0xbb8   : > { %10062 = vmatpush1.bf16.msra.mxu1 %v19118_v14  ;;  %v19171_v14 = vld [vmem:[%s25322_s8 + $0xc04] ss:$16 sps:$4 sm:$0xff]  }
 0xbb9   : > { %10074 = vmatprep.subr.bf16.mxu1 %v19123_v41  ;;  %v19169_v41 = vld [vmem:[%s25322_s8 + $0xc00] ss:$16 sps:$4 sm:$0xff]  }
 0xbbb   : > { %10064 = vmatmul.mubr.bf16.vlgmr.msra.gmra.mrb[0].mxu1 %v22805_v59 }
 0xbbc   : > { %10075 = vmatpush1.bf16.msra.mxu1 %v19121_v15  ;;  %10106 = vmatprep.mubr.bf16.mxu1 %v22816_v5  ;;  %v19130_v5 = vld [vmem:[%s25322_s8 + $0xa68] ss:$16 sps:$4 sm:$0xff]   ;;  %v19174_v15 = vld [vmem:[%s25322_s8 + $0xc24] ss:$16 sps:$4 sm:$0xff]  }
 0xbbd   : > { %10076 = vmatprep.subr.bf16.mxu1 %v19126_v19  ;;  %v19172_v19 = vld [vmem:[%s25322_s8 + $0xc20] ss:$16 sps:$4 sm:$0xff]  }
 0xbc0   : > { %10077 = vmatpush1.bf16.msra.mxu1 %v19124_v17  ;;  %v19177_v17 = vld [vmem:[%s25322_s8 + $0xc44] ss:$16 sps:$4 sm:$0xff]  }
 0xbc1   : > { %10078 = vmatprep.subr.bf16.mxu1 %v19129_v32  ;;  %v19175_v32 = vld [vmem:[%s25322_s8 + $0xc40] ss:$16 sps:$4 sm:$0xff]  }
 0xbc4   : > { %10079 = vmatpush1.bf16.msra.mxu1 %v19127_v24  ;;  %v19178_v24 = vld [vmem:[%s25322_s8 + $0xc60] ss:$16 sps:$4 sm:$0xff]  }
 0xbc5   : > { %v23242_v18 = vpop.f32.mrb[144].mxu0  ;;  %10080 = vmatprep.subr.bf16.mxu1 %v19132_v44  ;;  %v19183_v44 = vld [vmem:[%s25322_s8 + $0xc84] ss:$16 sps:$4 sm:$0xff]  }
 0xbc6   : > { %v23247_v42 = vpop.f32.mrb[145].mxu0 }
 0xbc7   : > { %v23249_v25 = vpop.f32.mrb[146].mxu0 }
 0xbc8   : > { %10081 = vmatpush1.bf16.msra.mxu1 %v19130_v5  ;;  %v23251_v54 = vpop.f32.mrb[147].mxu0  ;;  %v19181_v5 = vld [vmem:[%s25322_s8 + $0xc80] ss:$16 sps:$4 sm:$0xff]  }
 0xbc9   : > { %10082 = vmatprep.subr.bf16.mxu1 %v19135_v46  ;;  %v19186_v46 = vld [vmem:[%s25322_s8 + $0xca4] ss:$16 sps:$4 sm:$0xff]  }
 0xbcc   : > { %10083 = vmatpush1.bf16.msra.mxu1 %v19133_v53  ;;  %v19184_v53 = vld [vmem:[%s25322_s8 + $0xca0] ss:$16 sps:$4 sm:$0xff]  }
 0xbcd   : > { %10084 = vmatprep.subr.bf16.mxu1 %v19138_v50  ;;  %v19189_v50 = vld [vmem:[%s25322_s8 + $0xcc4] ss:$16 sps:$4 sm:$0xff]  }
 0xbd0   : > { %10085 = vmatpush1.bf16.msra.mxu1 %v19136_v57  ;;  %v19187_v57 = vld [vmem:[%s25322_s8 + $0xcc0] ss:$16 sps:$4 sm:$0xff]  }
 0xbd1   : > { %10086 = vmatprep.subr.bf16.mxu1 %v19141_v26  ;;  %v19192_v26 = vld [vmem:[%s25322_s8 + $0xce4] ss:$16 sps:$4 sm:$0xff]  }
 0xbd4   : > { %10087 = vmatpush1.bf16.msra.mxu1 %v19139_v40  ;;  %v19190_v40 = vld [vmem:[%s25322_s8 + $0xce0] ss:$16 sps:$4 sm:$0xff]  }
 0xbd5   : > { %10088 = vmatprep.subr.bf16.mxu1 %v19144_v55  ;;  %v19195_v55 = vld [vmem:[%s25322_s8 + $0xd04] ss:$16 sps:$4 sm:$0xff]  }
 0xbd8   : > { %10089 = vmatpush1.bf16.msra.mxu1 %v19142_v8  ;;  %v19193_v8 = vld [vmem:[%s25322_s8 + $0xd00] ss:$16 sps:$4 sm:$0xff]  }
 0xbd9   : > { %10090 = vmatprep.subr.bf16.mxu1 %v19147_v23  ;;  %v19198_v23 = vld [vmem:[%s25322_s8 + $0xd24] ss:$16 sps:$4 sm:$0xff]  }
 0xbdc   : > { %10091 = vmatpush1.bf16.msra.mxu1 %v19145_v45  ;;  %v19196_v45 = vld [vmem:[%s25322_s8 + $0xd20] ss:$16 sps:$4 sm:$0xff]  }
 0xbdd   : > { %10092 = vmatprep.subr.bf16.mxu1 %v19150_v34  ;;  %v19201_v34 = vld [vmem:[%s25322_s8 + $0xd44] ss:$16 sps:$4 sm:$0xff]  }
 0xbe0   : > { %10093 = vmatpush1.bf16.msra.mxu1 %v19148_v39  ;;  %v19199_v39 = vld [vmem:[%s25322_s8 + $0xd40] ss:$16 sps:$4 sm:$0xff]  }
 0xbe1   : > { %10094 = vmatprep.subr.bf16.mxu1 %v19153_v30  ;;  %v19204_v30 = vld [vmem:[%s25322_s8 + $0xd64] ss:$16 sps:$4 sm:$0xff]  }
 0xbe4   : > { %10095 = vmatpush1.bf16.msra.mxu1 %v19151_v51  ;;  %v19202_v51 = vld [vmem:[%s25322_s8 + $0xd60] ss:$16 sps:$4 sm:$0xff]  }
 0xbe5   : > { %10096 = vmatprep.subr.bf16.mxu1 %v19156_v35  ;;  %v19207_v35 = vld [vmem:[%s25322_s8 + $0xd84] ss:$16 sps:$4 sm:$0xff]  }
 0xbe8   : > { %10097 = vmatpush1.bf16.msra.mxu1 %v19154_v4  ;;  %v19205_v4 = vld [vmem:[%s25322_s8 + $0xd80] ss:$16 sps:$4 sm:$0xff]  }
 0xbe9   : > { %10098 = vmatprep.subr.bf16.mxu1 %v19159_v27  ;;  %v19210_v27 = vld [vmem:[%s25322_s8 + $0xda4] ss:$16 sps:$4 sm:$0xff]  }
 0xbec   : > { %10099 = vmatpush1.bf16.msra.mxu1 %v19157_v48  ;;  %v19208_v48 = vld [vmem:[%s25322_s8 + $0xda0] ss:$16 sps:$4 sm:$0xff]  }
 0xbed   : > { %10100 = vmatprep.subr.bf16.mxu1 %v19162_v20  ;;  %v19213_v20 = vld [vmem:[%s25322_s8 + $0xdc4] ss:$16 sps:$4 sm:$0xff]  }
 0xbf0   : > { %10101 = vmatpush1.bf16.msra.mxu1 %v19160_v63  ;;  %v19211_v63 = vld [vmem:[%s25322_s8 + $0xdc0] ss:$16 sps:$4 sm:$0xff]  }
 0xbf1   : > { %10102 = vmatprep.subr.bf16.mxu1 %v19165_v7  ;;  %v19216_v7 = vld [vmem:[%s25322_s8 + $0xde4] ss:$16 sps:$4 sm:$0xff]  }
 0xbf4   : > { %10103 = vmatpush1.bf16.msra.mxu1 %v19163_v2  ;;  %v19214_v2 = vld [vmem:[%s25322_s8 + $0xde0] ss:$16 sps:$4 sm:$0xff]  }
 0xbf5   : > { %10104 = vmatprep.subr.bf16.mxu1 %v19168_v13  ;;  %v19219_v13 = vld [vmem:[%s25322_s8 + $0xc0c] ss:$16 sps:$4 sm:$0xff]  }
 0xbf8   : > { %10105 = vmatpush1.bf16.msra.mxu1 %v19166_v52  ;;  %v19217_v52 = vld [vmem:[%s25322_s8 + $0xc08] ss:$16 sps:$4 sm:$0xff]  }
 0xbf9   : > { %10509 = vmatprep.subr.bf16.mxu1 %v19171_v14  ;;  %v19222_v14 = vld [vmem:[%s25322_s8 + $0xc2c] ss:$16 sps:$4 sm:$0xff]  }
 0xbfb   : > { %10107 = vmatmul.mubr.bf16.vlgmr.msra.gmra.mrb[4].mxu1 %v22805_v59  ;;  %v19180_v59 = vld [vmem:[%s25322_s8 + $0xc64] ss:$16 sps:$4 sm:$0xff]  }
 0xbfc   : > { %10510 = vmatpush1.bf16.msra.mxu1 %v19169_v41  ;;  %10541 = vmatprep.mubr.bf16.mxu1 %v22832_v61  ;;  %v19220_v41 = vld [vmem:[%s25322_s8 + $0xc28] ss:$16 sps:$4 sm:$0xff]  }
 0xbfd   : > { %10511 = vmatprep.subr.bf16.mxu1 %v19174_v15  ;;  %v19225_v15 = vld [vmem:[%s25322_s8 + $0xc4c] ss:$16 sps:$4 sm:$0xff]  }
 0xc00   : > { %10512 = vmatpush1.bf16.msra.mxu1 %v19172_v19  ;;  %v19223_v19 = vld [vmem:[%s25322_s8 + $0xc48] ss:$16 sps:$4 sm:$0xff]  }
 0xc01   : > { %10513 = vmatprep.subr.bf16.mxu1 %v19177_v17  ;;  %v19228_v17 = vld [vmem:[%s25322_s8 + $0xc6c] ss:$16 sps:$4 sm:$0xff]  }
 0xc04   : > { %10514 = vmatpush1.bf16.msra.mxu1 %v19175_v32  ;;  %v19231_v32 = vld [vmem:[%s25322_s8 + $0xc8c] ss:$16 sps:$4 sm:$0xff]  }
 0xc05   : > { %10515 = vmatprep.subr.bf16.mxu1 %v19180_v59  ;;  %v19229_v59 = vld [vmem:[%s25322_s8 + $0xc88] ss:$16 sps:$4 sm:$0xff]  }
 0xc08   : > { %10516 = vmatpush1.bf16.msra.mxu1 %v19178_v24  ;;  %v19234_v24 = vld [vmem:[%s25322_s8 + $0xcac] ss:$16 sps:$4 sm:$0xff]  }
 0xc09   : > { %10517 = vmatprep.subr.bf16.mxu1 %v19183_v44  ;;  %v19232_v44 = vld [vmem:[%s25322_s8 + $0xca8] ss:$16 sps:$4 sm:$0xff]  }
 0xc0c   : > { %10518 = vmatpush1.bf16.msra.mxu1 %v19181_v5  ;;  %v19237_v5 = vld [vmem:[%s25322_s8 + $0xccc] ss:$16 sps:$4 sm:$0xff]  }
 0xc0d   : > { %10519 = vmatprep.subr.bf16.mxu1 %v19186_v46  ;;  %v19235_v46 = vld [vmem:[%s25322_s8 + $0xcc8] ss:$16 sps:$4 sm:$0xff]  }
 0xc10   : > { %10520 = vmatpush1.bf16.msra.mxu1 %v19184_v53  ;;  %v19240_v53 = vld [vmem:[%s25322_s8 + $0xcec] ss:$16 sps:$4 sm:$0xff]  }
 0xc11   : > { %10521 = vmatprep.subr.bf16.mxu1 %v19189_v50  ;;  %v19238_v50 = vld [vmem:[%s25322_s8 + $0xce8] ss:$16 sps:$4 sm:$0xff]  }
 0xc14   : > { %10522 = vmatpush1.bf16.msra.mxu1 %v19187_v57  ;;  %v19243_v57 = vld [vmem:[%s25322_s8 + $0xd0c] ss:$16 sps:$4 sm:$0xff]  }
 0xc15   : > { %10523 = vmatprep.subr.bf16.mxu1 %v19192_v26  ;;  %v19241_v26 = vld [vmem:[%s25322_s8 + $0xd08] ss:$16 sps:$4 sm:$0xff]  }
 0xc18   : > { %10524 = vmatpush1.bf16.msra.mxu1 %v19190_v40  ;;  %v19246_v40 = vld [vmem:[%s25322_s8 + $0xd2c] ss:$16 sps:$4 sm:$0xff]  }
 0xc19   : > { %10525 = vmatprep.subr.bf16.mxu1 %v19195_v55  ;;  %v19244_v55 = vld [vmem:[%s25322_s8 + $0xd28] ss:$16 sps:$4 sm:$0xff]  }
 0xc1c   : > { %10526 = vmatpush1.bf16.msra.mxu1 %v19193_v8  ;;  %v19249_v8 = vld [vmem:[%s25322_s8 + $0xd4c] ss:$16 sps:$4 sm:$0xff]  }
 0xc1d   : > { %10527 = vmatprep.subr.bf16.mxu1 %v19198_v23  ;;  %v19247_v23 = vld [vmem:[%s25322_s8 + $0xd48] ss:$16 sps:$4 sm:$0xff]  }
 0xc20   : > { %10528 = vmatpush1.bf16.msra.mxu1 %v19196_v45  ;;  %v19252_v45 = vld [vmem:[%s25322_s8 + $0xd6c] ss:$16 sps:$4 sm:$0xff]  }
 0xc21   : > { %10529 = vmatprep.subr.bf16.mxu1 %v19201_v34  ;;  %v19250_v34 = vld [vmem:[%s25322_s8 + $0xd68] ss:$16 sps:$4 sm:$0xff]  }
 0xc24   : > { %10530 = vmatpush1.bf16.msra.mxu1 %v19199_v39  ;;  %v19255_v39 = vld [vmem:[%s25322_s8 + $0xd8c] ss:$16 sps:$4 sm:$0xff]  }
 0xc25   : > { %10531 = vmatprep.subr.bf16.mxu1 %v19204_v30  ;;  %v19253_v30 = vld [vmem:[%s25322_s8 + $0xd88] ss:$16 sps:$4 sm:$0xff]  }
 0xc28   : > { %10532 = vmatpush1.bf16.msra.mxu1 %v19202_v51  ;;  %v19258_v51 = vld [vmem:[%s25322_s8 + $0xdac] ss:$16 sps:$4 sm:$0xff]  }
 0xc29   : > { %10533 = vmatprep.subr.bf16.mxu1 %v19207_v35  ;;  %v19256_v35 = vld [vmem:[%s25322_s8 + $0xda8] ss:$16 sps:$4 sm:$0xff]  }
 0xc2c   : > { %10534 = vmatpush1.bf16.msra.mxu1 %v19205_v4  ;;  %v19261_v4 = vld [vmem:[%s25322_s8 + $0xdcc] ss:$16 sps:$4 sm:$0xff]  }
 0xc2d   : > { %10535 = vmatprep.subr.bf16.mxu1 %v19210_v27  ;;  %v19259_v27 = vld [vmem:[%s25322_s8 + $0xdc8] ss:$16 sps:$4 sm:$0xff]  }
 0xc30   : > { %10536 = vmatpush1.bf16.msra.mxu1 %v19208_v48  ;;  %v19264_v48 = vld [vmem:[%s25322_s8 + $0xdec] ss:$16 sps:$4 sm:$0xff]  }
 0xc31   : > { %10537 = vmatprep.subr.bf16.mxu1 %v19213_v20  ;;  %v19262_v20 = vld [vmem:[%s25322_s8 + $0xde8] ss:$16 sps:$4 sm:$0xff]  }
 0xc34   : > { %10538 = vmatpush1.bf16.msra.mxu1 %v19211_v63  ;;  %v19267_v63 = vld [vmem:[%s25322_s8 + $0xe04] ss:$16 sps:$4 sm:$0xff]  }
 0xc35   : > { %10539 = vmatprep.subr.bf16.mxu1 %v19216_v7  ;;  %v19265_v7 = vld [vmem:[%s25322_s8 + $0xe00] ss:$16 sps:$4 sm:$0xff]  }
 0xc38   : > { %10540 = vmatpush1.bf16.msra.mxu1 %v19214_v2  ;;  %v19270_v2 = vld [vmem:[%s25322_s8 + $0xe24] ss:$16 sps:$4 sm:$0xff]  }
 0xc39   : > { %10552 = vmatprep.subr.bf16.mxu1 %v19219_v13  ;;  %v19268_v13 = vld [vmem:[%s25322_s8 + $0xe20] ss:$16 sps:$4 sm:$0xff]  }
 0xc3b   : > { %10542 = vmatmul.mubr.bf16.vlgmr.msra.gmra.mrb[0].mxu1 %v22827_v43 }
 0xc3c   : > { %10553 = vmatpush1.bf16.msra.mxu1 %v19217_v52  ;;  %10584 = vmatprep.mubr.bf16.mxu1 %v22832_v61  ;;  %v19226_v61 = vld [vmem:[%s25322_s8 + $0xc68] ss:$16 sps:$4 sm:$0xff]   ;;  %v19273_v52 = vld [vmem:[%s25322_s8 + $0xe44] ss:$16 sps:$4 sm:$0xff]  }
 0xc3d   : > { %10554 = vmatprep.subr.bf16.mxu1 %v19222_v14  ;;  %v19271_v14 = vld [vmem:[%s25322_s8 + $0xe40] ss:$16 sps:$4 sm:$0xff]  }
 0xc40   : > { %10555 = vmatpush1.bf16.msra.mxu1 %v19220_v41  ;;  %v19274_v41 = vld [vmem:[%s25322_s8 + $0xe60] ss:$16 sps:$4 sm:$0xff]  }
 0xc41   : > { %10556 = vmatprep.subr.bf16.mxu1 %v19225_v15  ;;  %v19279_v15 = vld [vmem:[%s25322_s8 + $0xe84] ss:$16 sps:$4 sm:$0xff]  }
 0xc44   : > { %10557 = vmatpush1.bf16.msra.mxu1 %v19223_v19  ;;  %v19277_v19 = vld [vmem:[%s25322_s8 + $0xe80] ss:$16 sps:$4 sm:$0xff]  }
 0xc45   : > { %10558 = vmatprep.subr.bf16.mxu1 %v19228_v17  ;;  %v19282_v17 = vld [vmem:[%s25322_s8 + $0xea4] ss:$16 sps:$4 sm:$0xff]  }
 0xc48   : > { %10559 = vmatpush1.bf16.msra.mxu1 %v19226_v61  ;;  %v19280_v61 = vld [vmem:[%s25322_s8 + $0xea0] ss:$16 sps:$4 sm:$0xff]  }
 0xc49   : > { %10560 = vmatprep.subr.bf16.mxu1 %v19231_v32  ;;  %v19285_v32 = vld [vmem:[%s25322_s8 + $0xec4] ss:$16 sps:$4 sm:$0xff]  }
 0xc4c   : > { %10561 = vmatpush1.bf16.msra.mxu1 %v19229_v59  ;;  %v19283_v59 = vld [vmem:[%s25322_s8 + $0xec0] ss:$16 sps:$4 sm:$0xff]  }
 0xc4d   : > { %10562 = vmatprep.subr.bf16.mxu1 %v19234_v24  ;;  %v19288_v24 = vld [vmem:[%s25322_s8 + $0xee4] ss:$16 sps:$4 sm:$0xff]  }
 0xc50   : > { %10563 = vmatpush1.bf16.msra.mxu1 %v19232_v44  ;;  %v19286_v44 = vld [vmem:[%s25322_s8 + $0xee0] ss:$16 sps:$4 sm:$0xff]  }
 0xc51   : > { %10564 = vmatprep.subr.bf16.mxu1 %v19237_v5  ;;  %v19291_v5 = vld [vmem:[%s25322_s8 + $0xf04] ss:$16 sps:$4 sm:$0xff]  }
 0xc54   : > { %10565 = vmatpush1.bf16.msra.mxu1 %v19235_v46  ;;  %v19289_v46 = vld [vmem:[%s25322_s8 + $0xf00] ss:$16 sps:$4 sm:$0xff]  }
 0xc55   : > { %10566 = vmatprep.subr.bf16.mxu1 %v19240_v53  ;;  %v19294_v53 = vld [vmem:[%s25322_s8 + $0xf24] ss:$16 sps:$4 sm:$0xff]  }
 0xc58   : > { %10567 = vmatpush1.bf16.msra.mxu1 %v19238_v50  ;;  %v19292_v50 = vld [vmem:[%s25322_s8 + $0xf20] ss:$16 sps:$4 sm:$0xff]  }
 0xc59   : > { %10568 = vmatprep.subr.bf16.mxu1 %v19243_v57  ;;  %v19297_v57 = vld [vmem:[%s25322_s8 + $0xf44] ss:$16 sps:$4 sm:$0xff]  }
 0xc5c   : > { %10569 = vmatpush1.bf16.msra.mxu1 %v19241_v26  ;;  %v19295_v26 = vld [vmem:[%s25322_s8 + $0xf40] ss:$16 sps:$4 sm:$0xff]  }
 0xc5d   : > { %10570 = vmatprep.subr.bf16.mxu1 %v19246_v40  ;;  %v19300_v40 = vld [vmem:[%s25322_s8 + $0xf64] ss:$16 sps:$4 sm:$0xff]  }
 0xc60   : > { %10571 = vmatpush1.bf16.msra.mxu1 %v19244_v55  ;;  %v19298_v55 = vld [vmem:[%s25322_s8 + $0xf60] ss:$16 sps:$4 sm:$0xff]  }
 0xc61   : > { %10572 = vmatprep.subr.bf16.mxu1 %v19249_v8  ;;  %v19303_v8 = vld [vmem:[%s25322_s8 + $0xf84] ss:$16 sps:$4 sm:$0xff]  }
 0xc64   : > { %10573 = vmatpush1.bf16.msra.mxu1 %v19247_v23  ;;  %v19301_v23 = vld [vmem:[%s25322_s8 + $0xf80] ss:$16 sps:$4 sm:$0xff]  }
 0xc65   : > { %10574 = vmatprep.subr.bf16.mxu1 %v19252_v45  ;;  %v19306_v45 = vld [vmem:[%s25322_s8 + $0xfa4] ss:$16 sps:$4 sm:$0xff]  }
 0xc68   : > { %10575 = vmatpush1.bf16.msra.mxu1 %v19250_v34  ;;  %v19304_v34 = vld [vmem:[%s25322_s8 + $0xfa0] ss:$16 sps:$4 sm:$0xff]  }
 0xc69   : > { %10576 = vmatprep.subr.bf16.mxu1 %v19255_v39  ;;  %v19309_v39 = vld [vmem:[%s25322_s8 + $0xfc4] ss:$16 sps:$4 sm:$0xff]  }
 0xc6c   : > { %10577 = vmatpush1.bf16.msra.mxu1 %v19253_v30  ;;  %v19307_v30 = vld [vmem:[%s25322_s8 + $0xfc0] ss:$16 sps:$4 sm:$0xff]  }
 0xc6d   : > { %10578 = vmatprep.subr.bf16.mxu1 %v19258_v51  ;;  %v19312_v51 = vld [vmem:[%s25322_s8 + $0xfe4] ss:$16 sps:$4 sm:$0xff]  }
 0xc70   : > { %10579 = vmatpush1.bf16.msra.mxu1 %v19256_v35  ;;  %v19310_v35 = vld [vmem:[%s25322_s8 + $0xfe0] ss:$16 sps:$4 sm:$0xff]  }
 0xc71   : > { %10580 = vmatprep.subr.bf16.mxu1 %v19261_v4  ;;  %v19315_v4 = vld [vmem:[%s25322_s8 + $0xe0c] ss:$16 sps:$4 sm:$0xff]  }
 0xc74   : > { %10581 = vmatpush1.bf16.msra.mxu1 %v19259_v27  ;;  %v19313_v27 = vld [vmem:[%s25322_s8 + $0xe08] ss:$16 sps:$4 sm:$0xff]  }
 0xc75   : > { %10582 = vmatprep.subr.bf16.mxu1 %v19264_v48  ;;  %v19318_v48 = vld [vmem:[%s25322_s8 + $0xe2c] ss:$16 sps:$4 sm:$0xff]  }
 0xc78   : > { %10583 = vmatpush1.bf16.msra.mxu1 %v19262_v20  ;;  %v19316_v20 = vld [vmem:[%s25322_s8 + $0xe28] ss:$16 sps:$4 sm:$0xff]  }
 0xc79   : > { %10987 = vmatprep.subr.bf16.mxu1 %v19267_v63  ;;  %v19321_v63 = vld [vmem:[%s25322_s8 + $0xe4c] ss:$16 sps:$4 sm:$0xff]  }
 0xc7b   : > { %10585 = vmatmul.mubr.bf16.vlgmr.msra.gmra.mrb[4].mxu1 %v22827_v43  ;;  %v19276_v43 = vld [vmem:[%s25322_s8 + $0xe64] ss:$16 sps:$4 sm:$0xff]  }
 0xc7c   : > { %10988 = vmatpush1.bf16.msra.mxu1 %v19265_v7  ;;  %11019 = vmatprep.mubr.bf16.mxu1 %v22848_v11  ;;  %v19319_v7 = vld [vmem:[%s25322_s8 + $0xe48] ss:$16 sps:$4 sm:$0xff]  }
 0xc7d   : > { %10989 = vmatprep.subr.bf16.mxu1 %v19270_v2  ;;  %v19324_v2 = vld [vmem:[%s25322_s8 + $0xe6c] ss:$16 sps:$4 sm:$0xff]  }
 0xc80   : > { %10990 = vmatpush1.bf16.msra.mxu1 %v19268_v13  ;;  %v19327_v13 = vld [vmem:[%s25322_s8 + $0xe8c] ss:$16 sps:$4 sm:$0xff]  }
 0xc81   : > { %10991 = vmatprep.subr.bf16.mxu1 %v19273_v52  ;;  %v19325_v52 = vld [vmem:[%s25322_s8 + $0xe88] ss:$16 sps:$4 sm:$0xff]  }
 0xc84   : > { %10992 = vmatpush1.bf16.msra.mxu1 %v19271_v14  ;;  %v19330_v14 = vld [vmem:[%s25322_s8 + $0xeac] ss:$16 sps:$4 sm:$0xff]  }
 0xc85   : > { %10993 = vmatprep.subr.bf16.mxu1 %v19276_v43  ;;  %v19328_v43 = vld [vmem:[%s25322_s8 + $0xea8] ss:$16 sps:$4 sm:$0xff]  }
 0xc88   : > { %10994 = vmatpush1.bf16.msra.mxu1 %v19274_v41  ;;  %v19333_v41 = vld [vmem:[%s25322_s8 + $0xecc] ss:$16 sps:$4 sm:$0xff]  }
 0xc89   : > { %10995 = vmatprep.subr.bf16.mxu1 %v19279_v15  ;;  %v19331_v15 = vld [vmem:[%s25322_s8 + $0xec8] ss:$16 sps:$4 sm:$0xff]  }
 0xc8c   : > { %10996 = vmatpush1.bf16.msra.mxu1 %v19277_v19  ;;  %v19336_v19 = vld [vmem:[%s25322_s8 + $0xeec] ss:$16 sps:$4 sm:$0xff]  }
 0xc8d   : > { %10997 = vmatprep.subr.bf16.mxu1 %v19282_v17  ;;  %v19334_v17 = vld [vmem:[%s25322_s8 + $0xee8] ss:$16 sps:$4 sm:$0xff]  }
 0xc90   : > { %10998 = vmatpush1.bf16.msra.mxu1 %v19280_v61  ;;  %v19339_v61 = vld [vmem:[%s25322_s8 + $0xf0c] ss:$16 sps:$4 sm:$0xff]  }
 0xc91   : > { %10999 = vmatprep.subr.bf16.mxu1 %v19285_v32  ;;  %v19337_v32 = vld [vmem:[%s25322_s8 + $0xf08] ss:$16 sps:$4 sm:$0xff]  }
 0xc94   : > { %11000 = vmatpush1.bf16.msra.mxu1 %v19283_v59  ;;  %v19342_v59 = vld [vmem:[%s25322_s8 + $0xf2c] ss:$16 sps:$4 sm:$0xff]  }
 0xc95   : > { %11001 = vmatprep.subr.bf16.mxu1 %v19288_v24  ;;  %v19340_v24 = vld [vmem:[%s25322_s8 + $0xf28] ss:$16 sps:$4 sm:$0xff]  }
 0xc98   : > { %11002 = vmatpush1.bf16.msra.mxu1 %v19286_v44  ;;  %v19345_v44 = vld [vmem:[%s25322_s8 + $0xf4c] ss:$16 sps:$4 sm:$0xff]  }
 0xc99   : > { %11003 = vmatprep.subr.bf16.mxu1 %v19291_v5  ;;  %v19343_v5 = vld [vmem:[%s25322_s8 + $0xf48] ss:$16 sps:$4 sm:$0xff]  }
 0xc9c   : > { %11004 = vmatpush1.bf16.msra.mxu1 %v19289_v46  ;;  %v19348_v46 = vld [vmem:[%s25322_s8 + $0xf6c] ss:$16 sps:$4 sm:$0xff]  }
 0xc9d   : > { %11005 = vmatprep.subr.bf16.mxu1 %v19294_v53  ;;  %v19346_v53 = vld [vmem:[%s25322_s8 + $0xf68] ss:$16 sps:$4 sm:$0xff]  }
 0xca0   : > { %11006 = vmatpush1.bf16.msra.mxu1 %v19292_v50  ;;  %v19351_v50 = vld [vmem:[%s25322_s8 + $0xf8c] ss:$16 sps:$4 sm:$0xff]  }
 0xca1   : > { %11007 = vmatprep.subr.bf16.mxu1 %v19297_v57  ;;  %v19349_v57 = vld [vmem:[%s25322_s8 + $0xf88] ss:$16 sps:$4 sm:$0xff]  }
 0xca4   : > { %11008 = vmatpush1.bf16.msra.mxu1 %v19295_v26  ;;  %v19354_v26 = vld [vmem:[%s25322_s8 + $0xfac] ss:$16 sps:$4 sm:$0xff]  }
 0xca5   : > { %11009 = vmatprep.subr.bf16.mxu1 %v19300_v40  ;;  %v19352_v40 = vld [vmem:[%s25322_s8 + $0xfa8] ss:$16 sps:$4 sm:$0xff]  }
 0xca8   : > { %11010 = vmatpush1.bf16.msra.mxu1 %v19298_v55  ;;  %v19357_v55 = vld [vmem:[%s25322_s8 + $0xfcc] ss:$16 sps:$4 sm:$0xff]  }
 0xca9   : > { %11011 = vmatprep.subr.bf16.mxu1 %v19303_v8  ;;  %v19355_v8 = vld [vmem:[%s25322_s8 + $0xfc8] ss:$16 sps:$4 sm:$0xff]  }
 0xcac   : > { %11012 = vmatpush1.bf16.msra.mxu1 %v19301_v23  ;;  %v19360_v23 = vld [vmem:[%s25322_s8 + $0xfec] ss:$16 sps:$4 sm:$0xff]  }
 0xcad   : > { %11013 = vmatprep.subr.bf16.mxu1 %v19306_v45  ;;  %v19358_v45 = vld [vmem:[%s25322_s8 + $0xfe8] ss:$16 sps:$4 sm:$0xff]  }
 0xcb0   : > { %11014 = vmatpush1.bf16.msra.mxu1 %v19304_v34  ;;  %v19363_v34 = vld [vmem:[%s25322_s8 + $0x1004] ss:$16 sps:$4 sm:$0xff]  }
 0xcb1   : > { %11015 = vmatprep.subr.bf16.mxu1 %v19309_v39  ;;  %v19361_v39 = vld [vmem:[%s25322_s8 + $0x1000] ss:$16 sps:$4 sm:$0xff]  }
 0xcb4   : > { %11016 = vmatpush1.bf16.msra.mxu1 %v19307_v30  ;;  %v19366_v30 = vld [vmem:[%s25322_s8 + $0x1024] ss:$16 sps:$4 sm:$0xff]  }
 0xcb5   : > { %11017 = vmatprep.subr.bf16.mxu1 %v19312_v51  ;;  %v19364_v51 = vld [vmem:[%s25322_s8 + $0x1020] ss:$16 sps:$4 sm:$0xff]  }
 0xcb8   : > { %11018 = vmatpush1.bf16.msra.mxu1 %v19310_v35  ;;  %v19369_v35 = vld [vmem:[%s25322_s8 + $0x1044] ss:$16 sps:$4 sm:$0xff]  }
 0xcb9   : > { %11030 = vmatprep.subr.bf16.mxu1 %v19315_v4  ;;  %v19367_v4 = vld [vmem:[%s25322_s8 + $0x1040] ss:$16 sps:$4 sm:$0xff]  }
 0xcbb   : > { %11020 = vmatmul.mubr.bf16.vlgmr.msra.gmra.mrb[0].mxu1 %v22843_v22 }
 0xcbc   : > { %11031 = vmatpush1.bf16.msra.mxu1 %v19313_v27  ;;  %11062 = vmatprep.mubr.bf16.mxu1 %v22848_v11  ;;  %v19322_v11 = vld [vmem:[%s25322_s8 + $0xe68] ss:$16 sps:$4 sm:$0xff]   ;;  %v19370_v27 = vld [vmem:[%s25322_s8 + $0x1060] ss:$16 sps:$4 sm:$0xff]  }
 0xcbd   : > { %11032 = vmatprep.subr.bf16.mxu1 %v19318_v48  ;;  %v19375_v48 = vld [vmem:[%s25322_s8 + $0x1084] ss:$16 sps:$4 sm:$0xff]  }
 0xcc0   : > { %11033 = vmatpush1.bf16.msra.mxu1 %v19316_v20  ;;  %v19373_v20 = vld [vmem:[%s25322_s8 + $0x1080] ss:$16 sps:$4 sm:$0xff]  }
 0xcc1   : > { %11034 = vmatprep.subr.bf16.mxu1 %v19321_v63  ;;  %v19378_v63 = vld [vmem:[%s25322_s8 + $0x10a4] ss:$16 sps:$4 sm:$0xff]  }
 0xcc4   : > { %11035 = vmatpush1.bf16.msra.mxu1 %v19319_v7  ;;  %v19376_v7 = vld [vmem:[%s25322_s8 + $0x10a0] ss:$16 sps:$4 sm:$0xff]  }
 0xcc5   : > { %11036 = vmatprep.subr.bf16.mxu1 %v19324_v2  ;;  %v19381_v2 = vld [vmem:[%s25322_s8 + $0x10c4] ss:$16 sps:$4 sm:$0xff]  }
 0xcc8   : > { %11037 = vmatpush1.bf16.msra.mxu1 %v19322_v11  ;;  %v19379_v11 = vld [vmem:[%s25322_s8 + $0x10c0] ss:$16 sps:$4 sm:$0xff]  }
 0xcc9   : > { %11038 = vmatprep.subr.bf16.mxu1 %v19327_v13  ;;  %v19384_v13 = vld [vmem:[%s25322_s8 + $0x10e4] ss:$16 sps:$4 sm:$0xff]  }
 0xccc   : > { %11039 = vmatpush1.bf16.msra.mxu1 %v19325_v52  ;;  %v19382_v52 = vld [vmem:[%s25322_s8 + $0x10e0] ss:$16 sps:$4 sm:$0xff]  }
 0xccd   : > { %11040 = vmatprep.subr.bf16.mxu1 %v19330_v14  ;;  %v19387_v14 = vld [vmem:[%s25322_s8 + $0x1104] ss:$16 sps:$4 sm:$0xff]  }
 0xcd0   : > { %11041 = vmatpush1.bf16.msra.mxu1 %v19328_v43  ;;  %v19385_v43 = vld [vmem:[%s25322_s8 + $0x1100] ss:$16 sps:$4 sm:$0xff]  }
 0xcd1   : > { %11042 = vmatprep.subr.bf16.mxu1 %v19333_v41  ;;  %v19390_v41 = vld [vmem:[%s25322_s8 + $0x1124] ss:$16 sps:$4 sm:$0xff]  }
 0xcd4   : > { %11043 = vmatpush1.bf16.msra.mxu1 %v19331_v15  ;;  %v19388_v15 = vld [vmem:[%s25322_s8 + $0x1120] ss:$16 sps:$4 sm:$0xff]  }
 0xcd5   : > { %11044 = vmatprep.subr.bf16.mxu1 %v19336_v19  ;;  %v19393_v19 = vld [vmem:[%s25322_s8 + $0x1144] ss:$16 sps:$4 sm:$0xff]  }
 0xcd8   : > { %11045 = vmatpush1.bf16.msra.mxu1 %v19334_v17  ;;  %v19391_v17 = vld [vmem:[%s25322_s8 + $0x1140] ss:$16 sps:$4 sm:$0xff]  }
 0xcd9   : > { %11046 = vmatprep.subr.bf16.mxu1 %v19339_v61  ;;  %v19396_v61 = vld [vmem:[%s25322_s8 + $0x1164] ss:$16 sps:$4 sm:$0xff]  }
 0xcdc   : > { %11047 = vmatpush1.bf16.msra.mxu1 %v19337_v32  ;;  %v19394_v32 = vld [vmem:[%s25322_s8 + $0x1160] ss:$16 sps:$4 sm:$0xff]  }
 0xcdd   : > { %11048 = vmatprep.subr.bf16.mxu1 %v19342_v59  ;;  %v19399_v59 = vld [vmem:[%s25322_s8 + $0x1184] ss:$16 sps:$4 sm:$0xff]  }
 0xce0   : > { %11049 = vmatpush1.bf16.msra.mxu1 %v19340_v24  ;;  %v19397_v24 = vld [vmem:[%s25322_s8 + $0x1180] ss:$16 sps:$4 sm:$0xff]  }
 0xce1   : > { %11050 = vmatprep.subr.bf16.mxu1 %v19345_v44  ;;  %v19402_v44 = vld [vmem:[%s25322_s8 + $0x11a4] ss:$16 sps:$4 sm:$0xff]  }
 0xce4   : > { %11051 = vmatpush1.bf16.msra.mxu1 %v19343_v5  ;;  %v19400_v5 = vld [vmem:[%s25322_s8 + $0x11a0] ss:$16 sps:$4 sm:$0xff]  }
 0xce5   : > { %11052 = vmatprep.subr.bf16.mxu1 %v19348_v46  ;;  %v19405_v46 = vld [vmem:[%s25322_s8 + $0x11c4] ss:$16 sps:$4 sm:$0xff]  }
 0xce8   : > { %11053 = vmatpush1.bf16.msra.mxu1 %v19346_v53  ;;  %v19403_v53 = vld [vmem:[%s25322_s8 + $0x11c0] ss:$16 sps:$4 sm:$0xff]  }
 0xce9   : > { %11054 = vmatprep.subr.bf16.mxu1 %v19351_v50  ;;  %v19408_v50 = vld [vmem:[%s25322_s8 + $0x11e4] ss:$16 sps:$4 sm:$0xff]  }
 0xcec   : > { %11055 = vmatpush1.bf16.msra.mxu1 %v19349_v57  ;;  %v19406_v57 = vld [vmem:[%s25322_s8 + $0x11e0] ss:$16 sps:$4 sm:$0xff]  }
 0xced   : > { %11056 = vmatprep.subr.bf16.mxu1 %v19354_v26  ;;  %v19411_v26 = vld [vmem:[%s25322_s8 + $0x100c] ss:$16 sps:$4 sm:$0xff]  }
 0xcf0   : > { %11057 = vmatpush1.bf16.msra.mxu1 %v19352_v40  ;;  %v19409_v40 = vld [vmem:[%s25322_s8 + $0x1008] ss:$16 sps:$4 sm:$0xff]  }
 0xcf1   : > { %11058 = vmatprep.subr.bf16.mxu1 %v19357_v55  ;;  %v19414_v55 = vld [vmem:[%s25322_s8 + $0x102c] ss:$16 sps:$4 sm:$0xff]  }
 0xcf4   : > { %11059 = vmatpush1.bf16.msra.mxu1 %v19355_v8  ;;  %v19412_v8 = vld [vmem:[%s25322_s8 + $0x1028] ss:$16 sps:$4 sm:$0xff]  }
 0xcf5   : > { %11060 = vmatprep.subr.bf16.mxu1 %v19360_v23  ;;  %v19417_v23 = vld [vmem:[%s25322_s8 + $0x104c] ss:$16 sps:$4 sm:$0xff]  }
 0xcf8   : > { %11061 = vmatpush1.bf16.msra.mxu1 %v19358_v45  ;;  %v19415_v45 = vld [vmem:[%s25322_s8 + $0x1048] ss:$16 sps:$4 sm:$0xff]  }
 0xcf9   : > { %11465 = vmatprep.subr.bf16.mxu1 %v19363_v34  ;;  %v19420_v34 = vld [vmem:[%s25322_s8 + $0x106c] ss:$16 sps:$4 sm:$0xff]  }
 0xcfb   : > { %11063 = vmatmul.mubr.bf16.vlgmr.msra.gmra.mrb[4].mxu1 %v22843_v22  ;;  %v19372_v22 = vld [vmem:[%s25322_s8 + $0x1064] ss:$16 sps:$4 sm:$0xff]  }
 0xcfc   : > { %11466 = vmatpush1.bf16.msra.mxu1 %v19361_v39  ;;  %11497 = vmatprep.mubr.bf16.mxu1 %v22864_v10  ;;  %v19423_v39 = vld [vmem:[%s25322_s8 + $0x108c] ss:$16 sps:$4 sm:$0xff]  }
 0xcfd   : > { %11467 = vmatprep.subr.bf16.mxu1 %v19366_v30  ;;  %v19421_v30 = vld [vmem:[%s25322_s8 + $0x1088] ss:$16 sps:$4 sm:$0xff]  }
 0xd00   : > { %11468 = vmatpush1.bf16.msra.mxu1 %v19364_v51  ;;  %v19426_v51 = vld [vmem:[%s25322_s8 + $0x10ac] ss:$16 sps:$4 sm:$0xff]  }
 0xd01   : > { %11469 = vmatprep.subr.bf16.mxu1 %v19369_v35  ;;  %v19424_v35 = vld [vmem:[%s25322_s8 + $0x10a8] ss:$16 sps:$4 sm:$0xff]  }
 0xd04   : > { %11470 = vmatpush1.bf16.msra.mxu1 %v19367_v4  ;;  %v19429_v4 = vld [vmem:[%s25322_s8 + $0x10cc] ss:$16 sps:$4 sm:$0xff]  }
 0xd05   : > { %11471 = vmatprep.subr.bf16.mxu1 %v19372_v22  ;;  %v19427_v22 = vld [vmem:[%s25322_s8 + $0x10c8] ss:$16 sps:$4 sm:$0xff]  }
 0xd08   : > { %11472 = vmatpush1.bf16.msra.mxu1 %v19370_v27  ;;  %v19432_v27 = vld [vmem:[%s25322_s8 + $0x10ec] ss:$16 sps:$4 sm:$0xff]  }
 0xd09   : > { %11473 = vmatprep.subr.bf16.mxu1 %v19375_v48  ;;  %v19430_v48 = vld [vmem:[%s25322_s8 + $0x10e8] ss:$16 sps:$4 sm:$0xff]  }
 0xd0c   : > { %11474 = vmatpush1.bf16.msra.mxu1 %v19373_v20  ;;  %v19435_v20 = vld [vmem:[%s25322_s8 + $0x110c] ss:$16 sps:$4 sm:$0xff]  }
 0xd0d   : > { %11475 = vmatprep.subr.bf16.mxu1 %v19378_v63  ;;  %v19433_v63 = vld [vmem:[%s25322_s8 + $0x1108] ss:$16 sps:$4 sm:$0xff]  }
 0xd10   : > { %11476 = vmatpush1.bf16.msra.mxu1 %v19376_v7  ;;  %v19438_v7 = vld [vmem:[%s25322_s8 + $0x112c] ss:$16 sps:$4 sm:$0xff]  }
 0xd11   : > { %11477 = vmatprep.subr.bf16.mxu1 %v19381_v2  ;;  %v19436_v2 = vld [vmem:[%s25322_s8 + $0x1128] ss:$16 sps:$4 sm:$0xff]  }
 0xd14   : > { %11478 = vmatpush1.bf16.msra.mxu1 %v19379_v11  ;;  %v19441_v11 = vld [vmem:[%s25322_s8 + $0x114c] ss:$16 sps:$4 sm:$0xff]  }
 0xd15   : > { %11479 = vmatprep.subr.bf16.mxu1 %v19384_v13  ;;  %v19439_v13 = vld [vmem:[%s25322_s8 + $0x1148] ss:$16 sps:$4 sm:$0xff]  }
 0xd18   : > { %11480 = vmatpush1.bf16.msra.mxu1 %v19382_v52  ;;  %v19444_v52 = vld [vmem:[%s25322_s8 + $0x116c] ss:$16 sps:$4 sm:$0xff]  }
 0xd19   : > { %11481 = vmatprep.subr.bf16.mxu1 %v19387_v14  ;;  %v19442_v14 = vld [vmem:[%s25322_s8 + $0x1168] ss:$16 sps:$4 sm:$0xff]  }
 0xd1c   : > { %11482 = vmatpush1.bf16.msra.mxu1 %v19385_v43  ;;  %v19447_v43 = vld [vmem:[%s25322_s8 + $0x118c] ss:$16 sps:$4 sm:$0xff]  }
 0xd1d   : > { %11483 = vmatprep.subr.bf16.mxu1 %v19390_v41  ;;  %v19445_v41 = vld [vmem:[%s25322_s8 + $0x1188] ss:$16 sps:$4 sm:$0xff]  }
 0xd20   : > { %11484 = vmatpush1.bf16.msra.mxu1 %v19388_v15  ;;  %v19450_v15 = vld [vmem:[%s25322_s8 + $0x11ac] ss:$16 sps:$4 sm:$0xff]  }
 0xd21   : > { %11485 = vmatprep.subr.bf16.mxu1 %v19393_v19  ;;  %v19448_v19 = vld [vmem:[%s25322_s8 + $0x11a8] ss:$16 sps:$4 sm:$0xff]  }
 0xd24   : > { %11486 = vmatpush1.bf16.msra.mxu1 %v19391_v17  ;;  %v19453_v17 = vld [vmem:[%s25322_s8 + $0x11cc] ss:$16 sps:$4 sm:$0xff]  }
 0xd25   : > { %11487 = vmatprep.subr.bf16.mxu1 %v19396_v61  ;;  %v19451_v61 = vld [vmem:[%s25322_s8 + $0x11c8] ss:$16 sps:$4 sm:$0xff]  }
 0xd28   : > { %11488 = vmatpush1.bf16.msra.mxu1 %v19394_v32  ;;  %v19456_v32 = vld [vmem:[%s25322_s8 + $0x11ec] ss:$16 sps:$4 sm:$0xff]  }
 0xd29   : > { %11489 = vmatprep.subr.bf16.mxu1 %v19399_v59  ;;  %v19454_v59 = vld [vmem:[%s25322_s8 + $0x11e8] ss:$16 sps:$4 sm:$0xff]  }
 0xd2c   : > { %11490 = vmatpush1.bf16.msra.mxu1 %v19397_v24  ;;  %v19459_v24 = vld [vmem:[%s25322_s8 + $0x1204] ss:$16 sps:$4 sm:$0xff]  }
 0xd2d   : > { %11491 = vmatprep.subr.bf16.mxu1 %v19402_v44  ;;  %v19457_v44 = vld [vmem:[%s25322_s8 + $0x1200] ss:$16 sps:$4 sm:$0xff]  }
 0xd30   : > { %11492 = vmatpush1.bf16.msra.mxu1 %v19400_v5  ;;  %v19462_v5 = vld [vmem:[%s25322_s8 + $0x1224] ss:$16 sps:$4 sm:$0xff]  }
 0xd31   : > { %11493 = vmatprep.subr.bf16.mxu1 %v19405_v46  ;;  %v19460_v46 = vld [vmem:[%s25322_s8 + $0x1220] ss:$16 sps:$4 sm:$0xff]  }
 0xd34   : > { %11494 = vmatpush1.bf16.msra.mxu1 %v19403_v53  ;;  %v19465_v53 = vld [vmem:[%s25322_s8 + $0x1244] ss:$16 sps:$4 sm:$0xff]  }
 0xd35   : > { %11495 = vmatprep.subr.bf16.mxu1 %v19408_v50  ;;  %v19463_v50 = vld [vmem:[%s25322_s8 + $0x1240] ss:$16 sps:$4 sm:$0xff]  }
 0xd38   : > { %11496 = vmatpush1.bf16.msra.mxu1 %v19406_v57  ;;  %v19466_v57 = vld [vmem:[%s25322_s8 + $0x1260] ss:$16 sps:$4 sm:$0xff]  }
 0xd39   : > { %11508 = vmatprep.subr.bf16.mxu1 %v19411_v26  ;;  %v19471_v26 = vld [vmem:[%s25322_s8 + $0x1284] ss:$16 sps:$4 sm:$0xff]  }
 0xd3b   : > { %11498 = vmatmul.mubr.bf16.vlgmr.msra.gmra.mrb[0].mxu1 %v22859_v31 }
 0xd3c   : > { %11509 = vmatpush1.bf16.msra.mxu1 %v19409_v40  ;;  %11540 = vmatprep.mubr.bf16.mxu1 %v22864_v10  ;;  %v19418_v10 = vld [vmem:[%s25322_s8 + $0x1068] ss:$16 sps:$4 sm:$0xff]   ;;  %v19469_v40 = vld [vmem:[%s25322_s8 + $0x1280] ss:$16 sps:$4 sm:$0xff]  }
 0xd3d   : > { %11510 = vmatprep.subr.bf16.mxu1 %v19414_v55  ;;  %v19474_v55 = vld [vmem:[%s25322_s8 + $0x12a4] ss:$16 sps:$4 sm:$0xff]  }
 0xd40   : > { %11511 = vmatpush1.bf16.msra.mxu1 %v19412_v8  ;;  %v19472_v8 = vld [vmem:[%s25322_s8 + $0x12a0] ss:$16 sps:$4 sm:$0xff]  }
 0xd41   : > { %11512 = vmatprep.subr.bf16.mxu1 %v19417_v23  ;;  %v19477_v23 = vld [vmem:[%s25322_s8 + $0x12c4] ss:$16 sps:$4 sm:$0xff]  }
 0xd44   : > { %11513 = vmatpush1.bf16.msra.mxu1 %v19415_v45  ;;  %v19475_v45 = vld [vmem:[%s25322_s8 + $0x12c0] ss:$16 sps:$4 sm:$0xff]  }
 0xd45   : > { %11514 = vmatprep.subr.bf16.mxu1 %v19420_v34  ;;  %v19480_v34 = vld [vmem:[%s25322_s8 + $0x12e4] ss:$16 sps:$4 sm:$0xff]  }
 0xd48   : > { %11515 = vmatpush1.bf16.msra.mxu1 %v19418_v10  ;;  %v19478_v10 = vld [vmem:[%s25322_s8 + $0x12e0] ss:$16 sps:$4 sm:$0xff]  }
 0xd49   : > { %11516 = vmatprep.subr.bf16.mxu1 %v19423_v39  ;;  %v19483_v39 = vld [vmem:[%s25322_s8 + $0x1304] ss:$16 sps:$4 sm:$0xff]  }
 0xd4c   : > { %11517 = vmatpush1.bf16.msra.mxu1 %v19421_v30  ;;  %v19481_v30 = vld [vmem:[%s25322_s8 + $0x1300] ss:$16 sps:$4 sm:$0xff]  }
 0xd4d   : > { %11518 = vmatprep.subr.bf16.mxu1 %v19426_v51  ;;  %v19486_v51 = vld [vmem:[%s25322_s8 + $0x1324] ss:$16 sps:$4 sm:$0xff]  }
 0xd50   : > { %11519 = vmatpush1.bf16.msra.mxu1 %v19424_v35  ;;  %v19484_v35 = vld [vmem:[%s25322_s8 + $0x1320] ss:$16 sps:$4 sm:$0xff]  }
 0xd51   : > { %11520 = vmatprep.subr.bf16.mxu1 %v19429_v4  ;;  %v19489_v4 = vld [vmem:[%s25322_s8 + $0x1344] ss:$16 sps:$4 sm:$0xff]  }
 0xd54   : > { %11521 = vmatpush1.bf16.msra.mxu1 %v19427_v22  ;;  %v19487_v22 = vld [vmem:[%s25322_s8 + $0x1340] ss:$16 sps:$4 sm:$0xff]  }
 0xd55   : > { %11522 = vmatprep.subr.bf16.mxu1 %v19432_v27  ;;  %v19492_v27 = vld [vmem:[%s25322_s8 + $0x1364] ss:$16 sps:$4 sm:$0xff]  }
 0xd58   : > { %11523 = vmatpush1.bf16.msra.mxu1 %v19430_v48  ;;  %v19490_v48 = vld [vmem:[%s25322_s8 + $0x1360] ss:$16 sps:$4 sm:$0xff]  }
 0xd59   : > { %11524 = vmatprep.subr.bf16.mxu1 %v19435_v20  ;;  %v19495_v20 = vld [vmem:[%s25322_s8 + $0x1384] ss:$16 sps:$4 sm:$0xff]  }
 0xd5c   : > { %11525 = vmatpush1.bf16.msra.mxu1 %v19433_v63  ;;  %v19493_v63 = vld [vmem:[%s25322_s8 + $0x1380] ss:$16 sps:$4 sm:$0xff]  }
 0xd5d   : > { %11526 = vmatprep.subr.bf16.mxu1 %v19438_v7  ;;  %v19498_v7 = vld [vmem:[%s25322_s8 + $0x13a4] ss:$16 sps:$4 sm:$0xff]  }
 0xd60   : > { %11527 = vmatpush1.bf16.msra.mxu1 %v19436_v2  ;;  %v19496_v2 = vld [vmem:[%s25322_s8 + $0x13a0] ss:$16 sps:$4 sm:$0xff]  }
 0xd61   : > { %11528 = vmatprep.subr.bf16.mxu1 %v19441_v11  ;;  %v19501_v11 = vld [vmem:[%s25322_s8 + $0x13c4] ss:$16 sps:$4 sm:$0xff]  }
 0xd64   : > { %11529 = vmatpush1.bf16.msra.mxu1 %v19439_v13  ;;  %v19499_v13 = vld [vmem:[%s25322_s8 + $0x13c0] ss:$16 sps:$4 sm:$0xff]  }
 0xd65   : > { %11530 = vmatprep.subr.bf16.mxu1 %v19444_v52  ;;  %v19504_v52 = vld [vmem:[%s25322_s8 + $0x13e4] ss:$16 sps:$4 sm:$0xff]  }
 0xd68   : > { %11531 = vmatpush1.bf16.msra.mxu1 %v19442_v14  ;;  %v19502_v14 = vld [vmem:[%s25322_s8 + $0x13e0] ss:$16 sps:$4 sm:$0xff]  }
 0xd69   : > { %11532 = vmatprep.subr.bf16.mxu1 %v19447_v43  ;;  %v19507_v43 = vld [vmem:[%s25322_s8 + $0x120c] ss:$16 sps:$4 sm:$0xff]  }
 0xd6c   : > { %11533 = vmatpush1.bf16.msra.mxu1 %v19445_v41  ;;  %v19505_v41 = vld [vmem:[%s25322_s8 + $0x1208] ss:$16 sps:$4 sm:$0xff]  }
 0xd6d   : > { %11534 = vmatprep.subr.bf16.mxu1 %v19450_v15  ;;  %v19510_v15 = vld [vmem:[%s25322_s8 + $0x122c] ss:$16 sps:$4 sm:$0xff]  }
 0xd70   : > { %11535 = vmatpush1.bf16.msra.mxu1 %v19448_v19  ;;  %v19508_v19 = vld [vmem:[%s25322_s8 + $0x1228] ss:$16 sps:$4 sm:$0xff]  }
 0xd71   : > { %11536 = vmatprep.subr.bf16.mxu1 %v19453_v17  ;;  %v19513_v17 = vld [vmem:[%s25322_s8 + $0x124c] ss:$16 sps:$4 sm:$0xff]  }
 0xd74   : > { %11537 = vmatpush1.bf16.msra.mxu1 %v19451_v61  ;;  %v19511_v61 = vld [vmem:[%s25322_s8 + $0x1248] ss:$16 sps:$4 sm:$0xff]  }
 0xd75   : > { %11538 = vmatprep.subr.bf16.mxu1 %v19456_v32  ;;  %v19516_v32 = vld [vmem:[%s25322_s8 + $0x126c] ss:$16 sps:$4 sm:$0xff]  }
 0xd78   : > { %11539 = vmatpush1.bf16.msra.mxu1 %v19454_v59  ;;  %v19519_v59 = vld [vmem:[%s25322_s8 + $0x128c] ss:$16 sps:$4 sm:$0xff]  }
 0xd79   : > { %11943 = vmatprep.subr.bf16.mxu1 %v19459_v24  ;;  %v19517_v24 = vld [vmem:[%s25322_s8 + $0x1288] ss:$16 sps:$4 sm:$0xff]  }
 0xd7b   : > { %11541 = vmatmul.mubr.bf16.vlgmr.msra.gmra.mrb[4].mxu1 %v22859_v31  ;;  %v19468_v31 = vld [vmem:[%s25322_s8 + $0x1264] ss:$16 sps:$4 sm:$0xff]  }
 0xd7c   : > { %11944 = vmatpush1.bf16.msra.mxu1 %v19457_v44  ;;  %11975 = vmatprep.mubr.bf16.mxu1 %v22877_v38  ;;  %v19522_v44 = vld [vmem:[%s25322_s8 + $0x12ac] ss:$16 sps:$4 sm:$0xff]  }
 0xd7d   : > { %11945 = vmatprep.subr.bf16.mxu1 %v19462_v5  ;;  %v19520_v5 = vld [vmem:[%s25322_s8 + $0x12a8] ss:$16 sps:$4 sm:$0xff]  }
 0xd80   : > { %11946 = vmatpush1.bf16.msra.mxu1 %v19460_v46  ;;  %v19525_v46 = vld [vmem:[%s25322_s8 + $0x12cc] ss:$16 sps:$4 sm:$0xff]  }
 0xd81   : > { %11947 = vmatprep.subr.bf16.mxu1 %v19465_v53  ;;  %v19523_v53 = vld [vmem:[%s25322_s8 + $0x12c8] ss:$16 sps:$4 sm:$0xff]  }
 0xd84   : > { %11948 = vmatpush1.bf16.msra.mxu1 %v19463_v50  ;;  %v19528_v50 = vld [vmem:[%s25322_s8 + $0x12ec] ss:$16 sps:$4 sm:$0xff]  }
 0xd85   : > { %11949 = vmatprep.subr.bf16.mxu1 %v19468_v31  ;;  %v19526_v31 = vld [vmem:[%s25322_s8 + $0x12e8] ss:$16 sps:$4 sm:$0xff]  }
 0xd88   : > { %11950 = vmatpush1.bf16.msra.mxu1 %v19466_v57  ;;  %v19531_v57 = vld [vmem:[%s25322_s8 + $0x130c] ss:$16 sps:$4 sm:$0xff]  }
 0xd89   : > { %11951 = vmatprep.subr.bf16.mxu1 %v19471_v26  ;;  %v19529_v26 = vld [vmem:[%s25322_s8 + $0x1308] ss:$16 sps:$4 sm:$0xff]  }
 0xd8c   : > { %11952 = vmatpush1.bf16.msra.mxu1 %v19469_v40  ;;  %v19534_v40 = vld [vmem:[%s25322_s8 + $0x132c] ss:$16 sps:$4 sm:$0xff]  }
 0xd8d   : > { %11953 = vmatprep.subr.bf16.mxu1 %v19474_v55  ;;  %v19532_v55 = vld [vmem:[%s25322_s8 + $0x1328] ss:$16 sps:$4 sm:$0xff]  }
 0xd90   : > { %11954 = vmatpush1.bf16.msra.mxu1 %v19472_v8  ;;  %v19537_v8 = vld [vmem:[%s25322_s8 + $0x134c] ss:$16 sps:$4 sm:$0xff]  }
 0xd91   : > { %11955 = vmatprep.subr.bf16.mxu1 %v19477_v23  ;;  %v19535_v23 = vld [vmem:[%s25322_s8 + $0x1348] ss:$16 sps:$4 sm:$0xff]  }
 0xd94   : > { %11956 = vmatpush1.bf16.msra.mxu1 %v19475_v45  ;;  %v19540_v45 = vld [vmem:[%s25322_s8 + $0x136c] ss:$16 sps:$4 sm:$0xff]  }
 0xd95   : > { %11957 = vmatprep.subr.bf16.mxu1 %v19480_v34  ;;  %v19538_v34 = vld [vmem:[%s25322_s8 + $0x1368] ss:$16 sps:$4 sm:$0xff]  }
 0xd98   : > { %11958 = vmatpush1.bf16.msra.mxu1 %v19478_v10  ;;  %v19543_v10 = vld [vmem:[%s25322_s8 + $0x138c] ss:$16 sps:$4 sm:$0xff]  }
 0xd99   : > { %11959 = vmatprep.subr.bf16.mxu1 %v19483_v39  ;;  %v19541_v39 = vld [vmem:[%s25322_s8 + $0x1388] ss:$16 sps:$4 sm:$0xff]  }
 0xd9c   : > { %11960 = vmatpush1.bf16.msra.mxu1 %v19481_v30  ;;  %v19546_v30 = vld [vmem:[%s25322_s8 + $0x13ac] ss:$16 sps:$4 sm:$0xff]  }
 0xd9d   : > { %11961 = vmatprep.subr.bf16.mxu1 %v19486_v51  ;;  %v19544_v51 = vld [vmem:[%s25322_s8 + $0x13a8] ss:$16 sps:$4 sm:$0xff]  }
 0xda0   : > { %11962 = vmatpush1.bf16.msra.mxu1 %v19484_v35  ;;  %v19549_v35 = vld [vmem:[%s25322_s8 + $0x13cc] ss:$16 sps:$4 sm:$0xff]  }
 0xda1   : > { %11963 = vmatprep.subr.bf16.mxu1 %v19489_v4  ;;  %v19547_v4 = vld [vmem:[%s25322_s8 + $0x13c8] ss:$16 sps:$4 sm:$0xff]  }
 0xda4   : > { %11964 = vmatpush1.bf16.msra.mxu1 %v19487_v22  ;;  %v19552_v22 = vld [vmem:[%s25322_s8 + $0x13ec] ss:$16 sps:$4 sm:$0xff]  }
 0xda5   : > { %11965 = vmatprep.subr.bf16.mxu1 %v19492_v27  ;;  %v19550_v27 = vld [vmem:[%s25322_s8 + $0x13e8] ss:$16 sps:$4 sm:$0xff]  }
 0xda8   : > { %11966 = vmatpush1.bf16.msra.mxu1 %v19490_v48  ;;  %v19555_v48 = vld [vmem:[%s25322_s8 + $0x1404] ss:$16 sps:$4 sm:$0xff]  }
 0xda9   : > { %11967 = vmatprep.subr.bf16.mxu1 %v19495_v20  ;;  %v19553_v20 = vld [vmem:[%s25322_s8 + $0x1400] ss:$16 sps:$4 sm:$0xff]  }
 0xdac   : > { %11968 = vmatpush1.bf16.msra.mxu1 %v19493_v63  ;;  %v19558_v63 = vld [vmem:[%s25322_s8 + $0x1424] ss:$16 sps:$4 sm:$0xff]  }
 0xdad   : > { %11969 = vmatprep.subr.bf16.mxu1 %v19498_v7  ;;  %v19556_v7 = vld [vmem:[%s25322_s8 + $0x1420] ss:$16 sps:$4 sm:$0xff]  }
 0xdb0   : > { %11970 = vmatpush1.bf16.msra.mxu1 %v19496_v2  ;;  %v19561_v2 = vld [vmem:[%s25322_s8 + $0x1444] ss:$16 sps:$4 sm:$0xff]  }
 0xdb1   : > { %11971 = vmatprep.subr.bf16.mxu1 %v19501_v11  ;;  %v19559_v11 = vld [vmem:[%s25322_s8 + $0x1440] ss:$16 sps:$4 sm:$0xff]  }
 0xdb4   : > { %11972 = vmatpush1.bf16.msra.mxu1 %v19499_v13  ;;  %v19562_v13 = vld [vmem:[%s25322_s8 + $0x1460] ss:$16 sps:$4 sm:$0xff]  }
 0xdb5   : > { %11973 = vmatprep.subr.bf16.mxu1 %v19504_v52  ;;  %v19567_v52 = vld [vmem:[%s25322_s8 + $0x1484] ss:$16 sps:$4 sm:$0xff]  }
 0xdb8   : > { %11974 = vmatpush1.bf16.msra.mxu1 %v19502_v14  ;;  %v19565_v14 = vld [vmem:[%s25322_s8 + $0x1480] ss:$16 sps:$4 sm:$0xff]  }
 0xdb9   : > { %11986 = vmatprep.subr.bf16.mxu1 %v19507_v43  ;;  %v19570_v43 = vld [vmem:[%s25322_s8 + $0x14a4] ss:$16 sps:$4 sm:$0xff]  }
 0xdbb   : > { %11976 = vmatmul.mubr.bf16.vlgmr.msra.gmra.mrb[0].mxu1 %v22872_v28 }
 0xdbc   : > { %11987 = vmatpush1.bf16.msra.mxu1 %v19505_v41  ;;  %12018 = vmatprep.mubr.bf16.mxu1 %v22877_v38  ;;  %v19514_v38 = vld [vmem:[%s25322_s8 + $0x1268] ss:$16 sps:$4 sm:$0xff]   ;;  %v19568_v41 = vld [vmem:[%s25322_s8 + $0x14a0] ss:$16 sps:$4 sm:$0xff]  }
 0xdbd   : > { %11988 = vmatprep.subr.bf16.mxu1 %v19510_v15  ;;  %v19573_v15 = vld [vmem:[%s25322_s8 + $0x14c4] ss:$16 sps:$4 sm:$0xff]  }
 0xdc0   : > { %11989 = vmatpush1.bf16.msra.mxu1 %v19508_v19  ;;  %v19571_v19 = vld [vmem:[%s25322_s8 + $0x14c0] ss:$16 sps:$4 sm:$0xff]  }
 0xdc1   : > { %11990 = vmatprep.subr.bf16.mxu1 %v19513_v17  ;;  %v19576_v17 = vld [vmem:[%s25322_s8 + $0x14e4] ss:$16 sps:$4 sm:$0xff]  }
 0xdc4   : > { %11991 = vmatpush1.bf16.msra.mxu1 %v19511_v61  ;;  %v19574_v61 = vld [vmem:[%s25322_s8 + $0x14e0] ss:$16 sps:$4 sm:$0xff]  }
 0xdc5   : > { %11992 = vmatprep.subr.bf16.mxu1 %v19516_v32  ;;  %v19579_v32 = vld [vmem:[%s25322_s8 + $0x1504] ss:$16 sps:$4 sm:$0xff]  }
 0xdc8   : > { %11993 = vmatpush1.bf16.msra.mxu1 %v19514_v38  ;;  %v19577_v38 = vld [vmem:[%s25322_s8 + $0x1500] ss:$16 sps:$4 sm:$0xff]  }
 0xdc9   : > { %11994 = vmatprep.subr.bf16.mxu1 %v19519_v59  ;;  %v19582_v59 = vld [vmem:[%s25322_s8 + $0x1524] ss:$16 sps:$4 sm:$0xff]  }
 0xdcc   : > { %11995 = vmatpush1.bf16.msra.mxu1 %v19517_v24  ;;  %v19580_v24 = vld [vmem:[%s25322_s8 + $0x1520] ss:$16 sps:$4 sm:$0xff]  }
 0xdcd   : > { %11996 = vmatprep.subr.bf16.mxu1 %v19522_v44  ;;  %v19585_v44 = vld [vmem:[%s25322_s8 + $0x1544] ss:$16 sps:$4 sm:$0xff]  }
 0xdd0   : > { %11997 = vmatpush1.bf16.msra.mxu1 %v19520_v5  ;;  %v19583_v5 = vld [vmem:[%s25322_s8 + $0x1540] ss:$16 sps:$4 sm:$0xff]  }
 0xdd1   : > { %11998 = vmatprep.subr.bf16.mxu1 %v19525_v46  ;;  %v19588_v46 = vld [vmem:[%s25322_s8 + $0x1564] ss:$16 sps:$4 sm:$0xff]  }
 0xdd4   : > { %11999 = vmatpush1.bf16.msra.mxu1 %v19523_v53  ;;  %v19586_v53 = vld [vmem:[%s25322_s8 + $0x1560] ss:$16 sps:$4 sm:$0xff]  }
 0xdd5   : > { %12000 = vmatprep.subr.bf16.mxu1 %v19528_v50  ;;  %v19591_v50 = vld [vmem:[%s25322_s8 + $0x1584] ss:$16 sps:$4 sm:$0xff]  }
 0xdd8   : > { %12001 = vmatpush1.bf16.msra.mxu1 %v19526_v31  ;;  %v19589_v31 = vld [vmem:[%s25322_s8 + $0x1580] ss:$16 sps:$4 sm:$0xff]  }
 0xdd9   : > { %12002 = vmatprep.subr.bf16.mxu1 %v19531_v57  ;;  %v19594_v57 = vld [vmem:[%s25322_s8 + $0x15a4] ss:$16 sps:$4 sm:$0xff]  }
 0xddc   : > { %12003 = vmatpush1.bf16.msra.mxu1 %v19529_v26  ;;  %v19592_v26 = vld [vmem:[%s25322_s8 + $0x15a0] ss:$16 sps:$4 sm:$0xff]  }
 0xddd   : > { %12004 = vmatprep.subr.bf16.mxu1 %v19534_v40  ;;  %v19597_v40 = vld [vmem:[%s25322_s8 + $0x15c4] ss:$16 sps:$4 sm:$0xff]  }
 0xde0   : > { %12005 = vmatpush1.bf16.msra.mxu1 %v19532_v55  ;;  %v19595_v55 = vld [vmem:[%s25322_s8 + $0x15c0] ss:$16 sps:$4 sm:$0xff]  }
 0xde1   : > { %12006 = vmatprep.subr.bf16.mxu1 %v19537_v8  ;;  %v19600_v8 = vld [vmem:[%s25322_s8 + $0x15e4] ss:$16 sps:$4 sm:$0xff]  }
 0xde4   : > { %12007 = vmatpush1.bf16.msra.mxu1 %v19535_v23  ;;  %v19598_v23 = vld [vmem:[%s25322_s8 + $0x15e0] ss:$16 sps:$4 sm:$0xff]  }
 0xde5   : > { %12008 = vmatprep.subr.bf16.mxu1 %v19540_v45  ;;  %v19603_v45 = vld [vmem:[%s25322_s8 + $0x140c] ss:$16 sps:$4 sm:$0xff]  }
 0xde8   : > { %12009 = vmatpush1.bf16.msra.mxu1 %v19538_v34  ;;  %v19601_v34 = vld [vmem:[%s25322_s8 + $0x1408] ss:$16 sps:$4 sm:$0xff]  }
 0xde9   : > { %12010 = vmatprep.subr.bf16.mxu1 %v19543_v10  ;;  %v19606_v10 = vld [vmem:[%s25322_s8 + $0x142c] ss:$16 sps:$4 sm:$0xff]  }
 0xdec   : > { %12011 = vmatpush1.bf16.msra.mxu1 %v19541_v39  ;;  %v19604_v39 = vld [vmem:[%s25322_s8 + $0x1428] ss:$16 sps:$4 sm:$0xff]  }
 0xded   : > { %12012 = vmatprep.subr.bf16.mxu1 %v19546_v30  ;;  %v19609_v30 = vld [vmem:[%s25322_s8 + $0x144c] ss:$16 sps:$4 sm:$0xff]  }
 0xdf0   : > { %12013 = vmatpush1.bf16.msra.mxu1 %v19544_v51  ;;  %v19607_v51 = vld [vmem:[%s25322_s8 + $0x1448] ss:$16 sps:$4 sm:$0xff]  }
 0xdf1   : > { %12014 = vmatprep.subr.bf16.mxu1 %v19549_v35  ;;  %v19612_v35 = vld [vmem:[%s25322_s8 + $0x146c] ss:$16 sps:$4 sm:$0xff]  }
 0xdf4   : > { %12015 = vmatpush1.bf16.msra.mxu1 %v19547_v4  ;;  %v19615_v4 = vld [vmem:[%s25322_s8 + $0x148c] ss:$16 sps:$4 sm:$0xff]  }
 0xdf5   : > { %12016 = vmatprep.subr.bf16.mxu1 %v19552_v22  ;;  %v19613_v22 = vld [vmem:[%s25322_s8 + $0x1488] ss:$16 sps:$4 sm:$0xff]  }
 0xdf8   : > { %12017 = vmatpush1.bf16.msra.mxu1 %v19550_v27  ;;  %v19618_v27 = vld [vmem:[%s25322_s8 + $0x14ac] ss:$16 sps:$4 sm:$0xff]  }
 0xdf9   : > { %12421 = vmatprep.subr.bf16.mxu1 %v19555_v48  ;;  %v19616_v48 = vld [vmem:[%s25322_s8 + $0x14a8] ss:$16 sps:$4 sm:$0xff]  }
 0xdfb   : > { %12019 = vmatmul.mubr.bf16.vlgmr.msra.gmra.mrb[4].mxu1 %v22872_v28  ;;  %v19564_v28 = vld [vmem:[%s25322_s8 + $0x1464] ss:$16 sps:$4 sm:$0xff]  }
 0xdfc   : > { %12422 = vmatpush1.bf16.msra.mxu1 %v19553_v20  ;;  %12453 = vmatprep.mubr.bf16.mxu1 %v22887_v47  ;;  %v19621_v20 = vld [vmem:[%s25322_s8 + $0x14cc] ss:$16 sps:$4 sm:$0xff]  }
 0xdfd   : > { %12423 = vmatprep.subr.bf16.mxu1 %v19558_v63  ;;  %v19619_v63 = vld [vmem:[%s25322_s8 + $0x14c8] ss:$16 sps:$4 sm:$0xff]  }
 0xe00   : > { %12424 = vmatpush1.bf16.msra.mxu1 %v19556_v7  ;;  %v19624_v7 = vld [vmem:[%s25322_s8 + $0x14ec] ss:$16 sps:$4 sm:$0xff]  }
 0xe01   : > { %12425 = vmatprep.subr.bf16.mxu1 %v19561_v2  ;;  %v19622_v2 = vld [vmem:[%s25322_s8 + $0x14e8] ss:$16 sps:$4 sm:$0xff]  }
 0xe04   : > { %12426 = vmatpush1.bf16.msra.mxu1 %v19559_v11  ;;  %v19627_v11 = vld [vmem:[%s25322_s8 + $0x150c] ss:$16 sps:$4 sm:$0xff]  }
 0xe05   : > { %12427 = vmatprep.subr.bf16.mxu1 %v19564_v28  ;;  %v19625_v28 = vld [vmem:[%s25322_s8 + $0x1508] ss:$16 sps:$4 sm:$0xff]  }
 0xe08   : > { %12428 = vmatpush1.bf16.msra.mxu1 %v19562_v13  ;;  %v19630_v13 = vld [vmem:[%s25322_s8 + $0x152c] ss:$16 sps:$4 sm:$0xff]  }
 0xe09   : > { %12429 = vmatprep.subr.bf16.mxu1 %v19567_v52  ;;  %v19628_v52 = vld [vmem:[%s25322_s8 + $0x1528] ss:$16 sps:$4 sm:$0xff]  }
 0xe0c   : > { %12430 = vmatpush1.bf16.msra.mxu1 %v19565_v14  ;;  %v19633_v14 = vld [vmem:[%s25322_s8 + $0x154c] ss:$16 sps:$4 sm:$0xff]  }
 0xe0d   : > { %12431 = vmatprep.subr.bf16.mxu1 %v19570_v43  ;;  %v19631_v43 = vld [vmem:[%s25322_s8 + $0x1548] ss:$16 sps:$4 sm:$0xff]  }
 0xe10   : > { %12432 = vmatpush1.bf16.msra.mxu1 %v19568_v41  ;;  %v19636_v41 = vld [vmem:[%s25322_s8 + $0x156c] ss:$16 sps:$4 sm:$0xff]  }
 0xe11   : > { %12433 = vmatprep.subr.bf16.mxu1 %v19573_v15  ;;  %v19634_v15 = vld [vmem:[%s25322_s8 + $0x1568] ss:$16 sps:$4 sm:$0xff]  }
 0xe14   : > { %12434 = vmatpush1.bf16.msra.mxu1 %v19571_v19  ;;  %v19639_v19 = vld [vmem:[%s25322_s8 + $0x158c] ss:$16 sps:$4 sm:$0xff]  }
 0xe15   : > { %12435 = vmatprep.subr.bf16.mxu1 %v19576_v17  ;;  %v19637_v17 = vld [vmem:[%s25322_s8 + $0x1588] ss:$16 sps:$4 sm:$0xff]  }
 0xe18   : > { %12436 = vmatpush1.bf16.msra.mxu1 %v19574_v61  ;;  %v19642_v61 = vld [vmem:[%s25322_s8 + $0x15ac] ss:$16 sps:$4 sm:$0xff]  }
 0xe19   : > { %12437 = vmatprep.subr.bf16.mxu1 %v19579_v32  ;;  %v19640_v32 = vld [vmem:[%s25322_s8 + $0x15a8] ss:$16 sps:$4 sm:$0xff]  }
 0xe1c   : > { %12438 = vmatpush1.bf16.msra.mxu1 %v19577_v38  ;;  %v19645_v38 = vld [vmem:[%s25322_s8 + $0x15cc] ss:$16 sps:$4 sm:$0xff]  }
 0xe1d   : > { %12439 = vmatprep.subr.bf16.mxu1 %v19582_v59  ;;  %v19643_v59 = vld [vmem:[%s25322_s8 + $0x15c8] ss:$16 sps:$4 sm:$0xff]  }
 0xe20   : > { %12440 = vmatpush1.bf16.msra.mxu1 %v19580_v24  ;;  %v19648_v24 = vld [vmem:[%s25322_s8 + $0x15ec] ss:$16 sps:$4 sm:$0xff]  }
 0xe21   : > { %12441 = vmatprep.subr.bf16.mxu1 %v19585_v44  ;;  %v19646_v44 = vld [vmem:[%s25322_s8 + $0x15e8] ss:$16 sps:$4 sm:$0xff]  }
 0xe24   : > { %12442 = vmatpush1.bf16.msra.mxu1 %v19583_v5  ;;  %v19651_v5 = vld [vmem:[%s25322_s8 + $0x1604] ss:$16 sps:$4 sm:$0xff]  }
 0xe25   : > { %12443 = vmatprep.subr.bf16.mxu1 %v19588_v46  ;;  %v19649_v46 = vld [vmem:[%s25322_s8 + $0x1600] ss:$16 sps:$4 sm:$0xff]  }
 0xe28   : > { %12444 = vmatpush1.bf16.msra.mxu1 %v19586_v53  ;;  %v19654_v53 = vld [vmem:[%s25322_s8 + $0x1624] ss:$16 sps:$4 sm:$0xff]  }
 0xe29   : > { %12445 = vmatprep.subr.bf16.mxu1 %v19591_v50  ;;  %v19652_v50 = vld [vmem:[%s25322_s8 + $0x1620] ss:$16 sps:$4 sm:$0xff]  }
 0xe2c   : > { %12446 = vmatpush1.bf16.msra.mxu1 %v19589_v31  ;;  %v19657_v31 = vld [vmem:[%s25322_s8 + $0x1644] ss:$16 sps:$4 sm:$0xff]  }
 0xe2d   : > { %12447 = vmatprep.subr.bf16.mxu1 %v19594_v57  ;;  %v19655_v57 = vld [vmem:[%s25322_s8 + $0x1640] ss:$16 sps:$4 sm:$0xff]  }
 0xe30   : > { %12448 = vmatpush1.bf16.msra.mxu1 %v19592_v26  ;;  %v19658_v26 = vld [vmem:[%s25322_s8 + $0x1660] ss:$16 sps:$4 sm:$0xff]  }
 0xe31   : > { %12449 = vmatprep.subr.bf16.mxu1 %v19597_v40  ;;  %v19663_v40 = vld [vmem:[%s25322_s8 + $0x1684] ss:$16 sps:$4 sm:$0xff]  }
 0xe34   : > { %12450 = vmatpush1.bf16.msra.mxu1 %v19595_v55  ;;  %v19661_v55 = vld [vmem:[%s25322_s8 + $0x1680] ss:$16 sps:$4 sm:$0xff]  }
 0xe35   : > { %12451 = vmatprep.subr.bf16.mxu1 %v19600_v8  ;;  %v19666_v8 = vld [vmem:[%s25322_s8 + $0x16a4] ss:$16 sps:$4 sm:$0xff]  }
 0xe38   : > { %12452 = vmatpush1.bf16.msra.mxu1 %v19598_v23  ;;  %v19664_v23 = vld [vmem:[%s25322_s8 + $0x16a0] ss:$16 sps:$4 sm:$0xff]  }
 0xe39   : > { %12464 = vmatprep.subr.bf16.mxu1 %v19603_v45  ;;  %v19669_v45 = vld [vmem:[%s25322_s8 + $0x16c4] ss:$16 sps:$4 sm:$0xff]  }
 0xe3b   : > { %12454 = vmatmul.mubr.bf16.vlgmr.msra.gmra.mrb[0].mxu1 %v22882_v16 }
 0xe3c   : > { %12465 = vmatpush1.bf16.msra.mxu1 %v19601_v34  ;;  %12496 = vmatprep.mubr.bf16.mxu1 %v22887_v47  ;;  %v19610_v47 = vld [vmem:[%s25322_s8 + $0x1468] ss:$16 sps:$4 sm:$0xff]   ;;  %v19667_v34 = vld [vmem:[%s25322_s8 + $0x16c0] ss:$16 sps:$4 sm:$0xff]  }
 0xe3d   : > { %12466 = vmatprep.subr.bf16.mxu1 %v19606_v10  ;;  %v19672_v10 = vld [vmem:[%s25322_s8 + $0x16e4] ss:$16 sps:$4 sm:$0xff]  }
 0xe40   : > { %12467 = vmatpush1.bf16.msra.mxu1 %v19604_v39  ;;  %v19670_v39 = vld [vmem:[%s25322_s8 + $0x16e0] ss:$16 sps:$4 sm:$0xff]  }
 0xe41   : > { %12468 = vmatprep.subr.bf16.mxu1 %v19609_v30  ;;  %v19675_v30 = vld [vmem:[%s25322_s8 + $0x1704] ss:$16 sps:$4 sm:$0xff]  }
 0xe44   : > { %12469 = vmatpush1.bf16.msra.mxu1 %v19607_v51  ;;  %v19673_v51 = vld [vmem:[%s25322_s8 + $0x1700] ss:$16 sps:$4 sm:$0xff]  }
 0xe45   : > { %12470 = vmatprep.subr.bf16.mxu1 %v19612_v35  ;;  %v19678_v35 = vld [vmem:[%s25322_s8 + $0x1724] ss:$16 sps:$4 sm:$0xff]  }
 0xe48   : > { %12471 = vmatpush1.bf16.msra.mxu1 %v19610_v47  ;;  %v19676_v47 = vld [vmem:[%s25322_s8 + $0x1720] ss:$16 sps:$4 sm:$0xff]  }
 0xe49   : > { %12472 = vmatprep.subr.bf16.mxu1 %v19615_v4  ;;  %v19681_v4 = vld [vmem:[%s25322_s8 + $0x1744] ss:$16 sps:$4 sm:$0xff]  }
 0xe4c   : > { %12473 = vmatpush1.bf16.msra.mxu1 %v19613_v22  ;;  %v19679_v22 = vld [vmem:[%s25322_s8 + $0x1740] ss:$16 sps:$4 sm:$0xff]  }
 0xe4d   : > { %12474 = vmatprep.subr.bf16.mxu1 %v19618_v27  ;;  %v19684_v27 = vld [vmem:[%s25322_s8 + $0x1764] ss:$16 sps:$4 sm:$0xff]  }
 0xe50   : > { %12475 = vmatpush1.bf16.msra.mxu1 %v19616_v48  ;;  %v19682_v48 = vld [vmem:[%s25322_s8 + $0x1760] ss:$16 sps:$4 sm:$0xff]  }
 0xe51   : > { %12476 = vmatprep.subr.bf16.mxu1 %v19621_v20  ;;  %v19687_v20 = vld [vmem:[%s25322_s8 + $0x1784] ss:$16 sps:$4 sm:$0xff]  }
 0xe54   : > { %12477 = vmatpush1.bf16.msra.mxu1 %v19619_v63  ;;  %v19685_v63 = vld [vmem:[%s25322_s8 + $0x1780] ss:$16 sps:$4 sm:$0xff]  }
 0xe55   : > { %12478 = vmatprep.subr.bf16.mxu1 %v19624_v7  ;;  %v19690_v7 = vld [vmem:[%s25322_s8 + $0x17a4] ss:$16 sps:$4 sm:$0xff]  }
 0xe58   : > { %12479 = vmatpush1.bf16.msra.mxu1 %v19622_v2  ;;  %v19688_v2 = vld [vmem:[%s25322_s8 + $0x17a0] ss:$16 sps:$4 sm:$0xff]  }
 0xe59   : > { %12480 = vmatprep.subr.bf16.mxu1 %v19627_v11  ;;  %v19693_v11 = vld [vmem:[%s25322_s8 + $0x17c4] ss:$16 sps:$4 sm:$0xff]  }
 0xe5c   : > { %12481 = vmatpush1.bf16.msra.mxu1 %v19625_v28  ;;  %v19691_v28 = vld [vmem:[%s25322_s8 + $0x17c0] ss:$16 sps:$4 sm:$0xff]  }
 0xe5d   : > { %12482 = vmatprep.subr.bf16.mxu1 %v19630_v13  ;;  %v19696_v13 = vld [vmem:[%s25322_s8 + $0x17e4] ss:$16 sps:$4 sm:$0xff]  }
 0xe60   : > { %12483 = vmatpush1.bf16.msra.mxu1 %v19628_v52  ;;  %v19694_v52 = vld [vmem:[%s25322_s8 + $0x17e0] ss:$16 sps:$4 sm:$0xff]  }
 0xe61   : > { %12484 = vmatprep.subr.bf16.mxu1 %v19633_v14  ;;  %v19699_v14 = vld [vmem:[%s25322_s8 + $0x160c] ss:$16 sps:$4 sm:$0xff]  }
 0xe64   : > { %12485 = vmatpush1.bf16.msra.mxu1 %v19631_v43  ;;  %v19697_v43 = vld [vmem:[%s25322_s8 + $0x1608] ss:$16 sps:$4 sm:$0xff]  }
 0xe65   : > { %12486 = vmatprep.subr.bf16.mxu1 %v19636_v41  ;;  %v19702_v41 = vld [vmem:[%s25322_s8 + $0x162c] ss:$16 sps:$4 sm:$0xff]  }
 0xe68   : > { %12487 = vmatpush1.bf16.msra.mxu1 %v19634_v15  ;;  %v19700_v15 = vld [vmem:[%s25322_s8 + $0x1628] ss:$16 sps:$4 sm:$0xff]  }
 0xe69   : > { %12488 = vmatprep.subr.bf16.mxu1 %v19639_v19  ;;  %v19705_v19 = vld [vmem:[%s25322_s8 + $0x164c] ss:$16 sps:$4 sm:$0xff]  }
 0xe6c   : > { %12489 = vmatpush1.bf16.msra.mxu1 %v19637_v17  ;;  %v19703_v17 = vld [vmem:[%s25322_s8 + $0x1648] ss:$16 sps:$4 sm:$0xff]  }
 0xe6d   : > { %12490 = vmatprep.subr.bf16.mxu1 %v19642_v61  ;;  %v19708_v61 = vld [vmem:[%s25322_s8 + $0x166c] ss:$16 sps:$4 sm:$0xff]  }
 0xe70   : > { %12491 = vmatpush1.bf16.msra.mxu1 %v19640_v32  ;;  %v19711_v32 = vld [vmem:[%s25322_s8 + $0x168c] ss:$16 sps:$4 sm:$0xff]  }
 0xe71   : > { %12492 = vmatprep.subr.bf16.mxu1 %v19645_v38  ;;  %v19709_v38 = vld [vmem:[%s25322_s8 + $0x1688] ss:$16 sps:$4 sm:$0xff]  }
 0xe74   : > { %12493 = vmatpush1.bf16.msra.mxu1 %v19643_v59  ;;  %v19714_v59 = vld [vmem:[%s25322_s8 + $0x16ac] ss:$16 sps:$4 sm:$0xff]  }
 0xe75   : > { %12494 = vmatprep.subr.bf16.mxu1 %v19648_v24  ;;  %v19712_v24 = vld [vmem:[%s25322_s8 + $0x16a8] ss:$16 sps:$4 sm:$0xff]  }
 0xe78   : > { %12495 = vmatpush1.bf16.msra.mxu1 %v19646_v44  ;;  %v19717_v44 = vld [vmem:[%s25322_s8 + $0x16cc] ss:$16 sps:$4 sm:$0xff]  }
 0xe79   : > { %12899 = vmatprep.subr.bf16.mxu1 %v19651_v5  ;;  %v19715_v5 = vld [vmem:[%s25322_s8 + $0x16c8] ss:$16 sps:$4 sm:$0xff]  }
 0xe7b   : > { %12497 = vmatmul.mubr.bf16.vlgmr.msra.gmra.mrb[4].mxu1 %v22882_v16  ;;  %v19660_v16 = vld [vmem:[%s25322_s8 + $0x1664] ss:$16 sps:$4 sm:$0xff]  }
 0xe7c   : > { %12900 = vmatpush1.bf16.msra.mxu1 %v19649_v46  ;;  %12931 = vmatprep.mubr.bf16.mxu1 %v22899_v33  ;;  %v19720_v46 = vld [vmem:[%s25322_s8 + $0x16ec] ss:$16 sps:$4 sm:$0xff]  }
 0xe7d   : > { %12901 = vmatprep.subr.bf16.mxu1 %v19654_v53  ;;  %v19718_v53 = vld [vmem:[%s25322_s8 + $0x16e8] ss:$16 sps:$4 sm:$0xff]  }
 0xe80   : > { %12902 = vmatpush1.bf16.msra.mxu1 %v19652_v50  ;;  %v19723_v50 = vld [vmem:[%s25322_s8 + $0x170c] ss:$16 sps:$4 sm:$0xff]  }
 0xe81   : > { %12903 = vmatprep.subr.bf16.mxu1 %v19657_v31  ;;  %v19721_v31 = vld [vmem:[%s25322_s8 + $0x1708] ss:$16 sps:$4 sm:$0xff]  }
 0xe84   : > { %12904 = vmatpush1.bf16.msra.mxu1 %v19655_v57  ;;  %v19726_v57 = vld [vmem:[%s25322_s8 + $0x172c] ss:$16 sps:$4 sm:$0xff]  }
 0xe85   : > { %12905 = vmatprep.subr.bf16.mxu1 %v19660_v16  ;;  %v19724_v16 = vld [vmem:[%s25322_s8 + $0x1728] ss:$16 sps:$4 sm:$0xff]  }
 0xe88   : > { %12906 = vmatpush1.bf16.msra.mxu1 %v19658_v26  ;;  %v19729_v26 = vld [vmem:[%s25322_s8 + $0x174c] ss:$16 sps:$4 sm:$0xff]  }
 0xe89   : > { %12907 = vmatprep.subr.bf16.mxu1 %v19663_v40  ;;  %v19727_v40 = vld [vmem:[%s25322_s8 + $0x1748] ss:$16 sps:$4 sm:$0xff]  }
 0xe8c   : > { %12908 = vmatpush1.bf16.msra.mxu1 %v19661_v55  ;;  %v19732_v55 = vld [vmem:[%s25322_s8 + $0x176c] ss:$16 sps:$4 sm:$0xff]  }
 0xe8d   : > { %12909 = vmatprep.subr.bf16.mxu1 %v19666_v8  ;;  %v19730_v8 = vld [vmem:[%s25322_s8 + $0x1768] ss:$16 sps:$4 sm:$0xff]  }
 0xe90   : > { %12910 = vmatpush1.bf16.msra.mxu1 %v19664_v23  ;;  %v19735_v23 = vld [vmem:[%s25322_s8 + $0x178c] ss:$16 sps:$4 sm:$0xff]  }
 0xe91   : > { %12911 = vmatprep.subr.bf16.mxu1 %v19669_v45  ;;  %v19733_v45 = vld [vmem:[%s25322_s8 + $0x1788] ss:$16 sps:$4 sm:$0xff]  }
 0xe94   : > { %12912 = vmatpush1.bf16.msra.mxu1 %v19667_v34  ;;  %v19738_v34 = vld [vmem:[%s25322_s8 + $0x17ac] ss:$16 sps:$4 sm:$0xff]  }
 0xe95   : > { %12913 = vmatprep.subr.bf16.mxu1 %v19672_v10  ;;  %v19736_v10 = vld [vmem:[%s25322_s8 + $0x17a8] ss:$16 sps:$4 sm:$0xff]  }
 0xe98   : > { %12914 = vmatpush1.bf16.msra.mxu1 %v19670_v39  ;;  %v19741_v39 = vld [vmem:[%s25322_s8 + $0x17cc] ss:$16 sps:$4 sm:$0xff]  }
 0xe99   : > { %12915 = vmatprep.subr.bf16.mxu1 %v19675_v30  ;;  %v19739_v30 = vld [vmem:[%s25322_s8 + $0x17c8] ss:$16 sps:$4 sm:$0xff]  }
 0xe9c   : > { %12916 = vmatpush1.bf16.msra.mxu1 %v19673_v51  ;;  %v19744_v51 = vld [vmem:[%s25322_s8 + $0x17ec] ss:$16 sps:$4 sm:$0xff]  }
 0xe9d   : > { %12917 = vmatprep.subr.bf16.mxu1 %v19678_v35  ;;  %v19742_v35 = vld [vmem:[%s25322_s8 + $0x17e8] ss:$16 sps:$4 sm:$0xff]  }
 0xea0   : > { %12918 = vmatpush1.bf16.msra.mxu1 %v19676_v47  ;;  %v19747_v47 = vld [vmem:[%s25322_s8 + $0x1804] ss:$16 sps:$4 sm:$0xff]  }
 0xea1   : > { %12919 = vmatprep.subr.bf16.mxu1 %v19681_v4  ;;  %v19745_v4 = vld [vmem:[%s25322_s8 + $0x1800] ss:$16 sps:$4 sm:$0xff]  }
 0xea4   : > { %12920 = vmatpush1.bf16.msra.mxu1 %v19679_v22  ;;  %v19750_v22 = vld [vmem:[%s25322_s8 + $0x1824] ss:$16 sps:$4 sm:$0xff]  }
 0xea5   : > { %12921 = vmatprep.subr.bf16.mxu1 %v19684_v27  ;;  %v19748_v27 = vld [vmem:[%s25322_s8 + $0x1820] ss:$16 sps:$4 sm:$0xff]  }
 0xea8   : > { %12922 = vmatpush1.bf16.msra.mxu1 %v19682_v48  ;;  %v19753_v48 = vld [vmem:[%s25322_s8 + $0x1844] ss:$16 sps:$4 sm:$0xff]  }
 0xea9   : > { %12923 = vmatprep.subr.bf16.mxu1 %v19687_v20  ;;  %v19751_v20 = vld [vmem:[%s25322_s8 + $0x1840] ss:$16 sps:$4 sm:$0xff]  }
 0xeac   : > { %12924 = vmatpush1.bf16.msra.mxu1 %v19685_v63  ;;  %v19754_v63 = vld [vmem:[%s25322_s8 + $0x1860] ss:$16 sps:$4 sm:$0xff]  }
 0xead   : > { %12925 = vmatprep.subr.bf16.mxu1 %v19690_v7  ;;  %v19759_v7 = vld [vmem:[%s25322_s8 + $0x1884] ss:$16 sps:$4 sm:$0xff]  }
 0xeb0   : > { %12926 = vmatpush1.bf16.msra.mxu1 %v19688_v2  ;;  %v19757_v2 = vld [vmem:[%s25322_s8 + $0x1880] ss:$16 sps:$4 sm:$0xff]  }
 0xeb1   : > { %12927 = vmatprep.subr.bf16.mxu1 %v19693_v11  ;;  %v19762_v11 = vld [vmem:[%s25322_s8 + $0x18a4] ss:$16 sps:$4 sm:$0xff]  }
 0xeb4   : > { %12928 = vmatpush1.bf16.msra.mxu1 %v19691_v28  ;;  %v19760_v28 = vld [vmem:[%s25322_s8 + $0x18a0] ss:$16 sps:$4 sm:$0xff]  }
 0xeb5   : > { %12929 = vmatprep.subr.bf16.mxu1 %v19696_v13  ;;  %v19765_v13 = vld [vmem:[%s25322_s8 + $0x18c4] ss:$16 sps:$4 sm:$0xff]  }
 0xeb8   : > { %12930 = vmatpush1.bf16.msra.mxu1 %v19694_v52  ;;  %v19763_v52 = vld [vmem:[%s25322_s8 + $0x18c0] ss:$16 sps:$4 sm:$0xff]  }
 0xeb9   : > { %12942 = vmatprep.subr.bf16.mxu1 %v19699_v14  ;;  %v19768_v14 = vld [vmem:[%s25322_s8 + $0x18e4] ss:$16 sps:$4 sm:$0xff]  }
 0xebb   : > { %12932 = vmatmul.mubr.bf16.vlgmr.msra.gmra.mrb[0].mxu1 %v22894_v3 }
 0xebc   : > { %12943 = vmatpush1.bf16.msra.mxu1 %v19697_v43  ;;  %12974 = vmatprep.mubr.bf16.mxu1 %v22899_v33  ;;  %v19706_v33 = vld [vmem:[%s25322_s8 + $0x1668] ss:$16 sps:$4 sm:$0xff]   ;;  %v19766_v43 = vld [vmem:[%s25322_s8 + $0x18e0] ss:$16 sps:$4 sm:$0xff]  }
 0xebd   : > { %12944 = vmatprep.subr.bf16.mxu1 %v19702_v41  ;;  %v19771_v41 = vld [vmem:[%s25322_s8 + $0x1904] ss:$16 sps:$4 sm:$0xff]  }
 0xec0   : > { %12945 = vmatpush1.bf16.msra.mxu1 %v19700_v15  ;;  %v19769_v15 = vld [vmem:[%s25322_s8 + $0x1900] ss:$16 sps:$4 sm:$0xff]  }
 0xec1   : > { %12946 = vmatprep.subr.bf16.mxu1 %v19705_v19  ;;  %v19774_v19 = vld [vmem:[%s25322_s8 + $0x1924] ss:$16 sps:$4 sm:$0xff]  }
 0xec4   : > { %12947 = vmatpush1.bf16.msra.mxu1 %v19703_v17  ;;  %v19772_v17 = vld [vmem:[%s25322_s8 + $0x1920] ss:$16 sps:$4 sm:$0xff]  }
 0xec5   : > { %12948 = vmatprep.subr.bf16.mxu1 %v19708_v61  ;;  %v19777_v61 = vld [vmem:[%s25322_s8 + $0x1944] ss:$16 sps:$4 sm:$0xff]  }
 0xec8   : > { %12949 = vmatpush1.bf16.msra.mxu1 %v19706_v33  ;;  %v19775_v33 = vld [vmem:[%s25322_s8 + $0x1940] ss:$16 sps:$4 sm:$0xff]  }
 0xec9   : > { %12950 = vmatprep.subr.bf16.mxu1 %v19711_v32  ;;  %v19780_v32 = vld [vmem:[%s25322_s8 + $0x1964] ss:$16 sps:$4 sm:$0xff]  }
 0xecc   : > { %12951 = vmatpush1.bf16.msra.mxu1 %v19709_v38  ;;  %v19778_v38 = vld [vmem:[%s25322_s8 + $0x1960] ss:$16 sps:$4 sm:$0xff]  }
 0xecd   : > { %12952 = vmatprep.subr.bf16.mxu1 %v19714_v59  ;;  %v19783_v59 = vld [vmem:[%s25322_s8 + $0x1984] ss:$16 sps:$4 sm:$0xff]  }
 0xed0   : > { %12953 = vmatpush1.bf16.msra.mxu1 %v19712_v24  ;;  %v19781_v24 = vld [vmem:[%s25322_s8 + $0x1980] ss:$16 sps:$4 sm:$0xff]  }
 0xed1   : > { %12954 = vmatprep.subr.bf16.mxu1 %v19717_v44  ;;  %v19786_v44 = vld [vmem:[%s25322_s8 + $0x19a4] ss:$16 sps:$4 sm:$0xff]  }
 0xed4   : > { %12955 = vmatpush1.bf16.msra.mxu1 %v19715_v5  ;;  %v19784_v5 = vld [vmem:[%s25322_s8 + $0x19a0] ss:$16 sps:$4 sm:$0xff]  }
 0xed5   : > { %12956 = vmatprep.subr.bf16.mxu1 %v19720_v46  ;;  %v19789_v46 = vld [vmem:[%s25322_s8 + $0x19c4] ss:$16 sps:$4 sm:$0xff]  }
 0xed8   : > { %12957 = vmatpush1.bf16.msra.mxu1 %v19718_v53  ;;  %v19787_v53 = vld [vmem:[%s25322_s8 + $0x19c0] ss:$16 sps:$4 sm:$0xff]  }
 0xed9   : > { %12958 = vmatprep.subr.bf16.mxu1 %v19723_v50  ;;  %v19792_v50 = vld [vmem:[%s25322_s8 + $0x19e4] ss:$16 sps:$4 sm:$0xff]  }
 0xedc   : > { %12959 = vmatpush1.bf16.msra.mxu1 %v19721_v31  ;;  %v19790_v31 = vld [vmem:[%s25322_s8 + $0x19e0] ss:$16 sps:$4 sm:$0xff]  }
 0xedd   : > { %12960 = vmatprep.subr.bf16.mxu1 %v19726_v57  ;;  %v19795_v57 = vld [vmem:[%s25322_s8 + $0x180c] ss:$16 sps:$4 sm:$0xff]  }
 0xee0   : > { %12961 = vmatpush1.bf16.msra.mxu1 %v19724_v16  ;;  %v19793_v16 = vld [vmem:[%s25322_s8 + $0x1808] ss:$16 sps:$4 sm:$0xff]  }
 0xee1   : > { %12962 = vmatprep.subr.bf16.mxu1 %v19729_v26  ;;  %v19798_v26 = vld [vmem:[%s25322_s8 + $0x182c] ss:$16 sps:$4 sm:$0xff]  }
 0xee4   : > { %12963 = vmatpush1.bf16.msra.mxu1 %v19727_v40  ;;  %v19796_v40 = vld [vmem:[%s25322_s8 + $0x1828] ss:$16 sps:$4 sm:$0xff]  }
 0xee5   : > { %12964 = vmatprep.subr.bf16.mxu1 %v19732_v55  ;;  %v19801_v55 = vld [vmem:[%s25322_s8 + $0x184c] ss:$16 sps:$4 sm:$0xff]  }
 0xee8   : > { %12965 = vmatpush1.bf16.msra.mxu1 %v19730_v8  ;;  %v19799_v8 = vld [vmem:[%s25322_s8 + $0x1848] ss:$16 sps:$4 sm:$0xff]  }
 0xee9   : > { %12966 = vmatprep.subr.bf16.mxu1 %v19735_v23  ;;  %v19804_v23 = vld [vmem:[%s25322_s8 + $0x186c] ss:$16 sps:$4 sm:$0xff]  }
 0xeec   : > { %12967 = vmatpush1.bf16.msra.mxu1 %v19733_v45  ;;  %v19807_v45 = vld [vmem:[%s25322_s8 + $0x188c] ss:$16 sps:$4 sm:$0xff]  }
 0xeed   : > { %12968 = vmatprep.subr.bf16.mxu1 %v19738_v34  ;;  %v19805_v34 = vld [vmem:[%s25322_s8 + $0x1888] ss:$16 sps:$4 sm:$0xff]  }
 0xef0   : > { %12969 = vmatpush1.bf16.msra.mxu1 %v19736_v10  ;;  %v19810_v10 = vld [vmem:[%s25322_s8 + $0x18ac] ss:$16 sps:$4 sm:$0xff]  }
 0xef1   : > { %12970 = vmatprep.subr.bf16.mxu1 %v19741_v39  ;;  %v19808_v39 = vld [vmem:[%s25322_s8 + $0x18a8] ss:$16 sps:$4 sm:$0xff]  }
 0xef4   : > { %12971 = vmatpush1.bf16.msra.mxu1 %v19739_v30  ;;  %v19813_v30 = vld [vmem:[%s25322_s8 + $0x18cc] ss:$16 sps:$4 sm:$0xff]  }
 0xef5   : > { %12972 = vmatprep.subr.bf16.mxu1 %v19744_v51  ;;  %v19811_v51 = vld [vmem:[%s25322_s8 + $0x18c8] ss:$16 sps:$4 sm:$0xff]  }
 0xef8   : > { %12973 = vmatpush1.bf16.msra.mxu1 %v19742_v35  ;;  %v19816_v35 = vld [vmem:[%s25322_s8 + $0x18ec] ss:$16 sps:$4 sm:$0xff]  }
 0xef9   : > { %13377 = vmatprep.subr.bf16.mxu1 %v19747_v47  ;;  %v19814_v47 = vld [vmem:[%s25322_s8 + $0x18e8] ss:$16 sps:$4 sm:$0xff]  }
 0xefb   : > { %12975 = vmatmul.mubr.bf16.vlgmr.msra.gmra.mrb[4].mxu1 %v22894_v3  ;;  %v19756_v3 = vld [vmem:[%s25322_s8 + $0x1864] ss:$16 sps:$4 sm:$0xff]  }
 0xefc   : > { %13378 = vmatpush1.bf16.msra.mxu1 %v19745_v4  ;;  %13409 = vmatprep.mubr.bf16.mxu1 %v22909_v0  ;;  %v19819_v4 = vld [vmem:[%s25322_s8 + $0x190c] ss:$16 sps:$4 sm:$0xff]  }
 0xefd   : > { %13379 = vmatprep.subr.bf16.mxu1 %v19750_v22  ;;  %v19817_v22 = vld [vmem:[%s25322_s8 + $0x1908] ss:$16 sps:$4 sm:$0xff]  }
 0xf00   : > { %13380 = vmatpush1.bf16.msra.mxu1 %v19748_v27  ;;  %v19822_v27 = vld [vmem:[%s25322_s8 + $0x192c] ss:$16 sps:$4 sm:$0xff]  }
 0xf01   : > { %13381 = vmatprep.subr.bf16.mxu1 %v19753_v48  ;;  %v19820_v48 = vld [vmem:[%s25322_s8 + $0x1928] ss:$16 sps:$4 sm:$0xff]  }
 0xf04   : > { %13382 = vmatpush1.bf16.msra.mxu1 %v19751_v20  ;;  %v19825_v20 = vld [vmem:[%s25322_s8 + $0x194c] ss:$16 sps:$4 sm:$0xff]  }
 0xf05   : > { %13383 = vmatprep.subr.bf16.mxu1 %v19756_v3  ;;  %v19823_v3 = vld [vmem:[%s25322_s8 + $0x1948] ss:$16 sps:$4 sm:$0xff]  }
 0xf08   : > { %13384 = vmatpush1.bf16.msra.mxu1 %v19754_v63  ;;  %v19828_v63 = vld [vmem:[%s25322_s8 + $0x196c] ss:$16 sps:$4 sm:$0xff]  }
 0xf09   : > { %13385 = vmatprep.subr.bf16.mxu1 %v19759_v7  ;;  %v19826_v7 = vld [vmem:[%s25322_s8 + $0x1968] ss:$16 sps:$4 sm:$0xff]  }
 0xf0c   : > { %13386 = vmatpush1.bf16.msra.mxu1 %v19757_v2  ;;  %v19831_v2 = vld [vmem:[%s25322_s8 + $0x198c] ss:$16 sps:$4 sm:$0xff]  }
 0xf0d   : > { %13387 = vmatprep.subr.bf16.mxu1 %v19762_v11  ;;  %v19829_v11 = vld [vmem:[%s25322_s8 + $0x1988] ss:$16 sps:$4 sm:$0xff]  }
 0xf10   : > { %13388 = vmatpush1.bf16.msra.mxu1 %v19760_v28  ;;  %v19834_v28 = vld [vmem:[%s25322_s8 + $0x19ac] ss:$16 sps:$4 sm:$0xff]  }
 0xf11   : > { %13389 = vmatprep.subr.bf16.mxu1 %v19765_v13  ;;  %v19832_v13 = vld [vmem:[%s25322_s8 + $0x19a8] ss:$16 sps:$4 sm:$0xff]  }
 0xf14   : > { %13390 = vmatpush1.bf16.msra.mxu1 %v19763_v52  ;;  %v19837_v52 = vld [vmem:[%s25322_s8 + $0x19cc] ss:$16 sps:$4 sm:$0xff]  }
 0xf15   : > { %13391 = vmatprep.subr.bf16.mxu1 %v19768_v14  ;;  %v19835_v14 = vld [vmem:[%s25322_s8 + $0x19c8] ss:$16 sps:$4 sm:$0xff]  }
 0xf18   : > { %13392 = vmatpush1.bf16.msra.mxu1 %v19766_v43  ;;  %v19840_v43 = vld [vmem:[%s25322_s8 + $0x19ec] ss:$16 sps:$4 sm:$0xff]  }
 0xf19   : > { %13393 = vmatprep.subr.bf16.mxu1 %v19771_v41  ;;  %v19838_v41 = vld [vmem:[%s25322_s8 + $0x19e8] ss:$16 sps:$4 sm:$0xff]  }
 0xf1c   : > { %13394 = vmatpush1.bf16.msra.mxu1 %v19769_v15  ;;  %v19843_v15 = vld [vmem:[%s25322_s8 + $0x1a04] ss:$16 sps:$4 sm:$0xff]  }
 0xf1d   : > { %13395 = vmatprep.subr.bf16.mxu1 %v19774_v19  ;;  %v19841_v19 = vld [vmem:[%s25322_s8 + $0x1a00] ss:$16 sps:$4 sm:$0xff]  }
 0xf20   : > { %13396 = vmatpush1.bf16.msra.mxu1 %v19772_v17  ;;  %v19846_v17 = vld [vmem:[%s25322_s8 + $0x1a24] ss:$16 sps:$4 sm:$0xff]  }
 0xf21   : > { %13397 = vmatprep.subr.bf16.mxu1 %v19777_v61  ;;  %v19844_v61 = vld [vmem:[%s25322_s8 + $0x1a20] ss:$16 sps:$4 sm:$0xff]  }
 0xf24   : > { %13398 = vmatpush1.bf16.msra.mxu1 %v19775_v33  ;;  %v19849_v33 = vld [vmem:[%s25322_s8 + $0x1a44] ss:$16 sps:$4 sm:$0xff]  }
 0xf25   : > { %13399 = vmatprep.subr.bf16.mxu1 %v19780_v32  ;;  %v19847_v32 = vld [vmem:[%s25322_s8 + $0x1a40] ss:$16 sps:$4 sm:$0xff]  }
 0xf28   : > { %13400 = vmatpush1.bf16.msra.mxu1 %v19778_v38  ;;  %v19850_v38 = vld [vmem:[%s25322_s8 + $0x1a60] ss:$16 sps:$4 sm:$0xff]  }
 0xf29   : > { %13401 = vmatprep.subr.bf16.mxu1 %v19783_v59  ;;  %v19855_v59 = vld [vmem:[%s25322_s8 + $0x1a84] ss:$16 sps:$4 sm:$0xff]  }
 0xf2c   : > { %13402 = vmatpush1.bf16.msra.mxu1 %v19781_v24  ;;  %v19853_v24 = vld [vmem:[%s25322_s8 + $0x1a80] ss:$16 sps:$4 sm:$0xff]  }
 0xf2d   : > { %13403 = vmatprep.subr.bf16.mxu1 %v19786_v44  ;;  %v19858_v44 = vld [vmem:[%s25322_s8 + $0x1aa4] ss:$16 sps:$4 sm:$0xff]  }
 0xf30   : > { %13404 = vmatpush1.bf16.msra.mxu1 %v19784_v5  ;;  %v19856_v5 = vld [vmem:[%s25322_s8 + $0x1aa0] ss:$16 sps:$4 sm:$0xff]  }
 0xf31   : > { %13405 = vmatprep.subr.bf16.mxu1 %v19789_v46  ;;  %v19861_v46 = vld [vmem:[%s25322_s8 + $0x1ac4] ss:$16 sps:$4 sm:$0xff]  }
 0xf34   : > { %13406 = vmatpush1.bf16.msra.mxu1 %v19787_v53  ;;  %v19859_v53 = vld [vmem:[%s25322_s8 + $0x1ac0] ss:$16 sps:$4 sm:$0xff]  }
 0xf35   : > { %13407 = vmatprep.subr.bf16.mxu1 %v19792_v50  ;;  %v19864_v50 = vld [vmem:[%s25322_s8 + $0x1ae4] ss:$16 sps:$4 sm:$0xff]  }
 0xf38   : > { %13408 = vmatpush1.bf16.msra.mxu1 %v19790_v31  ;;  %v19862_v31 = vld [vmem:[%s25322_s8 + $0x1ae0] ss:$16 sps:$4 sm:$0xff]  }
 0xf39   : > { %13420 = vmatprep.subr.bf16.mxu1 %v19795_v57  ;;  %v19867_v57 = vld [vmem:[%s25322_s8 + $0x1b04] ss:$16 sps:$4 sm:$0xff]  }
 0xf3b   : > { %13410 = vmatmul.mubr.bf16.vlgmr.msra.gmra.mrb[0].mxu1 %v22904_v21 }
 0xf3c   : > { %13421 = vmatpush1.bf16.msra.mxu1 %v19793_v16  ;;  %13452 = vmatprep.mubr.bf16.mxu1 %v22909_v0  ;;  %v19802_v0 = vld [vmem:[%s25322_s8 + $0x1868] ss:$16 sps:$4 sm:$0xff]   ;;  %v19865_v16 = vld [vmem:[%s25322_s8 + $0x1b00] ss:$16 sps:$4 sm:$0xff]  }
 0xf3d   : > { %13422 = vmatprep.subr.bf16.mxu1 %v19798_v26  ;;  %v19870_v26 = vld [vmem:[%s25322_s8 + $0x1b24] ss:$16 sps:$4 sm:$0xff]  }
 0xf40   : > { %13423 = vmatpush1.bf16.msra.mxu1 %v19796_v40  ;;  %v19868_v40 = vld [vmem:[%s25322_s8 + $0x1b20] ss:$16 sps:$4 sm:$0xff]  }
 0xf41   : > { %13424 = vmatprep.subr.bf16.mxu1 %v19801_v55  ;;  %v19873_v55 = vld [vmem:[%s25322_s8 + $0x1b44] ss:$16 sps:$4 sm:$0xff]  }
 0xf44   : > { %13425 = vmatpush1.bf16.msra.mxu1 %v19799_v8  ;;  %v19871_v8 = vld [vmem:[%s25322_s8 + $0x1b40] ss:$16 sps:$4 sm:$0xff]  }
 0xf45   : > { %13426 = vmatprep.subr.bf16.mxu1 %v19804_v23  ;;  %v19876_v23 = vld [vmem:[%s25322_s8 + $0x1b64] ss:$16 sps:$4 sm:$0xff]  }
 0xf48   : > { %13427 = vmatpush1.bf16.msra.mxu1 %v19802_v0  ;;  %v19874_v0 = vld [vmem:[%s25322_s8 + $0x1b60] ss:$16 sps:$4 sm:$0xff]  }
 0xf49   : > { %13428 = vmatprep.subr.bf16.mxu1 %v19807_v45  ;;  %v19879_v45 = vld [vmem:[%s25322_s8 + $0x1b84] ss:$16 sps:$4 sm:$0xff]  }
 0xf4c   : > { %13429 = vmatpush1.bf16.msra.mxu1 %v19805_v34  ;;  %v19877_v34 = vld [vmem:[%s25322_s8 + $0x1b80] ss:$16 sps:$4 sm:$0xff]  }
 0xf4d   : > { %13430 = vmatprep.subr.bf16.mxu1 %v19810_v10  ;;  %v19882_v10 = vld [vmem:[%s25322_s8 + $0x1ba4] ss:$16 sps:$4 sm:$0xff]  }
 0xf50   : > { %13431 = vmatpush1.bf16.msra.mxu1 %v19808_v39  ;;  %v19880_v39 = vld [vmem:[%s25322_s8 + $0x1ba0] ss:$16 sps:$4 sm:$0xff]  }
 0xf51   : > { %13432 = vmatprep.subr.bf16.mxu1 %v19813_v30  ;;  %v19885_v30 = vld [vmem:[%s25322_s8 + $0x1bc4] ss:$16 sps:$4 sm:$0xff]  }
 0xf54   : > { %13433 = vmatpush1.bf16.msra.mxu1 %v19811_v51  ;;  %v19883_v51 = vld [vmem:[%s25322_s8 + $0x1bc0] ss:$16 sps:$4 sm:$0xff]  }
 0xf55   : > { %13434 = vmatprep.subr.bf16.mxu1 %v19816_v35  ;;  %v19888_v35 = vld [vmem:[%s25322_s8 + $0x1be4] ss:$16 sps:$4 sm:$0xff]  }
 0xf58   : > { %13435 = vmatpush1.bf16.msra.mxu1 %v19814_v47  ;;  %v19886_v47 = vld [vmem:[%s25322_s8 + $0x1be0] ss:$16 sps:$4 sm:$0xff]  }
 0xf59   : > { %13436 = vmatprep.subr.bf16.mxu1 %v19819_v4  ;;  %v19891_v4 = vld [vmem:[%s25322_s8 + $0x1a0c] ss:$16 sps:$4 sm:$0xff]  }
 0xf5c   : > { %13437 = vmatpush1.bf16.msra.mxu1 %v19817_v22  ;;  %v19889_v22 = vld [vmem:[%s25322_s8 + $0x1a08] ss:$16 sps:$4 sm:$0xff]  }
 0xf5d   : > { %13438 = vmatprep.subr.bf16.mxu1 %v19822_v27  ;;  %v19894_v27 = vld [vmem:[%s25322_s8 + $0x1a2c] ss:$16 sps:$4 sm:$0xff]  }
 0xf60   : > { %13439 = vmatpush1.bf16.msra.mxu1 %v19820_v48  ;;  %v19892_v48 = vld [vmem:[%s25322_s8 + $0x1a28] ss:$16 sps:$4 sm:$0xff]  }
 0xf61   : > { %13440 = vmatprep.subr.bf16.mxu1 %v19825_v20  ;;  %v19897_v20 = vld [vmem:[%s25322_s8 + $0x1a4c] ss:$16 sps:$4 sm:$0xff]  }
 0xf64   : > { %13441 = vmatpush1.bf16.msra.mxu1 %v19823_v3  ;;  %v19895_v3 = vld [vmem:[%s25322_s8 + $0x1a48] ss:$16 sps:$4 sm:$0xff]  }
 0xf65   : > { %13442 = vmatprep.subr.bf16.mxu1 %v19828_v63  ;;  %v19900_v63 = vld [vmem:[%s25322_s8 + $0x1a6c] ss:$16 sps:$4 sm:$0xff]  }
 0xf68   : > { %13443 = vmatpush1.bf16.msra.mxu1 %v19826_v7  ;;  %v19903_v7 = vld [vmem:[%s25322_s8 + $0x1a8c] ss:$16 sps:$4 sm:$0xff]  }
 0xf69   : > { %13444 = vmatprep.subr.bf16.mxu1 %v19831_v2  ;;  %v19901_v2 = vld [vmem:[%s25322_s8 + $0x1a88] ss:$16 sps:$4 sm:$0xff]  }
 0xf6c   : > { %13445 = vmatpush1.bf16.msra.mxu1 %v19829_v11  ;;  %v19906_v11 = vld [vmem:[%s25322_s8 + $0x1aac] ss:$16 sps:$4 sm:$0xff]  }
 0xf6d   : > { %13446 = vmatprep.subr.bf16.mxu1 %v19834_v28  ;;  %v19904_v28 = vld [vmem:[%s25322_s8 + $0x1aa8] ss:$16 sps:$4 sm:$0xff]  }
 0xf70   : > { %13447 = vmatpush1.bf16.msra.mxu1 %v19832_v13  ;;  %v19909_v13 = vld [vmem:[%s25322_s8 + $0x1acc] ss:$16 sps:$4 sm:$0xff]  }
 0xf71   : > { %13448 = vmatprep.subr.bf16.mxu1 %v19837_v52  ;;  %v19907_v52 = vld [vmem:[%s25322_s8 + $0x1ac8] ss:$16 sps:$4 sm:$0xff]  }
 0xf74   : > { %13449 = vmatpush1.bf16.msra.mxu1 %v19835_v14  ;;  %v19912_v14 = vld [vmem:[%s25322_s8 + $0x1aec] ss:$16 sps:$4 sm:$0xff]  }
 0xf75   : > { %13450 = vmatprep.subr.bf16.mxu1 %v19840_v43  ;;  %v19910_v43 = vld [vmem:[%s25322_s8 + $0x1ae8] ss:$16 sps:$4 sm:$0xff]  }
 0xf78   : > { %13451 = vmatpush1.bf16.msra.mxu1 %v19838_v41  ;;  %v19915_v41 = vld [vmem:[%s25322_s8 + $0x1b0c] ss:$16 sps:$4 sm:$0xff]  }
 0xf79   : > { %13855 = vmatprep.subr.bf16.mxu1 %v19843_v15  ;;  %v19913_v15 = vld [vmem:[%s25322_s8 + $0x1b08] ss:$16 sps:$4 sm:$0xff]  }
 0xf7b   : > { %13453 = vmatmul.mubr.bf16.vlgmr.msra.gmra.mrb[4].mxu1 %v22904_v21  ;;  %v19852_v21 = vld [vmem:[%s25322_s8 + $0x1a64] ss:$16 sps:$4 sm:$0xff]  }
 0xf7c   : > { %13856 = vmatpush1.bf16.msra.mxu1 %v19841_v19  ;;  %13887 = vmatprep.mubr.bf16.mxu1 %v22921_v6  ;;  %v19918_v19 = vld [vmem:[%s25322_s8 + $0x1b2c] ss:$16 sps:$4 sm:$0xff]  }
 0xf7d   : > { %13857 = vmatprep.subr.bf16.mxu1 %v19846_v17  ;;  %v19916_v17 = vld [vmem:[%s25322_s8 + $0x1b28] ss:$16 sps:$4 sm:$0xff]  }
 0xf80   : > { %13858 = vmatpush1.bf16.msra.mxu1 %v19844_v61  ;;  %v19921_v61 = vld [vmem:[%s25322_s8 + $0x1b4c] ss:$16 sps:$4 sm:$0xff]  }
 0xf81   : > { %13859 = vmatprep.subr.bf16.mxu1 %v19849_v33  ;;  %v19919_v33 = vld [vmem:[%s25322_s8 + $0x1b48] ss:$16 sps:$4 sm:$0xff]  }
 0xf84   : > { %13860 = vmatpush1.bf16.msra.mxu1 %v19847_v32  ;;  %v19924_v32 = vld [vmem:[%s25322_s8 + $0x1b6c] ss:$16 sps:$4 sm:$0xff]  }
 0xf85   : > { %13861 = vmatprep.subr.bf16.mxu1 %v19852_v21  ;;  %v19922_v21 = vld [vmem:[%s25322_s8 + $0x1b68] ss:$16 sps:$4 sm:$0xff]  }
 0xf88   : > { %13862 = vmatpush1.bf16.msra.mxu1 %v19850_v38  ;;  %v19927_v38 = vld [vmem:[%s25322_s8 + $0x1b8c] ss:$16 sps:$4 sm:$0xff]  }
 0xf89   : > { %13863 = vmatprep.subr.bf16.mxu1 %v19855_v59  ;;  %v19925_v59 = vld [vmem:[%s25322_s8 + $0x1b88] ss:$16 sps:$4 sm:$0xff]  }
 0xf8c   : > { %13864 = vmatpush1.bf16.msra.mxu1 %v19853_v24  ;;  %v19930_v24 = vld [vmem:[%s25322_s8 + $0x1bac] ss:$16 sps:$4 sm:$0xff]  }
 0xf8d   : > { %13865 = vmatprep.subr.bf16.mxu1 %v19858_v44  ;;  %v19928_v44 = vld [vmem:[%s25322_s8 + $0x1ba8] ss:$16 sps:$4 sm:$0xff]  }
 0xf90   : > { %13866 = vmatpush1.bf16.msra.mxu1 %v19856_v5  ;;  %v19933_v5 = vld [vmem:[%s25322_s8 + $0x1bcc] ss:$16 sps:$4 sm:$0xff]  }
 0xf91   : > { %13867 = vmatprep.subr.bf16.mxu1 %v19861_v46  ;;  %v19931_v46 = vld [vmem:[%s25322_s8 + $0x1bc8] ss:$16 sps:$4 sm:$0xff]  }
 0xf94   : > { %13868 = vmatpush1.bf16.msra.mxu1 %v19859_v53  ;;  %v19936_v53 = vld [vmem:[%s25322_s8 + $0x1bec] ss:$16 sps:$4 sm:$0xff]  }
 0xf95   : > { %13869 = vmatprep.subr.bf16.mxu1 %v19864_v50  ;;  %v19934_v50 = vld [vmem:[%s25322_s8 + $0x1be8] ss:$16 sps:$4 sm:$0xff]  }
 0xf98   : > { %13870 = vmatpush1.bf16.msra.mxu1 %v19862_v31  ;;  %v19939_v31 = vld [vmem:[%s25322_s8 + $0x1c04] ss:$16 sps:$4 sm:$0xff]  }
 0xf99   : > { %13871 = vmatprep.subr.bf16.mxu1 %v19867_v57  ;;  %v19937_v57 = vld [vmem:[%s25322_s8 + $0x1c00] ss:$16 sps:$4 sm:$0xff]  }
 0xf9c   : > { %13872 = vmatpush1.bf16.msra.mxu1 %v19865_v16  ;;  %v19942_v16 = vld [vmem:[%s25322_s8 + $0x1c24] ss:$16 sps:$4 sm:$0xff]  }
 0xf9d   : > { %13873 = vmatprep.subr.bf16.mxu1 %v19870_v26  ;;  %v19940_v26 = vld [vmem:[%s25322_s8 + $0x1c20] ss:$16 sps:$4 sm:$0xff]  }
 0xfa0   : > { %13874 = vmatpush1.bf16.msra.mxu1 %v19868_v40  ;;  %v19945_v40 = vld [vmem:[%s25322_s8 + $0x1c44] ss:$16 sps:$4 sm:$0xff]  }
 0xfa1   : > { %13875 = vmatprep.subr.bf16.mxu1 %v19873_v55  ;;  %v19943_v55 = vld [vmem:[%s25322_s8 + $0x1c40] ss:$16 sps:$4 sm:$0xff]  }
 0xfa4   : > { %13876 = vmatpush1.bf16.msra.mxu1 %v19871_v8  ;;  %v19946_v8 = vld [vmem:[%s25322_s8 + $0x1c60] ss:$16 sps:$4 sm:$0xff]  }
 0xfa5   : > { %13877 = vmatprep.subr.bf16.mxu1 %v19876_v23  ;;  %v19951_v23 = vld [vmem:[%s25322_s8 + $0x1c84] ss:$16 sps:$4 sm:$0xff]  }
 0xfa8   : > { %13878 = vmatpush1.bf16.msra.mxu1 %v19874_v0  ;;  %v19949_v0 = vld [vmem:[%s25322_s8 + $0x1c80] ss:$16 sps:$4 sm:$0xff]  }
 0xfa9   : > { %13879 = vmatprep.subr.bf16.mxu1 %v19879_v45  ;;  %v19954_v45 = vld [vmem:[%s25322_s8 + $0x1ca4] ss:$16 sps:$4 sm:$0xff]  }
 0xfac   : > { %13880 = vmatpush1.bf16.msra.mxu1 %v19877_v34  ;;  %v19952_v34 = vld [vmem:[%s25322_s8 + $0x1ca0] ss:$16 sps:$4 sm:$0xff]  }
 0xfad   : > { %13881 = vmatprep.subr.bf16.mxu1 %v19882_v10  ;;  %v19957_v10 = vld [vmem:[%s25322_s8 + $0x1cc4] ss:$16 sps:$4 sm:$0xff]  }
 0xfb0   : > { %13882 = vmatpush1.bf16.msra.mxu1 %v19880_v39  ;;  %v19955_v39 = vld [vmem:[%s25322_s8 + $0x1cc0] ss:$16 sps:$4 sm:$0xff]  }
 0xfb1   : > { %13883 = vmatprep.subr.bf16.mxu1 %v19885_v30  ;;  %v19960_v30 = vld [vmem:[%s25322_s8 + $0x1ce4] ss:$16 sps:$4 sm:$0xff]  }
 0xfb4   : > { %13884 = vmatpush1.bf16.msra.mxu1 %v19883_v51  ;;  %v19958_v51 = vld [vmem:[%s25322_s8 + $0x1ce0] ss:$16 sps:$4 sm:$0xff]  }
 0xfb5   : > { %13885 = vmatprep.subr.bf16.mxu1 %v19888_v35  ;;  %v19963_v35 = vld [vmem:[%s25322_s8 + $0x1d04] ss:$16 sps:$4 sm:$0xff]  }
 0xfb8   : > { %13886 = vmatpush1.bf16.msra.mxu1 %v19886_v47  ;;  %v19961_v47 = vld [vmem:[%s25322_s8 + $0x1d00] ss:$16 sps:$4 sm:$0xff]  }
 0xfb9   : > { %13898 = vmatprep.subr.bf16.mxu1 %v19891_v4  ;;  %v19966_v4 = vld [vmem:[%s25322_s8 + $0x1d24] ss:$16 sps:$4 sm:$0xff]  }
 0xfbb   : > { %13888 = vmatmul.mubr.bf16.vlgmr.msra.gmra.mrb[0].mxu1 %v22916_v58 }
 0xfbc   : > { %13899 = vmatpush1.bf16.msra.mxu1 %v19889_v22  ;;  %13930 = vmatprep.mubr.bf16.mxu1 %v22921_v6  ;;  %v19898_v6 = vld [vmem:[%s25322_s8 + $0x1a68] ss:$16 sps:$4 sm:$0xff]   ;;  %v19964_v22 = vld [vmem:[%s25322_s8 + $0x1d20] ss:$16 sps:$4 sm:$0xff]  }
 0xfbd   : > { %13900 = vmatprep.subr.bf16.mxu1 %v19894_v27  ;;  %v19969_v27 = vld [vmem:[%s25322_s8 + $0x1d44] ss:$16 sps:$4 sm:$0xff]  }
 0xfc0   : > { %13901 = vmatpush1.bf16.msra.mxu1 %v19892_v48  ;;  %v19967_v48 = vld [vmem:[%s25322_s8 + $0x1d40] ss:$16 sps:$4 sm:$0xff]  }
 0xfc1   : > { %13902 = vmatprep.subr.bf16.mxu1 %v19897_v20  ;;  %v19972_v20 = vld [vmem:[%s25322_s8 + $0x1d64] ss:$16 sps:$4 sm:$0xff]  }
 0xfc4   : > { %13903 = vmatpush1.bf16.msra.mxu1 %v19895_v3  ;;  %v19970_v3 = vld [vmem:[%s25322_s8 + $0x1d60] ss:$16 sps:$4 sm:$0xff]  }
 0xfc5   : > { %13904 = vmatprep.subr.bf16.mxu1 %v19900_v63  ;;  %v19975_v63 = vld [vmem:[%s25322_s8 + $0x1d84] ss:$16 sps:$4 sm:$0xff]  }
 0xfc8   : > { %13905 = vmatpush1.bf16.msra.mxu1 %v19898_v6  ;;  %v19973_v6 = vld [vmem:[%s25322_s8 + $0x1d80] ss:$16 sps:$4 sm:$0xff]  }
 0xfc9   : > { %13906 = vmatprep.subr.bf16.mxu1 %v19903_v7  ;;  %v19978_v7 = vld [vmem:[%s25322_s8 + $0x1da4] ss:$16 sps:$4 sm:$0xff]  }
 0xfcc   : > { %13907 = vmatpush1.bf16.msra.mxu1 %v19901_v2  ;;  %v19976_v2 = vld [vmem:[%s25322_s8 + $0x1da0] ss:$16 sps:$4 sm:$0xff]  }
 0xfcd   : > { %13908 = vmatprep.subr.bf16.mxu1 %v19906_v11  ;;  %v19981_v11 = vld [vmem:[%s25322_s8 + $0x1dc4] ss:$16 sps:$4 sm:$0xff]  }
 0xfd0   : > { %13909 = vmatpush1.bf16.msra.mxu1 %v19904_v28  ;;  %v19979_v28 = vld [vmem:[%s25322_s8 + $0x1dc0] ss:$16 sps:$4 sm:$0xff]  }
 0xfd1   : > { %13910 = vmatprep.subr.bf16.mxu1 %v19909_v13  ;;  %v19984_v13 = vld [vmem:[%s25322_s8 + $0x1de4] ss:$16 sps:$4 sm:$0xff]  }
 0xfd4   : > { %13911 = vmatpush1.bf16.msra.mxu1 %v19907_v52  ;;  %v19982_v52 = vld [vmem:[%s25322_s8 + $0x1de0] ss:$16 sps:$4 sm:$0xff]  }
 0xfd5   : > { %13912 = vmatprep.subr.bf16.mxu1 %v19912_v14  ;;  %v19987_v14 = vld [vmem:[%s25322_s8 + $0x1c0c] ss:$16 sps:$4 sm:$0xff]  }
 0xfd8   : > { %13913 = vmatpush1.bf16.msra.mxu1 %v19910_v43  ;;  %v19985_v43 = vld [vmem:[%s25322_s8 + $0x1c08] ss:$16 sps:$4 sm:$0xff]  }
 0xfd9   : > { %13914 = vmatprep.subr.bf16.mxu1 %v19915_v41  ;;  %v19990_v41 = vld [vmem:[%s25322_s8 + $0x1c2c] ss:$16 sps:$4 sm:$0xff]  }
 0xfdc   : > { %13915 = vmatpush1.bf16.msra.mxu1 %v19913_v15  ;;  %v19988_v15 = vld [vmem:[%s25322_s8 + $0x1c28] ss:$16 sps:$4 sm:$0xff]  }
 0xfdd   : > { %13916 = vmatprep.subr.bf16.mxu1 %v19918_v19  ;;  %v19993_v19 = vld [vmem:[%s25322_s8 + $0x1c4c] ss:$16 sps:$4 sm:$0xff]  }
 0xfe0   : > { %13917 = vmatpush1.bf16.msra.mxu1 %v19916_v17  ;;  %v19991_v17 = vld [vmem:[%s25322_s8 + $0x1c48] ss:$16 sps:$4 sm:$0xff]  }
 0xfe1   : > { %13918 = vmatprep.subr.bf16.mxu1 %v19921_v61  ;;  %v19996_v61 = vld [vmem:[%s25322_s8 + $0x1c6c] ss:$16 sps:$4 sm:$0xff]  }
 0xfe4   : > { %13919 = vmatpush1.bf16.msra.mxu1 %v19919_v33  ;;  %v19999_v33 = vld [vmem:[%s25322_s8 + $0x1c8c] ss:$16 sps:$4 sm:$0xff]  }
 0xfe5   : > { %13920 = vmatprep.subr.bf16.mxu1 %v19924_v32  ;;  %v19997_v32 = vld [vmem:[%s25322_s8 + $0x1c88] ss:$16 sps:$4 sm:$0xff]  }
 0xfe8   : > { %13921 = vmatpush1.bf16.msra.mxu1 %v19922_v21  ;;  %v20002_v21 = vld [vmem:[%s25322_s8 + $0x1cac] ss:$16 sps:$4 sm:$0xff]  }
 0xfe9   : > { %13922 = vmatprep.subr.bf16.mxu1 %v19927_v38  ;;  %v20000_v38 = vld [vmem:[%s25322_s8 + $0x1ca8] ss:$16 sps:$4 sm:$0xff]  }
 0xfec   : > { %13923 = vmatpush1.bf16.msra.mxu1 %v19925_v59  ;;  %v20005_v59 = vld [vmem:[%s25322_s8 + $0x1ccc] ss:$16 sps:$4 sm:$0xff]  }
 0xfed   : > { %13924 = vmatprep.subr.bf16.mxu1 %v19930_v24  ;;  %v20003_v24 = vld [vmem:[%s25322_s8 + $0x1cc8] ss:$16 sps:$4 sm:$0xff]  }
 0xff0   : > { %13925 = vmatpush1.bf16.msra.mxu1 %v19928_v44  ;;  %v20008_v44 = vld [vmem:[%s25322_s8 + $0x1cec] ss:$16 sps:$4 sm:$0xff]  }
 0xff1   : > { %13926 = vmatprep.subr.bf16.mxu1 %v19933_v5  ;;  %v20006_v5 = vld [vmem:[%s25322_s8 + $0x1ce8] ss:$16 sps:$4 sm:$0xff]  }
 0xff4   : > { %13927 = vmatpush1.bf16.msra.mxu1 %v19931_v46  ;;  %v20011_v46 = vld [vmem:[%s25322_s8 + $0x1d0c] ss:$16 sps:$4 sm:$0xff]  }
 0xff5   : > { %13928 = vmatprep.subr.bf16.mxu1 %v19936_v53  ;;  %v20009_v53 = vld [vmem:[%s25322_s8 + $0x1d08] ss:$16 sps:$4 sm:$0xff]  }
 0xff8   : > { %13929 = vmatpush1.bf16.msra.mxu1 %v19934_v50  ;;  %v20014_v50 = vld [vmem:[%s25322_s8 + $0x1d2c] ss:$16 sps:$4 sm:$0xff]  }
 0xff9   : > { %14333 = vmatprep.subr.bf16.mxu1 %v19939_v31  ;;  %v20012_v31 = vld [vmem:[%s25322_s8 + $0x1d28] ss:$16 sps:$4 sm:$0xff]  }
 0xffb   : > { %13931 = vmatmul.mubr.bf16.vlgmr.msra.gmra.mrb[4].mxu1 %v22916_v58  ;;  %v19948_v58 = vld [vmem:[%s25322_s8 + $0x1c64] ss:$16 sps:$4 sm:$0xff]  }
 0xffc   : > { %14334 = vmatpush1.bf16.msra.mxu1 %v19937_v57  ;;  %14365 = vmatprep.mubr.bf16.mxu1 %v22931_v29  ;;  %v20017_v57 = vld [vmem:[%s25322_s8 + $0x1d4c] ss:$16 sps:$4 sm:$0xff]  }
 0xffd   : > { %14335 = vmatprep.subr.bf16.mxu1 %v19942_v16  ;;  %v20015_v16 = vld [vmem:[%s25322_s8 + $0x1d48] ss:$16 sps:$4 sm:$0xff]  }
0x1000   : > { %14336 = vmatpush1.bf16.msra.mxu1 %v19940_v26  ;;  %v20020_v26 = vld [vmem:[%s25322_s8 + $0x1d6c] ss:$16 sps:$4 sm:$0xff]  }
0x1001   : > { %14337 = vmatprep.subr.bf16.mxu1 %v19945_v40  ;;  %v20018_v40 = vld [vmem:[%s25322_s8 + $0x1d68] ss:$16 sps:$4 sm:$0xff]  }
0x1004   : > { %14338 = vmatpush1.bf16.msra.mxu1 %v19943_v55  ;;  %v20023_v55 = vld [vmem:[%s25322_s8 + $0x1d8c] ss:$16 sps:$4 sm:$0xff]  }
0x1005   : > { %14339 = vmatprep.subr.bf16.mxu1 %v19948_v58  ;;  %v20021_v58 = vld [vmem:[%s25322_s8 + $0x1d88] ss:$16 sps:$4 sm:$0xff]  }
0x1008   : > { %14340 = vmatpush1.bf16.msra.mxu1 %v19946_v8  ;;  %v20026_v8 = vld [vmem:[%s25322_s8 + $0x1dac] ss:$16 sps:$4 sm:$0xff]  }
0x1009   : > { %14341 = vmatprep.subr.bf16.mxu1 %v19951_v23  ;;  %v20024_v23 = vld [vmem:[%s25322_s8 + $0x1da8] ss:$16 sps:$4 sm:$0xff]  }
0x100c   : > { %14342 = vmatpush1.bf16.msra.mxu1 %v19949_v0  ;;  %v20029_v0 = vld [vmem:[%s25322_s8 + $0x1dcc] ss:$16 sps:$4 sm:$0xff]  }
0x100d   : > { %14343 = vmatprep.subr.bf16.mxu1 %v19954_v45  ;;  %v20027_v45 = vld [vmem:[%s25322_s8 + $0x1dc8] ss:$16 sps:$4 sm:$0xff]  }
0x1010   : > { %14344 = vmatpush1.bf16.msra.mxu1 %v19952_v34  ;;  %v20032_v34 = vld [vmem:[%s25322_s8 + $0x1dec] ss:$16 sps:$4 sm:$0xff]  }
0x1011   : > { %14345 = vmatprep.subr.bf16.mxu1 %v19957_v10  ;;  %v20030_v10 = vld [vmem:[%s25322_s8 + $0x1de8] ss:$16 sps:$4 sm:$0xff]  }
0x1014   : > { %14346 = vmatpush1.bf16.msra.mxu1 %v19955_v39  ;;  %v20035_v39 = vld [vmem:[%s25322_s8 + $0x1e04] ss:$16 sps:$4 sm:$0xff]  }
0x1015   : > { %14347 = vmatprep.subr.bf16.mxu1 %v19960_v30  ;;  %v20033_v30 = vld [vmem:[%s25322_s8 + $0x1e00] ss:$16 sps:$4 sm:$0xff]  }
0x1018   : > { %14348 = vmatpush1.bf16.msra.mxu1 %v19958_v51  ;;  %v20038_v51 = vld [vmem:[%s25322_s8 + $0x1e24] ss:$16 sps:$4 sm:$0xff]  }
0x1019   : > { %14349 = vmatprep.subr.bf16.mxu1 %v19963_v35  ;;  %v20036_v35 = vld [vmem:[%s25322_s8 + $0x1e20] ss:$16 sps:$4 sm:$0xff]  }
0x101c   : > { %14350 = vmatpush1.bf16.msra.mxu1 %v19961_v47  ;;  %v20041_v47 = vld [vmem:[%s25322_s8 + $0x1e44] ss:$16 sps:$4 sm:$0xff]  }
0x101d   : > { %14351 = vmatprep.subr.bf16.mxu1 %v19966_v4  ;;  %v20039_v4 = vld [vmem:[%s25322_s8 + $0x1e40] ss:$16 sps:$4 sm:$0xff]  }
0x1020   : > { %14352 = vmatpush1.bf16.msra.mxu1 %v19964_v22  ;;  %v20042_v22 = vld [vmem:[%s25322_s8 + $0x1e60] ss:$16 sps:$4 sm:$0xff]  }
0x1021   : > { %14353 = vmatprep.subr.bf16.mxu1 %v19969_v27  ;;  %v20047_v27 = vld [vmem:[%s25322_s8 + $0x1e84] ss:$16 sps:$4 sm:$0xff]  }
0x1024   : > { %14354 = vmatpush1.bf16.msra.mxu1 %v19967_v48  ;;  %v20045_v48 = vld [vmem:[%s25322_s8 + $0x1e80] ss:$16 sps:$4 sm:$0xff]  }
0x1025   : > { %14355 = vmatprep.subr.bf16.mxu1 %v19972_v20  ;;  %v20050_v20 = vld [vmem:[%s25322_s8 + $0x1ea4] ss:$16 sps:$4 sm:$0xff]  }
0x1028   : > { %14356 = vmatpush1.bf16.msra.mxu1 %v19970_v3  ;;  %v20048_v3 = vld [vmem:[%s25322_s8 + $0x1ea0] ss:$16 sps:$4 sm:$0xff]  }
0x1029   : > { %14357 = vmatprep.subr.bf16.mxu1 %v19975_v63  ;;  %v20053_v63 = vld [vmem:[%s25322_s8 + $0x1ec4] ss:$16 sps:$4 sm:$0xff]  }
0x102c   : > { %14358 = vmatpush1.bf16.msra.mxu1 %v19973_v6  ;;  %v20051_v6 = vld [vmem:[%s25322_s8 + $0x1ec0] ss:$16 sps:$4 sm:$0xff]  }
0x102d   : > { %14359 = vmatprep.subr.bf16.mxu1 %v19978_v7  ;;  %v20056_v7 = vld [vmem:[%s25322_s8 + $0x1ee4] ss:$16 sps:$4 sm:$0xff]  }
0x1030   : > { %14360 = vmatpush1.bf16.msra.mxu1 %v19976_v2  ;;  %v20054_v2 = vld [vmem:[%s25322_s8 + $0x1ee0] ss:$16 sps:$4 sm:$0xff]  }
0x1031   : > { %14361 = vmatprep.subr.bf16.mxu1 %v19981_v11  ;;  %v20059_v11 = vld [vmem:[%s25322_s8 + $0x1f04] ss:$16 sps:$4 sm:$0xff]  }
0x1034   : > { %14362 = vmatpush1.bf16.msra.mxu1 %v19979_v28  ;;  %v20057_v28 = vld [vmem:[%s25322_s8 + $0x1f00] ss:$16 sps:$4 sm:$0xff]  }
0x1035   : > { %14363 = vmatprep.subr.bf16.mxu1 %v19984_v13  ;;  %v20062_v13 = vld [vmem:[%s25322_s8 + $0x1f24] ss:$16 sps:$4 sm:$0xff]  }
0x1038   : > { %14364 = vmatpush1.bf16.msra.mxu1 %v19982_v52  ;;  %v20060_v52 = vld [vmem:[%s25322_s8 + $0x1f20] ss:$16 sps:$4 sm:$0xff]  }
0x1039   : > { %14376 = vmatprep.subr.bf16.mxu1 %v19987_v14  ;;  %v20065_v14 = vld [vmem:[%s25322_s8 + $0x1f44] ss:$16 sps:$4 sm:$0xff]  }
0x103b   : > { %14366 = vmatmul.mubr.bf16.vlgmr.msra.gmra.mrb[0].mxu1 %v22926_v62 }
0x103c   : > { %14377 = vmatpush1.bf16.msra.mxu1 %v19985_v43  ;;  %14408 = vmatprep.mubr.bf16.mxu1 %v22931_v29  ;;  %v19994_v29 = vld [vmem:[%s25322_s8 + $0x1c68] ss:$16 sps:$4 sm:$0xff]   ;;  %v20063_v43 = vld [vmem:[%s25322_s8 + $0x1f40] ss:$16 sps:$4 sm:$0xff]  }
0x103d   : > { %14378 = vmatprep.subr.bf16.mxu1 %v19990_v41  ;;  %v20068_v41 = vld [vmem:[%s25322_s8 + $0x1f64] ss:$16 sps:$4 sm:$0xff]  }
0x1040   : > { %14379 = vmatpush1.bf16.msra.mxu1 %v19988_v15  ;;  %v20066_v15 = vld [vmem:[%s25322_s8 + $0x1f60] ss:$16 sps:$4 sm:$0xff]  }
0x1041   : > { %14380 = vmatprep.subr.bf16.mxu1 %v19993_v19  ;;  %v20071_v19 = vld [vmem:[%s25322_s8 + $0x1f84] ss:$16 sps:$4 sm:$0xff]  }
0x1044   : > { %14381 = vmatpush1.bf16.msra.mxu1 %v19991_v17  ;;  %v20069_v17 = vld [vmem:[%s25322_s8 + $0x1f80] ss:$16 sps:$4 sm:$0xff]  }
0x1045   : > { %14382 = vmatprep.subr.bf16.mxu1 %v19996_v61  ;;  %v20074_v61 = vld [vmem:[%s25322_s8 + $0x1fa4] ss:$16 sps:$4 sm:$0xff]  }
0x1048   : > { %14383 = vmatpush1.bf16.msra.mxu1 %v19994_v29  ;;  %v20072_v29 = vld [vmem:[%s25322_s8 + $0x1fa0] ss:$16 sps:$4 sm:$0xff]  }
0x1049   : > { %14384 = vmatprep.subr.bf16.mxu1 %v19999_v33  ;;  %v20077_v33 = vld [vmem:[%s25322_s8 + $0x1fc4] ss:$16 sps:$4 sm:$0xff]  }
0x104c   : > { %14385 = vmatpush1.bf16.msra.mxu1 %v19997_v32  ;;  %v20075_v32 = vld [vmem:[%s25322_s8 + $0x1fc0] ss:$16 sps:$4 sm:$0xff]  }
0x104d   : > { %14386 = vmatprep.subr.bf16.mxu1 %v20002_v21  ;;  %v20080_v21 = vld [vmem:[%s25322_s8 + $0x1fe4] ss:$16 sps:$4 sm:$0xff]  }
0x1050   : > { %14387 = vmatpush1.bf16.msra.mxu1 %v20000_v38  ;;  %v20078_v38 = vld [vmem:[%s25322_s8 + $0x1fe0] ss:$16 sps:$4 sm:$0xff]  }
0x1051   : > { %14388 = vmatprep.subr.bf16.mxu1 %v20005_v59  ;;  %v20083_v59 = vld [vmem:[%s25322_s8 + $0x1e0c] ss:$16 sps:$4 sm:$0xff]  }
0x1054   : > { %14389 = vmatpush1.bf16.msra.mxu1 %v20003_v24  ;;  %v20081_v24 = vld [vmem:[%s25322_s8 + $0x1e08] ss:$16 sps:$4 sm:$0xff]  }
0x1055   : > { %14390 = vmatprep.subr.bf16.mxu1 %v20008_v44  ;;  %v20086_v44 = vld [vmem:[%s25322_s8 + $0x1e2c] ss:$16 sps:$4 sm:$0xff]  }
0x1058   : > { %14391 = vmatpush1.bf16.msra.mxu1 %v20006_v5  ;;  %v20084_v5 = vld [vmem:[%s25322_s8 + $0x1e28] ss:$16 sps:$4 sm:$0xff]  }
0x1059   : > { %14392 = vmatprep.subr.bf16.mxu1 %v20011_v46  ;;  %v20089_v46 = vld [vmem:[%s25322_s8 + $0x1e4c] ss:$16 sps:$4 sm:$0xff]  }
0x105c   : > { %14393 = vmatpush1.bf16.msra.mxu1 %v20009_v53  ;;  %v20087_v53 = vld [vmem:[%s25322_s8 + $0x1e48] ss:$16 sps:$4 sm:$0xff]  }
0x105d   : > { %14394 = vmatprep.subr.bf16.mxu1 %v20014_v50  ;;  %v20092_v50 = vld [vmem:[%s25322_s8 + $0x1e6c] ss:$16 sps:$4 sm:$0xff]  }
0x1060   : > { %14395 = vmatpush1.bf16.msra.mxu1 %v20012_v31  ;;  %v20095_v31 = vld [vmem:[%s25322_s8 + $0x1e8c] ss:$16 sps:$4 sm:$0xff]  }
0x1061   : > { %14396 = vmatprep.subr.bf16.mxu1 %v20017_v57  ;;  %v20093_v57 = vld [vmem:[%s25322_s8 + $0x1e88] ss:$16 sps:$4 sm:$0xff]  }
0x1064   : > { %14397 = vmatpush1.bf16.msra.mxu1 %v20015_v16  ;;  %v20098_v16 = vld [vmem:[%s25322_s8 + $0x1eac] ss:$16 sps:$4 sm:$0xff]  }
0x1065   : > { %14398 = vmatprep.subr.bf16.mxu1 %v20020_v26  ;;  %v20096_v26 = vld [vmem:[%s25322_s8 + $0x1ea8] ss:$16 sps:$4 sm:$0xff]  }
0x1068   : > { %14399 = vmatpush1.bf16.msra.mxu1 %v20018_v40  ;;  %v20101_v40 = vld [vmem:[%s25322_s8 + $0x1ecc] ss:$16 sps:$4 sm:$0xff]  }
0x1069   : > { %14400 = vmatprep.subr.bf16.mxu1 %v20023_v55  ;;  %v20099_v55 = vld [vmem:[%s25322_s8 + $0x1ec8] ss:$16 sps:$4 sm:$0xff]  }
0x106c   : > { %14401 = vmatpush1.bf16.msra.mxu1 %v20021_v58  ;;  %v20104_v58 = vld [vmem:[%s25322_s8 + $0x1eec] ss:$16 sps:$4 sm:$0xff]  }
0x106d   : > { %14402 = vmatprep.subr.bf16.mxu1 %v20026_v8  ;;  %v20102_v8 = vld [vmem:[%s25322_s8 + $0x1ee8] ss:$16 sps:$4 sm:$0xff]  }
0x1070   : > { %14403 = vmatpush1.bf16.msra.mxu1 %v20024_v23  ;;  %v20107_v23 = vld [vmem:[%s25322_s8 + $0x1f0c] ss:$16 sps:$4 sm:$0xff]  }
0x1071   : > { %14404 = vmatprep.subr.bf16.mxu1 %v20029_v0  ;;  %v20105_v0 = vld [vmem:[%s25322_s8 + $0x1f08] ss:$16 sps:$4 sm:$0xff]  }
0x1074   : > { %14405 = vmatpush1.bf16.msra.mxu1 %v20027_v45  ;;  %v20110_v45 = vld [vmem:[%s25322_s8 + $0x1f2c] ss:$16 sps:$4 sm:$0xff]  }
0x1075   : > { %14406 = vmatprep.subr.bf16.mxu1 %v20032_v34  ;;  %v20108_v34 = vld [vmem:[%s25322_s8 + $0x1f28] ss:$16 sps:$4 sm:$0xff]  }
0x1078   : > { %14407 = vmatpush1.bf16.msra.mxu1 %v20030_v10  ;;  %v20113_v10 = vld [vmem:[%s25322_s8 + $0x1f4c] ss:$16 sps:$4 sm:$0xff]  }
0x1079   : > { %14811 = vmatprep.subr.bf16.mxu1 %v20035_v39  ;;  %v20111_v39 = vld [vmem:[%s25322_s8 + $0x1f48] ss:$16 sps:$4 sm:$0xff]  }
0x107b   : > { %14409 = vmatmul.mubr.bf16.vlgmr.msra.gmra.mrb[4].mxu1 %v22926_v62  ;;  %v20044_v62 = vld [vmem:[%s25322_s8 + $0x1e64] ss:$16 sps:$4 sm:$0xff]  }
0x107c   : > { %14812 = vmatpush1.bf16.msra.mxu1 %v20033_v30  ;;  %14843 = vmatprep.mubr.bf16.mxu1 %v22941_v37  ;;  %v20116_v30 = vld [vmem:[%s25322_s8 + $0x1f6c] ss:$16 sps:$4 sm:$0xff]  }
0x107d   : > { %14813 = vmatprep.subr.bf16.mxu1 %v20038_v51  ;;  %v20114_v51 = vld [vmem:[%s25322_s8 + $0x1f68] ss:$16 sps:$4 sm:$0xff]  }
0x1080   : > { %14814 = vmatpush1.bf16.msra.mxu1 %v20036_v35  ;;  %v20119_v35 = vld [vmem:[%s25322_s8 + $0x1f8c] ss:$16 sps:$4 sm:$0xff]  }
0x1081   : > { %14815 = vmatprep.subr.bf16.mxu1 %v20041_v47  ;;  %v20117_v47 = vld [vmem:[%s25322_s8 + $0x1f88] ss:$16 sps:$4 sm:$0xff]  }
0x1084   : > { %14816 = vmatpush1.bf16.msra.mxu1 %v20039_v4  ;;  %v20122_v4 = vld [vmem:[%s25322_s8 + $0x1fac] ss:$16 sps:$4 sm:$0xff]  }
0x1085   : > { %14817 = vmatprep.subr.bf16.mxu1 %v20044_v62  ;;  %v20120_v62 = vld [vmem:[%s25322_s8 + $0x1fa8] ss:$16 sps:$4 sm:$0xff]  }
0x1088   : > { %14818 = vmatpush1.bf16.msra.mxu1 %v20042_v22  ;;  %v20125_v22 = vld [vmem:[%s25322_s8 + $0x1fcc] ss:$16 sps:$4 sm:$0xff]  }
0x1089   : > { %14819 = vmatprep.subr.bf16.mxu1 %v20047_v27  ;;  %v20123_v27 = vld [vmem:[%s25322_s8 + $0x1fc8] ss:$16 sps:$4 sm:$0xff]  }
0x108c   : > { %14820 = vmatpush1.bf16.msra.mxu1 %v20045_v48  ;;  %v20128_v48 = vld [vmem:[%s25322_s8 + $0x1fec] ss:$16 sps:$4 sm:$0xff]  }
0x108d   : > { %14821 = vmatprep.subr.bf16.mxu1 %v20050_v20  ;;  %v20126_v20 = vld [vmem:[%s25322_s8 + $0x1fe8] ss:$16 sps:$4 sm:$0xff]  }
0x1090   : > { %14822 = vmatpush1.bf16.msra.mxu1 %v20048_v3  ;;  %v14907_v3 = vsub.s32 3, %v25455_v9 }
0x1091   : > { %14823 = vmatprep.subr.bf16.mxu1 %v20053_v63  ;;  %v25284_v63 = vld [vmem:[#allocation10] sm:$0xff] }
0x1094   : > { %14824 = vmatpush1.bf16.msra.mxu1 %v20051_v6  ;;  %v14908_v6 = vrot.slane %v25284_v63, %v14907_v3 }
0x1095   : > { %14825 = vmatprep.subr.bf16.mxu1 %v20056_v7 }
0x1098   : > { %14826 = vmatpush1.bf16.msra.mxu1 %v20054_v2  ;;  %v20137_v2 = vld [vmem:[#allocation10 + $0x8] sm:$0xff] }
0x1099   : > { %14827 = vmatprep.subr.bf16.mxu1 %v20059_v11  ;;  %v14912_v11 = vrot.slane %v20137_v2, %v14907_v3 }
0x109c   : > { %14828 = vmatpush1.bf16.msra.mxu1 %v20057_v28 }
0x109d   : > { %14829 = vmatprep.subr.bf16.mxu1 %v20062_v13 }
0x10a0   : > { %14830 = vmatpush1.bf16.msra.mxu1 %v20060_v52 }
0x10a1   : > { %14831 = vmatprep.subr.bf16.mxu1 %v20065_v14 }
0x10a4   : > { %14832 = vmatpush1.bf16.msra.mxu1 %v20063_v43 }
0x10a5   : > { %14833 = vmatprep.subr.bf16.mxu1 %v20068_v41 }
0x10a8   : > { %14834 = vmatpush1.bf16.msra.mxu1 %v20066_v15 }
0x10a9   : > { %14835 = vmatprep.subr.bf16.mxu1 %v20071_v19 }
0x10ac   : > { %14836 = vmatpush1.bf16.msra.mxu1 %v20069_v17 }
0x10ad   : > { %14837 = vmatprep.subr.bf16.mxu1 %v20074_v61 }
0x10b0   : > { %14838 = vmatpush1.bf16.msra.mxu1 %v20072_v29 }
0x10b1   : > { %14839 = vmatprep.subr.bf16.mxu1 %v20077_v33 }
0x10b4   : > { %14840 = vmatpush1.bf16.msra.mxu1 %v20075_v32 }
0x10b5   : > { %14841 = vmatprep.subr.bf16.mxu1 %v20080_v21 }
0x10b8   : > { %14842 = vmatpush1.bf16.msra.mxu1 %v20078_v38 }
0x10b9   : > { %14854 = vmatprep.subr.bf16.mxu1 %v20083_v59 }
0x10bb   : > { %14844 = vmatmul.mubr.bf16.vlgmr.msra.gmra.mrb[0].mxu1 %v22936_v1 }
0x10bc   : > { %14855 = vmatpush1.bf16.msra.mxu1 %v20081_v24  ;;  %14886 = vmatprep.mubr.bf16.mxu1 %v22941_v37  ;;  %v20090_v37 = vld [vmem:[%s25322_s8 + $0x1e68] ss:$16 sps:$4 sm:$0xff]   ;;  %v499_v24 = vld [vmem:[#allocation10 + $0x10] sm:$0xff] }
0x10bd   : > { %14856 = vmatprep.subr.bf16.mxu1 %v20086_v44  ;;  %v500_v44 = vld [vmem:[#allocation10 + $0x18] sm:$0xff] }
0x10c0   : > { %14857 = vmatpush1.bf16.msra.mxu1 %v20084_v5  ;;  %v14916_v5 = vrot.slane %v499_v24, %v14907_v3 }
0x10c1   : > { %14858 = vmatprep.subr.bf16.mxu1 %v20089_v46 }
0x10c4   : > { %14859 = vmatpush1.bf16.msra.mxu1 %v20087_v53  ;;  %v14920_v53 = vrot.slane %v500_v44, %v14907_v3 }
0x10c5   : > { %14860 = vmatprep.subr.bf16.mxu1 %v20092_v50 }
0x10c8   : > { %14861 = vmatpush1.bf16.msra.mxu1 %v20090_v37 }
0x10c9   : > { %14862 = vmatprep.subr.bf16.mxu1 %v20095_v31 }
0x10cc   : > { %14863 = vmatpush1.bf16.msra.mxu1 %v20093_v57 }
0x10cd   : > { %14864 = vmatprep.subr.bf16.mxu1 %v20098_v16 }
0x10d0   : > { %14865 = vmatpush1.bf16.msra.mxu1 %v20096_v26 }
0x10d1   : > { %14866 = vmatprep.subr.bf16.mxu1 %v20101_v40 }
0x10d4   : > { %14867 = vmatpush1.bf16.msra.mxu1 %v20099_v55 }
0x10d5   : > { %14868 = vmatprep.subr.bf16.mxu1 %v20104_v58 }
0x10d8   : > { %14869 = vmatpush1.bf16.msra.mxu1 %v20102_v8 }
0x10d9   : > { %14870 = vmatprep.subr.bf16.mxu1 %v20107_v23 }
0x10dc   : > { %14871 = vmatpush1.bf16.msra.mxu1 %v20105_v0 }
0x10dd   : > { %14872 = vmatprep.subr.bf16.mxu1 %v20110_v45 }
0x10e0   : > { %14873 = vmatpush1.bf16.msra.mxu1 %v20108_v34 }
0x10e1   : > { %14874 = vmatprep.subr.bf16.mxu1 %v20113_v10 }
0x10e4   : > { %14875 = vmatpush1.bf16.msra.mxu1 %v20111_v39 }
0x10e5   : > { %14876 = vmatprep.subr.bf16.mxu1 %v20116_v30 }
0x10e8   : > { %14877 = vmatpush1.bf16.msra.mxu1 %v20114_v51  ;;  %v15053_v51 = vld [vmem:[#allocation9] sm:$0xff] }
0x10e9   : > { %14878 = vmatprep.subr.bf16.mxu1 %v20119_v35  ;;  %v15054_v35 = vld [vmem:[#allocation9 + $0x8] sm:$0xff] }
0x10ec   : > { %14879 = vmatpush1.bf16.msra.mxu1 %v20117_v47 }
0x10ed   : > { %14880 = vmatprep.subr.bf16.mxu1 %v20122_v4  ;;  %v15057_v4 = vld [vmem:[#allocation9 + $0x20] sm:$0xff] }
0x10f0   : > { %14881 = vmatpush1.bf16.msra.mxu1 %v20120_v62 }
0x10f1   : > { %14882 = vmatprep.subr.bf16.mxu1 %v20125_v22 }
0x10f4   : > { %14883 = vmatpush1.bf16.msra.mxu1 %v20123_v27  ;;  %v15058_v27 = vld [vmem:[#allocation9 + $0x28] sm:$0xff] }
0x10f5   : > { %14884 = vmatprep.subr.bf16.mxu1 %v20128_v48 }
0x10f8   : > { %14885 = vmatpush1.bf16.msra.mxu1 %v20126_v20 }
0x10fb   : > { %14887 = vmatmul.mubr.bf16.vlgmr.msra.gmra.mrb[4].mxu1 %v22936_v1 }
0x118e   : > { %v14845_v7 = vpop.f32.mrb[0].mxu1 }
0x118f   : > { %v17523_v28 = vadd.f32 %v14845_v7, %v23136_v12  ;;  %v14847_v13 = vpop.f32.mrb[1].mxu1 }
0x1190   : > { %v17524_v52 = vadd.f32 %v14847_v13, %v23141_v56  ;;  %v14849_v14 = vpop.f32.mrb[2].mxu1 }
0x1191   : > { %v14921_v43 = vadd.f32 %v17523_v28, %v14908_v6  ;;  %v17525_v41 = vadd.f32 %v14849_v14, %v23143_v36  ;;  %v14851_v15 = vpop.f32.mrb[3].mxu1  ;;  %v15069_v28 = vld [vmem:[%s25324_s10] sm:$0x1]  ;;  %v15059_v14 = vld [vmem:[#allocation9 + $0x30] sm:$0xff] }
0x1192   : > { %v14922_v1 = vadd.f32 %v17524_v52, %v14912_v11  ;;  %v17526_v9 = vadd.f32 %v14851_v15, %v23145_v60  ;;  %v20129_v60 = vld [vmem:[%s25318_s4] sm:$0xff]   ;;  %v15055_v52 = vld [vmem:[#allocation9 + $0x10] sm:$0xff]  ;;  %v15060_v15 = vld [vmem:[#allocation9 + $0x38] sm:$0xff] }
0x1193   : > { %v14937_v19 = vmul.f32 0.2, %v14921_v43  ;;  %v14925_v17 = vadd.f32 %v17525_v41, %v14908_v6  ;;  %vm14929_vm15 = vcmp.ge.f32.partialorder %v14921_v43, 0.0  ;;  %v15056_v41 = vld [vmem:[#allocation9 + $0x18] sm:$0xff] }
0x1194   : > { %v14938_v61 = vmul.f32 0.2, %v14922_v1  ;;  %v14926_v29 = vadd.f32 %v17526_v9, %v14912_v11  ;;  %vm14930_vm1 = vcmp.ge.f32.partialorder %v14922_v1, 0.0 }
0x1195   : > { %vm14933_vm2 = vcmp.ge.f32.partialorder %v14925_v17, 0.0  ;;  %v14941_v33 = vmul.f32 0.2, %v14925_v17  ;;  %v14945_v32 = vsel %vm14929_vm15, %v14921_v43, %v14937_v19 }
0x1196   : > { %vm14934_vm3 = vcmp.ge.f32.partialorder %v14926_v29, 0.0  ;;  %v14942_v12 = vmul.f32 0.2, %v14926_v29  ;;  %v14946_v21 = vsel %vm14930_vm1, %v14922_v1, %v14938_v61 }
0x1197   : > { %v14949_v56 = vsel %vm14933_vm2, %v14925_v17, %v14941_v33 }
0x1198   : > { %v14950_v38 = vsel %vm14934_vm3, %v14926_v29, %v14942_v12  ;;  %v14953_v59 = vpack.c.bf16 %v14949_v56, %v14945_v32 }
0x1199   : > { %v14954_v36 = vpack.c.bf16 %v14950_v38, %v14946_v21 }
0x119b   : > { %14967 = vmatprep.subr.bf16.mxu0 %v14954_v36 }
0x119c   : > { %14968 = vmatpush1.bf16.msra.mxu0 %v14953_v59 }
0x119f   : > { %17004 = vmatmul.mubr.msk.bf16.vlgmr.msra.gmra.mrb[148].mxu0 %vm6999_vm14, %v20129_v60 }
0x11a0   : > { %15042 = vmatprep.mubr.bf16.mxu0 %v25456_v49 }
0x11ce   : > { %v14888_v46 = vpop.f32.mrb[4].mxu1 }
0x11cf   : > { %v17527_v50 = vadd.f32 %v14888_v46, %v23242_v18  ;;  %v14890_v37 = vpop.f32.mrb[5].mxu1 }
0x11d0   : > { %v17528_v31 = vadd.f32 %v14890_v37, %v23247_v42  ;;  %v14892_v57 = vpop.f32.mrb[6].mxu1 }
0x11d1   : > { %v14923_v16 = vadd.f32 %v17527_v50, %v14916_v5  ;;  %v17529_v26 = vadd.f32 %v14892_v57, %v23249_v25  ;;  %v14894_v40 = vpop.f32.mrb[7].mxu1 }
0x11d2   : > { %v14924_v55 = vadd.f32 %v17528_v31, %v14920_v53  ;;  %v17530_v58 = vadd.f32 %v14894_v40, %v23251_v54  ;;  %v20343_v54 = vmov 0.0  }
0x11d3   : > { %v14939_v8 = vmul.f32 0.2, %v14923_v16  ;;  %v14927_v49 = vadd.f32 %v17529_v26, %v14916_v5  ;;  %vm14931_vm4 = vcmp.ge.f32.partialorder %v14923_v16, 0.0 }
0x11d4   : > { %v14940_v23 = vmul.f32 0.2, %v14924_v55  ;;  %v14928_v0 = vadd.f32 %v17530_v58, %v14920_v53  ;;  %vm14932_vm5 = vcmp.ge.f32.partialorder %v14924_v55, 0.0  ;;  %v15226_v53 = vrot.slane %v25284_v63, 4 }
0x11d5   : > { %vm14935_vm6 = vcmp.ge.f32.partialorder %v14927_v49, 0.0  ;;  %v14943_v45 = vmul.f32 0.2, %v14927_v49  ;;  %v14947_v34 = vsel %vm14931_vm4, %v14923_v16, %v14939_v8 }
0x11d6   : > { %vm14936_vm7 = vcmp.ge.f32.partialorder %v14928_v0, 0.0  ;;  %v14944_v18 = vmul.f32 0.2, %v14928_v0  ;;  %v14948_v10 = vsel %vm14932_vm5, %v14924_v55, %v14940_v23 }
0x11d7   : > { %v14951_v42 = vsel %vm14935_vm6, %v14927_v49, %v14943_v45 }
0x11d8   : > { %v14952_v39 = vsel %vm14936_vm7, %v14928_v0, %v14944_v18  ;;  %v14955_v30 = vpack.c.bf16 %v14951_v42, %v14947_v34 }
0x11d9   : > { %v14956_v25 = vpack.c.bf16 %v14952_v39, %v14948_v10 }
0x11db   : > { %15010 = vmatprep.subr.bf16.mxu0 %v14956_v25 }
0x11dc   : > { %15011 = vmatpush1.bf16.msra.mxu0 %v14955_v30 }
0x11df   : > { %17005 = vmatmul.mubr.msk.bf16.vlgmr.msra.gmra.mrb[152].mxu0 %vm6999_vm14, %v20129_v60 }
0x11e0   : > { %15137 = vmatprep.mubr.f32.mxu0 %v20343_v54 }
0x1272   : > { %v15001_v47 = vpop.f32.mrb[148].mxu0 }
0x1273   : > { %v15061_v62 = vmul.f32 %v15053_v51, %v15001_v47  ;;  %v15003_v22 = vpop.f32.mrb[149].mxu0 }
0x1274   : > { %v15062_v48 = vmul.f32 %v15054_v35, %v15003_v22  ;;  %v15005_v20 = vpop.f32.mrb[150].mxu0 }
0x1275   : > { %v15065_v3 = vmul.f32 %v15057_v4, %v15005_v20  ;;  %v15007_v6 = vpop.f32.mrb[151].mxu0 }
0x1276   : > { %v15066_v7 = vmul.f32 %v15058_v27, %v15007_v6 }
0x1277   : > { %v17517_v2 = vpack.c.bf16 %v15065_v3, %v15061_v62 }
0x1278   : > { %v17515_v11 = vpack.c.bf16 %v15066_v7, %v15062_v48 }
0x127a   : > { %17516 = vmatprep.subr.bf16.mxu0 %v17515_v11 }
0x127b   : > { %17518 = vmatpush1.bf16.msra.mxu0 %v17517_v2 }
0x127e   : > { %17006 = vmatmul.mubr.msk.f32.vlgmr.msra.gmra.mrb[156].mxu0 %vm6999_vm14, %v15069_v28 }
0x127f   : > { %15208 = vmatprep.mubr.f32.mxu0 %v20343_v54 }
0x12b2   : > { %v15044_v13 = vpop.f32.mrb[152].mxu0 }
0x12b3   : > { %v15046_v43 = vpop.f32.mrb[153].mxu0  ;;  %v15063_v9 = vmul.f32 %v15055_v52, %v15044_v13 }
0x12b4   : > { %v15048_v1 = vpop.f32.mrb[154].mxu0  ;;  %v15064_v61 = vmul.f32 %v15056_v41, %v15046_v43 }
0x12b5   : > { %v15067_v19 = vmul.f32 %v15059_v14, %v15048_v1  ;;  %v15050_v17 = vpop.f32.mrb[155].mxu0 }
0x12b6   : > { %v15068_v29 = vmul.f32 %v15060_v15, %v15050_v17 }
0x12b7   : > { %v17521_v33 = vpack.c.bf16 %v15067_v19, %v15063_v9 }
0x12b8   : > { %v17519_v12 = vpack.c.bf16 %v15068_v29, %v15064_v61 }
0x12ba   : > { %17520 = vmatprep.subr.bf16.mxu0 %v17519_v12 }
0x12bb   : > { %17522 = vmatpush1.bf16.msra.mxu0 %v17521_v33 }
0x12be   : > { %17007 = vmatmul.mubr.msk.f32.vlgmr.msra.gmra.mrb[158].mxu0 %vm6999_vm14, %v15069_v28 }
0x1351   : > { %v15139_v32 = vpop.f32.mrb[156].mxu0 }
0x1352   : > { %v15216_v56 = vsel %vm15215_vm8, %v15139_v32, 0.0  ;;  %v15141_v21 = vpop.f32.mrb[157].mxu0 }
0x1353   : > { %v15217_v38 = vsel %vm15215_vm8, %v15141_v21, 0.0 }
0x1354   : > { %v15218_v59 = vadd.f32 %v15217_v38, %v15216_v56 }
0x1391   : > { %v15210_v36 = vpop.f32.mrb[158].mxu0 }
0x1392   : > { %v15219_v60 = vsel %vm15215_vm8, %v15210_v36, 0.0  ;;  %v15212_v24 = vpop.f32.mrb[159].mxu0 }
0x1393   : > { %v15220_v44 = vadd.f32 %v15219_v60, %v15218_v59  ;;  %v15221_v5 = vsel %vm15215_vm8, %v15212_v24, 0.0 }
0x1395   : > { %v15222_v46 = vadd.f32 %v15221_v5, %v15220_v44 }
0x1397   : > { %15223 = vadd.xlane.f32.xlu0 %v15222_v46 }
0x1424   : > { %v15224_v50 = vpop.xlane.xlu0 %15223 }
0x1425   : > { %v15228_v37 = vadd.f32 %v15226_v53, %v15224_v50 }
0x1427   : > { %v15229_v31 = vsub.f32 0.0, %v15228_v37 }
0x1429   : > { %v15230_v57 = vmul.f32 1.442695, %v15229_v31 }
0x142b   : > { %20130 = vpow2.f32 %v15230_v57 }
0x1435   : > { %v20131_v16 = vpop.eup %20130 }
0x1436   : > { %v15232_v26 = vadd.f32 1.0, %v20131_v16 }
0x1438   : > { %20132 = vrcp.f32 %v15232_v26 }
0x1442   : > { %v20133_v40 = vpop.eup %20132 }
0x1443   : > { %15237 = vperm.xlu0 %17900, %v20133_v40  }
0x14c2   : > { %v15238_v55 = vpop.permute.xlu0 %15237 }
0x14c3   : > { %15240 = vst [vmem:[%s495_s19] sm:$0x1] %v15238_v55 }
0x14c4 PF: > { %s25457_s20 = sld [smem:[#allocation16_spill]] }
0x14ca   : > { %s26_s21 = sadd.s32 1, %s25457_s20  }
0x14cb   : > { %p23_p6 = scmp.ge.s32.totalorder %s26_s21, 4  }
0x14cd   :  { %25 = sbr.rel (!%p23_p6) target bundleno = 6 (0x6), region = 123 }
0x14d4   :  { %15258 = vsyncpa [#allocation3], 1 }
0x14d5   :  { %15260 = vsyncpa [#allocation3 + $0x1], 1 }
0x14d6   :  { %15261 = vsyncpa [#allocation5], 1 }
0x14d7   :  { %15262 = vsyncpa [#allocation8], 1 }
0x14d8   :  { %15263 = vsyncpa [#allocation11], 1 }

</bundles_post_ra>
